<compile_context>
chip_gen: v7x
topology: tpu7x:2x2x1
jax: 0.10.0
libtpu: 0.0.40
codegen_flags: <defaults>
</compile_context>

<pallas_src>
import functools

import jax
import jax.numpy as jnp
from jax import lax
from jax.experimental import pallas as pl
from jax.experimental.pallas import tpu as pltpu

LSTM_DIM = 12 * 24 * 2 + 96 + 1   # 673 = concat(x, x2, mask) feature dim
FC_DIM = 128
HIDDEN = FC_DIM // 2              # 64 per direction
NUM_CLASSES = 96

KT = 16                           # timesteps per grid step in the recurrent kernel
D_IN_PAD = 768                    # 673 padded up to a multiple of 128 (MXU K dim)
D_HEAD = LSTM_DIM + FC_DIM        # 801
D_HEAD_PAD = 896                  # 801 padded up to a multiple of 128
C_PAD = 128                       # 96 classes padded to 128 (lane-dense stores)
NEG_LOGIT = -1e30                 # padded-class bias -> softmax prob exactly 0


def _round_up(n, m):
    return ((n + m - 1) // m) * m


# ----------------------------------------------------------------------------
# Row-tiled dense kernels (input projection and FC head), grid over rows.
# ----------------------------------------------------------------------------
def _proj_kernel(x_ref, w_ref, b_ref, o_ref):
    o_ref[...] = (jnp.dot(x_ref[...], w_ref[...],
                          preferred_element_type=jnp.float32) + b_ref[...])


def _head_kernel(x_ref, w_ref, b_ref, o_ref):
    # dropout (p=0.2) is identity at inference; ReLU -> Linear -> softmax fused.
    x = jnp.maximum(x_ref[...], 0.0)
    logits = jnp.dot(x, w_ref[...], preferred_element_type=jnp.float32) + b_ref[...]
    m = jnp.max(logits, axis=-1, keepdims=True)
    e = jnp.exp(logits - m)                      # padded classes underflow to 0
    o_ref[...] = e / jnp.sum(e, axis=-1, keepdims=True)


def _row_tiled_call(kernel, x, w, b, out_cols, row_cap=256):
    """y[i, :] = kernel(x[i, :], w, b); rows tiled, grid marked 'parallel'."""
    n, d = x.shape
    if n <= row_cap:
        tile = max(8, _round_up(n, 8))
    else:
        tile = row_cap                            # multiple of 8
    n_pad = _round_up(n, tile)
    if n_pad != n:
        x = jnp.pad(x, ((0, n_pad - n), (0, 0)))
    out = pl.pallas_call(
        kernel,
        out_shape=jax.ShapeDtypeStruct((n_pad, out_cols), jnp.float32),
        grid=(n_pad // tile,),
        in_specs=[
            pl.BlockSpec((tile, d), lambda i: (i, 0)),
            pl.BlockSpec((d, out_cols), lambda i: (0, 0)),
            pl.BlockSpec((1, out_cols), lambda i: (0, 0)),
        ],
        out_specs=pl.BlockSpec((tile, out_cols), lambda i: (i, 0)),
        compiler_params=pltpu.CompilerParams(
            dimension_semantics=("parallel",)),     # shards across TCs on v7x
    )(x, w, b)
    return out[:n]


# ----------------------------------------------------------------------------
# Fused bidirectional LSTM layer: grid over KT-sized time blocks; only the
# recurrent h @ W_hh matmul stays in the serial loop (input gates precomputed).
# ----------------------------------------------------------------------------
def _bilstm_kernel(lens_ref, gxf_ref, gxr_ref, whhf_ref, whhr_ref, out_ref,
                   hf_sc, cf_sc, hb_sc, cb_sc, *, kt, t_pad, hid):
    g = pl.program_id(0)

    @pl.when(g == 0)
    def _():
        hf_sc[...] = jnp.zeros_like(hf_sc)
        cf_sc[...] = jnp.zeros_like(cf_sc)
        hb_sc[...] = jnp.zeros_like(hb_sc)
        cb_sc[...] = jnp.zeros_like(cb_sc)

    lens = lens_ref[...]            # (B, 1) int32; constant index map -> 1 DMA total
    whh_f = whhf_ref[...]           # (H, 4H)
    whh_r = whhr_ref[...]
    t0_f = g * kt                   # first forward time of this block
    t0_r = t_pad - 1 - g * kt       # first reverse time of this block (descending)

    def _cell(gates, c_prev):
        # gate columns ordered (i, f, o, g): one sigmoid over [0:3H], one tanh.
        sig = jax.nn.sigmoid(gates[:, :3 * hid])
        i_g = sig[:, 0 * hid:1 * hid]
        f_g = sig[:, 1 * hid:2 * hid]
        o_g = sig[:, 2 * hid:3 * hid]
        g_g = jnp.tanh(gates[:, 3 * hid:])
        c_new = f_g * c_prev + i_g * g_g
        h_new = o_g * jnp.tanh(c_new)
        return h_new, c_new

    def step(k, carry):
        h_f, c_f, h_b, c_b = carry

        # ---- forward direction, absolute time t0_f + k ----
        gates_f = gxf_ref[k] + jnp.dot(h_f, whh_f, preferred_element_type=jnp.float32)
        h_new, c_new = _cell(gates_f, c_f)
        valid_f = (t0_f + k) < lens                     # packed-sequence mask (B,1)
        h_f = jnp.where(valid_f, h_new, h_f)
        c_f = jnp.where(valid_f, c_new, c_f)
        out_ref[pl.ds(t0_f + k, 1), :, 0:hid] = jnp.where(valid_f, h_f, 0.0)[None]

        # ---- reverse direction, absolute time t0_r - k ----
        gates_r = (gxr_ref[kt - 1 - k]
                   + jnp.dot(h_b, whh_r, preferred_element_type=jnp.float32))
        h_new, c_new = _cell(gates_r, c_b)
        valid_r = (t0_r - k) < lens
        h_b = jnp.where(valid_r, h_new, h_b)
        c_b = jnp.where(valid_r, c_new, c_b)
        out_ref[pl.ds(t0_r - k, 1), :, hid:2 * hid] = jnp.where(valid_r, h_b, 0.0)[None]

        return h_f, c_f, h_b, c_b

    carry = (hf_sc[...], cf_sc[...], hb_sc[...], cb_sc[...])
    carry = lax.fori_loop(0, kt, step, carry, unroll=True)
    hf_sc[...], cf_sc[...], hb_sc[...], cb_sc[...] = carry


def bilstm_layer(gates_x, lens_b1, whh_f, whh_r):
    """gates_x: (T_pad, B, 8H) = precomputed x@W_ih + b for [fwd | rev] gates."""
    t_pad, b, _ = gates_x.shape
    hid = HIDDEN
    nb = t_pad // KT
    kernel = functools.partial(_bilstm_kernel, kt=KT, t_pad=t_pad, hid=hid)
    return pl.pallas_call(
        kernel,
        out_shape=jax.ShapeDtypeStruct((t_pad, b, 2 * hid), jnp.float32),
        grid_spec=pltpu.PrefetchScalarGridSpec(
            num_scalar_prefetch=0,
            grid=(nb,),
            in_specs=[
                pl.BlockSpec((b, 1), lambda g: (0, 0)),                      # lengths
                pl.BlockSpec((KT, b, 4 * hid), lambda g: (g, 0, 0)),         # fwd gates
                pl.BlockSpec((KT, b, 4 * hid), lambda g: (nb - 1 - g, 0, 1)),  # rev gates
                pl.BlockSpec((hid, 4 * hid), lambda g: (0, 0)),              # W_hh fwd
                pl.BlockSpec((hid, 4 * hid), lambda g: (0, 0)),              # W_hh rev
            ],
            # Output block = full array, constant index -> VMEM-resident, one
            # dense 128-lane writeback at the end of the grid.
            out_specs=pl.BlockSpec((t_pad, b, 2 * hid), lambda g: (0, 0, 0)),
            scratch_shapes=[pltpu.VMEM((b, hid), jnp.float32) for _ in range(4)],
        ),
        compiler_params=pltpu.CompilerParams(
            dimension_semantics=("arbitrary",)),     # recurrent -> sequential
    )(lens_b1, gates_x, gates_x, whh_f, whh_r)


# ----------------------------------------------------------------------------
# Full forward pass.
# ----------------------------------------------------------------------------
def multitask_forward(params, x, length, x2, mask):
    # TODO(synk): original module hardcodes pad_packed_sequence(total_length=272);
    # here total_length == T of the (small) demo input.
    B, T, _ = x.shape
    xcat = jnp.concatenate([x, x2, mask], axis=-1)               # (B, T, 673)
    lens_b1 = length.reshape(B, 1).astype(jnp.int32)

    t_pad = _round_up(T, KT)
    x_tbd = jnp.transpose(xcat, (1, 0, 2))                       # (T, B, 673)
    x_tbd = jnp.pad(x_tbd, ((0, t_pad - T), (0, 0), (0, D_IN_PAD - LSTM_DIM)))

    # ---- bi-LSTM layer 0: hoisted input projection (both directions at once) ----
    wih0 = jnp.pad(jnp.concatenate([params["wih_l0"], params["wih_l0r"]], axis=1),
                   ((0, D_IN_PAD - LSTM_DIM), (0, 0)))           # (768, 512)
    b0 = jnp.concatenate([params["b_l0"], params["b_l0r"]], axis=1)
    gx0 = _row_tiled_call(_proj_kernel, x_tbd.reshape(t_pad * B, D_IN_PAD),
                          wih0, b0, 8 * HIDDEN)
    gx0 = gx0.reshape(t_pad, B, 8 * HIDDEN)
    h0 = bilstm_layer(gx0, lens_b1, params["whh_l0"], params["whh_l0r"])  # (t_pad,B,128)

    # ---- bi-LSTM layer 1 (inter-layer dropout = identity at inference) ----
    wih1 = jnp.concatenate([params["wih_l1"], params["wih_l1r"]], axis=1)  # (128, 512)
    b1 = jnp.concatenate([params["b_l1"], params["b_l1r"]], axis=1)
    gx1 = _row_tiled_call(_proj_kernel, h0.reshape(t_pad * B, 2 * HIDDEN),
                          wih1, b1, 8 * HIDDEN)
    gx1 = gx1.reshape(t_pad, B, 8 * HIDDEN)
    h1 = bilstm_layer(gx1, lens_b1, params["whh_l1"], params["whh_l1r"])  # (t_pad,B,128)

    lstmout = jnp.transpose(h1[:T], (1, 0, 2))                   # (B, T, 128)

    # ---- head: (dropout) -> ReLU -> Linear(801->96) -> softmax, padded for lanes ----
    feat = jnp.concatenate([xcat, lstmout], axis=-1)             # (B, T, 801)
    feat = jnp.pad(feat.reshape(B * T, D_HEAD), ((0, 0), (0, D_HEAD_PAD - D_HEAD)))
    fc_w = jnp.pad(params["fc_w"],
                   ((0, D_HEAD_PAD - D_HEAD), (0, C_PAD - NUM_CLASSES)))
    fc_b = jnp.pad(params["fc_b"], ((0, 0), (0, C_PAD - NUM_CLASSES)),
                   constant_values=NEG_LOGIT)
    probs = _row_tiled_call(_head_kernel, feat, fc_w, fc_b, C_PAD)   # (B*T, 128)
    return probs[:, :NUM_CLASSES].reshape(B, T, NUM_CLASSES)


# ----------------------------------------------------------------------------
# Deterministic parameter init (shapes from nn.LSTM / nn.Linear in __init__).
# Gate column order is (i, f, o, g); converting real PyTorch weights requires
# a transpose + gate-block permutation.
# ----------------------------------------------------------------------------
def init_params(key):
    H, G = HIDDEN, 4 * HIDDEN
    s = float(1.0 / (H ** 0.5))
    dims = {"l0": LSTM_DIM, "l0r": LSTM_DIM, "l1": 2 * H, "l1r": 2 * H}
    keys = jax.random.split(key, 3 * len(dims) + 2)
    params, ki = {}, 0
    for name, din in dims.items():
        params[f"wih_{name}"] = jax.random.uniform(keys[ki], (din, G), jnp.float32, -s, s); ki += 1
        params[f"whh_{name}"] = jax.random.uniform(keys[ki], (H, G), jnp.float32, -s, s); ki += 1
        # combined bias (b_ih + b_hh)
        params[f"b_{name}"] = jax.random.uniform(keys[ki], (1, G), jnp.float32, -2 * s, 2 * s); ki += 1
    d_fc = LSTM_DIM + FC_DIM  # 801
    params["fc_w"] = jax.random.uniform(keys[ki], (d_fc, NUM_CLASSES), jnp.float32, -0.05, 0.05); ki += 1
    params["fc_b"] = jax.random.uniform(keys[ki], (1, NUM_CLASSES), jnp.float32, -0.05, 0.05)
    return params


if __name__ == "__main__":
    B, T = 2, 16   # small demo shapes (original uses seq len 272)
    key = jax.random.PRNGKey(0)
    kp, kx, kx2, km = jax.random.split(key, 4)
    params = init_params(kp)

    x = jax.random.normal(kx, (B, T, 12 * 24 * 2), jnp.float32)           # (2, 16, 576)
    x2 = jax.random.normal(kx2, (B, T, 96), jnp.float32)                  # (2, 16, 96)
    mask = (jax.random.uniform(km, (B, T, 1)) > 0.5).astype(jnp.float32)  # (2, 16, 1)
    length = jnp.array([T, 11], dtype=jnp.int32)                          # valid lengths

    out = jax.jit(multitask_forward)(params, x, length, x2, mask)
    jax.block_until_ready(out)
    assert out.shape == (B, T, NUM_CLASSES)
    # probabilities: rows sum to ~1
    assert bool(jnp.all(jnp.abs(jnp.sum(out, axis=-1) - 1.0) < 1e-3))
    print("KERNEL_OK")
</pallas_src>

<mosaic_0001>
module attributes {stable_mosaic.version = 11 : i64} {
  func.func @_proj_kernel(%arg0: i32, %arg1: memref<32x768xf32, #tpu.memory_space<vmem>>, %arg2: memref<768x512xf32, #tpu.memory_space<vmem>>, %arg3: memref<1x512xf32, #tpu.memory_space<vmem>>, %arg4: memref<32x512xf32, #tpu.memory_space<vmem>>) attributes {dimension_semantics = [#tpu.dimension_semantics<parallel>], iteration_bounds = array<i64: 1>, scalar_prefetch = 0 : i64, scratch_operands = 0 : i64, tpu.core_type = #tpu.core_type<tc>, window_params = [{transform_indices = @transform_0, window_bounds = array<i64: 32, 768>}, {pipeline_mode = #tpu.pipeline_mode<synchronous>, transform_indices = @transform_1, window_bounds = array<i64: 768, 512>}, {pipeline_mode = #tpu.pipeline_mode<synchronous>, transform_indices = @transform_2, window_bounds = array<i64: 1, 512>}, {transform_indices = @transform_3, window_bounds = array<i64: 32, 512>}]} {
    %c0 = arith.constant 0 : index
    %c0_0 = arith.constant 0 : index
    %0 = vector.load %arg1[%c0, %c0_0] : memref<32x768xf32, #tpu.memory_space<vmem>>, vector<32x768xf32>
    %c0_1 = arith.constant 0 : index
    %c0_2 = arith.constant 0 : index
    %1 = vector.load %arg2[%c0_1, %c0_2] : memref<768x512xf32, #tpu.memory_space<vmem>>, vector<768x512xf32>
    %cst = arith.constant dense<0.000000e+00> : vector<32x512xf32>
    %2 = tpu.matmul %0, %1, %cst {dimension_numbers = #tpu.dot_dimension_numbers<[1], [0], [0], [1], [0, 0, 1, 1], [], []>} : vector<32x768xf32>, vector<768x512xf32>, vector<32x512xf32> -> vector<32x512xf32>
    %c0_3 = arith.constant 0 : index
    %c0_4 = arith.constant 0 : index
    %3 = vector.load %arg3[%c0_3, %c0_4] : memref<1x512xf32, #tpu.memory_space<vmem>>, vector<1x512xf32>
    %4 = vector.broadcast %3 : vector<1x512xf32> to vector<32x512xf32>
    %5 = arith.addf %2, %4 : vector<32x512xf32>
    %c0_5 = arith.constant 0 : index
    %c0_6 = arith.constant 0 : index
    %6 = vector.load %arg4[%c0_5, %c0_6] : memref<32x512xf32, #tpu.memory_space<vmem>>, vector<32x512xf32>
    tpu.vector_store %arg4[%c0_5, %c0_6], %5 {strides = array<i32>} : memref<32x512xf32, #tpu.memory_space<vmem>>, vector<32x512xf32>,
    return
  }
  func.func @transform_0(%arg0: i32) -> (i32, i32) {
    %c0_i32 = arith.constant 0 : i32
    %c0_i32_0 = arith.constant 0 : i32
    return %arg0, %c0_i32 : i32, i32
  }
  func.func @transform_1(%arg0: i32) -> (i32, i32) {
    %c0_i32 = arith.constant 0 : i32
    %c0_i32_0 = arith.constant 0 : i32
    %c0_i32_1 = arith.constant 0 : i32
    return %c0_i32, %c0_i32_0 : i32, i32
  }
  func.func @transform_2(%arg0: i32) -> (i32, i32) {
    %c0_i32 = arith.constant 0 : i32
    %c0_i32_0 = arith.constant 0 : i32
    %c0_i32_1 = arith.constant 0 : i32
    return %c0_i32, %c0_i32_0 : i32, i32
  }
  func.func @transform_3(%arg0: i32) -> (i32, i32) {
    %c0_i32 = arith.constant 0 : i32
    %c0_i32_0 = arith.constant 0 : i32
    return %arg0, %c0_i32 : i32, i32
  }
}

module attributes {stable_mosaic.version = 11 : i64} {
  func.func @_bilstm_kernel(%arg0: i32, %arg1: memref<2x1xi32, #tpu.memory_space<vmem>>, %arg2: memref<16x2x256xf32, #tpu.memory_space<vmem>>, %arg3: memref<16x2x256xf32, #tpu.memory_space<vmem>>, %arg4: memref<64x256xf32, #tpu.memory_space<vmem>>, %arg5: memref<64x256xf32, #tpu.memory_space<vmem>>, %arg6: memref<16x2x128xf32, #tpu.memory_space<vmem>>, %arg7: memref<2x64xf32, #tpu.memory_space<vmem>>, %arg8: memref<2x64xf32, #tpu.memory_space<vmem>>, %arg9: memref<2x64xf32, #tpu.memory_space<vmem>>, %arg10: memref<2x64xf32, #tpu.memory_space<vmem>>) attributes {dimension_semantics = [#tpu.dimension_semantics<arbitrary>], iteration_bounds = array<i64: 1>, scalar_prefetch = 0 : i64, scratch_operands = 4 : i64, tpu.core_type = #tpu.core_type<tc>, window_params = [{pipeline_mode = #tpu.pipeline_mode<synchronous>, transform_indices = @transform_0, window_bounds = array<i64: 2, 1>}, {transform_indices = @transform_1, window_bounds = array<i64: 16, 2, 256>}, {transform_indices = @transform_2, window_bounds = array<i64: 16, 2, 256>}, {pipeline_mode = #tpu.pipeline_mode<synchronous>, transform_indices = @transform_3, window_bounds = array<i64: 64, 256>}, {pipeline_mode = #tpu.pipeline_mode<synchronous>, transform_indices = @transform_4, window_bounds = array<i64: 64, 256>}, {pipeline_mode = #tpu.pipeline_mode<synchronous>, transform_indices = @transform_5, window_bounds = array<i64: 16, 2, 128>}]} {
    %c0_i32 = arith.constant 0 : i32
    %0 = arith.cmpi eq, %arg0, %c0_i32 : i32
    %1 = arith.extui %0 : i1 to i32
    %c0_i32_0 = arith.constant 0 : i32
    %2 = arith.cmpi ne, %1, %c0_i32_0 : i32
    scf.if %2 {
      %cst_264 = arith.constant 0.000000e+00 : f32
      %1249 = vector.broadcast %cst_264 : f32 to vector<2x64xf32>
      %c0_265 = arith.constant 0 : index
      %c0_266 = arith.constant 0 : index
      %1250 = vector.load %arg7[%c0_265, %c0_266] : memref<2x64xf32, #tpu.memory_space<vmem>>, vector<2x64xf32>
      tpu.vector_store %arg7[%c0_265, %c0_266], %1249 {strides = array<i32>} : memref<2x64xf32, #tpu.memory_space<vmem>>, vector<2x64xf32>,
      %cst_267 = arith.constant 0.000000e+00 : f32
      %1251 = vector.broadcast %cst_267 : f32 to vector<2x64xf32>
      %c0_268 = arith.constant 0 : index
      %c0_269 = arith.constant 0 : index
      %1252 = vector.load %arg8[%c0_268, %c0_269] : memref<2x64xf32, #tpu.memory_space<vmem>>, vector<2x64xf32>
      tpu.vector_store %arg8[%c0_268, %c0_269], %1251 {strides = array<i32>} : memref<2x64xf32, #tpu.memory_space<vmem>>, vector<2x64xf32>,
      %cst_270 = arith.constant 0.000000e+00 : f32
      %1253 = vector.broadcast %cst_270 : f32 to vector<2x64xf32>
      %c0_271 = arith.constant 0 : index
      %c0_272 = arith.constant 0 : index
      %1254 = vector.load %arg9[%c0_271, %c0_272] : memref<2x64xf32, #tpu.memory_space<vmem>>, vector<2x64xf32>
      tpu.vector_store %arg9[%c0_271, %c0_272], %1253 {strides = array<i32>} : memref<2x64xf32, #tpu.memory_space<vmem>>, vector<2x64xf32>,
      %cst_273 = arith.constant 0.000000e+00 : f32
      %1255 = vector.broadcast %cst_273 : f32 to vector<2x64xf32>
      %c0_274 = arith.constant 0 : index
      %c0_275 = arith.constant 0 : index
      %1256 = vector.load %arg10[%c0_274, %c0_275] : memref<2x64xf32, #tpu.memory_space<vmem>>, vector<2x64xf32>
      tpu.vector_store %arg10[%c0_274, %c0_275], %1255 {strides = array<i32>} : memref<2x64xf32, #tpu.memory_space<vmem>>, vector<2x64xf32>,
    } else {
    }
    %c0 = arith.constant 0 : index
    %c0_1 = arith.constant 0 : index
    %3 = vector.load %arg1[%c0, %c0_1] : memref<2x1xi32, #tpu.memory_space<vmem>>, vector<2x1xi32>
    %c0_2 = arith.constant 0 : index
    %c0_3 = arith.constant 0 : index
    %4 = vector.load %arg4[%c0_2, %c0_3] : memref<64x256xf32, #tpu.memory_space<vmem>>, vector<64x256xf32>
    %c0_4 = arith.constant 0 : index
    %c0_5 = arith.constant 0 : index
    %5 = vector.load %arg5[%c0_4, %c0_5] : memref<64x256xf32, #tpu.memory_space<vmem>>, vector<64x256xf32>
    %c16_i32 = arith.constant 16 : i32
    %6 = arith.muli %arg0, %c16_i32 : i32
    %c16_i32_6 = arith.constant 16 : i32
    %7 = arith.muli %arg0, %c16_i32_6 : i32
    %c15_i32 = arith.constant 15 : i32
    %8 = arith.subi %c15_i32, %7 : i32
    %c0_7 = arith.constant 0 : index
    %c0_8 = arith.constant 0 : index
    %9 = vector.load %arg7[%c0_7, %c0_8] : memref<2x64xf32, #tpu.memory_space<vmem>>, vector<2x64xf32>
    %c0_9 = arith.constant 0 : index
    %c0_10 = arith.constant 0 : index
    %10 = vector.load %arg8[%c0_9, %c0_10] : memref<2x64xf32, #tpu.memory_space<vmem>>, vector<2x64xf32>
    %c0_11 = arith.constant 0 : index
    %c0_12 = arith.constant 0 : index
    %11 = vector.load %arg9[%c0_11, %c0_12] : memref<2x64xf32, #tpu.memory_space<vmem>>, vector<2x64xf32>
    %c0_13 = arith.constant 0 : index
    %c0_14 = arith.constant 0 : index
    %12 = vector.load %arg10[%c0_13, %c0_14] : memref<2x64xf32, #tpu.memory_space<vmem>>, vector<2x64xf32>
    %c0_i32_15 = arith.constant 0 : i32
    %13 = arith.index_cast %c0_i32_15 : i32 to index
    %c0_16 = arith.constant 0 : index
    %c0_17 = arith.constant 0 : index
    %14 = vector.load %arg2[%13, %c0_16, %c0_17] : memref<16x2x256xf32, #tpu.memory_space<vmem>>, vector<1x2x256xf32>
    %15 = vector.shape_cast %14 : vector<1x2x256xf32> to vector<2x256xf32>
    %cst = arith.constant dense<0.000000e+00> : vector<2x256xf32>
    %16 = tpu.matmul %9, %4, %cst {dimension_numbers = #tpu.dot_dimension_numbers<[1], [0], [0], [1], [0, 0, 1, 1], [], []>} : vector<2x64xf32>, vector<64x256xf32>, vector<2x256xf32> -> vector<2x256xf32>
    %17 = arith.addf %15, %16 : vector<2x256xf32>
    %18 = vector.extract_strided_slice %17 {offsets = [0, 0], sizes = [2, 192], strides = [1, 1]} : vector<2x256xf32> to vector<2x192xf32>
    %19 = arith.negf %18 : vector<2x192xf32>
    %20 = math.exp %19 : vector<2x192xf32>
    %cst_18 = arith.constant 1.000000e+00 : f32
    %21 = vector.broadcast %cst_18 : f32 to vector<2x192xf32>
    %22 = arith.addf %21, %20 : vector<2x192xf32>
    %23 = arith.divf %21, %22 : vector<2x192xf32>
    %24 = vector.extract_strided_slice %23 {offsets = [0, 0], sizes = [2, 64], strides = [1, 1]} : vector<2x192xf32> to vector<2x64xf32>
    %25 = vector.extract_strided_slice %23 {offsets = [0, 64], sizes = [2, 64], strides = [1, 1]} : vector<2x192xf32> to vector<2x64xf32>
    %26 = vector.extract_strided_slice %23 {offsets = [0, 128], sizes = [2, 64], strides = [1, 1]} : vector<2x192xf32> to vector<2x64xf32>
    %27 = vector.extract_strided_slice %17 {offsets = [0, 192], sizes = [2, 64], strides = [1, 1]} : vector<2x256xf32> to vector<2x64xf32>
    %28 = math.tanh %27 : vector<2x64xf32>
    %29 = arith.mulf %25, %10 : vector<2x64xf32>
    %30 = arith.mulf %24, %28 : vector<2x64xf32>
    %31 = arith.addf %29, %30 : vector<2x64xf32>
    %32 = math.tanh %31 : vector<2x64xf32>
    %33 = arith.mulf %26, %32 : vector<2x64xf32>
    %34 = arith.addi %6, %c0_i32_15 : i32
    %35 = vector.broadcast %34 : i32 to vector<2x1xi32>
    %36 = arith.cmpi slt, %35, %3 : vector<2x1xi32>
    %37 = vector.shape_cast %36 : vector<2x1xi1> to vector<2x1xi1>
    %38 = vector.broadcast %37 : vector<2x1xi1> to vector<2x64xi1>
    %39 = arith.select %38, %33, %9 : vector<2x64xi1>, vector<2x64xf32>
    %40 = vector.shape_cast %36 : vector<2x1xi1> to vector<2x1xi1>
    %41 = vector.broadcast %40 : vector<2x1xi1> to vector<2x64xi1>
    %42 = arith.select %41, %31, %10 : vector<2x64xi1>, vector<2x64xf32>
    %cst_19 = arith.constant 0.000000e+00 : f32
    %43 = vector.shape_cast %36 : vector<2x1xi1> to vector<2x1xi1>
    %44 = vector.broadcast %43 : vector<2x1xi1> to vector<2x64xi1>
    %45 = vector.broadcast %cst_19 : f32 to vector<2x64xf32>
    %46 = arith.select %44, %39, %45 : vector<2x64xi1>, vector<2x64xf32>
    %47 = vector.shape_cast %46 : vector<2x64xf32> to vector<1x2x64xf32>
    %48 = arith.addi %6, %c0_i32_15 : i32
    %49 = arith.index_cast %48 : i32 to index
    %c0_20 = arith.constant 0 : index
    %c0_21 = arith.constant 0 : index
    %50 = vector.load %arg6[%49, %c0_20, %c0_21] : memref<16x2x128xf32, #tpu.memory_space<vmem>>, vector<1x2x64xf32>
    tpu.vector_store %arg6[%49, %c0_20, %c0_21], %47 {strides = array<i32>} : memref<16x2x128xf32, #tpu.memory_space<vmem>>, vector<1x2x64xf32>,
    %c15_i32_22 = arith.constant 15 : i32
    %51 = arith.subi %c15_i32_22, %c0_i32_15 : i32
    %52 = arith.index_cast %51 : i32 to index
    %c0_23 = arith.constant 0 : index
    %c0_24 = arith.constant 0 : index
    %53 = vector.load %arg3[%52, %c0_23, %c0_24] : memref<16x2x256xf32, #tpu.memory_space<vmem>>, vector<1x2x256xf32>
    %54 = vector.shape_cast %53 : vector<1x2x256xf32> to vector<2x256xf32>
    %cst_25 = arith.constant dense<0.000000e+00> : vector<2x256xf32>
    %55 = tpu.matmul %11, %5, %cst_25 {dimension_numbers = #tpu.dot_dimension_numbers<[1], [0], [0], [1], [0, 0, 1, 1], [], []>} : vector<2x64xf32>, vector<64x256xf32>, vector<2x256xf32> -> vector<2x256xf32>
    %56 = arith.addf %54, %55 : vector<2x256xf32>
    %57 = vector.extract_strided_slice %56 {offsets = [0, 0], sizes = [2, 192], strides = [1, 1]} : vector<2x256xf32> to vector<2x192xf32>
    %58 = arith.negf %57 : vector<2x192xf32>
    %59 = math.exp %58 : vector<2x192xf32>
    %cst_26 = arith.constant 1.000000e+00 : f32
    %60 = vector.broadcast %cst_26 : f32 to vector<2x192xf32>
    %61 = arith.addf %60, %59 : vector<2x192xf32>
    %62 = arith.divf %60, %61 : vector<2x192xf32>
    %63 = vector.extract_strided_slice %62 {offsets = [0, 0], sizes = [2, 64], strides = [1, 1]} : vector<2x192xf32> to vector<2x64xf32>
    %64 = vector.extract_strided_slice %62 {offsets = [0, 64], sizes = [2, 64], strides = [1, 1]} : vector<2x192xf32> to vector<2x64xf32>
    %65 = vector.extract_strided_slice %62 {offsets = [0, 128], sizes = [2, 64], strides = [1, 1]} : vector<2x192xf32> to vector<2x64xf32>
    %66 = vector.extract_strided_slice %56 {offsets = [0, 192], sizes = [2, 64], strides = [1, 1]} : vector<2x256xf32> to vector<2x64xf32>
    %67 = math.tanh %66 : vector<2x64xf32>
    %68 = arith.mulf %64, %12 : vector<2x64xf32>
    %69 = arith.mulf %63, %67 : vector<2x64xf32>
    %70 = arith.addf %68, %69 : vector<2x64xf32>
    %71 = math.tanh %70 : vector<2x64xf32>
    %72 = arith.mulf %65, %71 : vector<2x64xf32>
    %73 = arith.subi %8, %c0_i32_15 : i32
    %74 = vector.broadcast %73 : i32 to vector<2x1xi32>
    %75 = arith.cmpi slt, %74, %3 : vector<2x1xi32>
    %76 = vector.shape_cast %75 : vector<2x1xi1> to vector<2x1xi1>
    %77 = vector.broadcast %76 : vector<2x1xi1> to vector<2x64xi1>
    %78 = arith.select %77, %72, %11 : vector<2x64xi1>, vector<2x64xf32>
    %79 = vector.shape_cast %75 : vector<2x1xi1> to vector<2x1xi1>
    %80 = vector.broadcast %79 : vector<2x1xi1> to vector<2x64xi1>
    %81 = arith.select %80, %70, %12 : vector<2x64xi1>, vector<2x64xf32>
    %cst_27 = arith.constant 0.000000e+00 : f32
    %82 = vector.shape_cast %75 : vector<2x1xi1> to vector<2x1xi1>
    %83 = vector.broadcast %82 : vector<2x1xi1> to vector<2x64xi1>
    %84 = vector.broadcast %cst_27 : f32 to vector<2x64xf32>
    %85 = arith.select %83, %78, %84 : vector<2x64xi1>, vector<2x64xf32>
    %86 = vector.shape_cast %85 : vector<2x64xf32> to vector<1x2x64xf32>
    %87 = arith.subi %8, %c0_i32_15 : i32
    %88 = arith.index_cast %87 : i32 to index
    %c0_28 = arith.constant 0 : index
    %c64 = arith.constant 64 : index
    %89 = vector.load %arg6[%88, %c0_28, %c64] : memref<16x2x128xf32, #tpu.memory_space<vmem>>, vector<1x2x64xf32>
    tpu.vector_store %arg6[%88, %c0_28, %c64], %86 {strides = array<i32>} : memref<16x2x128xf32, #tpu.memory_space<vmem>>, vector<1x2x64xf32>,
    %c1_i32 = arith.constant 1 : i32
    %90 = arith.index_cast %c1_i32 : i32 to index
    %c0_29 = arith.constant 0 : index
    %c0_30 = arith.constant 0 : index
    %91 = vector.load %arg2[%90, %c0_29, %c0_30] : memref<16x2x256xf32, #tpu.memory_space<vmem>>, vector<1x2x256xf32>
    %92 = vector.shape_cast %91 : vector<1x2x256xf32> to vector<2x256xf32>
    %cst_31 = arith.constant dense<0.000000e+00> : vector<2x256xf32>
    %93 = tpu.matmul %39, %4, %cst_31 {dimension_numbers = #tpu.dot_dimension_numbers<[1], [0], [0], [1], [0, 0, 1, 1], [], []>} : vector<2x64xf32>, vector<64x256xf32>, vector<2x256xf32> -> vector<2x256xf32>
    %94 = arith.addf %92, %93 : vector<2x256xf32>
    %95 = vector.extract_strided_slice %94 {offsets = [0, 0], sizes = [2, 192], strides = [1, 1]} : vector<2x256xf32> to vector<2x192xf32>
    %96 = arith.negf %95 : vector<2x192xf32>
    %97 = math.exp %96 : vector<2x192xf32>
    %cst_32 = arith.constant 1.000000e+00 : f32
    %98 = vector.broadcast %cst_32 : f32 to vector<2x192xf32>
    %99 = arith.addf %98, %97 : vector<2x192xf32>
    %100 = arith.divf %98, %99 : vector<2x192xf32>
    %101 = vector.extract_strided_slice %100 {offsets = [0, 0], sizes = [2, 64], strides = [1, 1]} : vector<2x192xf32> to vector<2x64xf32>
    %102 = vector.extract_strided_slice %100 {offsets = [0, 64], sizes = [2, 64], strides = [1, 1]} : vector<2x192xf32> to vector<2x64xf32>
    %103 = vector.extract_strided_slice %100 {offsets = [0, 128], sizes = [2, 64], strides = [1, 1]} : vector<2x192xf32> to vector<2x64xf32>
    %104 = vector.extract_strided_slice %94 {offsets = [0, 192], sizes = [2, 64], strides = [1, 1]} : vector<2x256xf32> to vector<2x64xf32>
    %105 = math.tanh %104 : vector<2x64xf32>
    %106 = arith.mulf %102, %42 : vector<2x64xf32>
    %107 = arith.mulf %101, %105 : vector<2x64xf32>
    %108 = arith.addf %106, %107 : vector<2x64xf32>
    %109 = math.tanh %108 : vector<2x64xf32>
    %110 = arith.mulf %103, %109 : vector<2x64xf32>
    %111 = arith.addi %6, %c1_i32 : i32
    %112 = vector.broadcast %111 : i32 to vector<2x1xi32>
    %113 = arith.cmpi slt, %112, %3 : vector<2x1xi32>
    %114 = vector.shape_cast %113 : vector<2x1xi1> to vector<2x1xi1>
    %115 = vector.broadcast %114 : vector<2x1xi1> to vector<2x64xi1>
    %116 = arith.select %115, %110, %39 : vector<2x64xi1>, vector<2x64xf32>
    %117 = vector.shape_cast %113 : vector<2x1xi1> to vector<2x1xi1>
    %118 = vector.broadcast %117 : vector<2x1xi1> to vector<2x64xi1>
    %119 = arith.select %118, %108, %42 : vector<2x64xi1>, vector<2x64xf32>
    %cst_33 = arith.constant 0.000000e+00 : f32
    %120 = vector.shape_cast %113 : vector<2x1xi1> to vector<2x1xi1>
    %121 = vector.broadcast %120 : vector<2x1xi1> to vector<2x64xi1>
    %122 = vector.broadcast %cst_33 : f32 to vector<2x64xf32>
    %123 = arith.select %121, %116, %122 : vector<2x64xi1>, vector<2x64xf32>
    %124 = vector.shape_cast %123 : vector<2x64xf32> to vector<1x2x64xf32>
    %125 = arith.addi %6, %c1_i32 : i32
    %126 = arith.index_cast %125 : i32 to index
    %c0_34 = arith.constant 0 : index
    %c0_35 = arith.constant 0 : index
    %127 = vector.load %arg6[%126, %c0_34, %c0_35] : memref<16x2x128xf32, #tpu.memory_space<vmem>>, vector<1x2x64xf32>
    tpu.vector_store %arg6[%126, %c0_34, %c0_35], %124 {strides = array<i32>} : memref<16x2x128xf32, #tpu.memory_space<vmem>>, vector<1x2x64xf32>,
    %c15_i32_36 = arith.constant 15 : i32
    %128 = arith.subi %c15_i32_36, %c1_i32 : i32
    %129 = arith.index_cast %128 : i32 to index
    %c0_37 = arith.constant 0 : index
    %c0_38 = arith.constant 0 : index
    %130 = vector.load %arg3[%129, %c0_37, %c0_38] : memref<16x2x256xf32, #tpu.memory_space<vmem>>, vector<1x2x256xf32>
    %131 = vector.shape_cast %130 : vector<1x2x256xf32> to vector<2x256xf32>
    %cst_39 = arith.constant dense<0.000000e+00> : vector<2x256xf32>
    %132 = tpu.matmul %78, %5, %cst_39 {dimension_numbers = #tpu.dot_dimension_numbers<[1], [0], [0], [1], [0, 0, 1, 1], [], []>} : vector<2x64xf32>, vector<64x256xf32>, vector<2x256xf32> -> vector<2x256xf32>
    %133 = arith.addf %131, %132 : vector<2x256xf32>
    %134 = vector.extract_strided_slice %133 {offsets = [0, 0], sizes = [2, 192], strides = [1, 1]} : vector<2x256xf32> to vector<2x192xf32>
    %135 = arith.negf %134 : vector<2x192xf32>
    %136 = math.exp %135 : vector<2x192xf32>
    %cst_40 = arith.constant 1.000000e+00 : f32
    %137 = vector.broadcast %cst_40 : f32 to vector<2x192xf32>
    %138 = arith.addf %137, %136 : vector<2x192xf32>
    %139 = arith.divf %137, %138 : vector<2x192xf32>
    %140 = vector.extract_strided_slice %139 {offsets = [0, 0], sizes = [2, 64], strides = [1, 1]} : vector<2x192xf32> to vector<2x64xf32>
    %141 = vector.extract_strided_slice %139 {offsets = [0, 64], sizes = [2, 64], strides = [1, 1]} : vector<2x192xf32> to vector<2x64xf32>
    %142 = vector.extract_strided_slice %139 {offsets = [0, 128], sizes = [2, 64], strides = [1, 1]} : vector<2x192xf32> to vector<2x64xf32>
    %143 = vector.extract_strided_slice %133 {offsets = [0, 192], sizes = [2, 64], strides = [1, 1]} : vector<2x256xf32> to vector<2x64xf32>
    %144 = math.tanh %143 : vector<2x64xf32>
    %145 = arith.mulf %141, %81 : vector<2x64xf32>
    %146 = arith.mulf %140, %144 : vector<2x64xf32>
    %147 = arith.addf %145, %146 : vector<2x64xf32>
    %148 = math.tanh %147 : vector<2x64xf32>
    %149 = arith.mulf %142, %148 : vector<2x64xf32>
    %150 = arith.subi %8, %c1_i32 : i32
    %151 = vector.broadcast %150 : i32 to vector<2x1xi32>
    %152 = arith.cmpi slt, %151, %3 : vector<2x1xi32>
    %153 = vector.shape_cast %152 : vector<2x1xi1> to vector<2x1xi1>
    %154 = vector.broadcast %153 : vector<2x1xi1> to vector<2x64xi1>
    %155 = arith.select %154, %149, %78 : vector<2x64xi1>, vector<2x64xf32>
    %156 = vector.shape_cast %152 : vector<2x1xi1> to vector<2x1xi1>
    %157 = vector.broadcast %156 : vector<2x1xi1> to vector<2x64xi1>
    %158 = arith.select %157, %147, %81 : vector<2x64xi1>, vector<2x64xf32>
    %cst_41 = arith.constant 0.000000e+00 : f32
    %159 = vector.shape_cast %152 : vector<2x1xi1> to vector<2x1xi1>
    %160 = vector.broadcast %159 : vector<2x1xi1> to vector<2x64xi1>
    %161 = vector.broadcast %cst_41 : f32 to vector<2x64xf32>
    %162 = arith.select %160, %155, %161 : vector<2x64xi1>, vector<2x64xf32>
    %163 = vector.shape_cast %162 : vector<2x64xf32> to vector<1x2x64xf32>
    %164 = arith.subi %8, %c1_i32 : i32
    %165 = arith.index_cast %164 : i32 to index
    %c0_42 = arith.constant 0 : index
    %c64_43 = arith.constant 64 : index
    %166 = vector.load %arg6[%165, %c0_42, %c64_43] : memref<16x2x128xf32, #tpu.memory_space<vmem>>, vector<1x2x64xf32>
    tpu.vector_store %arg6[%165, %c0_42, %c64_43], %163 {strides = array<i32>} : memref<16x2x128xf32, #tpu.memory_space<vmem>>, vector<1x2x64xf32>,
    %c2_i32 = arith.constant 2 : i32
    %167 = arith.index_cast %c2_i32 : i32 to index
    %c0_44 = arith.constant 0 : index
    %c0_45 = arith.constant 0 : index
    %168 = vector.load %arg2[%167, %c0_44, %c0_45] : memref<16x2x256xf32, #tpu.memory_space<vmem>>, vector<1x2x256xf32>
    %169 = vector.shape_cast %168 : vector<1x2x256xf32> to vector<2x256xf32>
    %cst_46 = arith.constant dense<0.000000e+00> : vector<2x256xf32>
    %170 = tpu.matmul %116, %4, %cst_46 {dimension_numbers = #tpu.dot_dimension_numbers<[1], [0], [0], [1], [0, 0, 1, 1], [], []>} : vector<2x64xf32>, vector<64x256xf32>, vector<2x256xf32> -> vector<2x256xf32>
    %171 = arith.addf %169, %170 : vector<2x256xf32>
    %172 = vector.extract_strided_slice %171 {offsets = [0, 0], sizes = [2, 192], strides = [1, 1]} : vector<2x256xf32> to vector<2x192xf32>
    %173 = arith.negf %172 : vector<2x192xf32>
    %174 = math.exp %173 : vector<2x192xf32>
    %cst_47 = arith.constant 1.000000e+00 : f32
    %175 = vector.broadcast %cst_47 : f32 to vector<2x192xf32>
    %176 = arith.addf %175, %174 : vector<2x192xf32>
    %177 = arith.divf %175, %176 : vector<2x192xf32>
    %178 = vector.extract_strided_slice %177 {offsets = [0, 0], sizes = [2, 64], strides = [1, 1]} : vector<2x192xf32> to vector<2x64xf32>
    %179 = vector.extract_strided_slice %177 {offsets = [0, 64], sizes = [2, 64], strides = [1, 1]} : vector<2x192xf32> to vector<2x64xf32>
    %180 = vector.extract_strided_slice %177 {offsets = [0, 128], sizes = [2, 64], strides = [1, 1]} : vector<2x192xf32> to vector<2x64xf32>
    %181 = vector.extract_strided_slice %171 {offsets = [0, 192], sizes = [2, 64], strides = [1, 1]} : vector<2x256xf32> to vector<2x64xf32>
    %182 = math.tanh %181 : vector<2x64xf32>
    %183 = arith.mulf %179, %119 : vector<2x64xf32>
    %184 = arith.mulf %178, %182 : vector<2x64xf32>
    %185 = arith.addf %183, %184 : vector<2x64xf32>
    %186 = math.tanh %185 : vector<2x64xf32>
    %187 = arith.mulf %180, %186 : vector<2x64xf32>
    %188 = arith.addi %6, %c2_i32 : i32
    %189 = vector.broadcast %188 : i32 to vector<2x1xi32>
    %190 = arith.cmpi slt, %189, %3 : vector<2x1xi32>
    %191 = vector.shape_cast %190 : vector<2x1xi1> to vector<2x1xi1>
    %192 = vector.broadcast %191 : vector<2x1xi1> to vector<2x64xi1>
    %193 = arith.select %192, %187, %116 : vector<2x64xi1>, vector<2x64xf32>
    %194 = vector.shape_cast %190 : vector<2x1xi1> to vector<2x1xi1>
    %195 = vector.broadcast %194 : vector<2x1xi1> to vector<2x64xi1>
    %196 = arith.select %195, %185, %119 : vector<2x64xi1>, vector<2x64xf32>
    %cst_48 = arith.constant 0.000000e+00 : f32
    %197 = vector.shape_cast %190 : vector<2x1xi1> to vector<2x1xi1>
    %198 = vector.broadcast %197 : vector<2x1xi1> to vector<2x64xi1>
    %199 = vector.broadcast %cst_48 : f32 to vector<2x64xf32>
    %200 = arith.select %198, %193, %199 : vector<2x64xi1>, vector<2x64xf32>
    %201 = vector.shape_cast %200 : vector<2x64xf32> to vector<1x2x64xf32>
    %202 = arith.addi %6, %c2_i32 : i32
    %203 = arith.index_cast %202 : i32 to index
    %c0_49 = arith.constant 0 : index
    %c0_50 = arith.constant 0 : index
    %204 = vector.load %arg6[%203, %c0_49, %c0_50] : memref<16x2x128xf32, #tpu.memory_space<vmem>>, vector<1x2x64xf32>
    tpu.vector_store %arg6[%203, %c0_49, %c0_50], %201 {strides = array<i32>} : memref<16x2x128xf32, #tpu.memory_space<vmem>>, vector<1x2x64xf32>,
    %c15_i32_51 = arith.constant 15 : i32
    %205 = arith.subi %c15_i32_51, %c2_i32 : i32
    %206 = arith.index_cast %205 : i32 to index
    %c0_52 = arith.constant 0 : index
    %c0_53 = arith.constant 0 : index
    %207 = vector.load %arg3[%206, %c0_52, %c0_53] : memref<16x2x256xf32, #tpu.memory_space<vmem>>, vector<1x2x256xf32>
    %208 = vector.shape_cast %207 : vector<1x2x256xf32> to vector<2x256xf32>
    %cst_54 = arith.constant dense<0.000000e+00> : vector<2x256xf32>
    %209 = tpu.matmul %155, %5, %cst_54 {dimension_numbers = #tpu.dot_dimension_numbers<[1], [0], [0], [1], [0, 0, 1, 1], [], []>} : vector<2x64xf32>, vector<64x256xf32>, vector<2x256xf32> -> vector<2x256xf32>
    %210 = arith.addf %208, %209 : vector<2x256xf32>
    %211 = vector.extract_strided_slice %210 {offsets = [0, 0], sizes = [2, 192], strides = [1, 1]} : vector<2x256xf32> to vector<2x192xf32>
    %212 = arith.negf %211 : vector<2x192xf32>
    %213 = math.exp %212 : vector<2x192xf32>
    %cst_55 = arith.constant 1.000000e+00 : f32
    %214 = vector.broadcast %cst_55 : f32 to vector<2x192xf32>
    %215 = arith.addf %214, %213 : vector<2x192xf32>
    %216 = arith.divf %214, %215 : vector<2x192xf32>
    %217 = vector.extract_strided_slice %216 {offsets = [0, 0], sizes = [2, 64], strides = [1, 1]} : vector<2x192xf32> to vector<2x64xf32>
    %218 = vector.extract_strided_slice %216 {offsets = [0, 64], sizes = [2, 64], strides = [1, 1]} : vector<2x192xf32> to vector<2x64xf32>
    %219 = vector.extract_strided_slice %216 {offsets = [0, 128], sizes = [2, 64], strides = [1, 1]} : vector<2x192xf32> to vector<2x64xf32>
    %220 = vector.extract_strided_slice %210 {offsets = [0, 192], sizes = [2, 64], strides = [1, 1]} : vector<2x256xf32> to vector<2x64xf32>
    %221 = math.tanh %220 : vector<2x64xf32>
    %222 = arith.mulf %218, %158 : vector<2x64xf32>
    %223 = arith.mulf %217, %221 : vector<2x64xf32>
    %224 = arith.addf %222, %223 : vector<2x64xf32>
    %225 = math.tanh %224 : vector<2x64xf32>
    %226 = arith.mulf %219, %225 : vector<2x64xf32>
    %227 = arith.subi %8, %c2_i32 : i32
    %228 = vector.broadcast %227 : i32 to vector<2x1xi32>
    %229 = arith.cmpi slt, %228, %3 : vector<2x1xi32>
    %230 = vector.shape_cast %229 : vector<2x1xi1> to vector<2x1xi1>
    %231 = vector.broadcast %230 : vector<2x1xi1> to vector<2x64xi1>
    %232 = arith.select %231, %226, %155 : vector<2x64xi1>, vector<2x64xf32>
    %233 = vector.shape_cast %229 : vector<2x1xi1> to vector<2x1xi1>
    %234 = vector.broadcast %233 : vector<2x1xi1> to vector<2x64xi1>
    %235 = arith.select %234, %224, %158 : vector<2x64xi1>, vector<2x64xf32>
    %cst_56 = arith.constant 0.000000e+00 : f32
    %236 = vector.shape_cast %229 : vector<2x1xi1> to vector<2x1xi1>
    %237 = vector.broadcast %236 : vector<2x1xi1> to vector<2x64xi1>
    %238 = vector.broadcast %cst_56 : f32 to vector<2x64xf32>
    %239 = arith.select %237, %232, %238 : vector<2x64xi1>, vector<2x64xf32>
    %240 = vector.shape_cast %239 : vector<2x64xf32> to vector<1x2x64xf32>
    %241 = arith.subi %8, %c2_i32 : i32
    %242 = arith.index_cast %241 : i32 to index
    %c0_57 = arith.constant 0 : index
    %c64_58 = arith.constant 64 : index
    %243 = vector.load %arg6[%242, %c0_57, %c64_58] : memref<16x2x128xf32, #tpu.memory_space<vmem>>, vector<1x2x64xf32>
    tpu.vector_store %arg6[%242, %c0_57, %c64_58], %240 {strides = array<i32>} : memref<16x2x128xf32, #tpu.memory_space<vmem>>, vector<1x2x64xf32>,
    %c3_i32 = arith.constant 3 : i32
    %244 = arith.index_cast %c3_i32 : i32 to index
    %c0_59 = arith.constant 0 : index
    %c0_60 = arith.constant 0 : index
    %245 = vector.load %arg2[%244, %c0_59, %c0_60] : memref<16x2x256xf32, #tpu.memory_space<vmem>>, vector<1x2x256xf32>
    %246 = vector.shape_cast %245 : vector<1x2x256xf32> to vector<2x256xf32>
    %cst_61 = arith.constant dense<0.000000e+00> : vector<2x256xf32>
    %247 = tpu.matmul %193, %4, %cst_61 {dimension_numbers = #tpu.dot_dimension_numbers<[1], [0], [0], [1], [0, 0, 1, 1], [], []>} : vector<2x64xf32>, vector<64x256xf32>, vector<2x256xf32> -> vector<2x256xf32>
    %248 = arith.addf %246, %247 : vector<2x256xf32>
    %249 = vector.extract_strided_slice %248 {offsets = [0, 0], sizes = [2, 192], strides = [1, 1]} : vector<2x256xf32> to vector<2x192xf32>
    %250 = arith.negf %249 : vector<2x192xf32>
    %251 = math.exp %250 : vector<2x192xf32>
    %cst_62 = arith.constant 1.000000e+00 : f32
    %252 = vector.broadcast %cst_62 : f32 to vector<2x192xf32>
    %253 = arith.addf %252, %251 : vector<2x192xf32>
    %254 = arith.divf %252, %253 : vector<2x192xf32>
    %255 = vector.extract_strided_slice %254 {offsets = [0, 0], sizes = [2, 64], strides = [1, 1]} : vector<2x192xf32> to vector<2x64xf32>
    %256 = vector.extract_strided_slice %254 {offsets = [0, 64], sizes = [2, 64], strides = [1, 1]} : vector<2x192xf32> to vector<2x64xf32>
    %257 = vector.extract_strided_slice %254 {offsets = [0, 128], sizes = [2, 64], strides = [1, 1]} : vector<2x192xf32> to vector<2x64xf32>
    %258 = vector.extract_strided_slice %248 {offsets = [0, 192], sizes = [2, 64], strides = [1, 1]} : vector<2x256xf32> to vector<2x64xf32>
    %259 = math.tanh %258 : vector<2x64xf32>
    %260 = arith.mulf %256, %196 : vector<2x64xf32>
    %261 = arith.mulf %255, %259 : vector<2x64xf32>
    %262 = arith.addf %260, %261 : vector<2x64xf32>
    %263 = math.tanh %262 : vector<2x64xf32>
    %264 = arith.mulf %257, %263 : vector<2x64xf32>
    %265 = arith.addi %6, %c3_i32 : i32
    %266 = vector.broadcast %265 : i32 to vector<2x1xi32>
    %267 = arith.cmpi slt, %266, %3 : vector<2x1xi32>
    %268 = vector.shape_cast %267 : vector<2x1xi1> to vector<2x1xi1>
    %269 = vector.broadcast %268 : vector<2x1xi1> to vector<2x64xi1>
    %270 = arith.select %269, %264, %193 : vector<2x64xi1>, vector<2x64xf32>
    %271 = vector.shape_cast %267 : vector<2x1xi1> to vector<2x1xi1>
    %272 = vector.broadcast %271 : vector<2x1xi1> to vector<2x64xi1>
    %273 = arith.select %272, %262, %196 : vector<2x64xi1>, vector<2x64xf32>
    %cst_63 = arith.constant 0.000000e+00 : f32
    %274 = vector.shape_cast %267 : vector<2x1xi1> to vector<2x1xi1>
    %275 = vector.broadcast %274 : vector<2x1xi1> to vector<2x64xi1>
    %276 = vector.broadcast %cst_63 : f32 to vector<2x64xf32>
    %277 = arith.select %275, %270, %276 : vector<2x64xi1>, vector<2x64xf32>
    %278 = vector.shape_cast %277 : vector<2x64xf32> to vector<1x2x64xf32>
    %279 = arith.addi %6, %c3_i32 : i32
    %280 = arith.index_cast %279 : i32 to index
    %c0_64 = arith.constant 0 : index
    %c0_65 = arith.constant 0 : index
    %281 = vector.load %arg6[%280, %c0_64, %c0_65] : memref<16x2x128xf32, #tpu.memory_space<vmem>>, vector<1x2x64xf32>
    tpu.vector_store %arg6[%280, %c0_64, %c0_65], %278 {strides = array<i32>} : memref<16x2x128xf32, #tpu.memory_space<vmem>>, vector<1x2x64xf32>,
    %c15_i32_66 = arith.constant 15 : i32
    %282 = arith.subi %c15_i32_66, %c3_i32 : i32
    %283 = arith.index_cast %282 : i32 to index
    %c0_67 = arith.constant 0 : index
    %c0_68 = arith.constant 0 : index
    %284 = vector.load %arg3[%283, %c0_67, %c0_68] : memref<16x2x256xf32, #tpu.memory_space<vmem>>, vector<1x2x256xf32>
    %285 = vector.shape_cast %284 : vector<1x2x256xf32> to vector<2x256xf32>
    %cst_69 = arith.constant dense<0.000000e+00> : vector<2x256xf32>
    %286 = tpu.matmul %232, %5, %cst_69 {dimension_numbers = #tpu.dot_dimension_numbers<[1], [0], [0], [1], [0, 0, 1, 1], [], []>} : vector<2x64xf32>, vector<64x256xf32>, vector<2x256xf32> -> vector<2x256xf32>
    %287 = arith.addf %285, %286 : vector<2x256xf32>
    %288 = vector.extract_strided_slice %287 {offsets = [0, 0], sizes = [2, 192], strides = [1, 1]} : vector<2x256xf32> to vector<2x192xf32>
    %289 = arith.negf %288 : vector<2x192xf32>
    %290 = math.exp %289 : vector<2x192xf32>
    %cst_70 = arith.constant 1.000000e+00 : f32
    %291 = vector.broadcast %cst_70 : f32 to vector<2x192xf32>
    %292 = arith.addf %291, %290 : vector<2x192xf32>
    %293 = arith.divf %291, %292 : vector<2x192xf32>
    %294 = vector.extract_strided_slice %293 {offsets = [0, 0], sizes = [2, 64], strides = [1, 1]} : vector<2x192xf32> to vector<2x64xf32>
    %295 = vector.extract_strided_slice %293 {offsets = [0, 64], sizes = [2, 64], strides = [1, 1]} : vector<2x192xf32> to vector<2x64xf32>
    %296 = vector.extract_strided_slice %293 {offsets = [0, 128], sizes = [2, 64], strides = [1, 1]} : vector<2x192xf32> to vector<2x64xf32>
    %297 = vector.extract_strided_slice %287 {offsets = [0, 192], sizes = [2, 64], strides = [1, 1]} : vector<2x256xf32> to vector<2x64xf32>
    %298 = math.tanh %297 : vector<2x64xf32>
    %299 = arith.mulf %295, %235 : vector<2x64xf32>
    %300 = arith.mulf %294, %298 : vector<2x64xf32>
    %301 = arith.addf %299, %300 : vector<2x64xf32>
    %302 = math.tanh %301 : vector<2x64xf32>
    %303 = arith.mulf %296, %302 : vector<2x64xf32>
    %304 = arith.subi %8, %c3_i32 : i32
    %305 = vector.broadcast %304 : i32 to vector<2x1xi32>
    %306 = arith.cmpi slt, %305, %3 : vector<2x1xi32>
    %307 = vector.shape_cast %306 : vector<2x1xi1> to vector<2x1xi1>
    %308 = vector.broadcast %307 : vector<2x1xi1> to vector<2x64xi1>
    %309 = arith.select %308, %303, %232 : vector<2x64xi1>, vector<2x64xf32>
    %310 = vector.shape_cast %306 : vector<2x1xi1> to vector<2x1xi1>
    %311 = vector.broadcast %310 : vector<2x1xi1> to vector<2x64xi1>
    %312 = arith.select %311, %301, %235 : vector<2x64xi1>, vector<2x64xf32>
    %cst_71 = arith.constant 0.000000e+00 : f32
    %313 = vector.shape_cast %306 : vector<2x1xi1> to vector<2x1xi1>
    %314 = vector.broadcast %313 : vector<2x1xi1> to vector<2x64xi1>
    %315 = vector.broadcast %cst_71 : f32 to vector<2x64xf32>
    %316 = arith.select %314, %309, %315 : vector<2x64xi1>, vector<2x64xf32>
    %317 = vector.shape_cast %316 : vector<2x64xf32> to vector<1x2x64xf32>
    %318 = arith.subi %8, %c3_i32 : i32
    %319 = arith.index_cast %318 : i32 to index
    %c0_72 = arith.constant 0 : index
    %c64_73 = arith.constant 64 : index
    %320 = vector.load %arg6[%319, %c0_72, %c64_73] : memref<16x2x128xf32, #tpu.memory_space<vmem>>, vector<1x2x64xf32>
    tpu.vector_store %arg6[%319, %c0_72, %c64_73], %317 {strides = array<i32>} : memref<16x2x128xf32, #tpu.memory_space<vmem>>, vector<1x2x64xf32>,
    %c4_i32 = arith.constant 4 : i32
    %321 = arith.index_cast %c4_i32 : i32 to index
    %c0_74 = arith.constant 0 : index
    %c0_75 = arith.constant 0 : index
    %322 = vector.load %arg2[%321, %c0_74, %c0_75] : memref<16x2x256xf32, #tpu.memory_space<vmem>>, vector<1x2x256xf32>
    %323 = vector.shape_cast %322 : vector<1x2x256xf32> to vector<2x256xf32>
    %cst_76 = arith.constant dense<0.000000e+00> : vector<2x256xf32>
    %324 = tpu.matmul %270, %4, %cst_76 {dimension_numbers = #tpu.dot_dimension_numbers<[1], [0], [0], [1], [0, 0, 1, 1], [], []>} : vector<2x64xf32>, vector<64x256xf32>, vector<2x256xf32> -> vector<2x256xf32>
    %325 = arith.addf %323, %324 : vector<2x256xf32>
    %326 = vector.extract_strided_slice %325 {offsets = [0, 0], sizes = [2, 192], strides = [1, 1]} : vector<2x256xf32> to vector<2x192xf32>
    %327 = arith.negf %326 : vector<2x192xf32>
    %328 = math.exp %327 : vector<2x192xf32>
    %cst_77 = arith.constant 1.000000e+00 : f32
    %329 = vector.broadcast %cst_77 : f32 to vector<2x192xf32>
    %330 = arith.addf %329, %328 : vector<2x192xf32>
    %331 = arith.divf %329, %330 : vector<2x192xf32>
    %332 = vector.extract_strided_slice %331 {offsets = [0, 0], sizes = [2, 64], strides = [1, 1]} : vector<2x192xf32> to vector<2x64xf32>
    %333 = vector.extract_strided_slice %331 {offsets = [0, 64], sizes = [2, 64], strides = [1, 1]} : vector<2x192xf32> to vector<2x64xf32>
    %334 = vector.extract_strided_slice %331 {offsets = [0, 128], sizes = [2, 64], strides = [1, 1]} : vector<2x192xf32> to vector<2x64xf32>
    %335 = vector.extract_strided_slice %325 {offsets = [0, 192], sizes = [2, 64], strides = [1, 1]} : vector<2x256xf32> to vector<2x64xf32>
    %336 = math.tanh %335 : vector<2x64xf32>
    %337 = arith.mulf %333, %273 : vector<2x64xf32>
    %338 = arith.mulf %332, %336 : vector<2x64xf32>
    %339 = arith.addf %337, %338 : vector<2x64xf32>
    %340 = math.tanh %339 : vector<2x64xf32>
    %341 = arith.mulf %334, %340 : vector<2x64xf32>
    %342 = arith.addi %6, %c4_i32 : i32
    %343 = vector.broadcast %342 : i32 to vector<2x1xi32>
    %344 = arith.cmpi slt, %343, %3 : vector<2x1xi32>
    %345 = vector.shape_cast %344 : vector<2x1xi1> to vector<2x1xi1>
    %346 = vector.broadcast %345 : vector<2x1xi1> to vector<2x64xi1>
    %347 = arith.select %346, %341, %270 : vector<2x64xi1>, vector<2x64xf32>
    %348 = vector.shape_cast %344 : vector<2x1xi1> to vector<2x1xi1>
    %349 = vector.broadcast %348 : vector<2x1xi1> to vector<2x64xi1>
    %350 = arith.select %349, %339, %273 : vector<2x64xi1>, vector<2x64xf32>
    %cst_78 = arith.constant 0.000000e+00 : f32
    %351 = vector.shape_cast %344 : vector<2x1xi1> to vector<2x1xi1>
    %352 = vector.broadcast %351 : vector<2x1xi1> to vector<2x64xi1>
    %353 = vector.broadcast %cst_78 : f32 to vector<2x64xf32>
    %354 = arith.select %352, %347, %353 : vector<2x64xi1>, vector<2x64xf32>
    %355 = vector.shape_cast %354 : vector<2x64xf32> to vector<1x2x64xf32>
    %356 = arith.addi %6, %c4_i32 : i32
    %357 = arith.index_cast %356 : i32 to index
    %c0_79 = arith.constant 0 : index
    %c0_80 = arith.constant 0 : index
    %358 = vector.load %arg6[%357, %c0_79, %c0_80] : memref<16x2x128xf32, #tpu.memory_space<vmem>>, vector<1x2x64xf32>
    tpu.vector_store %arg6[%357, %c0_79, %c0_80], %355 {strides = array<i32>} : memref<16x2x128xf32, #tpu.memory_space<vmem>>, vector<1x2x64xf32>,
    %c15_i32_81 = arith.constant 15 : i32
    %359 = arith.subi %c15_i32_81, %c4_i32 : i32
    %360 = arith.index_cast %359 : i32 to index
    %c0_82 = arith.constant 0 : index
    %c0_83 = arith.constant 0 : index
    %361 = vector.load %arg3[%360, %c0_82, %c0_83] : memref<16x2x256xf32, #tpu.memory_space<vmem>>, vector<1x2x256xf32>
    %362 = vector.shape_cast %361 : vector<1x2x256xf32> to vector<2x256xf32>
    %cst_84 = arith.constant dense<0.000000e+00> : vector<2x256xf32>
    %363 = tpu.matmul %309, %5, %cst_84 {dimension_numbers = #tpu.dot_dimension_numbers<[1], [0], [0], [1], [0, 0, 1, 1], [], []>} : vector<2x64xf32>, vector<64x256xf32>, vector<2x256xf32> -> vector<2x256xf32>
    %364 = arith.addf %362, %363 : vector<2x256xf32>
    %365 = vector.extract_strided_slice %364 {offsets = [0, 0], sizes = [2, 192], strides = [1, 1]} : vector<2x256xf32> to vector<2x192xf32>
    %366 = arith.negf %365 : vector<2x192xf32>
    %367 = math.exp %366 : vector<2x192xf32>
    %cst_85 = arith.constant 1.000000e+00 : f32
    %368 = vector.broadcast %cst_85 : f32 to vector<2x192xf32>
    %369 = arith.addf %368, %367 : vector<2x192xf32>
    %370 = arith.divf %368, %369 : vector<2x192xf32>
    %371 = vector.extract_strided_slice %370 {offsets = [0, 0], sizes = [2, 64], strides = [1, 1]} : vector<2x192xf32> to vector<2x64xf32>
    %372 = vector.extract_strided_slice %370 {offsets = [0, 64], sizes = [2, 64], strides = [1, 1]} : vector<2x192xf32> to vector<2x64xf32>
    %373 = vector.extract_strided_slice %370 {offsets = [0, 128], sizes = [2, 64], strides = [1, 1]} : vector<2x192xf32> to vector<2x64xf32>
    %374 = vector.extract_strided_slice %364 {offsets = [0, 192], sizes = [2, 64], strides = [1, 1]} : vector<2x256xf32> to vector<2x64xf32>
    %375 = math.tanh %374 : vector<2x64xf32>
    %376 = arith.mulf %372, %312 : vector<2x64xf32>
    %377 = arith.mulf %371, %375 : vector<2x64xf32>
    %378 = arith.addf %376, %377 : vector<2x64xf32>
    %379 = math.tanh %378 : vector<2x64xf32>
    %380 = arith.mulf %373, %379 : vector<2x64xf32>
    %381 = arith.subi %8, %c4_i32 : i32
    %382 = vector.broadcast %381 : i32 to vector<2x1xi32>
    %383 = arith.cmpi slt, %382, %3 : vector<2x1xi32>
    %384 = vector.shape_cast %383 : vector<2x1xi1> to vector<2x1xi1>
    %385 = vector.broadcast %384 : vector<2x1xi1> to vector<2x64xi1>
    %386 = arith.select %385, %380, %309 : vector<2x64xi1>, vector<2x64xf32>
    %387 = vector.shape_cast %383 : vector<2x1xi1> to vector<2x1xi1>
    %388 = vector.broadcast %387 : vector<2x1xi1> to vector<2x64xi1>
    %389 = arith.select %388, %378, %312 : vector<2x64xi1>, vector<2x64xf32>
    %cst_86 = arith.constant 0.000000e+00 : f32
    %390 = vector.shape_cast %383 : vector<2x1xi1> to vector<2x1xi1>
    %391 = vector.broadcast %390 : vector<2x1xi1> to vector<2x64xi1>
    %392 = vector.broadcast %cst_86 : f32 to vector<2x64xf32>
    %393 = arith.select %391, %386, %392 : vector<2x64xi1>, vector<2x64xf32>
    %394 = vector.shape_cast %393 : vector<2x64xf32> to vector<1x2x64xf32>
    %395 = arith.subi %8, %c4_i32 : i32
    %396 = arith.index_cast %395 : i32 to index
    %c0_87 = arith.constant 0 : index
    %c64_88 = arith.constant 64 : index
    %397 = vector.load %arg6[%396, %c0_87, %c64_88] : memref<16x2x128xf32, #tpu.memory_space<vmem>>, vector<1x2x64xf32>
    tpu.vector_store %arg6[%396, %c0_87, %c64_88], %394 {strides = array<i32>} : memref<16x2x128xf32, #tpu.memory_space<vmem>>, vector<1x2x64xf32>,
    %c5_i32 = arith.constant 5 : i32
    %398 = arith.index_cast %c5_i32 : i32 to index
    %c0_89 = arith.constant 0 : index
    %c0_90 = arith.constant 0 : index
    %399 = vector.load %arg2[%398, %c0_89, %c0_90] : memref<16x2x256xf32, #tpu.memory_space<vmem>>, vector<1x2x256xf32>
    %400 = vector.shape_cast %399 : vector<1x2x256xf32> to vector<2x256xf32>
    %cst_91 = arith.constant dense<0.000000e+00> : vector<2x256xf32>
    %401 = tpu.matmul %347, %4, %cst_91 {dimension_numbers = #tpu.dot_dimension_numbers<[1], [0], [0], [1], [0, 0, 1, 1], [], []>} : vector<2x64xf32>, vector<64x256xf32>, vector<2x256xf32> -> vector<2x256xf32>
    %402 = arith.addf %400, %401 : vector<2x256xf32>
    %403 = vector.extract_strided_slice %402 {offsets = [0, 0], sizes = [2, 192], strides = [1, 1]} : vector<2x256xf32> to vector<2x192xf32>
    %404 = arith.negf %403 : vector<2x192xf32>
    %405 = math.exp %404 : vector<2x192xf32>
    %cst_92 = arith.constant 1.000000e+00 : f32
    %406 = vector.broadcast %cst_92 : f32 to vector<2x192xf32>
    %407 = arith.addf %406, %405 : vector<2x192xf32>
    %408 = arith.divf %406, %407 : vector<2x192xf32>
    %409 = vector.extract_strided_slice %408 {offsets = [0, 0], sizes = [2, 64], strides = [1, 1]} : vector<2x192xf32> to vector<2x64xf32>
    %410 = vector.extract_strided_slice %408 {offsets = [0, 64], sizes = [2, 64], strides = [1, 1]} : vector<2x192xf32> to vector<2x64xf32>
    %411 = vector.extract_strided_slice %408 {offsets = [0, 128], sizes = [2, 64], strides = [1, 1]} : vector<2x192xf32> to vector<2x64xf32>
    %412 = vector.extract_strided_slice %402 {offsets = [0, 192], sizes = [2, 64], strides = [1, 1]} : vector<2x256xf32> to vector<2x64xf32>
    %413 = math.tanh %412 : vector<2x64xf32>
    %414 = arith.mulf %410, %350 : vector<2x64xf32>
    %415 = arith.mulf %409, %413 : vector<2x64xf32>
    %416 = arith.addf %414, %415 : vector<2x64xf32>
    %417 = math.tanh %416 : vector<2x64xf32>
    %418 = arith.mulf %411, %417 : vector<2x64xf32>
    %419 = arith.addi %6, %c5_i32 : i32
    %420 = vector.broadcast %419 : i32 to vector<2x1xi32>
    %421 = arith.cmpi slt, %420, %3 : vector<2x1xi32>
    %422 = vector.shape_cast %421 : vector<2x1xi1> to vector<2x1xi1>
    %423 = vector.broadcast %422 : vector<2x1xi1> to vector<2x64xi1>
    %424 = arith.select %423, %418, %347 : vector<2x64xi1>, vector<2x64xf32>
    %425 = vector.shape_cast %421 : vector<2x1xi1> to vector<2x1xi1>
    %426 = vector.broadcast %425 : vector<2x1xi1> to vector<2x64xi1>
    %427 = arith.select %426, %416, %350 : vector<2x64xi1>, vector<2x64xf32>
    %cst_93 = arith.constant 0.000000e+00 : f32
    %428 = vector.shape_cast %421 : vector<2x1xi1> to vector<2x1xi1>
    %429 = vector.broadcast %428 : vector<2x1xi1> to vector<2x64xi1>
    %430 = vector.broadcast %cst_93 : f32 to vector<2x64xf32>
    %431 = arith.select %429, %424, %430 : vector<2x64xi1>, vector<2x64xf32>
    %432 = vector.shape_cast %431 : vector<2x64xf32> to vector<1x2x64xf32>
    %433 = arith.addi %6, %c5_i32 : i32
    %434 = arith.index_cast %433 : i32 to index
    %c0_94 = arith.constant 0 : index
    %c0_95 = arith.constant 0 : index
    %435 = vector.load %arg6[%434, %c0_94, %c0_95] : memref<16x2x128xf32, #tpu.memory_space<vmem>>, vector<1x2x64xf32>
    tpu.vector_store %arg6[%434, %c0_94, %c0_95], %432 {strides = array<i32>} : memref<16x2x128xf32, #tpu.memory_space<vmem>>, vector<1x2x64xf32>,
    %c15_i32_96 = arith.constant 15 : i32
    %436 = arith.subi %c15_i32_96, %c5_i32 : i32
    %437 = arith.index_cast %436 : i32 to index
    %c0_97 = arith.constant 0 : index
    %c0_98 = arith.constant 0 : index
    %438 = vector.load %arg3[%437, %c0_97, %c0_98] : memref<16x2x256xf32, #tpu.memory_space<vmem>>, vector<1x2x256xf32>
    %439 = vector.shape_cast %438 : vector<1x2x256xf32> to vector<2x256xf32>
    %cst_99 = arith.constant dense<0.000000e+00> : vector<2x256xf32>
    %440 = tpu.matmul %386, %5, %cst_99 {dimension_numbers = #tpu.dot_dimension_numbers<[1], [0], [0], [1], [0, 0, 1, 1], [], []>} : vector<2x64xf32>, vector<64x256xf32>, vector<2x256xf32> -> vector<2x256xf32>
    %441 = arith.addf %439, %440 : vector<2x256xf32>
    %442 = vector.extract_strided_slice %441 {offsets = [0, 0], sizes = [2, 192], strides = [1, 1]} : vector<2x256xf32> to vector<2x192xf32>
    %443 = arith.negf %442 : vector<2x192xf32>
    %444 = math.exp %443 : vector<2x192xf32>
    %cst_100 = arith.constant 1.000000e+00 : f32
    %445 = vector.broadcast %cst_100 : f32 to vector<2x192xf32>
    %446 = arith.addf %445, %444 : vector<2x192xf32>
    %447 = arith.divf %445, %446 : vector<2x192xf32>
    %448 = vector.extract_strided_slice %447 {offsets = [0, 0], sizes = [2, 64], strides = [1, 1]} : vector<2x192xf32> to vector<2x64xf32>
    %449 = vector.extract_strided_slice %447 {offsets = [0, 64], sizes = [2, 64], strides = [1, 1]} : vector<2x192xf32> to vector<2x64xf32>
    %450 = vector.extract_strided_slice %447 {offsets = [0, 128], sizes = [2, 64], strides = [1, 1]} : vector<2x192xf32> to vector<2x64xf32>
    %451 = vector.extract_strided_slice %441 {offsets = [0, 192], sizes = [2, 64], strides = [1, 1]} : vector<2x256xf32> to vector<2x64xf32>
    %452 = math.tanh %451 : vector<2x64xf32>
    %453 = arith.mulf %449, %389 : vector<2x64xf32>
    %454 = arith.mulf %448, %452 : vector<2x64xf32>
    %455 = arith.addf %453, %454 : vector<2x64xf32>
    %456 = math.tanh %455 : vector<2x64xf32>
    %457 = arith.mulf %450, %456 : vector<2x64xf32>
    %458 = arith.subi %8, %c5_i32 : i32
    %459 = vector.broadcast %458 : i32 to vector<2x1xi32>
    %460 = arith.cmpi slt, %459, %3 : vector<2x1xi32>
    %461 = vector.shape_cast %460 : vector<2x1xi1> to vector<2x1xi1>
    %462 = vector.broadcast %461 : vector<2x1xi1> to vector<2x64xi1>
    %463 = arith.select %462, %457, %386 : vector<2x64xi1>, vector<2x64xf32>
    %464 = vector.shape_cast %460 : vector<2x1xi1> to vector<2x1xi1>
    %465 = vector.broadcast %464 : vector<2x1xi1> to vector<2x64xi1>
    %466 = arith.select %465, %455, %389 : vector<2x64xi1>, vector<2x64xf32>
    %cst_101 = arith.constant 0.000000e+00 : f32
    %467 = vector.shape_cast %460 : vector<2x1xi1> to vector<2x1xi1>
    %468 = vector.broadcast %467 : vector<2x1xi1> to vector<2x64xi1>
    %469 = vector.broadcast %cst_101 : f32 to vector<2x64xf32>
    %470 = arith.select %468, %463, %469 : vector<2x64xi1>, vector<2x64xf32>
    %471 = vector.shape_cast %470 : vector<2x64xf32> to vector<1x2x64xf32>
    %472 = arith.subi %8, %c5_i32 : i32
    %473 = arith.index_cast %472 : i32 to index
    %c0_102 = arith.constant 0 : index
    %c64_103 = arith.constant 64 : index
    %474 = vector.load %arg6[%473, %c0_102, %c64_103] : memref<16x2x128xf32, #tpu.memory_space<vmem>>, vector<1x2x64xf32>
    tpu.vector_store %arg6[%473, %c0_102, %c64_103], %471 {strides = array<i32>} : memref<16x2x128xf32, #tpu.memory_space<vmem>>, vector<1x2x64xf32>,
    %c6_i32 = arith.constant 6 : i32
    %475 = arith.index_cast %c6_i32 : i32 to index
    %c0_104 = arith.constant 0 : index
    %c0_105 = arith.constant 0 : index
    %476 = vector.load %arg2[%475, %c0_104, %c0_105] : memref<16x2x256xf32, #tpu.memory_space<vmem>>, vector<1x2x256xf32>
    %477 = vector.shape_cast %476 : vector<1x2x256xf32> to vector<2x256xf32>
    %cst_106 = arith.constant dense<0.000000e+00> : vector<2x256xf32>
    %478 = tpu.matmul %424, %4, %cst_106 {dimension_numbers = #tpu.dot_dimension_numbers<[1], [0], [0], [1], [0, 0, 1, 1], [], []>} : vector<2x64xf32>, vector<64x256xf32>, vector<2x256xf32> -> vector<2x256xf32>
    %479 = arith.addf %477, %478 : vector<2x256xf32>
    %480 = vector.extract_strided_slice %479 {offsets = [0, 0], sizes = [2, 192], strides = [1, 1]} : vector<2x256xf32> to vector<2x192xf32>
    %481 = arith.negf %480 : vector<2x192xf32>
    %482 = math.exp %481 : vector<2x192xf32>
    %cst_107 = arith.constant 1.000000e+00 : f32
    %483 = vector.broadcast %cst_107 : f32 to vector<2x192xf32>
    %484 = arith.addf %483, %482 : vector<2x192xf32>
    %485 = arith.divf %483, %484 : vector<2x192xf32>
    %486 = vector.extract_strided_slice %485 {offsets = [0, 0], sizes = [2, 64], strides = [1, 1]} : vector<2x192xf32> to vector<2x64xf32>
    %487 = vector.extract_strided_slice %485 {offsets = [0, 64], sizes = [2, 64], strides = [1, 1]} : vector<2x192xf32> to vector<2x64xf32>
    %488 = vector.extract_strided_slice %485 {offsets = [0, 128], sizes = [2, 64], strides = [1, 1]} : vector<2x192xf32> to vector<2x64xf32>
    %489 = vector.extract_strided_slice %479 {offsets = [0, 192], sizes = [2, 64], strides = [1, 1]} : vector<2x256xf32> to vector<2x64xf32>
    %490 = math.tanh %489 : vector<2x64xf32>
    %491 = arith.mulf %487, %427 : vector<2x64xf32>
    %492 = arith.mulf %486, %490 : vector<2x64xf32>
    %493 = arith.addf %491, %492 : vector<2x64xf32>
    %494 = math.tanh %493 : vector<2x64xf32>
    %495 = arith.mulf %488, %494 : vector<2x64xf32>
    %496 = arith.addi %6, %c6_i32 : i32
    %497 = vector.broadcast %496 : i32 to vector<2x1xi32>
    %498 = arith.cmpi slt, %497, %3 : vector<2x1xi32>
    %499 = vector.shape_cast %498 : vector<2x1xi1> to vector<2x1xi1>
    %500 = vector.broadcast %499 : vector<2x1xi1> to vector<2x64xi1>
    %501 = arith.select %500, %495, %424 : vector<2x64xi1>, vector<2x64xf32>
    %502 = vector.shape_cast %498 : vector<2x1xi1> to vector<2x1xi1>
    %503 = vector.broadcast %502 : vector<2x1xi1> to vector<2x64xi1>
    %504 = arith.select %503, %493, %427 : vector<2x64xi1>, vector<2x64xf32>
    %cst_108 = arith.constant 0.000000e+00 : f32
    %505 = vector.shape_cast %498 : vector<2x1xi1> to vector<2x1xi1>
    %506 = vector.broadcast %505 : vector<2x1xi1> to vector<2x64xi1>
    %507 = vector.broadcast %cst_108 : f32 to vector<2x64xf32>
    %508 = arith.select %506, %501, %507 : vector<2x64xi1>, vector<2x64xf32>
    %509 = vector.shape_cast %508 : vector<2x64xf32> to vector<1x2x64xf32>
    %510 = arith.addi %6, %c6_i32 : i32
    %511 = arith.index_cast %510 : i32 to index
    %c0_109 = arith.constant 0 : index
    %c0_110 = arith.constant 0 : index
    %512 = vector.load %arg6[%511, %c0_109, %c0_110] : memref<16x2x128xf32, #tpu.memory_space<vmem>>, vector<1x2x64xf32>
    tpu.vector_store %arg6[%511, %c0_109, %c0_110], %509 {strides = array<i32>} : memref<16x2x128xf32, #tpu.memory_space<vmem>>, vector<1x2x64xf32>,
    %c15_i32_111 = arith.constant 15 : i32
    %513 = arith.subi %c15_i32_111, %c6_i32 : i32
    %514 = arith.index_cast %513 : i32 to index
    %c0_112 = arith.constant 0 : index
    %c0_113 = arith.constant 0 : index
    %515 = vector.load %arg3[%514, %c0_112, %c0_113] : memref<16x2x256xf32, #tpu.memory_space<vmem>>, vector<1x2x256xf32>
    %516 = vector.shape_cast %515 : vector<1x2x256xf32> to vector<2x256xf32>
    %cst_114 = arith.constant dense<0.000000e+00> : vector<2x256xf32>
    %517 = tpu.matmul %463, %5, %cst_114 {dimension_numbers = #tpu.dot_dimension_numbers<[1], [0], [0], [1], [0, 0, 1, 1], [], []>} : vector<2x64xf32>, vector<64x256xf32>, vector<2x256xf32> -> vector<2x256xf32>
    %518 = arith.addf %516, %517 : vector<2x256xf32>
    %519 = vector.extract_strided_slice %518 {offsets = [0, 0], sizes = [2, 192], strides = [1, 1]} : vector<2x256xf32> to vector<2x192xf32>
    %520 = arith.negf %519 : vector<2x192xf32>
    %521 = math.exp %520 : vector<2x192xf32>
    %cst_115 = arith.constant 1.000000e+00 : f32
    %522 = vector.broadcast %cst_115 : f32 to vector<2x192xf32>
    %523 = arith.addf %522, %521 : vector<2x192xf32>
    %524 = arith.divf %522, %523 : vector<2x192xf32>
    %525 = vector.extract_strided_slice %524 {offsets = [0, 0], sizes = [2, 64], strides = [1, 1]} : vector<2x192xf32> to vector<2x64xf32>
    %526 = vector.extract_strided_slice %524 {offsets = [0, 64], sizes = [2, 64], strides = [1, 1]} : vector<2x192xf32> to vector<2x64xf32>
    %527 = vector.extract_strided_slice %524 {offsets = [0, 128], sizes = [2, 64], strides = [1, 1]} : vector<2x192xf32> to vector<2x64xf32>
    %528 = vector.extract_strided_slice %518 {offsets = [0, 192], sizes = [2, 64], strides = [1, 1]} : vector<2x256xf32> to vector<2x64xf32>
    %529 = math.tanh %528 : vector<2x64xf32>
    %530 = arith.mulf %526, %466 : vector<2x64xf32>
    %531 = arith.mulf %525, %529 : vector<2x64xf32>
    %532 = arith.addf %530, %531 : vector<2x64xf32>
    %533 = math.tanh %532 : vector<2x64xf32>
    %534 = arith.mulf %527, %533 : vector<2x64xf32>
    %535 = arith.subi %8, %c6_i32 : i32
    %536 = vector.broadcast %535 : i32 to vector<2x1xi32>
    %537 = arith.cmpi slt, %536, %3 : vector<2x1xi32>
    %538 = vector.shape_cast %537 : vector<2x1xi1> to vector<2x1xi1>
    %539 = vector.broadcast %538 : vector<2x1xi1> to vector<2x64xi1>
    %540 = arith.select %539, %534, %463 : vector<2x64xi1>, vector<2x64xf32>
    %541 = vector.shape_cast %537 : vector<2x1xi1> to vector<2x1xi1>
    %542 = vector.broadcast %541 : vector<2x1xi1> to vector<2x64xi1>
    %543 = arith.select %542, %532, %466 : vector<2x64xi1>, vector<2x64xf32>
    %cst_116 = arith.constant 0.000000e+00 : f32
    %544 = vector.shape_cast %537 : vector<2x1xi1> to vector<2x1xi1>
    %545 = vector.broadcast %544 : vector<2x1xi1> to vector<2x64xi1>
    %546 = vector.broadcast %cst_116 : f32 to vector<2x64xf32>
    %547 = arith.select %545, %540, %546 : vector<2x64xi1>, vector<2x64xf32>
    %548 = vector.shape_cast %547 : vector<2x64xf32> to vector<1x2x64xf32>
    %549 = arith.subi %8, %c6_i32 : i32
    %550 = arith.index_cast %549 : i32 to index
    %c0_117 = arith.constant 0 : index
    %c64_118 = arith.constant 64 : index
    %551 = vector.load %arg6[%550, %c0_117, %c64_118] : memref<16x2x128xf32, #tpu.memory_space<vmem>>, vector<1x2x64xf32>
    tpu.vector_store %arg6[%550, %c0_117, %c64_118], %548 {strides = array<i32>} : memref<16x2x128xf32, #tpu.memory_space<vmem>>, vector<1x2x64xf32>,
    %c7_i32 = arith.constant 7 : i32
    %552 = arith.index_cast %c7_i32 : i32 to index
    %c0_119 = arith.constant 0 : index
    %c0_120 = arith.constant 0 : index
    %553 = vector.load %arg2[%552, %c0_119, %c0_120] : memref<16x2x256xf32, #tpu.memory_space<vmem>>, vector<1x2x256xf32>
    %554 = vector.shape_cast %553 : vector<1x2x256xf32> to vector<2x256xf32>
    %cst_121 = arith.constant dense<0.000000e+00> : vector<2x256xf32>
    %555 = tpu.matmul %501, %4, %cst_121 {dimension_numbers = #tpu.dot_dimension_numbers<[1], [0], [0], [1], [0, 0, 1, 1], [], []>} : vector<2x64xf32>, vector<64x256xf32>, vector<2x256xf32> -> vector<2x256xf32>
    %556 = arith.addf %554, %555 : vector<2x256xf32>
    %557 = vector.extract_strided_slice %556 {offsets = [0, 0], sizes = [2, 192], strides = [1, 1]} : vector<2x256xf32> to vector<2x192xf32>
    %558 = arith.negf %557 : vector<2x192xf32>
    %559 = math.exp %558 : vector<2x192xf32>
    %cst_122 = arith.constant 1.000000e+00 : f32
    %560 = vector.broadcast %cst_122 : f32 to vector<2x192xf32>
    %561 = arith.addf %560, %559 : vector<2x192xf32>
    %562 = arith.divf %560, %561 : vector<2x192xf32>
    %563 = vector.extract_strided_slice %562 {offsets = [0, 0], sizes = [2, 64], strides = [1, 1]} : vector<2x192xf32> to vector<2x64xf32>
    %564 = vector.extract_strided_slice %562 {offsets = [0, 64], sizes = [2, 64], strides = [1, 1]} : vector<2x192xf32> to vector<2x64xf32>
    %565 = vector.extract_strided_slice %562 {offsets = [0, 128], sizes = [2, 64], strides = [1, 1]} : vector<2x192xf32> to vector<2x64xf32>
    %566 = vector.extract_strided_slice %556 {offsets = [0, 192], sizes = [2, 64], strides = [1, 1]} : vector<2x256xf32> to vector<2x64xf32>
    %567 = math.tanh %566 : vector<2x64xf32>
    %568 = arith.mulf %564, %504 : vector<2x64xf32>
    %569 = arith.mulf %563, %567 : vector<2x64xf32>
    %570 = arith.addf %568, %569 : vector<2x64xf32>
    %571 = math.tanh %570 : vector<2x64xf32>
    %572 = arith.mulf %565, %571 : vector<2x64xf32>
    %573 = arith.addi %6, %c7_i32 : i32
    %574 = vector.broadcast %573 : i32 to vector<2x1xi32>
    %575 = arith.cmpi slt, %574, %3 : vector<2x1xi32>
    %576 = vector.shape_cast %575 : vector<2x1xi1> to vector<2x1xi1>
    %577 = vector.broadcast %576 : vector<2x1xi1> to vector<2x64xi1>
    %578 = arith.select %577, %572, %501 : vector<2x64xi1>, vector<2x64xf32>
    %579 = vector.shape_cast %575 : vector<2x1xi1> to vector<2x1xi1>
    %580 = vector.broadcast %579 : vector<2x1xi1> to vector<2x64xi1>
    %581 = arith.select %580, %570, %504 : vector<2x64xi1>, vector<2x64xf32>
    %cst_123 = arith.constant 0.000000e+00 : f32
    %582 = vector.shape_cast %575 : vector<2x1xi1> to vector<2x1xi1>
    %583 = vector.broadcast %582 : vector<2x1xi1> to vector<2x64xi1>
    %584 = vector.broadcast %cst_123 : f32 to vector<2x64xf32>
    %585 = arith.select %583, %578, %584 : vector<2x64xi1>, vector<2x64xf32>
    %586 = vector.shape_cast %585 : vector<2x64xf32> to vector<1x2x64xf32>
    %587 = arith.addi %6, %c7_i32 : i32
    %588 = arith.index_cast %587 : i32 to index
    %c0_124 = arith.constant 0 : index
    %c0_125 = arith.constant 0 : index
    %589 = vector.load %arg6[%588, %c0_124, %c0_125] : memref<16x2x128xf32, #tpu.memory_space<vmem>>, vector<1x2x64xf32>
    tpu.vector_store %arg6[%588, %c0_124, %c0_125], %586 {strides = array<i32>} : memref<16x2x128xf32, #tpu.memory_space<vmem>>, vector<1x2x64xf32>,
    %c15_i32_126 = arith.constant 15 : i32
    %590 = arith.subi %c15_i32_126, %c7_i32 : i32
    %591 = arith.index_cast %590 : i32 to index
    %c0_127 = arith.constant 0 : index
    %c0_128 = arith.constant 0 : index
    %592 = vector.load %arg3[%591, %c0_127, %c0_128] : memref<16x2x256xf32, #tpu.memory_space<vmem>>, vector<1x2x256xf32>
    %593 = vector.shape_cast %592 : vector<1x2x256xf32> to vector<2x256xf32>
    %cst_129 = arith.constant dense<0.000000e+00> : vector<2x256xf32>
    %594 = tpu.matmul %540, %5, %cst_129 {dimension_numbers = #tpu.dot_dimension_numbers<[1], [0], [0], [1], [0, 0, 1, 1], [], []>} : vector<2x64xf32>, vector<64x256xf32>, vector<2x256xf32> -> vector<2x256xf32>
    %595 = arith.addf %593, %594 : vector<2x256xf32>
    %596 = vector.extract_strided_slice %595 {offsets = [0, 0], sizes = [2, 192], strides = [1, 1]} : vector<2x256xf32> to vector<2x192xf32>
    %597 = arith.negf %596 : vector<2x192xf32>
    %598 = math.exp %597 : vector<2x192xf32>
    %cst_130 = arith.constant 1.000000e+00 : f32
    %599 = vector.broadcast %cst_130 : f32 to vector<2x192xf32>
    %600 = arith.addf %599, %598 : vector<2x192xf32>
    %601 = arith.divf %599, %600 : vector<2x192xf32>
    %602 = vector.extract_strided_slice %601 {offsets = [0, 0], sizes = [2, 64], strides = [1, 1]} : vector<2x192xf32> to vector<2x64xf32>
    %603 = vector.extract_strided_slice %601 {offsets = [0, 64], sizes = [2, 64], strides = [1, 1]} : vector<2x192xf32> to vector<2x64xf32>
    %604 = vector.extract_strided_slice %601 {offsets = [0, 128], sizes = [2, 64], strides = [1, 1]} : vector<2x192xf32> to vector<2x64xf32>
    %605 = vector.extract_strided_slice %595 {offsets = [0, 192], sizes = [2, 64], strides = [1, 1]} : vector<2x256xf32> to vector<2x64xf32>
    %606 = math.tanh %605 : vector<2x64xf32>
    %607 = arith.mulf %603, %543 : vector<2x64xf32>
    %608 = arith.mulf %602, %606 : vector<2x64xf32>
    %609 = arith.addf %607, %608 : vector<2x64xf32>
    %610 = math.tanh %609 : vector<2x64xf32>
    %611 = arith.mulf %604, %610 : vector<2x64xf32>
    %612 = arith.subi %8, %c7_i32 : i32
    %613 = vector.broadcast %612 : i32 to vector<2x1xi32>
    %614 = arith.cmpi slt, %613, %3 : vector<2x1xi32>
    %615 = vector.shape_cast %614 : vector<2x1xi1> to vector<2x1xi1>
    %616 = vector.broadcast %615 : vector<2x1xi1> to vector<2x64xi1>
    %617 = arith.select %616, %611, %540 : vector<2x64xi1>, vector<2x64xf32>
    %618 = vector.shape_cast %614 : vector<2x1xi1> to vector<2x1xi1>
    %619 = vector.broadcast %618 : vector<2x1xi1> to vector<2x64xi1>
    %620 = arith.select %619, %609, %543 : vector<2x64xi1>, vector<2x64xf32>
    %cst_131 = arith.constant 0.000000e+00 : f32
    %621 = vector.shape_cast %614 : vector<2x1xi1> to vector<2x1xi1>
    %622 = vector.broadcast %621 : vector<2x1xi1> to vector<2x64xi1>
    %623 = vector.broadcast %cst_131 : f32 to vector<2x64xf32>
    %624 = arith.select %622, %617, %623 : vector<2x64xi1>, vector<2x64xf32>
    %625 = vector.shape_cast %624 : vector<2x64xf32> to vector<1x2x64xf32>
    %626 = arith.subi %8, %c7_i32 : i32
    %627 = arith.index_cast %626 : i32 to index
    %c0_132 = arith.constant 0 : index
    %c64_133 = arith.constant 64 : index
    %628 = vector.load %arg6[%627, %c0_132, %c64_133] : memref<16x2x128xf32, #tpu.memory_space<vmem>>, vector<1x2x64xf32>
    tpu.vector_store %arg6[%627, %c0_132, %c64_133], %625 {strides = array<i32>} : memref<16x2x128xf32, #tpu.memory_space<vmem>>, vector<1x2x64xf32>,
    %c8_i32 = arith.constant 8 : i32
    %629 = arith.index_cast %c8_i32 : i32 to index
    %c0_134 = arith.constant 0 : index
    %c0_135 = arith.constant 0 : index
    %630 = vector.load %arg2[%629, %c0_134, %c0_135] : memref<16x2x256xf32, #tpu.memory_space<vmem>>, vector<1x2x256xf32>
    %631 = vector.shape_cast %630 : vector<1x2x256xf32> to vector<2x256xf32>
    %cst_136 = arith.constant dense<0.000000e+00> : vector<2x256xf32>
    %632 = tpu.matmul %578, %4, %cst_136 {dimension_numbers = #tpu.dot_dimension_numbers<[1], [0], [0], [1], [0, 0, 1, 1], [], []>} : vector<2x64xf32>, vector<64x256xf32>, vector<2x256xf32> -> vector<2x256xf32>
    %633 = arith.addf %631, %632 : vector<2x256xf32>
    %634 = vector.extract_strided_slice %633 {offsets = [0, 0], sizes = [2, 192], strides = [1, 1]} : vector<2x256xf32> to vector<2x192xf32>
    %635 = arith.negf %634 : vector<2x192xf32>
    %636 = math.exp %635 : vector<2x192xf32>
    %cst_137 = arith.constant 1.000000e+00 : f32
    %637 = vector.broadcast %cst_137 : f32 to vector<2x192xf32>
    %638 = arith.addf %637, %636 : vector<2x192xf32>
    %639 = arith.divf %637, %638 : vector<2x192xf32>
    %640 = vector.extract_strided_slice %639 {offsets = [0, 0], sizes = [2, 64], strides = [1, 1]} : vector<2x192xf32> to vector<2x64xf32>
    %641 = vector.extract_strided_slice %639 {offsets = [0, 64], sizes = [2, 64], strides = [1, 1]} : vector<2x192xf32> to vector<2x64xf32>
    %642 = vector.extract_strided_slice %639 {offsets = [0, 128], sizes = [2, 64], strides = [1, 1]} : vector<2x192xf32> to vector<2x64xf32>
    %643 = vector.extract_strided_slice %633 {offsets = [0, 192], sizes = [2, 64], strides = [1, 1]} : vector<2x256xf32> to vector<2x64xf32>
    %644 = math.tanh %643 : vector<2x64xf32>
    %645 = arith.mulf %641, %581 : vector<2x64xf32>
    %646 = arith.mulf %640, %644 : vector<2x64xf32>
    %647 = arith.addf %645, %646 : vector<2x64xf32>
    %648 = math.tanh %647 : vector<2x64xf32>
    %649 = arith.mulf %642, %648 : vector<2x64xf32>
    %650 = arith.addi %6, %c8_i32 : i32
    %651 = vector.broadcast %650 : i32 to vector<2x1xi32>
    %652 = arith.cmpi slt, %651, %3 : vector<2x1xi32>
    %653 = vector.shape_cast %652 : vector<2x1xi1> to vector<2x1xi1>
    %654 = vector.broadcast %653 : vector<2x1xi1> to vector<2x64xi1>
    %655 = arith.select %654, %649, %578 : vector<2x64xi1>, vector<2x64xf32>
    %656 = vector.shape_cast %652 : vector<2x1xi1> to vector<2x1xi1>
    %657 = vector.broadcast %656 : vector<2x1xi1> to vector<2x64xi1>
    %658 = arith.select %657, %647, %581 : vector<2x64xi1>, vector<2x64xf32>
    %cst_138 = arith.constant 0.000000e+00 : f32
    %659 = vector.shape_cast %652 : vector<2x1xi1> to vector<2x1xi1>
    %660 = vector.broadcast %659 : vector<2x1xi1> to vector<2x64xi1>
    %661 = vector.broadcast %cst_138 : f32 to vector<2x64xf32>
    %662 = arith.select %660, %655, %661 : vector<2x64xi1>, vector<2x64xf32>
    %663 = vector.shape_cast %662 : vector<2x64xf32> to vector<1x2x64xf32>
    %664 = arith.addi %6, %c8_i32 : i32
    %665 = arith.index_cast %664 : i32 to index
    %c0_139 = arith.constant 0 : index
    %c0_140 = arith.constant 0 : index
    %666 = vector.load %arg6[%665, %c0_139, %c0_140] : memref<16x2x128xf32, #tpu.memory_space<vmem>>, vector<1x2x64xf32>
    tpu.vector_store %arg6[%665, %c0_139, %c0_140], %663 {strides = array<i32>} : memref<16x2x128xf32, #tpu.memory_space<vmem>>, vector<1x2x64xf32>,
    %c15_i32_141 = arith.constant 15 : i32
    %667 = arith.subi %c15_i32_141, %c8_i32 : i32
    %668 = arith.index_cast %667 : i32 to index
    %c0_142 = arith.constant 0 : index
    %c0_143 = arith.constant 0 : index
    %669 = vector.load %arg3[%668, %c0_142, %c0_143] : memref<16x2x256xf32, #tpu.memory_space<vmem>>, vector<1x2x256xf32>
    %670 = vector.shape_cast %669 : vector<1x2x256xf32> to vector<2x256xf32>
    %cst_144 = arith.constant dense<0.000000e+00> : vector<2x256xf32>
    %671 = tpu.matmul %617, %5, %cst_144 {dimension_numbers = #tpu.dot_dimension_numbers<[1], [0], [0], [1], [0, 0, 1, 1], [], []>} : vector<2x64xf32>, vector<64x256xf32>, vector<2x256xf32> -> vector<2x256xf32>
    %672 = arith.addf %670, %671 : vector<2x256xf32>
    %673 = vector.extract_strided_slice %672 {offsets = [0, 0], sizes = [2, 192], strides = [1, 1]} : vector<2x256xf32> to vector<2x192xf32>
    %674 = arith.negf %673 : vector<2x192xf32>
    %675 = math.exp %674 : vector<2x192xf32>
    %cst_145 = arith.constant 1.000000e+00 : f32
    %676 = vector.broadcast %cst_145 : f32 to vector<2x192xf32>
    %677 = arith.addf %676, %675 : vector<2x192xf32>
    %678 = arith.divf %676, %677 : vector<2x192xf32>
    %679 = vector.extract_strided_slice %678 {offsets = [0, 0], sizes = [2, 64], strides = [1, 1]} : vector<2x192xf32> to vector<2x64xf32>
    %680 = vector.extract_strided_slice %678 {offsets = [0, 64], sizes = [2, 64], strides = [1, 1]} : vector<2x192xf32> to vector<2x64xf32>
    %681 = vector.extract_strided_slice %678 {offsets = [0, 128], sizes = [2, 64], strides = [1, 1]} : vector<2x192xf32> to vector<2x64xf32>
    %682 = vector.extract_strided_slice %672 {offsets = [0, 192], sizes = [2, 64], strides = [1, 1]} : vector<2x256xf32> to vector<2x64xf32>
    %683 = math.tanh %682 : vector<2x64xf32>
    %684 = arith.mulf %680, %620 : vector<2x64xf32>
    %685 = arith.mulf %679, %683 : vector<2x64xf32>
    %686 = arith.addf %684, %685 : vector<2x64xf32>
    %687 = math.tanh %686 : vector<2x64xf32>
    %688 = arith.mulf %681, %687 : vector<2x64xf32>
    %689 = arith.subi %8, %c8_i32 : i32
    %690 = vector.broadcast %689 : i32 to vector<2x1xi32>
    %691 = arith.cmpi slt, %690, %3 : vector<2x1xi32>
    %692 = vector.shape_cast %691 : vector<2x1xi1> to vector<2x1xi1>
    %693 = vector.broadcast %692 : vector<2x1xi1> to vector<2x64xi1>
    %694 = arith.select %693, %688, %617 : vector<2x64xi1>, vector<2x64xf32>
    %695 = vector.shape_cast %691 : vector<2x1xi1> to vector<2x1xi1>
    %696 = vector.broadcast %695 : vector<2x1xi1> to vector<2x64xi1>
    %697 = arith.select %696, %686, %620 : vector<2x64xi1>, vector<2x64xf32>
    %cst_146 = arith.constant 0.000000e+00 : f32
    %698 = vector.shape_cast %691 : vector<2x1xi1> to vector<2x1xi1>
    %699 = vector.broadcast %698 : vector<2x1xi1> to vector<2x64xi1>
    %700 = vector.broadcast %cst_146 : f32 to vector<2x64xf32>
    %701 = arith.select %699, %694, %700 : vector<2x64xi1>, vector<2x64xf32>
    %702 = vector.shape_cast %701 : vector<2x64xf32> to vector<1x2x64xf32>
    %703 = arith.subi %8, %c8_i32 : i32
    %704 = arith.index_cast %703 : i32 to index
    %c0_147 = arith.constant 0 : index
    %c64_148 = arith.constant 64 : index
    %705 = vector.load %arg6[%704, %c0_147, %c64_148] : memref<16x2x128xf32, #tpu.memory_space<vmem>>, vector<1x2x64xf32>
    tpu.vector_store %arg6[%704, %c0_147, %c64_148], %702 {strides = array<i32>} : memref<16x2x128xf32, #tpu.memory_space<vmem>>, vector<1x2x64xf32>,
    %c9_i32 = arith.constant 9 : i32
    %706 = arith.index_cast %c9_i32 : i32 to index
    %c0_149 = arith.constant 0 : index
    %c0_150 = arith.constant 0 : index
    %707 = vector.load %arg2[%706, %c0_149, %c0_150] : memref<16x2x256xf32, #tpu.memory_space<vmem>>, vector<1x2x256xf32>
    %708 = vector.shape_cast %707 : vector<1x2x256xf32> to vector<2x256xf32>
    %cst_151 = arith.constant dense<0.000000e+00> : vector<2x256xf32>
    %709 = tpu.matmul %655, %4, %cst_151 {dimension_numbers = #tpu.dot_dimension_numbers<[1], [0], [0], [1], [0, 0, 1, 1], [], []>} : vector<2x64xf32>, vector<64x256xf32>, vector<2x256xf32> -> vector<2x256xf32>
    %710 = arith.addf %708, %709 : vector<2x256xf32>
    %711 = vector.extract_strided_slice %710 {offsets = [0, 0], sizes = [2, 192], strides = [1, 1]} : vector<2x256xf32> to vector<2x192xf32>
    %712 = arith.negf %711 : vector<2x192xf32>
    %713 = math.exp %712 : vector<2x192xf32>
    %cst_152 = arith.constant 1.000000e+00 : f32
    %714 = vector.broadcast %cst_152 : f32 to vector<2x192xf32>
    %715 = arith.addf %714, %713 : vector<2x192xf32>
    %716 = arith.divf %714, %715 : vector<2x192xf32>
    %717 = vector.extract_strided_slice %716 {offsets = [0, 0], sizes = [2, 64], strides = [1, 1]} : vector<2x192xf32> to vector<2x64xf32>
    %718 = vector.extract_strided_slice %716 {offsets = [0, 64], sizes = [2, 64], strides = [1, 1]} : vector<2x192xf32> to vector<2x64xf32>
    %719 = vector.extract_strided_slice %716 {offsets = [0, 128], sizes = [2, 64], strides = [1, 1]} : vector<2x192xf32> to vector<2x64xf32>
    %720 = vector.extract_strided_slice %710 {offsets = [0, 192], sizes = [2, 64], strides = [1, 1]} : vector<2x256xf32> to vector<2x64xf32>
    %721 = math.tanh %720 : vector<2x64xf32>
    %722 = arith.mulf %718, %658 : vector<2x64xf32>
    %723 = arith.mulf %717, %721 : vector<2x64xf32>
    %724 = arith.addf %722, %723 : vector<2x64xf32>
    %725 = math.tanh %724 : vector<2x64xf32>
    %726 = arith.mulf %719, %725 : vector<2x64xf32>
    %727 = arith.addi %6, %c9_i32 : i32
    %728 = vector.broadcast %727 : i32 to vector<2x1xi32>
    %729 = arith.cmpi slt, %728, %3 : vector<2x1xi32>
    %730 = vector.shape_cast %729 : vector<2x1xi1> to vector<2x1xi1>
    %731 = vector.broadcast %730 : vector<2x1xi1> to vector<2x64xi1>
    %732 = arith.select %731, %726, %655 : vector<2x64xi1>, vector<2x64xf32>
    %733 = vector.shape_cast %729 : vector<2x1xi1> to vector<2x1xi1>
    %734 = vector.broadcast %733 : vector<2x1xi1> to vector<2x64xi1>
    %735 = arith.select %734, %724, %658 : vector<2x64xi1>, vector<2x64xf32>
    %cst_153 = arith.constant 0.000000e+00 : f32
    %736 = vector.shape_cast %729 : vector<2x1xi1> to vector<2x1xi1>
    %737 = vector.broadcast %736 : vector<2x1xi1> to vector<2x64xi1>
    %738 = vector.broadcast %cst_153 : f32 to vector<2x64xf32>
    %739 = arith.select %737, %732, %738 : vector<2x64xi1>, vector<2x64xf32>
    %740 = vector.shape_cast %739 : vector<2x64xf32> to vector<1x2x64xf32>
    %741 = arith.addi %6, %c9_i32 : i32
    %742 = arith.index_cast %741 : i32 to index
    %c0_154 = arith.constant 0 : index
    %c0_155 = arith.constant 0 : index
    %743 = vector.load %arg6[%742, %c0_154, %c0_155] : memref<16x2x128xf32, #tpu.memory_space<vmem>>, vector<1x2x64xf32>
    tpu.vector_store %arg6[%742, %c0_154, %c0_155], %740 {strides = array<i32>} : memref<16x2x128xf32, #tpu.memory_space<vmem>>, vector<1x2x64xf32>,
    %c15_i32_156 = arith.constant 15 : i32
    %744 = arith.subi %c15_i32_156, %c9_i32 : i32
    %745 = arith.index_cast %744 : i32 to index
    %c0_157 = arith.constant 0 : index
    %c0_158 = arith.constant 0 : index
    %746 = vector.load %arg3[%745, %c0_157, %c0_158] : memref<16x2x256xf32, #tpu.memory_space<vmem>>, vector<1x2x256xf32>
    %747 = vector.shape_cast %746 : vector<1x2x256xf32> to vector<2x256xf32>
    %cst_159 = arith.constant dense<0.000000e+00> : vector<2x256xf32>
    %748 = tpu.matmul %694, %5, %cst_159 {dimension_numbers = #tpu.dot_dimension_numbers<[1], [0], [0], [1], [0, 0, 1, 1], [], []>} : vector<2x64xf32>, vector<64x256xf32>, vector<2x256xf32> -> vector<2x256xf32>
    %749 = arith.addf %747, %748 : vector<2x256xf32>
    %750 = vector.extract_strided_slice %749 {offsets = [0, 0], sizes = [2, 192], strides = [1, 1]} : vector<2x256xf32> to vector<2x192xf32>
    %751 = arith.negf %750 : vector<2x192xf32>
    %752 = math.exp %751 : vector<2x192xf32>
    %cst_160 = arith.constant 1.000000e+00 : f32
    %753 = vector.broadcast %cst_160 : f32 to vector<2x192xf32>
    %754 = arith.addf %753, %752 : vector<2x192xf32>
    %755 = arith.divf %753, %754 : vector<2x192xf32>
    %756 = vector.extract_strided_slice %755 {offsets = [0, 0], sizes = [2, 64], strides = [1, 1]} : vector<2x192xf32> to vector<2x64xf32>
    %757 = vector.extract_strided_slice %755 {offsets = [0, 64], sizes = [2, 64], strides = [1, 1]} : vector<2x192xf32> to vector<2x64xf32>
    %758 = vector.extract_strided_slice %755 {offsets = [0, 128], sizes = [2, 64], strides = [1, 1]} : vector<2x192xf32> to vector<2x64xf32>
    %759 = vector.extract_strided_slice %749 {offsets = [0, 192], sizes = [2, 64], strides = [1, 1]} : vector<2x256xf32> to vector<2x64xf32>
    %760 = math.tanh %759 : vector<2x64xf32>
    %761 = arith.mulf %757, %697 : vector<2x64xf32>
    %762 = arith.mulf %756, %760 : vector<2x64xf32>
    %763 = arith.addf %761, %762 : vector<2x64xf32>
    %764 = math.tanh %763 : vector<2x64xf32>
    %765 = arith.mulf %758, %764 : vector<2x64xf32>
    %766 = arith.subi %8, %c9_i32 : i32
    %767 = vector.broadcast %766 : i32 to vector<2x1xi32>
    %768 = arith.cmpi slt, %767, %3 : vector<2x1xi32>
    %769 = vector.shape_cast %768 : vector<2x1xi1> to vector<2x1xi1>
    %770 = vector.broadcast %769 : vector<2x1xi1> to vector<2x64xi1>
    %771 = arith.select %770, %765, %694 : vector<2x64xi1>, vector<2x64xf32>
    %772 = vector.shape_cast %768 : vector<2x1xi1> to vector<2x1xi1>
    %773 = vector.broadcast %772 : vector<2x1xi1> to vector<2x64xi1>
    %774 = arith.select %773, %763, %697 : vector<2x64xi1>, vector<2x64xf32>
    %cst_161 = arith.constant 0.000000e+00 : f32
    %775 = vector.shape_cast %768 : vector<2x1xi1> to vector<2x1xi1>
    %776 = vector.broadcast %775 : vector<2x1xi1> to vector<2x64xi1>
    %777 = vector.broadcast %cst_161 : f32 to vector<2x64xf32>
    %778 = arith.select %776, %771, %777 : vector<2x64xi1>, vector<2x64xf32>
    %779 = vector.shape_cast %778 : vector<2x64xf32> to vector<1x2x64xf32>
    %780 = arith.subi %8, %c9_i32 : i32
    %781 = arith.index_cast %780 : i32 to index
    %c0_162 = arith.constant 0 : index
    %c64_163 = arith.constant 64 : index
    %782 = vector.load %arg6[%781, %c0_162, %c64_163] : memref<16x2x128xf32, #tpu.memory_space<vmem>>, vector<1x2x64xf32>
    tpu.vector_store %arg6[%781, %c0_162, %c64_163], %779 {strides = array<i32>} : memref<16x2x128xf32, #tpu.memory_space<vmem>>, vector<1x2x64xf32>,
    %c10_i32 = arith.constant 10 : i32
    %783 = arith.index_cast %c10_i32 : i32 to index
    %c0_164 = arith.constant 0 : index
    %c0_165 = arith.constant 0 : index
    %784 = vector.load %arg2[%783, %c0_164, %c0_165] : memref<16x2x256xf32, #tpu.memory_space<vmem>>, vector<1x2x256xf32>
    %785 = vector.shape_cast %784 : vector<1x2x256xf32> to vector<2x256xf32>
    %cst_166 = arith.constant dense<0.000000e+00> : vector<2x256xf32>
    %786 = tpu.matmul %732, %4, %cst_166 {dimension_numbers = #tpu.dot_dimension_numbers<[1], [0], [0], [1], [0, 0, 1, 1], [], []>} : vector<2x64xf32>, vector<64x256xf32>, vector<2x256xf32> -> vector<2x256xf32>
    %787 = arith.addf %785, %786 : vector<2x256xf32>
    %788 = vector.extract_strided_slice %787 {offsets = [0, 0], sizes = [2, 192], strides = [1, 1]} : vector<2x256xf32> to vector<2x192xf32>
    %789 = arith.negf %788 : vector<2x192xf32>
    %790 = math.exp %789 : vector<2x192xf32>
    %cst_167 = arith.constant 1.000000e+00 : f32
    %791 = vector.broadcast %cst_167 : f32 to vector<2x192xf32>
    %792 = arith.addf %791, %790 : vector<2x192xf32>
    %793 = arith.divf %791, %792 : vector<2x192xf32>
    %794 = vector.extract_strided_slice %793 {offsets = [0, 0], sizes = [2, 64], strides = [1, 1]} : vector<2x192xf32> to vector<2x64xf32>
    %795 = vector.extract_strided_slice %793 {offsets = [0, 64], sizes = [2, 64], strides = [1, 1]} : vector<2x192xf32> to vector<2x64xf32>
    %796 = vector.extract_strided_slice %793 {offsets = [0, 128], sizes = [2, 64], strides = [1, 1]} : vector<2x192xf32> to vector<2x64xf32>
    %797 = vector.extract_strided_slice %787 {offsets = [0, 192], sizes = [2, 64], strides = [1, 1]} : vector<2x256xf32> to vector<2x64xf32>
    %798 = math.tanh %797 : vector<2x64xf32>
    %799 = arith.mulf %795, %735 : vector<2x64xf32>
    %800 = arith.mulf %794, %798 : vector<2x64xf32>
    %801 = arith.addf %799, %800 : vector<2x64xf32>
    %802 = math.tanh %801 : vector<2x64xf32>
    %803 = arith.mulf %796, %802 : vector<2x64xf32>
    %804 = arith.addi %6, %c10_i32 : i32
    %805 = vector.broadcast %804 : i32 to vector<2x1xi32>
    %806 = arith.cmpi slt, %805, %3 : vector<2x1xi32>
    %807 = vector.shape_cast %806 : vector<2x1xi1> to vector<2x1xi1>
    %808 = vector.broadcast %807 : vector<2x1xi1> to vector<2x64xi1>
    %809 = arith.select %808, %803, %732 : vector<2x64xi1>, vector<2x64xf32>
    %810 = vector.shape_cast %806 : vector<2x1xi1> to vector<2x1xi1>
    %811 = vector.broadcast %810 : vector<2x1xi1> to vector<2x64xi1>
    %812 = arith.select %811, %801, %735 : vector<2x64xi1>, vector<2x64xf32>
    %cst_168 = arith.constant 0.000000e+00 : f32
    %813 = vector.shape_cast %806 : vector<2x1xi1> to vector<2x1xi1>
    %814 = vector.broadcast %813 : vector<2x1xi1> to vector<2x64xi1>
    %815 = vector.broadcast %cst_168 : f32 to vector<2x64xf32>
    %816 = arith.select %814, %809, %815 : vector<2x64xi1>, vector<2x64xf32>
    %817 = vector.shape_cast %816 : vector<2x64xf32> to vector<1x2x64xf32>
    %818 = arith.addi %6, %c10_i32 : i32
    %819 = arith.index_cast %818 : i32 to index
    %c0_169 = arith.constant 0 : index
    %c0_170 = arith.constant 0 : index
    %820 = vector.load %arg6[%819, %c0_169, %c0_170] : memref<16x2x128xf32, #tpu.memory_space<vmem>>, vector<1x2x64xf32>
    tpu.vector_store %arg6[%819, %c0_169, %c0_170], %817 {strides = array<i32>} : memref<16x2x128xf32, #tpu.memory_space<vmem>>, vector<1x2x64xf32>,
    %c15_i32_171 = arith.constant 15 : i32
    %821 = arith.subi %c15_i32_171, %c10_i32 : i32
    %822 = arith.index_cast %821 : i32 to index
    %c0_172 = arith.constant 0 : index
    %c0_173 = arith.constant 0 : index
    %823 = vector.load %arg3[%822, %c0_172, %c0_173] : memref<16x2x256xf32, #tpu.memory_space<vmem>>, vector<1x2x256xf32>
    %824 = vector.shape_cast %823 : vector<1x2x256xf32> to vector<2x256xf32>
    %cst_174 = arith.constant dense<0.000000e+00> : vector<2x256xf32>
    %825 = tpu.matmul %771, %5, %cst_174 {dimension_numbers = #tpu.dot_dimension_numbers<[1], [0], [0], [1], [0, 0, 1, 1], [], []>} : vector<2x64xf32>, vector<64x256xf32>, vector<2x256xf32> -> vector<2x256xf32>
    %826 = arith.addf %824, %825 : vector<2x256xf32>
    %827 = vector.extract_strided_slice %826 {offsets = [0, 0], sizes = [2, 192], strides = [1, 1]} : vector<2x256xf32> to vector<2x192xf32>
    %828 = arith.negf %827 : vector<2x192xf32>
    %829 = math.exp %828 : vector<2x192xf32>
    %cst_175 = arith.constant 1.000000e+00 : f32
    %830 = vector.broadcast %cst_175 : f32 to vector<2x192xf32>
    %831 = arith.addf %830, %829 : vector<2x192xf32>
    %832 = arith.divf %830, %831 : vector<2x192xf32>
    %833 = vector.extract_strided_slice %832 {offsets = [0, 0], sizes = [2, 64], strides = [1, 1]} : vector<2x192xf32> to vector<2x64xf32>
    %834 = vector.extract_strided_slice %832 {offsets = [0, 64], sizes = [2, 64], strides = [1, 1]} : vector<2x192xf32> to vector<2x64xf32>
    %835 = vector.extract_strided_slice %832 {offsets = [0, 128], sizes = [2, 64], strides = [1, 1]} : vector<2x192xf32> to vector<2x64xf32>
    %836 = vector.extract_strided_slice %826 {offsets = [0, 192], sizes = [2, 64], strides = [1, 1]} : vector<2x256xf32> to vector<2x64xf32>
    %837 = math.tanh %836 : vector<2x64xf32>
    %838 = arith.mulf %834, %774 : vector<2x64xf32>
    %839 = arith.mulf %833, %837 : vector<2x64xf32>
    %840 = arith.addf %838, %839 : vector<2x64xf32>
    %841 = math.tanh %840 : vector<2x64xf32>
    %842 = arith.mulf %835, %841 : vector<2x64xf32>
    %843 = arith.subi %8, %c10_i32 : i32
    %844 = vector.broadcast %843 : i32 to vector<2x1xi32>
    %845 = arith.cmpi slt, %844, %3 : vector<2x1xi32>
    %846 = vector.shape_cast %845 : vector<2x1xi1> to vector<2x1xi1>
    %847 = vector.broadcast %846 : vector<2x1xi1> to vector<2x64xi1>
    %848 = arith.select %847, %842, %771 : vector<2x64xi1>, vector<2x64xf32>
    %849 = vector.shape_cast %845 : vector<2x1xi1> to vector<2x1xi1>
    %850 = vector.broadcast %849 : vector<2x1xi1> to vector<2x64xi1>
    %851 = arith.select %850, %840, %774 : vector<2x64xi1>, vector<2x64xf32>
    %cst_176 = arith.constant 0.000000e+00 : f32
    %852 = vector.shape_cast %845 : vector<2x1xi1> to vector<2x1xi1>
    %853 = vector.broadcast %852 : vector<2x1xi1> to vector<2x64xi1>
    %854 = vector.broadcast %cst_176 : f32 to vector<2x64xf32>
    %855 = arith.select %853, %848, %854 : vector<2x64xi1>, vector<2x64xf32>
    %856 = vector.shape_cast %855 : vector<2x64xf32> to vector<1x2x64xf32>
    %857 = arith.subi %8, %c10_i32 : i32
    %858 = arith.index_cast %857 : i32 to index
    %c0_177 = arith.constant 0 : index
    %c64_178 = arith.constant 64 : index
    %859 = vector.load %arg6[%858, %c0_177, %c64_178] : memref<16x2x128xf32, #tpu.memory_space<vmem>>, vector<1x2x64xf32>
    tpu.vector_store %arg6[%858, %c0_177, %c64_178], %856 {strides = array<i32>} : memref<16x2x128xf32, #tpu.memory_space<vmem>>, vector<1x2x64xf32>,
    %c11_i32 = arith.constant 11 : i32
    %860 = arith.index_cast %c11_i32 : i32 to index
    %c0_179 = arith.constant 0 : index
    %c0_180 = arith.constant 0 : index
    %861 = vector.load %arg2[%860, %c0_179, %c0_180] : memref<16x2x256xf32, #tpu.memory_space<vmem>>, vector<1x2x256xf32>
    %862 = vector.shape_cast %861 : vector<1x2x256xf32> to vector<2x256xf32>
    %cst_181 = arith.constant dense<0.000000e+00> : vector<2x256xf32>
    %863 = tpu.matmul %809, %4, %cst_181 {dimension_numbers = #tpu.dot_dimension_numbers<[1], [0], [0], [1], [0, 0, 1, 1], [], []>} : vector<2x64xf32>, vector<64x256xf32>, vector<2x256xf32> -> vector<2x256xf32>
    %864 = arith.addf %862, %863 : vector<2x256xf32>
    %865 = vector.extract_strided_slice %864 {offsets = [0, 0], sizes = [2, 192], strides = [1, 1]} : vector<2x256xf32> to vector<2x192xf32>
    %866 = arith.negf %865 : vector<2x192xf32>
    %867 = math.exp %866 : vector<2x192xf32>
    %cst_182 = arith.constant 1.000000e+00 : f32
    %868 = vector.broadcast %cst_182 : f32 to vector<2x192xf32>
    %869 = arith.addf %868, %867 : vector<2x192xf32>
    %870 = arith.divf %868, %869 : vector<2x192xf32>
    %871 = vector.extract_strided_slice %870 {offsets = [0, 0], sizes = [2, 64], strides = [1, 1]} : vector<2x192xf32> to vector<2x64xf32>
    %872 = vector.extract_strided_slice %870 {offsets = [0, 64], sizes = [2, 64], strides = [1, 1]} : vector<2x192xf32> to vector<2x64xf32>
    %873 = vector.extract_strided_slice %870 {offsets = [0, 128], sizes = [2, 64], strides = [1, 1]} : vector<2x192xf32> to vector<2x64xf32>
    %874 = vector.extract_strided_slice %864 {offsets = [0, 192], sizes = [2, 64], strides = [1, 1]} : vector<2x256xf32> to vector<2x64xf32>
    %875 = math.tanh %874 : vector<2x64xf32>
    %876 = arith.mulf %872, %812 : vector<2x64xf32>
    %877 = arith.mulf %871, %875 : vector<2x64xf32>
    %878 = arith.addf %876, %877 : vector<2x64xf32>
    %879 = math.tanh %878 : vector<2x64xf32>
    %880 = arith.mulf %873, %879 : vector<2x64xf32>
    %881 = arith.addi %6, %c11_i32 : i32
    %882 = vector.broadcast %881 : i32 to vector<2x1xi32>
    %883 = arith.cmpi slt, %882, %3 : vector<2x1xi32>
    %884 = vector.shape_cast %883 : vector<2x1xi1> to vector<2x1xi1>
    %885 = vector.broadcast %884 : vector<2x1xi1> to vector<2x64xi1>
    %886 = arith.select %885, %880, %809 : vector<2x64xi1>, vector<2x64xf32>
    %887 = vector.shape_cast %883 : vector<2x1xi1> to vector<2x1xi1>
    %888 = vector.broadcast %887 : vector<2x1xi1> to vector<2x64xi1>
    %889 = arith.select %888, %878, %812 : vector<2x64xi1>, vector<2x64xf32>
    %cst_183 = arith.constant 0.000000e+00 : f32
    %890 = vector.shape_cast %883 : vector<2x1xi1> to vector<2x1xi1>
    %891 = vector.broadcast %890 : vector<2x1xi1> to vector<2x64xi1>
    %892 = vector.broadcast %cst_183 : f32 to vector<2x64xf32>
    %893 = arith.select %891, %886, %892 : vector<2x64xi1>, vector<2x64xf32>
    %894 = vector.shape_cast %893 : vector<2x64xf32> to vector<1x2x64xf32>
    %895 = arith.addi %6, %c11_i32 : i32
    %896 = arith.index_cast %895 : i32 to index
    %c0_184 = arith.constant 0 : index
    %c0_185 = arith.constant 0 : index
    %897 = vector.load %arg6[%896, %c0_184, %c0_185] : memref<16x2x128xf32, #tpu.memory_space<vmem>>, vector<1x2x64xf32>
    tpu.vector_store %arg6[%896, %c0_184, %c0_185], %894 {strides = array<i32>} : memref<16x2x128xf32, #tpu.memory_space<vmem>>, vector<1x2x64xf32>,
    %c15_i32_186 = arith.constant 15 : i32
    %898 = arith.subi %c15_i32_186, %c11_i32 : i32
    %899 = arith.index_cast %898 : i32 to index
    %c0_187 = arith.constant 0 : index
    %c0_188 = arith.constant 0 : index
    %900 = vector.load %arg3[%899, %c0_187, %c0_188] : memref<16x2x256xf32, #tpu.memory_space<vmem>>, vector<1x2x256xf32>
    %901 = vector.shape_cast %900 : vector<1x2x256xf32> to vector<2x256xf32>
    %cst_189 = arith.constant dense<0.000000e+00> : vector<2x256xf32>
    %902 = tpu.matmul %848, %5, %cst_189 {dimension_numbers = #tpu.dot_dimension_numbers<[1], [0], [0], [1], [0, 0, 1, 1], [], []>} : vector<2x64xf32>, vector<64x256xf32>, vector<2x256xf32> -> vector<2x256xf32>
    %903 = arith.addf %901, %902 : vector<2x256xf32>
    %904 = vector.extract_strided_slice %903 {offsets = [0, 0], sizes = [2, 192], strides = [1, 1]} : vector<2x256xf32> to vector<2x192xf32>
    %905 = arith.negf %904 : vector<2x192xf32>
    %906 = math.exp %905 : vector<2x192xf32>
    %cst_190 = arith.constant 1.000000e+00 : f32
    %907 = vector.broadcast %cst_190 : f32 to vector<2x192xf32>
    %908 = arith.addf %907, %906 : vector<2x192xf32>
    %909 = arith.divf %907, %908 : vector<2x192xf32>
    %910 = vector.extract_strided_slice %909 {offsets = [0, 0], sizes = [2, 64], strides = [1, 1]} : vector<2x192xf32> to vector<2x64xf32>
    %911 = vector.extract_strided_slice %909 {offsets = [0, 64], sizes = [2, 64], strides = [1, 1]} : vector<2x192xf32> to vector<2x64xf32>
    %912 = vector.extract_strided_slice %909 {offsets = [0, 128], sizes = [2, 64], strides = [1, 1]} : vector<2x192xf32> to vector<2x64xf32>
    %913 = vector.extract_strided_slice %903 {offsets = [0, 192], sizes = [2, 64], strides = [1, 1]} : vector<2x256xf32> to vector<2x64xf32>
    %914 = math.tanh %913 : vector<2x64xf32>
    %915 = arith.mulf %911, %851 : vector<2x64xf32>
    %916 = arith.mulf %910, %914 : vector<2x64xf32>
    %917 = arith.addf %915, %916 : vector<2x64xf32>
    %918 = math.tanh %917 : vector<2x64xf32>
    %919 = arith.mulf %912, %918 : vector<2x64xf32>
    %920 = arith.subi %8, %c11_i32 : i32
    %921 = vector.broadcast %920 : i32 to vector<2x1xi32>
    %922 = arith.cmpi slt, %921, %3 : vector<2x1xi32>
    %923 = vector.shape_cast %922 : vector<2x1xi1> to vector<2x1xi1>
    %924 = vector.broadcast %923 : vector<2x1xi1> to vector<2x64xi1>
    %925 = arith.select %924, %919, %848 : vector<2x64xi1>, vector<2x64xf32>
    %926 = vector.shape_cast %922 : vector<2x1xi1> to vector<2x1xi1>
    %927 = vector.broadcast %926 : vector<2x1xi1> to vector<2x64xi1>
    %928 = arith.select %927, %917, %851 : vector<2x64xi1>, vector<2x64xf32>
    %cst_191 = arith.constant 0.000000e+00 : f32
    %929 = vector.shape_cast %922 : vector<2x1xi1> to vector<2x1xi1>
    %930 = vector.broadcast %929 : vector<2x1xi1> to vector<2x64xi1>
    %931 = vector.broadcast %cst_191 : f32 to vector<2x64xf32>
    %932 = arith.select %930, %925, %931 : vector<2x64xi1>, vector<2x64xf32>
    %933 = vector.shape_cast %932 : vector<2x64xf32> to vector<1x2x64xf32>
    %934 = arith.subi %8, %c11_i32 : i32
    %935 = arith.index_cast %934 : i32 to index
    %c0_192 = arith.constant 0 : index
    %c64_193 = arith.constant 64 : index
    %936 = vector.load %arg6[%935, %c0_192, %c64_193] : memref<16x2x128xf32, #tpu.memory_space<vmem>>, vector<1x2x64xf32>
    tpu.vector_store %arg6[%935, %c0_192, %c64_193], %933 {strides = array<i32>} : memref<16x2x128xf32, #tpu.memory_space<vmem>>, vector<1x2x64xf32>,
    %c12_i32 = arith.constant 12 : i32
    %937 = arith.index_cast %c12_i32 : i32 to index
    %c0_194 = arith.constant 0 : index
    %c0_195 = arith.constant 0 : index
    %938 = vector.load %arg2[%937, %c0_194, %c0_195] : memref<16x2x256xf32, #tpu.memory_space<vmem>>, vector<1x2x256xf32>
    %939 = vector.shape_cast %938 : vector<1x2x256xf32> to vector<2x256xf32>
    %cst_196 = arith.constant dense<0.000000e+00> : vector<2x256xf32>
    %940 = tpu.matmul %886, %4, %cst_196 {dimension_numbers = #tpu.dot_dimension_numbers<[1], [0], [0], [1], [0, 0, 1, 1], [], []>} : vector<2x64xf32>, vector<64x256xf32>, vector<2x256xf32> -> vector<2x256xf32>
    %941 = arith.addf %939, %940 : vector<2x256xf32>
    %942 = vector.extract_strided_slice %941 {offsets = [0, 0], sizes = [2, 192], strides = [1, 1]} : vector<2x256xf32> to vector<2x192xf32>
    %943 = arith.negf %942 : vector<2x192xf32>
    %944 = math.exp %943 : vector<2x192xf32>
    %cst_197 = arith.constant 1.000000e+00 : f32
    %945 = vector.broadcast %cst_197 : f32 to vector<2x192xf32>
    %946 = arith.addf %945, %944 : vector<2x192xf32>
    %947 = arith.divf %945, %946 : vector<2x192xf32>
    %948 = vector.extract_strided_slice %947 {offsets = [0, 0], sizes = [2, 64], strides = [1, 1]} : vector<2x192xf32> to vector<2x64xf32>
    %949 = vector.extract_strided_slice %947 {offsets = [0, 64], sizes = [2, 64], strides = [1, 1]} : vector<2x192xf32> to vector<2x64xf32>
    %950 = vector.extract_strided_slice %947 {offsets = [0, 128], sizes = [2, 64], strides = [1, 1]} : vector<2x192xf32> to vector<2x64xf32>
    %951 = vector.extract_strided_slice %941 {offsets = [0, 192], sizes = [2, 64], strides = [1, 1]} : vector<2x256xf32> to vector<2x64xf32>
    %952 = math.tanh %951 : vector<2x64xf32>
    %953 = arith.mulf %949, %889 : vector<2x64xf32>
    %954 = arith.mulf %948, %952 : vector<2x64xf32>
    %955 = arith.addf %953, %954 : vector<2x64xf32>
    %956 = math.tanh %955 : vector<2x64xf32>
    %957 = arith.mulf %950, %956 : vector<2x64xf32>
    %958 = arith.addi %6, %c12_i32 : i32
    %959 = vector.broadcast %958 : i32 to vector<2x1xi32>
    %960 = arith.cmpi slt, %959, %3 : vector<2x1xi32>
    %961 = vector.shape_cast %960 : vector<2x1xi1> to vector<2x1xi1>
    %962 = vector.broadcast %961 : vector<2x1xi1> to vector<2x64xi1>
    %963 = arith.select %962, %957, %886 : vector<2x64xi1>, vector<2x64xf32>
    %964 = vector.shape_cast %960 : vector<2x1xi1> to vector<2x1xi1>
    %965 = vector.broadcast %964 : vector<2x1xi1> to vector<2x64xi1>
    %966 = arith.select %965, %955, %889 : vector<2x64xi1>, vector<2x64xf32>
    %cst_198 = arith.constant 0.000000e+00 : f32
    %967 = vector.shape_cast %960 : vector<2x1xi1> to vector<2x1xi1>
    %968 = vector.broadcast %967 : vector<2x1xi1> to vector<2x64xi1>
    %969 = vector.broadcast %cst_198 : f32 to vector<2x64xf32>
    %970 = arith.select %968, %963, %969 : vector<2x64xi1>, vector<2x64xf32>
    %971 = vector.shape_cast %970 : vector<2x64xf32> to vector<1x2x64xf32>
    %972 = arith.addi %6, %c12_i32 : i32
    %973 = arith.index_cast %972 : i32 to index
    %c0_199 = arith.constant 0 : index
    %c0_200 = arith.constant 0 : index
    %974 = vector.load %arg6[%973, %c0_199, %c0_200] : memref<16x2x128xf32, #tpu.memory_space<vmem>>, vector<1x2x64xf32>
    tpu.vector_store %arg6[%973, %c0_199, %c0_200], %971 {strides = array<i32>} : memref<16x2x128xf32, #tpu.memory_space<vmem>>, vector<1x2x64xf32>,
    %c15_i32_201 = arith.constant 15 : i32
    %975 = arith.subi %c15_i32_201, %c12_i32 : i32
    %976 = arith.index_cast %975 : i32 to index
    %c0_202 = arith.constant 0 : index
    %c0_203 = arith.constant 0 : index
    %977 = vector.load %arg3[%976, %c0_202, %c0_203] : memref<16x2x256xf32, #tpu.memory_space<vmem>>, vector<1x2x256xf32>
    %978 = vector.shape_cast %977 : vector<1x2x256xf32> to vector<2x256xf32>
    %cst_204 = arith.constant dense<0.000000e+00> : vector<2x256xf32>
    %979 = tpu.matmul %925, %5, %cst_204 {dimension_numbers = #tpu.dot_dimension_numbers<[1], [0], [0], [1], [0, 0, 1, 1], [], []>} : vector<2x64xf32>, vector<64x256xf32>, vector<2x256xf32> -> vector<2x256xf32>
    %980 = arith.addf %978, %979 : vector<2x256xf32>
    %981 = vector.extract_strided_slice %980 {offsets = [0, 0], sizes = [2, 192], strides = [1, 1]} : vector<2x256xf32> to vector<2x192xf32>
    %982 = arith.negf %981 : vector<2x192xf32>
    %983 = math.exp %982 : vector<2x192xf32>
    %cst_205 = arith.constant 1.000000e+00 : f32
    %984 = vector.broadcast %cst_205 : f32 to vector<2x192xf32>
    %985 = arith.addf %984, %983 : vector<2x192xf32>
    %986 = arith.divf %984, %985 : vector<2x192xf32>
    %987 = vector.extract_strided_slice %986 {offsets = [0, 0], sizes = [2, 64], strides = [1, 1]} : vector<2x192xf32> to vector<2x64xf32>
    %988 = vector.extract_strided_slice %986 {offsets = [0, 64], sizes = [2, 64], strides = [1, 1]} : vector<2x192xf32> to vector<2x64xf32>
    %989 = vector.extract_strided_slice %986 {offsets = [0, 128], sizes = [2, 64], strides = [1, 1]} : vector<2x192xf32> to vector<2x64xf32>
    %990 = vector.extract_strided_slice %980 {offsets = [0, 192], sizes = [2, 64], strides = [1, 1]} : vector<2x256xf32> to vector<2x64xf32>
    %991 = math.tanh %990 : vector<2x64xf32>
    %992 = arith.mulf %988, %928 : vector<2x64xf32>
    %993 = arith.mulf %987, %991 : vector<2x64xf32>
    %994 = arith.addf %992, %993 : vector<2x64xf32>
    %995 = math.tanh %994 : vector<2x64xf32>
    %996 = arith.mulf %989, %995 : vector<2x64xf32>
    %997 = arith.subi %8, %c12_i32 : i32
    %998 = vector.broadcast %997 : i32 to vector<2x1xi32>
    %999 = arith.cmpi slt, %998, %3 : vector<2x1xi32>
    %1000 = vector.shape_cast %999 : vector<2x1xi1> to vector<2x1xi1>
    %1001 = vector.broadcast %1000 : vector<2x1xi1> to vector<2x64xi1>
    %1002 = arith.select %1001, %996, %925 : vector<2x64xi1>, vector<2x64xf32>
    %1003 = vector.shape_cast %999 : vector<2x1xi1> to vector<2x1xi1>
    %1004 = vector.broadcast %1003 : vector<2x1xi1> to vector<2x64xi1>
    %1005 = arith.select %1004, %994, %928 : vector<2x64xi1>, vector<2x64xf32>
    %cst_206 = arith.constant 0.000000e+00 : f32
    %1006 = vector.shape_cast %999 : vector<2x1xi1> to vector<2x1xi1>
    %1007 = vector.broadcast %1006 : vector<2x1xi1> to vector<2x64xi1>
    %1008 = vector.broadcast %cst_206 : f32 to vector<2x64xf32>
    %1009 = arith.select %1007, %1002, %1008 : vector<2x64xi1>, vector<2x64xf32>
    %1010 = vector.shape_cast %1009 : vector<2x64xf32> to vector<1x2x64xf32>
    %1011 = arith.subi %8, %c12_i32 : i32
    %1012 = arith.index_cast %1011 : i32 to index
    %c0_207 = arith.constant 0 : index
    %c64_208 = arith.constant 64 : index
    %1013 = vector.load %arg6[%1012, %c0_207, %c64_208] : memref<16x2x128xf32, #tpu.memory_space<vmem>>, vector<1x2x64xf32>
    tpu.vector_store %arg6[%1012, %c0_207, %c64_208], %1010 {strides = array<i32>} : memref<16x2x128xf32, #tpu.memory_space<vmem>>, vector<1x2x64xf32>,
    %c13_i32 = arith.constant 13 : i32
    %1014 = arith.index_cast %c13_i32 : i32 to index
    %c0_209 = arith.constant 0 : index
    %c0_210 = arith.constant 0 : index
    %1015 = vector.load %arg2[%1014, %c0_209, %c0_210] : memref<16x2x256xf32, #tpu.memory_space<vmem>>, vector<1x2x256xf32>
    %1016 = vector.shape_cast %1015 : vector<1x2x256xf32> to vector<2x256xf32>
    %cst_211 = arith.constant dense<0.000000e+00> : vector<2x256xf32>
    %1017 = tpu.matmul %963, %4, %cst_211 {dimension_numbers = #tpu.dot_dimension_numbers<[1], [0], [0], [1], [0, 0, 1, 1], [], []>} : vector<2x64xf32>, vector<64x256xf32>, vector<2x256xf32> -> vector<2x256xf32>
    %1018 = arith.addf %1016, %1017 : vector<2x256xf32>
    %1019 = vector.extract_strided_slice %1018 {offsets = [0, 0], sizes = [2, 192], strides = [1, 1]} : vector<2x256xf32> to vector<2x192xf32>
    %1020 = arith.negf %1019 : vector<2x192xf32>
    %1021 = math.exp %1020 : vector<2x192xf32>
    %cst_212 = arith.constant 1.000000e+00 : f32
    %1022 = vector.broadcast %cst_212 : f32 to vector<2x192xf32>
    %1023 = arith.addf %1022, %1021 : vector<2x192xf32>
    %1024 = arith.divf %1022, %1023 : vector<2x192xf32>
    %1025 = vector.extract_strided_slice %1024 {offsets = [0, 0], sizes = [2, 64], strides = [1, 1]} : vector<2x192xf32> to vector<2x64xf32>
    %1026 = vector.extract_strided_slice %1024 {offsets = [0, 64], sizes = [2, 64], strides = [1, 1]} : vector<2x192xf32> to vector<2x64xf32>
    %1027 = vector.extract_strided_slice %1024 {offsets = [0, 128], sizes = [2, 64], strides = [1, 1]} : vector<2x192xf32> to vector<2x64xf32>
    %1028 = vector.extract_strided_slice %1018 {offsets = [0, 192], sizes = [2, 64], strides = [1, 1]} : vector<2x256xf32> to vector<2x64xf32>
    %1029 = math.tanh %1028 : vector<2x64xf32>
    %1030 = arith.mulf %1026, %966 : vector<2x64xf32>
    %1031 = arith.mulf %1025, %1029 : vector<2x64xf32>
    %1032 = arith.addf %1030, %1031 : vector<2x64xf32>
    %1033 = math.tanh %1032 : vector<2x64xf32>
    %1034 = arith.mulf %1027, %1033 : vector<2x64xf32>
    %1035 = arith.addi %6, %c13_i32 : i32
    %1036 = vector.broadcast %1035 : i32 to vector<2x1xi32>
    %1037 = arith.cmpi slt, %1036, %3 : vector<2x1xi32>
    %1038 = vector.shape_cast %1037 : vector<2x1xi1> to vector<2x1xi1>
    %1039 = vector.broadcast %1038 : vector<2x1xi1> to vector<2x64xi1>
    %1040 = arith.select %1039, %1034, %963 : vector<2x64xi1>, vector<2x64xf32>
    %1041 = vector.shape_cast %1037 : vector<2x1xi1> to vector<2x1xi1>
    %1042 = vector.broadcast %1041 : vector<2x1xi1> to vector<2x64xi1>
    %1043 = arith.select %1042, %1032, %966 : vector<2x64xi1>, vector<2x64xf32>
    %cst_213 = arith.constant 0.000000e+00 : f32
    %1044 = vector.shape_cast %1037 : vector<2x1xi1> to vector<2x1xi1>
    %1045 = vector.broadcast %1044 : vector<2x1xi1> to vector<2x64xi1>
    %1046 = vector.broadcast %cst_213 : f32 to vector<2x64xf32>
    %1047 = arith.select %1045, %1040, %1046 : vector<2x64xi1>, vector<2x64xf32>
    %1048 = vector.shape_cast %1047 : vector<2x64xf32> to vector<1x2x64xf32>
    %1049 = arith.addi %6, %c13_i32 : i32
    %1050 = arith.index_cast %1049 : i32 to index
    %c0_214 = arith.constant 0 : index
    %c0_215 = arith.constant 0 : index
    %1051 = vector.load %arg6[%1050, %c0_214, %c0_215] : memref<16x2x128xf32, #tpu.memory_space<vmem>>, vector<1x2x64xf32>
    tpu.vector_store %arg6[%1050, %c0_214, %c0_215], %1048 {strides = array<i32>} : memref<16x2x128xf32, #tpu.memory_space<vmem>>, vector<1x2x64xf32>,
    %c15_i32_216 = arith.constant 15 : i32
    %1052 = arith.subi %c15_i32_216, %c13_i32 : i32
    %1053 = arith.index_cast %1052 : i32 to index
    %c0_217 = arith.constant 0 : index
    %c0_218 = arith.constant 0 : index
    %1054 = vector.load %arg3[%1053, %c0_217, %c0_218] : memref<16x2x256xf32, #tpu.memory_space<vmem>>, vector<1x2x256xf32>
    %1055 = vector.shape_cast %1054 : vector<1x2x256xf32> to vector<2x256xf32>
    %cst_219 = arith.constant dense<0.000000e+00> : vector<2x256xf32>
    %1056 = tpu.matmul %1002, %5, %cst_219 {dimension_numbers = #tpu.dot_dimension_numbers<[1], [0], [0], [1], [0, 0, 1, 1], [], []>} : vector<2x64xf32>, vector<64x256xf32>, vector<2x256xf32> -> vector<2x256xf32>
    %1057 = arith.addf %1055, %1056 : vector<2x256xf32>
    %1058 = vector.extract_strided_slice %1057 {offsets = [0, 0], sizes = [2, 192], strides = [1, 1]} : vector<2x256xf32> to vector<2x192xf32>
    %1059 = arith.negf %1058 : vector<2x192xf32>
    %1060 = math.exp %1059 : vector<2x192xf32>
    %cst_220 = arith.constant 1.000000e+00 : f32
    %1061 = vector.broadcast %cst_220 : f32 to vector<2x192xf32>
    %1062 = arith.addf %1061, %1060 : vector<2x192xf32>
    %1063 = arith.divf %1061, %1062 : vector<2x192xf32>
    %1064 = vector.extract_strided_slice %1063 {offsets = [0, 0], sizes = [2, 64], strides = [1, 1]} : vector<2x192xf32> to vector<2x64xf32>
    %1065 = vector.extract_strided_slice %1063 {offsets = [0, 64], sizes = [2, 64], strides = [1, 1]} : vector<2x192xf32> to vector<2x64xf32>
    %1066 = vector.extract_strided_slice %1063 {offsets = [0, 128], sizes = [2, 64], strides = [1, 1]} : vector<2x192xf32> to vector<2x64xf32>
    %1067 = vector.extract_strided_slice %1057 {offsets = [0, 192], sizes = [2, 64], strides = [1, 1]} : vector<2x256xf32> to vector<2x64xf32>
    %1068 = math.tanh %1067 : vector<2x64xf32>
    %1069 = arith.mulf %1065, %1005 : vector<2x64xf32>
    %1070 = arith.mulf %1064, %1068 : vector<2x64xf32>
    %1071 = arith.addf %1069, %1070 : vector<2x64xf32>
    %1072 = math.tanh %1071 : vector<2x64xf32>
    %1073 = arith.mulf %1066, %1072 : vector<2x64xf32>
    %1074 = arith.subi %8, %c13_i32 : i32
    %1075 = vector.broadcast %1074 : i32 to vector<2x1xi32>
    %1076 = arith.cmpi slt, %1075, %3 : vector<2x1xi32>
    %1077 = vector.shape_cast %1076 : vector<2x1xi1> to vector<2x1xi1>
    %1078 = vector.broadcast %1077 : vector<2x1xi1> to vector<2x64xi1>
    %1079 = arith.select %1078, %1073, %1002 : vector<2x64xi1>, vector<2x64xf32>
    %1080 = vector.shape_cast %1076 : vector<2x1xi1> to vector<2x1xi1>
    %1081 = vector.broadcast %1080 : vector<2x1xi1> to vector<2x64xi1>
    %1082 = arith.select %1081, %1071, %1005 : vector<2x64xi1>, vector<2x64xf32>
    %cst_221 = arith.constant 0.000000e+00 : f32
    %1083 = vector.shape_cast %1076 : vector<2x1xi1> to vector<2x1xi1>
    %1084 = vector.broadcast %1083 : vector<2x1xi1> to vector<2x64xi1>
    %1085 = vector.broadcast %cst_221 : f32 to vector<2x64xf32>
    %1086 = arith.select %1084, %1079, %1085 : vector<2x64xi1>, vector<2x64xf32>
    %1087 = vector.shape_cast %1086 : vector<2x64xf32> to vector<1x2x64xf32>
    %1088 = arith.subi %8, %c13_i32 : i32
    %1089 = arith.index_cast %1088 : i32 to index
    %c0_222 = arith.constant 0 : index
    %c64_223 = arith.constant 64 : index
    %1090 = vector.load %arg6[%1089, %c0_222, %c64_223] : memref<16x2x128xf32, #tpu.memory_space<vmem>>, vector<1x2x64xf32>
    tpu.vector_store %arg6[%1089, %c0_222, %c64_223], %1087 {strides = array<i32>} : memref<16x2x128xf32, #tpu.memory_space<vmem>>, vector<1x2x64xf32>,
    %c14_i32 = arith.constant 14 : i32
    %1091 = arith.index_cast %c14_i32 : i32 to index
    %c0_224 = arith.constant 0 : index
    %c0_225 = arith.constant 0 : index
    %1092 = vector.load %arg2[%1091, %c0_224, %c0_225] : memref<16x2x256xf32, #tpu.memory_space<vmem>>, vector<1x2x256xf32>
    %1093 = vector.shape_cast %1092 : vector<1x2x256xf32> to vector<2x256xf32>
    %cst_226 = arith.constant dense<0.000000e+00> : vector<2x256xf32>
    %1094 = tpu.matmul %1040, %4, %cst_226 {dimension_numbers = #tpu.dot_dimension_numbers<[1], [0], [0], [1], [0, 0, 1, 1], [], []>} : vector<2x64xf32>, vector<64x256xf32>, vector<2x256xf32> -> vector<2x256xf32>
    %1095 = arith.addf %1093, %1094 : vector<2x256xf32>
    %1096 = vector.extract_strided_slice %1095 {offsets = [0, 0], sizes = [2, 192], strides = [1, 1]} : vector<2x256xf32> to vector<2x192xf32>
    %1097 = arith.negf %1096 : vector<2x192xf32>
    %1098 = math.exp %1097 : vector<2x192xf32>
    %cst_227 = arith.constant 1.000000e+00 : f32
    %1099 = vector.broadcast %cst_227 : f32 to vector<2x192xf32>
    %1100 = arith.addf %1099, %1098 : vector<2x192xf32>
    %1101 = arith.divf %1099, %1100 : vector<2x192xf32>
    %1102 = vector.extract_strided_slice %1101 {offsets = [0, 0], sizes = [2, 64], strides = [1, 1]} : vector<2x192xf32> to vector<2x64xf32>
    %1103 = vector.extract_strided_slice %1101 {offsets = [0, 64], sizes = [2, 64], strides = [1, 1]} : vector<2x192xf32> to vector<2x64xf32>
    %1104 = vector.extract_strided_slice %1101 {offsets = [0, 128], sizes = [2, 64], strides = [1, 1]} : vector<2x192xf32> to vector<2x64xf32>
    %1105 = vector.extract_strided_slice %1095 {offsets = [0, 192], sizes = [2, 64], strides = [1, 1]} : vector<2x256xf32> to vector<2x64xf32>
    %1106 = math.tanh %1105 : vector<2x64xf32>
    %1107 = arith.mulf %1103, %1043 : vector<2x64xf32>
    %1108 = arith.mulf %1102, %1106 : vector<2x64xf32>
    %1109 = arith.addf %1107, %1108 : vector<2x64xf32>
    %1110 = math.tanh %1109 : vector<2x64xf32>
    %1111 = arith.mulf %1104, %1110 : vector<2x64xf32>
    %1112 = arith.addi %6, %c14_i32 : i32
    %1113 = vector.broadcast %1112 : i32 to vector<2x1xi32>
    %1114 = arith.cmpi slt, %1113, %3 : vector<2x1xi32>
    %1115 = vector.shape_cast %1114 : vector<2x1xi1> to vector<2x1xi1>
    %1116 = vector.broadcast %1115 : vector<2x1xi1> to vector<2x64xi1>
    %1117 = arith.select %1116, %1111, %1040 : vector<2x64xi1>, vector<2x64xf32>
    %1118 = vector.shape_cast %1114 : vector<2x1xi1> to vector<2x1xi1>
    %1119 = vector.broadcast %1118 : vector<2x1xi1> to vector<2x64xi1>
    %1120 = arith.select %1119, %1109, %1043 : vector<2x64xi1>, vector<2x64xf32>
    %cst_228 = arith.constant 0.000000e+00 : f32
    %1121 = vector.shape_cast %1114 : vector<2x1xi1> to vector<2x1xi1>
    %1122 = vector.broadcast %1121 : vector<2x1xi1> to vector<2x64xi1>
    %1123 = vector.broadcast %cst_228 : f32 to vector<2x64xf32>
    %1124 = arith.select %1122, %1117, %1123 : vector<2x64xi1>, vector<2x64xf32>
    %1125 = vector.shape_cast %1124 : vector<2x64xf32> to vector<1x2x64xf32>
    %1126 = arith.addi %6, %c14_i32 : i32
    %1127 = arith.index_cast %1126 : i32 to index
    %c0_229 = arith.constant 0 : index
    %c0_230 = arith.constant 0 : index
    %1128 = vector.load %arg6[%1127, %c0_229, %c0_230] : memref<16x2x128xf32, #tpu.memory_space<vmem>>, vector<1x2x64xf32>
    tpu.vector_store %arg6[%1127, %c0_229, %c0_230], %1125 {strides = array<i32>} : memref<16x2x128xf32, #tpu.memory_space<vmem>>, vector<1x2x64xf32>,
    %c15_i32_231 = arith.constant 15 : i32
    %1129 = arith.subi %c15_i32_231, %c14_i32 : i32
    %1130 = arith.index_cast %1129 : i32 to index
    %c0_232 = arith.constant 0 : index
    %c0_233 = arith.constant 0 : index
    %1131 = vector.load %arg3[%1130, %c0_232, %c0_233] : memref<16x2x256xf32, #tpu.memory_space<vmem>>, vector<1x2x256xf32>
    %1132 = vector.shape_cast %1131 : vector<1x2x256xf32> to vector<2x256xf32>
    %cst_234 = arith.constant dense<0.000000e+00> : vector<2x256xf32>
    %1133 = tpu.matmul %1079, %5, %cst_234 {dimension_numbers = #tpu.dot_dimension_numbers<[1], [0], [0], [1], [0, 0, 1, 1], [], []>} : vector<2x64xf32>, vector<64x256xf32>, vector<2x256xf32> -> vector<2x256xf32>
    %1134 = arith.addf %1132, %1133 : vector<2x256xf32>
    %1135 = vector.extract_strided_slice %1134 {offsets = [0, 0], sizes = [2, 192], strides = [1, 1]} : vector<2x256xf32> to vector<2x192xf32>
    %1136 = arith.negf %1135 : vector<2x192xf32>
    %1137 = math.exp %1136 : vector<2x192xf32>
    %cst_235 = arith.constant 1.000000e+00 : f32
    %1138 = vector.broadcast %cst_235 : f32 to vector<2x192xf32>
    %1139 = arith.addf %1138, %1137 : vector<2x192xf32>
    %1140 = arith.divf %1138, %1139 : vector<2x192xf32>
    %1141 = vector.extract_strided_slice %1140 {offsets = [0, 0], sizes = [2, 64], strides = [1, 1]} : vector<2x192xf32> to vector<2x64xf32>
    %1142 = vector.extract_strided_slice %1140 {offsets = [0, 64], sizes = [2, 64], strides = [1, 1]} : vector<2x192xf32> to vector<2x64xf32>
    %1143 = vector.extract_strided_slice %1140 {offsets = [0, 128], sizes = [2, 64], strides = [1, 1]} : vector<2x192xf32> to vector<2x64xf32>
    %1144 = vector.extract_strided_slice %1134 {offsets = [0, 192], sizes = [2, 64], strides = [1, 1]} : vector<2x256xf32> to vector<2x64xf32>
    %1145 = math.tanh %1144 : vector<2x64xf32>
    %1146 = arith.mulf %1142, %1082 : vector<2x64xf32>
    %1147 = arith.mulf %1141, %1145 : vector<2x64xf32>
    %1148 = arith.addf %1146, %1147 : vector<2x64xf32>
    %1149 = math.tanh %1148 : vector<2x64xf32>
    %1150 = arith.mulf %1143, %1149 : vector<2x64xf32>
    %1151 = arith.subi %8, %c14_i32 : i32
    %1152 = vector.broadcast %1151 : i32 to vector<2x1xi32>
    %1153 = arith.cmpi slt, %1152, %3 : vector<2x1xi32>
    %1154 = vector.shape_cast %1153 : vector<2x1xi1> to vector<2x1xi1>
    %1155 = vector.broadcast %1154 : vector<2x1xi1> to vector<2x64xi1>
    %1156 = arith.select %1155, %1150, %1079 : vector<2x64xi1>, vector<2x64xf32>
    %1157 = vector.shape_cast %1153 : vector<2x1xi1> to vector<2x1xi1>
    %1158 = vector.broadcast %1157 : vector<2x1xi1> to vector<2x64xi1>
    %1159 = arith.select %1158, %1148, %1082 : vector<2x64xi1>, vector<2x64xf32>
    %cst_236 = arith.constant 0.000000e+00 : f32
    %1160 = vector.shape_cast %1153 : vector<2x1xi1> to vector<2x1xi1>
    %1161 = vector.broadcast %1160 : vector<2x1xi1> to vector<2x64xi1>
    %1162 = vector.broadcast %cst_236 : f32 to vector<2x64xf32>
    %1163 = arith.select %1161, %1156, %1162 : vector<2x64xi1>, vector<2x64xf32>
    %1164 = vector.shape_cast %1163 : vector<2x64xf32> to vector<1x2x64xf32>
    %1165 = arith.subi %8, %c14_i32 : i32
    %1166 = arith.index_cast %1165 : i32 to index
    %c0_237 = arith.constant 0 : index
    %c64_238 = arith.constant 64 : index
    %1167 = vector.load %arg6[%1166, %c0_237, %c64_238] : memref<16x2x128xf32, #tpu.memory_space<vmem>>, vector<1x2x64xf32>
    tpu.vector_store %arg6[%1166, %c0_237, %c64_238], %1164 {strides = array<i32>} : memref<16x2x128xf32, #tpu.memory_space<vmem>>, vector<1x2x64xf32>,
    %c15_i32_239 = arith.constant 15 : i32
    %1168 = arith.index_cast %c15_i32_239 : i32 to index
    %c0_240 = arith.constant 0 : index
    %c0_241 = arith.constant 0 : index
    %1169 = vector.load %arg2[%1168, %c0_240, %c0_241] : memref<16x2x256xf32, #tpu.memory_space<vmem>>, vector<1x2x256xf32>
    %1170 = vector.shape_cast %1169 : vector<1x2x256xf32> to vector<2x256xf32>
    %cst_242 = arith.constant dense<0.000000e+00> : vector<2x256xf32>
    %1171 = tpu.matmul %1117, %4, %cst_242 {dimension_numbers = #tpu.dot_dimension_numbers<[1], [0], [0], [1], [0, 0, 1, 1], [], []>} : vector<2x64xf32>, vector<64x256xf32>, vector<2x256xf32> -> vector<2x256xf32>
    %1172 = arith.addf %1170, %1171 : vector<2x256xf32>
    %1173 = vector.extract_strided_slice %1172 {offsets = [0, 0], sizes = [2, 192], strides = [1, 1]} : vector<2x256xf32> to vector<2x192xf32>
    %1174 = arith.negf %1173 : vector<2x192xf32>
    %1175 = math.exp %1174 : vector<2x192xf32>
    %cst_243 = arith.constant 1.000000e+00 : f32
    %1176 = vector.broadcast %cst_243 : f32 to vector<2x192xf32>
    %1177 = arith.addf %1176, %1175 : vector<2x192xf32>
    %1178 = arith.divf %1176, %1177 : vector<2x192xf32>
    %1179 = vector.extract_strided_slice %1178 {offsets = [0, 0], sizes = [2, 64], strides = [1, 1]} : vector<2x192xf32> to vector<2x64xf32>
    %1180 = vector.extract_strided_slice %1178 {offsets = [0, 64], sizes = [2, 64], strides = [1, 1]} : vector<2x192xf32> to vector<2x64xf32>
    %1181 = vector.extract_strided_slice %1178 {offsets = [0, 128], sizes = [2, 64], strides = [1, 1]} : vector<2x192xf32> to vector<2x64xf32>
    %1182 = vector.extract_strided_slice %1172 {offsets = [0, 192], sizes = [2, 64], strides = [1, 1]} : vector<2x256xf32> to vector<2x64xf32>
    %1183 = math.tanh %1182 : vector<2x64xf32>
    %1184 = arith.mulf %1180, %1120 : vector<2x64xf32>
    %1185 = arith.mulf %1179, %1183 : vector<2x64xf32>
    %1186 = arith.addf %1184, %1185 : vector<2x64xf32>
    %1187 = math.tanh %1186 : vector<2x64xf32>
    %1188 = arith.mulf %1181, %1187 : vector<2x64xf32>
    %1189 = arith.addi %6, %c15_i32_239 : i32
    %1190 = vector.broadcast %1189 : i32 to vector<2x1xi32>
    %1191 = arith.cmpi slt, %1190, %3 : vector<2x1xi32>
    %1192 = vector.shape_cast %1191 : vector<2x1xi1> to vector<2x1xi1>
    %1193 = vector.broadcast %1192 : vector<2x1xi1> to vector<2x64xi1>
    %1194 = arith.select %1193, %1188, %1117 : vector<2x64xi1>, vector<2x64xf32>
    %1195 = vector.shape_cast %1191 : vector<2x1xi1> to vector<2x1xi1>
    %1196 = vector.broadcast %1195 : vector<2x1xi1> to vector<2x64xi1>
    %1197 = arith.select %1196, %1186, %1120 : vector<2x64xi1>, vector<2x64xf32>
    %cst_244 = arith.constant 0.000000e+00 : f32
    %1198 = vector.shape_cast %1191 : vector<2x1xi1> to vector<2x1xi1>
    %1199 = vector.broadcast %1198 : vector<2x1xi1> to vector<2x64xi1>
    %1200 = vector.broadcast %cst_244 : f32 to vector<2x64xf32>
    %1201 = arith.select %1199, %1194, %1200 : vector<2x64xi1>, vector<2x64xf32>
    %1202 = vector.shape_cast %1201 : vector<2x64xf32> to vector<1x2x64xf32>
    %1203 = arith.addi %6, %c15_i32_239 : i32
    %1204 = arith.index_cast %1203 : i32 to index
    %c0_245 = arith.constant 0 : index
    %c0_246 = arith.constant 0 : index
    %1205 = vector.load %arg6[%1204, %c0_245, %c0_246] : memref<16x2x128xf32, #tpu.memory_space<vmem>>, vector<1x2x64xf32>
    tpu.vector_store %arg6[%1204, %c0_245, %c0_246], %1202 {strides = array<i32>} : memref<16x2x128xf32, #tpu.memory_space<vmem>>, vector<1x2x64xf32>,
    %c15_i32_247 = arith.constant 15 : i32
    %1206 = arith.subi %c15_i32_247, %c15_i32_239 : i32
    %1207 = arith.index_cast %1206 : i32 to index
    %c0_248 = arith.constant 0 : index
    %c0_249 = arith.constant 0 : index
    %1208 = vector.load %arg3[%1207, %c0_248, %c0_249] : memref<16x2x256xf32, #tpu.memory_space<vmem>>, vector<1x2x256xf32>
    %1209 = vector.shape_cast %1208 : vector<1x2x256xf32> to vector<2x256xf32>
    %cst_250 = arith.constant dense<0.000000e+00> : vector<2x256xf32>
    %1210 = tpu.matmul %1156, %5, %cst_250 {dimension_numbers = #tpu.dot_dimension_numbers<[1], [0], [0], [1], [0, 0, 1, 1], [], []>} : vector<2x64xf32>, vector<64x256xf32>, vector<2x256xf32> -> vector<2x256xf32>
    %1211 = arith.addf %1209, %1210 : vector<2x256xf32>
    %1212 = vector.extract_strided_slice %1211 {offsets = [0, 0], sizes = [2, 192], strides = [1, 1]} : vector<2x256xf32> to vector<2x192xf32>
    %1213 = arith.negf %1212 : vector<2x192xf32>
    %1214 = math.exp %1213 : vector<2x192xf32>
    %cst_251 = arith.constant 1.000000e+00 : f32
    %1215 = vector.broadcast %cst_251 : f32 to vector<2x192xf32>
    %1216 = arith.addf %1215, %1214 : vector<2x192xf32>
    %1217 = arith.divf %1215, %1216 : vector<2x192xf32>
    %1218 = vector.extract_strided_slice %1217 {offsets = [0, 0], sizes = [2, 64], strides = [1, 1]} : vector<2x192xf32> to vector<2x64xf32>
    %1219 = vector.extract_strided_slice %1217 {offsets = [0, 64], sizes = [2, 64], strides = [1, 1]} : vector<2x192xf32> to vector<2x64xf32>
    %1220 = vector.extract_strided_slice %1217 {offsets = [0, 128], sizes = [2, 64], strides = [1, 1]} : vector<2x192xf32> to vector<2x64xf32>
    %1221 = vector.extract_strided_slice %1211 {offsets = [0, 192], sizes = [2, 64], strides = [1, 1]} : vector<2x256xf32> to vector<2x64xf32>
    %1222 = math.tanh %1221 : vector<2x64xf32>
    %1223 = arith.mulf %1219, %1159 : vector<2x64xf32>
    %1224 = arith.mulf %1218, %1222 : vector<2x64xf32>
    %1225 = arith.addf %1223, %1224 : vector<2x64xf32>
    %1226 = math.tanh %1225 : vector<2x64xf32>
    %1227 = arith.mulf %1220, %1226 : vector<2x64xf32>
    %1228 = arith.subi %8, %c15_i32_239 : i32
    %1229 = vector.broadcast %1228 : i32 to vector<2x1xi32>
    %1230 = arith.cmpi slt, %1229, %3 : vector<2x1xi32>
    %1231 = vector.shape_cast %1230 : vector<2x1xi1> to vector<2x1xi1>
    %1232 = vector.broadcast %1231 : vector<2x1xi1> to vector<2x64xi1>
    %1233 = arith.select %1232, %1227, %1156 : vector<2x64xi1>, vector<2x64xf32>
    %1234 = vector.shape_cast %1230 : vector<2x1xi1> to vector<2x1xi1>
    %1235 = vector.broadcast %1234 : vector<2x1xi1> to vector<2x64xi1>
    %1236 = arith.select %1235, %1225, %1159 : vector<2x64xi1>, vector<2x64xf32>
    %cst_252 = arith.constant 0.000000e+00 : f32
    %1237 = vector.shape_cast %1230 : vector<2x1xi1> to vector<2x1xi1>
    %1238 = vector.broadcast %1237 : vector<2x1xi1> to vector<2x64xi1>
    %1239 = vector.broadcast %cst_252 : f32 to vector<2x64xf32>
    %1240 = arith.select %1238, %1233, %1239 : vector<2x64xi1>, vector<2x64xf32>
    %1241 = vector.shape_cast %1240 : vector<2x64xf32> to vector<1x2x64xf32>
    %1242 = arith.subi %8, %c15_i32_239 : i32
    %1243 = arith.index_cast %1242 : i32 to index
    %c0_253 = arith.constant 0 : index
    %c64_254 = arith.constant 64 : index
    %1244 = vector.load %arg6[%1243, %c0_253, %c64_254] : memref<16x2x128xf32, #tpu.memory_space<vmem>>, vector<1x2x64xf32>
    tpu.vector_store %arg6[%1243, %c0_253, %c64_254], %1241 {strides = array<i32>} : memref<16x2x128xf32, #tpu.memory_space<vmem>>, vector<1x2x64xf32>,
    %c16_i32_255 = arith.constant 16 : i32
    %c0_256 = arith.constant 0 : index
    %c0_257 = arith.constant 0 : index
    %1245 = vector.load %arg7[%c0_256, %c0_257] : memref<2x64xf32, #tpu.memory_space<vmem>>, vector<2x64xf32>
    tpu.vector_store %arg7[%c0_256, %c0_257], %1194 {strides = array<i32>} : memref<2x64xf32, #tpu.memory_space<vmem>>, vector<2x64xf32>,
    %c0_258 = arith.constant 0 : index
    %c0_259 = arith.constant 0 : index
    %1246 = vector.load %arg8[%c0_258, %c0_259] : memref<2x64xf32, #tpu.memory_space<vmem>>, vector<2x64xf32>
    tpu.vector_store %arg8[%c0_258, %c0_259], %1197 {strides = array<i32>} : memref<2x64xf32, #tpu.memory_space<vmem>>, vector<2x64xf32>,
    %c0_260 = arith.constant 0 : index
    %c0_261 = arith.constant 0 : index
    %1247 = vector.load %arg9[%c0_260, %c0_261] : memref<2x64xf32, #tpu.memory_space<vmem>>, vector<2x64xf32>
    tpu.vector_store %arg9[%c0_260, %c0_261], %1233 {strides = array<i32>} : memref<2x64xf32, #tpu.memory_space<vmem>>, vector<2x64xf32>,
    %c0_262 = arith.constant 0 : index
    %c0_263 = arith.constant 0 : index
    %1248 = vector.load %arg10[%c0_262, %c0_263] : memref<2x64xf32, #tpu.memory_space<vmem>>, vector<2x64xf32>
    tpu.vector_store %arg10[%c0_262, %c0_263], %1236 {strides = array<i32>} : memref<2x64xf32, #tpu.memory_space<vmem>>, vector<2x64xf32>,
    return
  }
  func.func @transform_0(%arg0: i32) -> (i32, i32) {
    %c0_i32 = arith.constant 0 : i32
    %c0_i32_0 = arith.constant 0 : i32
    %c0_i32_1 = arith.constant 0 : i32
    return %c0_i32, %c0_i32_0 : i32, i32
  }
  func.func @transform_1(%arg0: i32) -> (i32, i32, i32) {
    %c0_i32 = arith.constant 0 : i32
    %c0_i32_0 = arith.constant 0 : i32
    %c0_i32_1 = arith.constant 0 : i32
    return %arg0, %c0_i32, %c0_i32_0 : i32, i32, i32
  }
  func.func @transform_2(%arg0: i32) -> (i32, i32, i32) {
    %c0_i32 = arith.constant 0 : i32
    %0 = arith.subi %c0_i32, %arg0 : i32
    %c0_i32_0 = arith.constant 0 : i32
    %c1_i32 = arith.constant 1 : i32
    %c0_i32_1 = arith.constant 0 : i32
    return %0, %c0_i32_0, %c1_i32 : i32, i32, i32
  }
  func.func @transform_3(%arg0: i32) -> (i32, i32) {
    %c0_i32 = arith.constant 0 : i32
    %c0_i32_0 = arith.constant 0 : i32
    %c0_i32_1 = arith.constant 0 : i32
    return %c0_i32, %c0_i32_0 : i32, i32
  }
  func.func @transform_4(%arg0: i32) -> (i32, i32) {
    %c0_i32 = arith.constant 0 : i32
    %c0_i32_0 = arith.constant 0 : i32
    %c0_i32_1 = arith.constant 0 : i32
    return %c0_i32, %c0_i32_0 : i32, i32
  }
  func.func @transform_5(%arg0: i32) -> (i32, i32, i32) {
    %c0_i32 = arith.constant 0 : i32
    %c0_i32_0 = arith.constant 0 : i32
    %c0_i32_1 = arith.constant 0 : i32
    %c0_i32_2 = arith.constant 0 : i32
    return %c0_i32, %c0_i32_0, %c0_i32_1 : i32, i32, i32
  }
}

module attributes {stable_mosaic.version = 11 : i64} {
  func.func @_proj_kernel(%arg0: i32, %arg1: memref<32x128xf32, #tpu.memory_space<vmem>>, %arg2: memref<128x512xf32, #tpu.memory_space<vmem>>, %arg3: memref<1x512xf32, #tpu.memory_space<vmem>>, %arg4: memref<32x512xf32, #tpu.memory_space<vmem>>) attributes {dimension_semantics = [#tpu.dimension_semantics<parallel>], iteration_bounds = array<i64: 1>, scalar_prefetch = 0 : i64, scratch_operands = 0 : i64, tpu.core_type = #tpu.core_type<tc>, window_params = [{transform_indices = @transform_0, window_bounds = array<i64: 32, 128>}, {pipeline_mode = #tpu.pipeline_mode<synchronous>, transform_indices = @transform_1, window_bounds = array<i64: 128, 512>}, {pipeline_mode = #tpu.pipeline_mode<synchronous>, transform_indices = @transform_2, window_bounds = array<i64: 1, 512>}, {transform_indices = @transform_3, window_bounds = array<i64: 32, 512>}]} {
    %c0 = arith.constant 0 : index
    %c0_0 = arith.constant 0 : index
    %0 = vector.load %arg1[%c0, %c0_0] : memref<32x128xf32, #tpu.memory_space<vmem>>, vector<32x128xf32>
    %c0_1 = arith.constant 0 : index
    %c0_2 = arith.constant 0 : index
    %1 = vector.load %arg2[%c0_1, %c0_2] : memref<128x512xf32, #tpu.memory_space<vmem>>, vector<128x512xf32>
    %cst = arith.constant dense<0.000000e+00> : vector<32x512xf32>
    %2 = tpu.matmul %0, %1, %cst {dimension_numbers = #tpu.dot_dimension_numbers<[1], [0], [0], [1], [0, 0, 1, 1], [], []>} : vector<32x128xf32>, vector<128x512xf32>, vector<32x512xf32> -> vector<32x512xf32>
    %c0_3 = arith.constant 0 : index
    %c0_4 = arith.constant 0 : index
    %3 = vector.load %arg3[%c0_3, %c0_4] : memref<1x512xf32, #tpu.memory_space<vmem>>, vector<1x512xf32>
    %4 = vector.broadcast %3 : vector<1x512xf32> to vector<32x512xf32>
    %5 = arith.addf %2, %4 : vector<32x512xf32>
    %c0_5 = arith.constant 0 : index
    %c0_6 = arith.constant 0 : index
    %6 = vector.load %arg4[%c0_5, %c0_6] : memref<32x512xf32, #tpu.memory_space<vmem>>, vector<32x512xf32>
    tpu.vector_store %arg4[%c0_5, %c0_6], %5 {strides = array<i32>} : memref<32x512xf32, #tpu.memory_space<vmem>>, vector<32x512xf32>,
    return
  }
  func.func @transform_0(%arg0: i32) -> (i32, i32) {
    %c0_i32 = arith.constant 0 : i32
    %c0_i32_0 = arith.constant 0 : i32
    return %arg0, %c0_i32 : i32, i32
  }
  func.func @transform_1(%arg0: i32) -> (i32, i32) {
    %c0_i32 = arith.constant 0 : i32
    %c0_i32_0 = arith.constant 0 : i32
    %c0_i32_1 = arith.constant 0 : i32
    return %c0_i32, %c0_i32_0 : i32, i32
  }
  func.func @transform_2(%arg0: i32) -> (i32, i32) {
    %c0_i32 = arith.constant 0 : i32
    %c0_i32_0 = arith.constant 0 : i32
    %c0_i32_1 = arith.constant 0 : i32
    return %c0_i32, %c0_i32_0 : i32, i32
  }
  func.func @transform_3(%arg0: i32) -> (i32, i32) {
    %c0_i32 = arith.constant 0 : i32
    %c0_i32_0 = arith.constant 0 : i32
    return %arg0, %c0_i32 : i32, i32
  }
}

module attributes {stable_mosaic.version = 11 : i64} {
  func.func @_head_kernel(%arg0: i32, %arg1: memref<32x896xf32, #tpu.memory_space<vmem>>, %arg2: memref<896x128xf32, #tpu.memory_space<vmem>>, %arg3: memref<1x128xf32, #tpu.memory_space<vmem>>, %arg4: memref<32x128xf32, #tpu.memory_space<vmem>>) attributes {dimension_semantics = [#tpu.dimension_semantics<parallel>], iteration_bounds = array<i64: 1>, scalar_prefetch = 0 : i64, scratch_operands = 0 : i64, tpu.core_type = #tpu.core_type<tc>, window_params = [{transform_indices = @transform_0, window_bounds = array<i64: 32, 896>}, {pipeline_mode = #tpu.pipeline_mode<synchronous>, transform_indices = @transform_1, window_bounds = array<i64: 896, 128>}, {pipeline_mode = #tpu.pipeline_mode<synchronous>, transform_indices = @transform_2, window_bounds = array<i64: 1, 128>}, {transform_indices = @transform_3, window_bounds = array<i64: 32, 128>}]} {
    %c0 = arith.constant 0 : index
    %c0_0 = arith.constant 0 : index
    %0 = vector.load %arg1[%c0, %c0_0] : memref<32x896xf32, #tpu.memory_space<vmem>>, vector<32x896xf32>
    %cst = arith.constant 0.000000e+00 : f32
    %1 = vector.broadcast %cst : f32 to vector<32x896xf32>
    %2 = arith.maximumf %0, %1 : vector<32x896xf32>
    %c0_1 = arith.constant 0 : index
    %c0_2 = arith.constant 0 : index
    %3 = vector.load %arg2[%c0_1, %c0_2] : memref<896x128xf32, #tpu.memory_space<vmem>>, vector<896x128xf32>
    %cst_3 = arith.constant dense<0.000000e+00> : vector<32x128xf32>
    %4 = tpu.matmul %2, %3, %cst_3 {dimension_numbers = #tpu.dot_dimension_numbers<[1], [0], [0], [1], [0, 0, 1, 1], [], []>} : vector<32x896xf32>, vector<896x128xf32>, vector<32x128xf32> -> vector<32x128xf32>
    %c0_4 = arith.constant 0 : index
    %c0_5 = arith.constant 0 : index
    %5 = vector.load %arg3[%c0_4, %c0_5] : memref<1x128xf32, #tpu.memory_space<vmem>>, vector<1x128xf32>
    %6 = vector.broadcast %5 : vector<1x128xf32> to vector<32x128xf32>
    %7 = arith.addf %4, %6 : vector<32x128xf32>
    %cst_6 = arith.constant dense<0xFF800000> : vector<32xf32>
    %8 = vector.multi_reduction <maximumf>, %7, %cst_6 [1] : vector<32x128xf32> to vector<32xf32>
    %9 = vector.shape_cast %8 : vector<32xf32> to vector<32x1xf32>
    %10 = vector.broadcast %9 : vector<32x1xf32> to vector<32x128xf32>
    %11 = arith.subf %7, %10 : vector<32x128xf32>
    %12 = math.exp %11 : vector<32x128xf32>
    %cst_7 = arith.constant dense<0.000000e+00> : vector<32xf32>
    %13 = vector.multi_reduction <add>, %12, %cst_7 [1] : vector<32x128xf32> to vector<32xf32>
    %14 = vector.shape_cast %13 : vector<32xf32> to vector<32x1xf32>
    %15 = vector.broadcast %14 : vector<32x1xf32> to vector<32x128xf32>
    %16 = arith.divf %12, %15 : vector<32x128xf32>
    %c0_8 = arith.constant 0 : index
    %c0_9 = arith.constant 0 : index
    %17 = vector.load %arg4[%c0_8, %c0_9] : memref<32x128xf32, #tpu.memory_space<vmem>>, vector<32x128xf32>
    tpu.vector_store %arg4[%c0_8, %c0_9], %16 {strides = array<i32>} : memref<32x128xf32, #tpu.memory_space<vmem>>, vector<32x128xf32>,
    return
  }
  func.func @transform_0(%arg0: i32) -> (i32, i32) {
    %c0_i32 = arith.constant 0 : i32
    %c0_i32_0 = arith.constant 0 : i32
    return %arg0, %c0_i32 : i32, i32
  }
  func.func @transform_1(%arg0: i32) -> (i32, i32) {
    %c0_i32 = arith.constant 0 : i32
    %c0_i32_0 = arith.constant 0 : i32
    %c0_i32_1 = arith.constant 0 : i32
    return %c0_i32, %c0_i32_0 : i32, i32
  }
  func.func @transform_2(%arg0: i32) -> (i32, i32) {
    %c0_i32 = arith.constant 0 : i32
    %c0_i32_0 = arith.constant 0 : i32
    %c0_i32_1 = arith.constant 0 : i32
    return %c0_i32, %c0_i32_0 : i32, i32
  }
  func.func @transform_3(%arg0: i32) -> (i32, i32) {
    %c0_i32 = arith.constant 0 : i32
    %c0_i32_0 = arith.constant 0 : i32
    return %arg0, %c0_i32 : i32, i32
  }
}

</mosaic_0001>

<bundles_post_ra>
// kernel: multitask_forward.7
= control target key start
LH: loop header
LB: loop body
LE: loop exit
PB: predicated region body
PF: predicated region fallthrough
CT: control target
= control target key end

     0   :  { %v367_v3 = vmov 0.0   ;;  %s651_s1 = inlined_call_operand.vmem [shape: f32[128,512], index: 1, kind: input, shape index: {}]   ;;  %s652_s0 = inlined_call_operand.vmem [shape: f32[32,128], index: 0, kind: input, shape index: {}]   ;;  %s653_s2 = inlined_call_operand.vmem [shape: f32[1,512], index: 2, kind: input, shape index: {}]   ;;  %s654_s3 = inlined_call_operand.vmem [shape: f32[32,512], index: 3, kind: output, shape index: {}]  }
   0x1   :  { %v19_v0 = vld [vmem:[%s651_s1 + $0x8] sm:$0xff]  ;;  %v21_v2 = vld [vmem:[%s651_s1 + $0x18] sm:$0xff]  ;;  %168 = vmatprep.mubr.f32.mxu0 %v367_v3  ;;  %257 = vmatprep.mubr.f32.mxu1 %v367_v3  ;;  %v18_v6 = vld [vmem:[%s651_s1] sm:$0xff] }
   0x2   :  { %v23_v1 = vld [vmem:[%s651_s1 + $0x28] sm:$0xff]  ;;  %v25_v5 = vld [vmem:[%s651_s1 + $0x38] sm:$0xff]  ;;  %v22_v7 = vld [vmem:[%s651_s1 + $0x20] sm:$0xff] }
   0x3   :  { %v302_v4 = vpack.c.bf16 %v23_v1, %v19_v0  ;;  %v334_v8 = vpack.c.bf16 %v25_v5, %v21_v2  ;;  %v304_v9 = vpack.c.bf16 %v22_v7, %v18_v6  ;;  %v20_v10 = vld [vmem:[%s651_s1 + $0x10] sm:$0xff]  ;;  %v27_v12 = vld [vmem:[%s651_s1 + $0x48] sm:$0xff]  ;;  %v29_v15 = vld [vmem:[%s651_s1 + $0x58] sm:$0xff] }
   0x4   :  { %v24_v11 = vld [vmem:[%s651_s1 + $0x30] sm:$0xff]  ;;  %v31_v14 = vld [vmem:[%s651_s1 + $0x68] sm:$0xff]  ;;  %v33_v16 = vld [vmem:[%s651_s1 + $0x78] sm:$0xff] }
   0x5   :  { %303 = vmatprep.subr.bf16.mxu0 %v302_v4  ;;  %v336_v13 = vpack.c.bf16 %v24_v11, %v20_v10  ;;  %335 = vmatprep.subr.bf16.mxu1 %v334_v8  ;;  %v306_v17 = vpack.c.bf16 %v31_v14, %v27_v12  ;;  %v338_v18 = vpack.c.bf16 %v33_v16, %v29_v15  ;;  %v26_v19 = vld [vmem:[%s651_s1 + $0x40] sm:$0xff]  ;;  %v28_v21 = vld [vmem:[%s651_s1 + $0x50] sm:$0xff]  ;;  %v35_v24 = vld [vmem:[%s651_s1 + $0x88] sm:$0xff] }
   0x6   :  { %305 = vmatpush1.bf16.msra.mxu0 %v304_v9  ;;  %v30_v20 = vld [vmem:[%s651_s1 + $0x60] sm:$0xff]  ;;  %v32_v23 = vld [vmem:[%s651_s1 + $0x70] sm:$0xff]  ;;  %v39_v25 = vld [vmem:[%s651_s1 + $0xa8] sm:$0xff] }
   0x7   :  { %337 = vmatpush1.bf16.msra.mxu1 %v336_v13  ;;  %v308_v22 = vpack.c.bf16 %v30_v20, %v26_v19  ;;  %307 = vmatprep.subr.bf16.mxu0 %v306_v17  ;;  %v340_v26 = vpack.c.bf16 %v32_v23, %v28_v21  ;;  %v310_v27 = vpack.c.bf16 %v39_v25, %v35_v24  ;;  %v37_v28 = vld [vmem:[%s651_s1 + $0x98] sm:$0xff]  ;;  %v34_v30 = vld [vmem:[%s651_s1 + $0x80] sm:$0xff]  ;;  %v36_v33 = vld [vmem:[%s651_s1 + $0x90] sm:$0xff] }
   0x8   :  { %339 = vmatprep.subr.bf16.mxu1 %v338_v18  ;;  %v41_v29 = vld [vmem:[%s651_s1 + $0xb8] sm:$0xff]  ;;  %v38_v32 = vld [vmem:[%s651_s1 + $0xa0] sm:$0xff]  ;;  %v40_v34 = vld [vmem:[%s651_s1 + $0xb0] sm:$0xff] }
   0x9   :  { %v342_v31 = vpack.c.bf16 %v41_v29, %v37_v28  ;;  %v312_v35 = vpack.c.bf16 %v38_v32, %v34_v30  ;;  %v43_v36 = vld [vmem:[%s651_s1 + $0xc8] sm:$0xff]  ;;  %v45_v38 = vld [vmem:[%s651_s1 + $0xd8] sm:$0xff]  ;;  %v344_v39 = vpack.c.bf16 %v40_v34, %v36_v33  ;;  %v42_v42 = vld [vmem:[%s651_s1 + $0xc0] sm:$0xff] }
   0xa   :  { %309 = vmatpush1.bf16.msra.mxu0 %v308_v22  ;;  %v47_v37 = vld [vmem:[%s651_s1 + $0xe8] sm:$0xff]  ;;  %v49_v41 = vld [vmem:[%s651_s1 + $0xf8] sm:$0xff]  ;;  %v46_v43 = vld [vmem:[%s651_s1 + $0xe0] sm:$0xff] }
   0xb   :  { %341 = vmatpush1.bf16.msra.mxu1 %v340_v26  ;;  %311 = vmatprep.subr.bf16.mxu0 %v310_v27  ;;  %v314_v40 = vpack.c.bf16 %v47_v37, %v43_v36  ;;  %v346_v44 = vpack.c.bf16 %v49_v41, %v45_v38  ;;  %v44_v45 = vld [vmem:[%s651_s1 + $0xd0] sm:$0xff]  ;;  %v51_v47 = vld [vmem:[%s651_s1 + $0x108] sm:$0xff]  ;;  %v53_v49 = vld [vmem:[%s651_s1 + $0x118] sm:$0xff]  ;;  %v316_v51 = vpack.c.bf16 %v46_v43, %v42_v42  ;;  %v84_v38 = vlaneseq }
   0xc   :  { %343 = vmatprep.subr.bf16.mxu1 %v342_v31  ;;  %v48_v46 = vld [vmem:[%s651_s1 + $0xf0] sm:$0xff]  ;;  %v55_v48 = vld [vmem:[%s651_s1 + $0x128] sm:$0xff]  ;;  %v57_v50 = vld [vmem:[%s651_s1 + $0x138] sm:$0xff] }
   0xd   :  { %v348_v52 = vpack.c.bf16 %v48_v46, %v44_v45  ;;  %v318_v53 = vpack.c.bf16 %v55_v48, %v51_v47  ;;  %v50_v54 = vld [vmem:[%s651_s1 + $0x100] sm:$0xff]  ;;  %v52_v56 = vld [vmem:[%s651_s1 + $0x110] sm:$0xff]  ;;  %v350_v57 = vpack.c.bf16 %v57_v50, %v53_v49  ;;  %v59_v59 = vld [vmem:[%s651_s1 + $0x148] sm:$0xff] }
   0xe   :  { %313 = vmatpush1.bf16.msra.mxu0 %v312_v35  ;;  %v54_v55 = vld [vmem:[%s651_s1 + $0x120] sm:$0xff]  ;;  %v56_v58 = vld [vmem:[%s651_s1 + $0x130] sm:$0xff]  ;;  %v63_v60 = vld [vmem:[%s651_s1 + $0x168] sm:$0xff] }
   0xf   :  { %345 = vmatpush1.bf16.msra.mxu1 %v344_v39  ;;  %315 = vmatprep.subr.bf16.mxu0 %v314_v40  ;;  %v61_v61 = vld [vmem:[%s651_s1 + $0x158] sm:$0xff]  ;;  %v320_v63 = vpack.c.bf16 %v54_v55, %v50_v54  ;;  %v352_v0 = vpack.c.bf16 %v56_v58, %v52_v56  ;;  %v322_v1 = vpack.c.bf16 %v63_v60, %v59_v59  ;;  %v58_v2 = vld [vmem:[%s651_s1 + $0x140] sm:$0xff]  ;;  %v60_v5 = vld [vmem:[%s651_s1 + $0x150] sm:$0xff]  ;;  %v85_v39 = vshrl.u32 %v84_v38, 7 }
  0x10   :  { %347 = vmatprep.subr.bf16.mxu1 %v346_v44  ;;  %v65_v62 = vld [vmem:[%s651_s1 + $0x178] sm:$0xff]  ;;  %v62_v4 = vld [vmem:[%s651_s1 + $0x160] sm:$0xff]  ;;  %v64_v7 = vld [vmem:[%s651_s1 + $0x170] sm:$0xff] }
  0x11   :  { %v354_v6 = vpack.c.bf16 %v65_v62, %v61_v61  ;;  %v67_v8 = vld [vmem:[%s651_s1 + $0x188] sm:$0xff]  ;;  %v69_v10 = vld [vmem:[%s651_s1 + $0x198] sm:$0xff]  ;;  %v324_v12 = vpack.c.bf16 %v62_v4, %v58_v2  ;;  %v356_v13 = vpack.c.bf16 %v64_v7, %v60_v5  ;;  %v66_v15 = vld [vmem:[%s651_s1 + $0x180] sm:$0xff]  ;;  %v86_v40 = vsub.s32 0, %v85_v39 }
  0x12   :  { %317 = vmatpush1.bf16.msra.mxu0 %v316_v51  ;;  %v71_v9 = vld [vmem:[%s651_s1 + $0x1a8] sm:$0xff]  ;;  %v73_v11 = vld [vmem:[%s651_s1 + $0x1b8] sm:$0xff]  ;;  %v70_v16 = vld [vmem:[%s651_s1 + $0x1a0] sm:$0xff]  ;;  %v94_v42 = vsub.s32 2, %v85_v39  ;;  %v90_v43 = vsub.s32 1, %v85_v39  ;;  %v98_v44 = vsub.s32 3, %v85_v39 }
  0x13   :  { %349 = vmatpush1.bf16.msra.mxu1 %v348_v52  ;;  %319 = vmatprep.subr.bf16.mxu0 %v318_v53  ;;  %v326_v14 = vpack.c.bf16 %v71_v9, %v67_v8  ;;  %v68_v17 = vld [vmem:[%s651_s1 + $0x190] sm:$0xff]  ;;  %v358_v18 = vpack.c.bf16 %v73_v11, %v69_v10  ;;  %v75_v20 = vld [vmem:[%s651_s1 + $0x1c8] sm:$0xff]  ;;  %v77_v22 = vld [vmem:[%s651_s1 + $0x1d8] sm:$0xff]  ;;  %v328_v24 = vpack.c.bf16 %v70_v16, %v66_v15 }
  0x14   :  { %351 = vmatprep.subr.bf16.mxu1 %v350_v57  ;;  %v72_v19 = vld [vmem:[%s651_s1 + $0x1b0] sm:$0xff]  ;;  %v79_v21 = vld [vmem:[%s651_s1 + $0x1e8] sm:$0xff]  ;;  %v81_v23 = vld [vmem:[%s651_s1 + $0x1f8] sm:$0xff] }
  0x15   :  { %v360_v25 = vpack.c.bf16 %v72_v19, %v68_v17  ;;  %v330_v26 = vpack.c.bf16 %v79_v21, %v75_v20  ;;  %v74_v27 = vld [vmem:[%s651_s1 + $0x1c0] sm:$0xff]  ;;  %v362_v29 = vpack.c.bf16 %v81_v23, %v77_v22  ;;  %v76_v30 = vld [vmem:[%s651_s1 + $0x1d0] sm:$0xff]  ;;  %v15_v35 = vld [vmem:[%s652_s0 + $0x8] sm:$0xff] }
  0x16   :  { %321 = vmatpush1.bf16.msra.mxu0 %v320_v63  ;;  %v78_v28 = vld [vmem:[%s651_s1 + $0x1e0] sm:$0xff]  ;;  %v80_v31 = vld [vmem:[%s651_s1 + $0x1f0] sm:$0xff]  ;;  %v17_v37 = vld [vmem:[%s652_s0 + $0x18] sm:$0xff] }
  0x17   :  { %353 = vmatpush1.bf16.msra.mxu1 %v352_v0  ;;  %323 = vmatprep.subr.bf16.mxu0 %v322_v1  ;;  %v332_v32 = vpack.c.bf16 %v78_v28, %v74_v27  ;;  %v364_v33 = vpack.c.bf16 %v80_v31, %v76_v30  ;;  %v14_v34 = vld [vmem:[%s652_s0] sm:$0xff]  ;;  %v16_v36 = vld [vmem:[%s652_s0 + $0x10] sm:$0xff] }
  0x18   :  { %355 = vmatprep.subr.bf16.mxu1 %v354_v6  ;;  %v82_v41 = vld [vmem:[%s653_s2] sm:$0xf] }
  0x19   :  { %v87_v45 = vrot.slane %v82_v41, %v86_v40  ;;  %v95_v46 = vrot.slane %v82_v41, %v94_v42  ;;  %v91_v47 = vrot.slane %v82_v41, %v90_v43  ;;  %v99_v48 = vrot.slane %v82_v41, %v98_v44 }
  0x1a   :  { %325 = vmatpush1.bf16.msra.mxu0 %v324_v12 }
  0x1b   :  { %357 = vmatpush1.bf16.msra.mxu1 %v356_v13  ;;  %327 = vmatprep.subr.bf16.mxu0 %v326_v14 }
  0x1c   :  { %359 = vmatprep.subr.bf16.mxu1 %v358_v18 }
  0x1e   :  { %329 = vmatpush1.bf16.msra.mxu0 %v328_v24 }
  0x1f   :  { %361 = vmatpush1.bf16.msra.mxu1 %v360_v25  ;;  %331 = vmatprep.subr.bf16.mxu0 %v330_v26 }
  0x20   :  { %363 = vmatprep.subr.bf16.mxu1 %v362_v29 }
  0x22   :  { %333 = vmatpush1.bf16.msra.mxu0 %v332_v32 }
  0x23   :  { %365 = vmatpush1.bf16.msra.mxu1 %v364_v33 }
  0x25   :  { %169 = vmatmul.mubr.f32.vlgmr.msra.gmra.mrb[0].mxu0 %v14_v34 }
  0x26   :  { %258 = vmatmul.mubr.f32.vlgmr.msra.gmra.mrb[0].mxu1 %v14_v34  ;;  %174 = vmatprep.mubr.f32.mxu0 %v367_v3 }
  0x27   :  { %263 = vmatprep.mubr.f32.mxu1 %v367_v3 }
  0x29   :  { %175 = vmatmul.mubr.f32.gmra.mrb[2].mxu0 %v15_v35 }
  0x2a   :  { %264 = vmatmul.mubr.f32.gmra.mrb[2].mxu1 %v15_v35  ;;  %180 = vmatprep.mubr.f32.mxu0 %v367_v3 }
  0x2b   :  { %269 = vmatprep.mubr.f32.mxu1 %v367_v3 }
  0x2d   :  { %181 = vmatmul.mubr.f32.gmra.mrb[4].mxu0 %v16_v36 }
  0x2e   :  { %270 = vmatmul.mubr.f32.gmra.mrb[4].mxu1 %v16_v36  ;;  %186 = vmatprep.mubr.f32.mxu0 %v367_v3 }
  0x2f   :  { %275 = vmatprep.mubr.f32.mxu1 %v367_v3 }
  0x31   :  { %187 = vmatmul.mubr.f32.gmra.mrb[6].mxu0 %v17_v37 }
  0x32   :  { %276 = vmatmul.mubr.f32.gmra.mrb[6].mxu1 %v17_v37 }
  0xf8   :  { %v170_v49 = vpop.f32.mrb[0].mxu0 }
  0xf9   :  { %v171_v50 = vadd.f32 %v170_v49, %v87_v45  ;;  %v259_v51 = vpop.f32.mrb[0].mxu1  ;;  %v172_v3 = vpop.f32.mrb[1].mxu0 }
  0xfa   :  { %v260_v52 = vadd.f32 %v259_v51, %v95_v46  ;;  %v173_v53 = vadd.f32 %v172_v3, %v91_v47  ;;  %v261_v54 = vpop.f32.mrb[1].mxu1 }
  0xfb   :  { %282 = vst [vmem:[%s654_s3] sm:$0xff] %v171_v50  ;;  %v262_v55 = vadd.f32 %v261_v54, %v99_v48 }
  0xfc   :  { %284 = vst [vmem:[%s654_s3 + $0x10] sm:$0xff] %v260_v52  ;;  %283 = vst [vmem:[%s654_s3 + $0x8] sm:$0xff] %v173_v53  ;;  %v176_v56 = vpop.f32.mrb[2].mxu0 }
  0xfd   :  { %285 = vst [vmem:[%s654_s3 + $0x18] sm:$0xff] %v262_v55  ;;  %v177_v57 = vadd.f32 %v176_v56, %v87_v45  ;;  %v265_v58 = vpop.f32.mrb[2].mxu1  ;;  %v178_v59 = vpop.f32.mrb[3].mxu0 }
  0xfe   :  { %v266_v60 = vadd.f32 %v265_v58, %v95_v46  ;;  %v179_v61 = vadd.f32 %v178_v59, %v91_v47  ;;  %v267_v62 = vpop.f32.mrb[3].mxu1 }
  0xff   :  { %286 = vst [vmem:[%s654_s3 + $0x20] sm:$0xff] %v177_v57  ;;  %v268_v63 = vadd.f32 %v267_v62, %v99_v48 }
 0x100   :  { %288 = vst [vmem:[%s654_s3 + $0x30] sm:$0xff] %v266_v60  ;;  %287 = vst [vmem:[%s654_s3 + $0x28] sm:$0xff] %v179_v61  ;;  %v182_v0 = vpop.f32.mrb[4].mxu0 }
 0x101   :  { %289 = vst [vmem:[%s654_s3 + $0x38] sm:$0xff] %v268_v63  ;;  %v183_v1 = vadd.f32 %v182_v0, %v87_v45  ;;  %v271_v2 = vpop.f32.mrb[4].mxu1  ;;  %v184_v4 = vpop.f32.mrb[5].mxu0 }
 0x102   :  { %v272_v5 = vadd.f32 %v271_v2, %v95_v46  ;;  %v185_v6 = vadd.f32 %v184_v4, %v91_v47  ;;  %v273_v7 = vpop.f32.mrb[5].mxu1 }
 0x103   :  { %290 = vst [vmem:[%s654_s3 + $0x40] sm:$0xff] %v183_v1  ;;  %v274_v8 = vadd.f32 %v273_v7, %v99_v48 }
 0x104   :  { %292 = vst [vmem:[%s654_s3 + $0x50] sm:$0xff] %v272_v5  ;;  %291 = vst [vmem:[%s654_s3 + $0x48] sm:$0xff] %v185_v6  ;;  %v188_v9 = vpop.f32.mrb[6].mxu0 }
 0x105   :  { %293 = vst [vmem:[%s654_s3 + $0x58] sm:$0xff] %v274_v8  ;;  %v189_v10 = vadd.f32 %v188_v9, %v87_v45  ;;  %v277_v11 = vpop.f32.mrb[6].mxu1  ;;  %v190_v12 = vpop.f32.mrb[7].mxu0 }
 0x106   :  { %v278_v13 = vadd.f32 %v277_v11, %v95_v46  ;;  %v191_v14 = vadd.f32 %v190_v12, %v91_v47  ;;  %v279_v15 = vpop.f32.mrb[7].mxu1 }
 0x107   :  { %294 = vst [vmem:[%s654_s3 + $0x60] sm:$0xff] %v189_v10  ;;  %v280_v16 = vadd.f32 %v279_v15, %v99_v48 }
 0x108   :  { %296 = vst [vmem:[%s654_s3 + $0x70] sm:$0xff] %v278_v13  ;;  %295 = vst [vmem:[%s654_s3 + $0x68] sm:$0xff] %v191_v14 }
 0x109   :  { %297 = vst [vmem:[%s654_s3 + $0x78] sm:$0xff] %v280_v16 }

// kernel: multitask_forward.5
= control target key start
LH: loop header
LB: loop body
LE: loop exit
PB: predicated region body
PF: predicated region fallthrough
CT: control target
= control target key end

     0   :  { %s2725_s1 = inlined_call_operand.vmem [shape: f32[768,512], index: 1, kind: input, shape index: {}]   ;;  %s2726_s0 = inlined_call_operand.vmem [shape: f32[32,768], index: 0, kind: input, shape index: {}]   ;;  %s2727_s2 = inlined_call_operand.vmem [shape: f32[1,512], index: 2, kind: input, shape index: {}]   ;;  %s2728_s3 = inlined_call_operand.vmem [shape: f32[32,512], index: 3, kind: output, shape index: {}]  }
   0x1   :  { %v39_v0 = vld [vmem:[%s2725_s1 + $0x8] sm:$0xff]  ;;  %v41_v2 = vld [vmem:[%s2725_s1 + $0x18] sm:$0xff]  ;;  %v38_v5 = vld [vmem:[%s2725_s1] sm:$0xff] }
   0x2   :  { %v43_v1 = vld [vmem:[%s2725_s1 + $0x28] sm:$0xff]  ;;  %v45_v4 = vld [vmem:[%s2725_s1 + $0x38] sm:$0xff]  ;;  %v42_v6 = vld [vmem:[%s2725_s1 + $0x20] sm:$0xff] }
   0x3   :  { %v998_v3 = vpack.c.bf16 %v43_v1, %v39_v0  ;;  %v1190_v7 = vpack.c.bf16 %v45_v4, %v41_v2  ;;  %v1000_v8 = vpack.c.bf16 %v42_v6, %v38_v5  ;;  %v40_v9 = vld [vmem:[%s2725_s1 + $0x10] sm:$0xff]  ;;  %v47_v11 = vld [vmem:[%s2725_s1 + $0x48] sm:$0xff]  ;;  %v49_v14 = vld [vmem:[%s2725_s1 + $0x58] sm:$0xff] }
   0x4   :  { %v44_v10 = vld [vmem:[%s2725_s1 + $0x30] sm:$0xff]  ;;  %v51_v13 = vld [vmem:[%s2725_s1 + $0x68] sm:$0xff]  ;;  %v53_v15 = vld [vmem:[%s2725_s1 + $0x78] sm:$0xff] }
   0x5   :  { %999 = vmatprep.subr.bf16.mxu0 %v998_v3  ;;  %v1192_v12 = vpack.c.bf16 %v44_v10, %v40_v9  ;;  %1191 = vmatprep.subr.bf16.mxu1 %v1190_v7  ;;  %v1002_v16 = vpack.c.bf16 %v51_v13, %v47_v11  ;;  %v1194_v17 = vpack.c.bf16 %v53_v15, %v49_v14  ;;  %v46_v18 = vld [vmem:[%s2725_s1 + $0x40] sm:$0xff]  ;;  %v48_v20 = vld [vmem:[%s2725_s1 + $0x50] sm:$0xff]  ;;  %v55_v23 = vld [vmem:[%s2725_s1 + $0x88] sm:$0xff] }
   0x6   :  { %1001 = vmatpush1.bf16.msra.mxu0 %v1000_v8  ;;  %v50_v19 = vld [vmem:[%s2725_s1 + $0x60] sm:$0xff]  ;;  %v52_v22 = vld [vmem:[%s2725_s1 + $0x70] sm:$0xff]  ;;  %v59_v24 = vld [vmem:[%s2725_s1 + $0xa8] sm:$0xff] }
   0x7   :  { %1193 = vmatpush1.bf16.msra.mxu1 %v1192_v12  ;;  %v1004_v21 = vpack.c.bf16 %v50_v19, %v46_v18  ;;  %1003 = vmatprep.subr.bf16.mxu0 %v1002_v16  ;;  %v1196_v25 = vpack.c.bf16 %v52_v22, %v48_v20  ;;  %v1006_v26 = vpack.c.bf16 %v59_v24, %v55_v23  ;;  %v57_v27 = vld [vmem:[%s2725_s1 + $0x98] sm:$0xff]  ;;  %v54_v29 = vld [vmem:[%s2725_s1 + $0x80] sm:$0xff]  ;;  %v56_v32 = vld [vmem:[%s2725_s1 + $0x90] sm:$0xff] }
   0x8   :  { %1195 = vmatprep.subr.bf16.mxu1 %v1194_v17  ;;  %v61_v28 = vld [vmem:[%s2725_s1 + $0xb8] sm:$0xff]  ;;  %v58_v31 = vld [vmem:[%s2725_s1 + $0xa0] sm:$0xff]  ;;  %v60_v33 = vld [vmem:[%s2725_s1 + $0xb0] sm:$0xff] }
   0x9   :  { %v1198_v30 = vpack.c.bf16 %v61_v28, %v57_v27  ;;  %v1008_v34 = vpack.c.bf16 %v58_v31, %v54_v29  ;;  %v63_v35 = vld [vmem:[%s2725_s1 + $0xc8] sm:$0xff]  ;;  %v65_v37 = vld [vmem:[%s2725_s1 + $0xd8] sm:$0xff]  ;;  %v1200_v38 = vpack.c.bf16 %v60_v33, %v56_v32  ;;  %v62_v41 = vld [vmem:[%s2725_s1 + $0xc0] sm:$0xff] }
   0xa   :  { %1005 = vmatpush1.bf16.msra.mxu0 %v1004_v21  ;;  %v67_v36 = vld [vmem:[%s2725_s1 + $0xe8] sm:$0xff]  ;;  %v69_v40 = vld [vmem:[%s2725_s1 + $0xf8] sm:$0xff]  ;;  %v66_v42 = vld [vmem:[%s2725_s1 + $0xe0] sm:$0xff] }
   0xb   :  { %1197 = vmatpush1.bf16.msra.mxu1 %v1196_v25  ;;  %1007 = vmatprep.subr.bf16.mxu0 %v1006_v26  ;;  %v1010_v39 = vpack.c.bf16 %v67_v36, %v63_v35  ;;  %v1202_v43 = vpack.c.bf16 %v69_v40, %v65_v37  ;;  %v64_v44 = vld [vmem:[%s2725_s1 + $0xd0] sm:$0xff]  ;;  %v71_v46 = vld [vmem:[%s2725_s1 + $0x108] sm:$0xff]  ;;  %v73_v48 = vld [vmem:[%s2725_s1 + $0x118] sm:$0xff]  ;;  %v1012_v50 = vpack.c.bf16 %v66_v42, %v62_v41 }
   0xc   :  { %1199 = vmatprep.subr.bf16.mxu1 %v1198_v30  ;;  %v68_v45 = vld [vmem:[%s2725_s1 + $0xf0] sm:$0xff]  ;;  %v75_v47 = vld [vmem:[%s2725_s1 + $0x128] sm:$0xff]  ;;  %v77_v49 = vld [vmem:[%s2725_s1 + $0x138] sm:$0xff] }
   0xd   :  { %v1204_v51 = vpack.c.bf16 %v68_v45, %v64_v44  ;;  %v1014_v52 = vpack.c.bf16 %v75_v47, %v71_v46  ;;  %v70_v53 = vld [vmem:[%s2725_s1 + $0x100] sm:$0xff]  ;;  %v72_v55 = vld [vmem:[%s2725_s1 + $0x110] sm:$0xff]  ;;  %v1206_v56 = vpack.c.bf16 %v77_v49, %v73_v48  ;;  %v79_v58 = vld [vmem:[%s2725_s1 + $0x148] sm:$0xff] }
   0xe   :  { %1009 = vmatpush1.bf16.msra.mxu0 %v1008_v34  ;;  %v74_v54 = vld [vmem:[%s2725_s1 + $0x120] sm:$0xff]  ;;  %v76_v57 = vld [vmem:[%s2725_s1 + $0x130] sm:$0xff]  ;;  %v83_v59 = vld [vmem:[%s2725_s1 + $0x168] sm:$0xff] }
   0xf   :  { %1201 = vmatpush1.bf16.msra.mxu1 %v1200_v38  ;;  %1011 = vmatprep.subr.bf16.mxu0 %v1010_v39  ;;  %v81_v60 = vld [vmem:[%s2725_s1 + $0x158] sm:$0xff]  ;;  %v1016_v62 = vpack.c.bf16 %v74_v54, %v70_v53  ;;  %v1208_v63 = vpack.c.bf16 %v76_v57, %v72_v55  ;;  %v1018_v0 = vpack.c.bf16 %v83_v59, %v79_v58  ;;  %v78_v1 = vld [vmem:[%s2725_s1 + $0x140] sm:$0xff]  ;;  %v80_v3 = vld [vmem:[%s2725_s1 + $0x150] sm:$0xff] }
  0x10   :  { %1203 = vmatprep.subr.bf16.mxu1 %v1202_v43  ;;  %v85_v61 = vld [vmem:[%s2725_s1 + $0x178] sm:$0xff]  ;;  %v82_v2 = vld [vmem:[%s2725_s1 + $0x160] sm:$0xff]  ;;  %v84_v5 = vld [vmem:[%s2725_s1 + $0x170] sm:$0xff] }
  0x11   :  { %v1210_v4 = vpack.c.bf16 %v85_v61, %v81_v60  ;;  %v87_v6 = vld [vmem:[%s2725_s1 + $0x188] sm:$0xff]  ;;  %v89_v8 = vld [vmem:[%s2725_s1 + $0x198] sm:$0xff]  ;;  %v1020_v10 = vpack.c.bf16 %v82_v2, %v78_v1  ;;  %v1212_v11 = vpack.c.bf16 %v84_v5, %v80_v3  ;;  %v86_v13 = vld [vmem:[%s2725_s1 + $0x180] sm:$0xff] }
  0x12   :  { %1013 = vmatpush1.bf16.msra.mxu0 %v1012_v50  ;;  %v91_v7 = vld [vmem:[%s2725_s1 + $0x1a8] sm:$0xff]  ;;  %v93_v9 = vld [vmem:[%s2725_s1 + $0x1b8] sm:$0xff]  ;;  %v90_v14 = vld [vmem:[%s2725_s1 + $0x1a0] sm:$0xff] }
  0x13   :  { %1205 = vmatpush1.bf16.msra.mxu1 %v1204_v51  ;;  %1015 = vmatprep.subr.bf16.mxu0 %v1014_v52  ;;  %v1022_v12 = vpack.c.bf16 %v91_v7, %v87_v6  ;;  %v88_v15 = vld [vmem:[%s2725_s1 + $0x190] sm:$0xff]  ;;  %v1214_v16 = vpack.c.bf16 %v93_v9, %v89_v8  ;;  %v95_v18 = vld [vmem:[%s2725_s1 + $0x1c8] sm:$0xff]  ;;  %v97_v20 = vld [vmem:[%s2725_s1 + $0x1d8] sm:$0xff]  ;;  %v1024_v22 = vpack.c.bf16 %v90_v14, %v86_v13 }
  0x14   :  { %1207 = vmatprep.subr.bf16.mxu1 %v1206_v56  ;;  %v92_v17 = vld [vmem:[%s2725_s1 + $0x1b0] sm:$0xff]  ;;  %v99_v19 = vld [vmem:[%s2725_s1 + $0x1e8] sm:$0xff]  ;;  %v101_v21 = vld [vmem:[%s2725_s1 + $0x1f8] sm:$0xff] }
  0x15   :  { %v1216_v23 = vpack.c.bf16 %v92_v17, %v88_v15  ;;  %v1026_v24 = vpack.c.bf16 %v99_v19, %v95_v18  ;;  %v94_v25 = vld [vmem:[%s2725_s1 + $0x1c0] sm:$0xff]  ;;  %v96_v27 = vld [vmem:[%s2725_s1 + $0x1d0] sm:$0xff]  ;;  %v1218_v28 = vpack.c.bf16 %v101_v21, %v97_v20  ;;  %v103_v30 = vld [vmem:[%s2725_s1 + $0x208] sm:$0xff] }
  0x16   :  { %1017 = vmatpush1.bf16.msra.mxu0 %v1016_v62  ;;  %v98_v26 = vld [vmem:[%s2725_s1 + $0x1e0] sm:$0xff]  ;;  %v100_v29 = vld [vmem:[%s2725_s1 + $0x1f0] sm:$0xff]  ;;  %v107_v31 = vld [vmem:[%s2725_s1 + $0x228] sm:$0xff] }
  0x17   :  { %1209 = vmatpush1.bf16.msra.mxu1 %v1208_v63  ;;  %1019 = vmatprep.subr.bf16.mxu0 %v1018_v0  ;;  %v105_v32 = vld [vmem:[%s2725_s1 + $0x218] sm:$0xff]  ;;  %v1028_v34 = vpack.c.bf16 %v98_v26, %v94_v25  ;;  %v1220_v35 = vpack.c.bf16 %v100_v29, %v96_v27  ;;  %v1030_v36 = vpack.c.bf16 %v107_v31, %v103_v30  ;;  %v102_v37 = vld [vmem:[%s2725_s1 + $0x200] sm:$0xff]  ;;  %v104_v39 = vld [vmem:[%s2725_s1 + $0x210] sm:$0xff] }
  0x18   :  { %1211 = vmatprep.subr.bf16.mxu1 %v1210_v4  ;;  %v109_v33 = vld [vmem:[%s2725_s1 + $0x238] sm:$0xff]  ;;  %v106_v38 = vld [vmem:[%s2725_s1 + $0x220] sm:$0xff]  ;;  %v108_v41 = vld [vmem:[%s2725_s1 + $0x230] sm:$0xff] }
  0x19   :  { %v1222_v40 = vpack.c.bf16 %v109_v33, %v105_v32  ;;  %v111_v42 = vld [vmem:[%s2725_s1 + $0x248] sm:$0xff]  ;;  %v113_v44 = vld [vmem:[%s2725_s1 + $0x258] sm:$0xff]  ;;  %v1032_v46 = vpack.c.bf16 %v106_v38, %v102_v37  ;;  %v1224_v47 = vpack.c.bf16 %v108_v41, %v104_v39  ;;  %v110_v49 = vld [vmem:[%s2725_s1 + $0x240] sm:$0xff] }
  0x1a   :  { %1021 = vmatpush1.bf16.msra.mxu0 %v1020_v10  ;;  %v115_v43 = vld [vmem:[%s2725_s1 + $0x268] sm:$0xff]  ;;  %v117_v45 = vld [vmem:[%s2725_s1 + $0x278] sm:$0xff]  ;;  %v114_v50 = vld [vmem:[%s2725_s1 + $0x260] sm:$0xff] }
  0x1b   :  { %1213 = vmatpush1.bf16.msra.mxu1 %v1212_v11  ;;  %1023 = vmatprep.subr.bf16.mxu0 %v1022_v12  ;;  %v1034_v48 = vpack.c.bf16 %v115_v43, %v111_v42  ;;  %v112_v51 = vld [vmem:[%s2725_s1 + $0x250] sm:$0xff]  ;;  %v1226_v52 = vpack.c.bf16 %v117_v45, %v113_v44  ;;  %v119_v54 = vld [vmem:[%s2725_s1 + $0x288] sm:$0xff]  ;;  %v121_v56 = vld [vmem:[%s2725_s1 + $0x298] sm:$0xff]  ;;  %v1036_v58 = vpack.c.bf16 %v114_v50, %v110_v49 }
  0x1c   :  { %1215 = vmatprep.subr.bf16.mxu1 %v1214_v16  ;;  %v116_v53 = vld [vmem:[%s2725_s1 + $0x270] sm:$0xff]  ;;  %v123_v55 = vld [vmem:[%s2725_s1 + $0x2a8] sm:$0xff]  ;;  %v125_v57 = vld [vmem:[%s2725_s1 + $0x2b8] sm:$0xff] }
  0x1d   :  { %v1228_v59 = vpack.c.bf16 %v116_v53, %v112_v51  ;;  %v1038_v60 = vpack.c.bf16 %v123_v55, %v119_v54  ;;  %v118_v61 = vld [vmem:[%s2725_s1 + $0x280] sm:$0xff]  ;;  %v120_v63 = vld [vmem:[%s2725_s1 + $0x290] sm:$0xff]  ;;  %v1230_v0 = vpack.c.bf16 %v125_v57, %v121_v56  ;;  %v127_v2 = vld [vmem:[%s2725_s1 + $0x2c8] sm:$0xff] }
  0x1e   :  { %1025 = vmatpush1.bf16.msra.mxu0 %v1024_v22  ;;  %v122_v62 = vld [vmem:[%s2725_s1 + $0x2a0] sm:$0xff]  ;;  %v124_v1 = vld [vmem:[%s2725_s1 + $0x2b0] sm:$0xff]  ;;  %v131_v3 = vld [vmem:[%s2725_s1 + $0x2e8] sm:$0xff] }
  0x1f   :  { %1217 = vmatpush1.bf16.msra.mxu1 %v1216_v23  ;;  %1027 = vmatprep.subr.bf16.mxu0 %v1026_v24  ;;  %v129_v4 = vld [vmem:[%s2725_s1 + $0x2d8] sm:$0xff]  ;;  %v1040_v6 = vpack.c.bf16 %v122_v62, %v118_v61  ;;  %v126_v7 = vld [vmem:[%s2725_s1 + $0x2c0] sm:$0xff]  ;;  %v1232_v8 = vpack.c.bf16 %v124_v1, %v120_v63  ;;  %v1042_v9 = vpack.c.bf16 %v131_v3, %v127_v2  ;;  %v128_v11 = vld [vmem:[%s2725_s1 + $0x2d0] sm:$0xff] }
  0x20   :  { %1219 = vmatprep.subr.bf16.mxu1 %v1218_v28  ;;  %v133_v5 = vld [vmem:[%s2725_s1 + $0x2f8] sm:$0xff]  ;;  %v130_v10 = vld [vmem:[%s2725_s1 + $0x2e0] sm:$0xff]  ;;  %v132_v12 = vld [vmem:[%s2725_s1 + $0x2f0] sm:$0xff] }
  0x21   :  { %v1234_v13 = vpack.c.bf16 %v133_v5, %v129_v4  ;;  %v135_v14 = vld [vmem:[%s2725_s1 + $0x308] sm:$0xff]  ;;  %v137_v17 = vld [vmem:[%s2725_s1 + $0x318] sm:$0xff]  ;;  %v1044_v19 = vpack.c.bf16 %v130_v10, %v126_v7  ;;  %v1236_v20 = vpack.c.bf16 %v132_v12, %v128_v11  ;;  %v134_v22 = vld [vmem:[%s2725_s1 + $0x300] sm:$0xff] }
  0x22   :  { %1029 = vmatpush1.bf16.msra.mxu0 %v1028_v34  ;;  %v139_v15 = vld [vmem:[%s2725_s1 + $0x328] sm:$0xff]  ;;  %v141_v18 = vld [vmem:[%s2725_s1 + $0x338] sm:$0xff]  ;;  %v138_v23 = vld [vmem:[%s2725_s1 + $0x320] sm:$0xff] }
  0x23   :  { %1221 = vmatpush1.bf16.msra.mxu1 %v1220_v35  ;;  %1031 = vmatprep.subr.bf16.mxu0 %v1030_v36  ;;  %v15_v16 = vld [vmem:[%s2726_s0 + $0x8] sm:$0xff]  ;;  %v1046_v21 = vpack.c.bf16 %v139_v15, %v135_v14  ;;  %v136_v24 = vld [vmem:[%s2725_s1 + $0x310] sm:$0xff]  ;;  %v1238_v25 = vpack.c.bf16 %v141_v18, %v137_v17  ;;  %v145_v29 = vld [vmem:[%s2725_s1 + $0x358] sm:$0xff]  ;;  %v1048_v31 = vpack.c.bf16 %v138_v23, %v134_v22 }
  0x24   :  { %1223 = vmatprep.subr.bf16.mxu1 %v1222_v40  ;;  %508 = vmatprep.mubr.f32.mxu0 %v15_v16  ;;  %v140_v26 = vld [vmem:[%s2725_s1 + $0x330] sm:$0xff]  ;;  %v143_v27 = vld [vmem:[%s2725_s1 + $0x348] sm:$0xff]  ;;  %v149_v30 = vld [vmem:[%s2725_s1 + $0x378] sm:$0xff] }
  0x25   :  { %775 = vmatprep.mubr.f32.mxu1 %v15_v16  ;;  %v147_v28 = vld [vmem:[%s2725_s1 + $0x368] sm:$0xff]  ;;  %v1240_v32 = vpack.c.bf16 %v140_v26, %v136_v24  ;;  %v142_v34 = vld [vmem:[%s2725_s1 + $0x340] sm:$0xff]  ;;  %v144_v36 = vld [vmem:[%s2725_s1 + $0x350] sm:$0xff]  ;;  %v1242_v37 = vpack.c.bf16 %v149_v30, %v145_v29 }
  0x26   :  { %1033 = vmatpush1.bf16.msra.mxu0 %v1032_v46  ;;  %v1050_v33 = vpack.c.bf16 %v147_v28, %v143_v27  ;;  %v146_v35 = vld [vmem:[%s2725_s1 + $0x360] sm:$0xff]  ;;  %v148_v38 = vld [vmem:[%s2725_s1 + $0x370] sm:$0xff]  ;;  %v151_v39 = vld [vmem:[%s2725_s1 + $0x388] sm:$0xff] }
  0x27   :  { %1225 = vmatpush1.bf16.msra.mxu1 %v1224_v47  ;;  %1035 = vmatprep.subr.bf16.mxu0 %v1034_v48  ;;  %v155_v40 = vld [vmem:[%s2725_s1 + $0x3a8] sm:$0xff]  ;;  %v153_v41 = vld [vmem:[%s2725_s1 + $0x398] sm:$0xff]  ;;  %v1052_v43 = vpack.c.bf16 %v146_v35, %v142_v34  ;;  %v1244_v44 = vpack.c.bf16 %v148_v38, %v144_v36  ;;  %v150_v46 = vld [vmem:[%s2725_s1 + $0x380] sm:$0xff] }
  0x28   :  { %1227 = vmatprep.subr.bf16.mxu1 %v1226_v52  ;;  %v157_v42 = vld [vmem:[%s2725_s1 + $0x3b8] sm:$0xff]  ;;  %v1054_v45 = vpack.c.bf16 %v155_v40, %v151_v39  ;;  %v154_v47 = vld [vmem:[%s2725_s1 + $0x3a0] sm:$0xff]  ;;  %v152_v48 = vld [vmem:[%s2725_s1 + $0x390] sm:$0xff] }
  0x29   :  { %v1246_v49 = vpack.c.bf16 %v157_v42, %v153_v41  ;;  %v156_v50 = vld [vmem:[%s2725_s1 + $0x3b0] sm:$0xff]  ;;  %v159_v51 = vld [vmem:[%s2725_s1 + $0x3c8] sm:$0xff]  ;;  %v161_v53 = vld [vmem:[%s2725_s1 + $0x3d8] sm:$0xff]  ;;  %v1056_v55 = vpack.c.bf16 %v154_v47, %v150_v46 }
  0x2a   :  { %1037 = vmatpush1.bf16.msra.mxu0 %v1036_v58  ;;  %v163_v52 = vld [vmem:[%s2725_s1 + $0x3e8] sm:$0xff]  ;;  %v165_v54 = vld [vmem:[%s2725_s1 + $0x3f8] sm:$0xff]  ;;  %v1248_v56 = vpack.c.bf16 %v156_v50, %v152_v48  ;;  %v158_v58 = vld [vmem:[%s2725_s1 + $0x3c0] sm:$0xff] }
  0x2b   :  { %1229 = vmatpush1.bf16.msra.mxu1 %v1228_v59  ;;  %1039 = vmatprep.subr.bf16.mxu0 %v1038_v60  ;;  %v1058_v57 = vpack.c.bf16 %v163_v52, %v159_v51  ;;  %v162_v59 = vld [vmem:[%s2725_s1 + $0x3e0] sm:$0xff]  ;;  %v160_v60 = vld [vmem:[%s2725_s1 + $0x3d0] sm:$0xff]  ;;  %v1250_v61 = vpack.c.bf16 %v165_v54, %v161_v53  ;;  %v167_v63 = vld [vmem:[%s2725_s1 + $0x408] sm:$0xff] }
  0x2c   :  { %1231 = vmatprep.subr.bf16.mxu1 %v1230_v0  ;;  %v164_v62 = vld [vmem:[%s2725_s1 + $0x3f0] sm:$0xff]  ;;  %v171_v0 = vld [vmem:[%s2725_s1 + $0x428] sm:$0xff]  ;;  %v169_v1 = vld [vmem:[%s2725_s1 + $0x418] sm:$0xff]  ;;  %v1060_v3 = vpack.c.bf16 %v162_v59, %v158_v58 }
  0x2d   :  { %v173_v2 = vld [vmem:[%s2725_s1 + $0x438] sm:$0xff]  ;;  %v1252_v4 = vpack.c.bf16 %v164_v62, %v160_v60  ;;  %v1062_v5 = vpack.c.bf16 %v171_v0, %v167_v63  ;;  %v170_v7 = vld [vmem:[%s2725_s1 + $0x420] sm:$0xff]  ;;  %v172_v10 = vld [vmem:[%s2725_s1 + $0x430] sm:$0xff] }
  0x2e   :  { %1041 = vmatpush1.bf16.msra.mxu0 %v1040_v6  ;;  %v166_v6 = vld [vmem:[%s2725_s1 + $0x400] sm:$0xff]  ;;  %v175_v11 = vld [vmem:[%s2725_s1 + $0x448] sm:$0xff]  ;;  %v181_v14 = vld [vmem:[%s2725_s1 + $0x478] sm:$0xff] }
  0x2f   :  { %1233 = vmatpush1.bf16.msra.mxu1 %v1232_v8  ;;  %1043 = vmatprep.subr.bf16.mxu0 %v1042_v9  ;;  %v168_v8 = vld [vmem:[%s2725_s1 + $0x410] sm:$0xff]  ;;  %v1254_v9 = vpack.c.bf16 %v173_v2, %v169_v1  ;;  %v179_v12 = vld [vmem:[%s2725_s1 + $0x468] sm:$0xff]  ;;  %v14_v15 = vld [vmem:[%s2726_s0] sm:$0xff]  ;;  %v1064_v16 = vpack.c.bf16 %v170_v7, %v166_v6 }
  0x30   :  { %1235 = vmatprep.subr.bf16.mxu1 %v1234_v13  ;;  %v177_v13 = vld [vmem:[%s2725_s1 + $0x458] sm:$0xff]  ;;  %v1256_v17 = vpack.c.bf16 %v172_v10, %v168_v8  ;;  %v1066_v18 = vpack.c.bf16 %v179_v12, %v175_v11  ;;  %v180_v23 = vld [vmem:[%s2725_s1 + $0x470] sm:$0xff]  ;;  %v183_v24 = vld [vmem:[%s2725_s1 + $0x488] sm:$0xff] }
  0x31   :  { %v1258_v22 = vpack.c.bf16 %v181_v14, %v177_v13  ;;  %v185_v26 = vld [vmem:[%s2725_s1 + $0x498] sm:$0xff]  ;;  %v188_v35 = vld [vmem:[%s2725_s1 + $0x4b0] sm:$0xff]  ;;  %v191_v36 = vld [vmem:[%s2725_s1 + $0x4c8] sm:$0xff] }
  0x32   :  { %1045 = vmatpush1.bf16.msra.mxu0 %v1044_v19  ;;  %v174_v19 = vld [vmem:[%s2725_s1 + $0x440] sm:$0xff]  ;;  %v189_v27 = vld [vmem:[%s2725_s1 + $0x4b8] sm:$0xff]  ;;  %v196_v47 = vld [vmem:[%s2725_s1 + $0x4f0] sm:$0xff] }
  0x33   :  { %1237 = vmatpush1.bf16.msra.mxu1 %v1236_v20  ;;  %1047 = vmatprep.subr.bf16.mxu0 %v1046_v21  ;;  %v178_v20 = vld [vmem:[%s2725_s1 + $0x460] sm:$0xff]  ;;  %v176_v21 = vld [vmem:[%s2725_s1 + $0x450] sm:$0xff]  ;;  %v1262_v34 = vpack.c.bf16 %v189_v27, %v185_v26  ;;  %v193_v38 = vld [vmem:[%s2725_s1 + $0x4d8] sm:$0xff] }
  0x34   :  { %1239 = vmatprep.subr.bf16.mxu1 %v1238_v25  ;;  %v187_v25 = vld [vmem:[%s2725_s1 + $0x4a8] sm:$0xff]  ;;  %v1068_v28 = vpack.c.bf16 %v178_v20, %v174_v19  ;;  %v1260_v29 = vpack.c.bf16 %v180_v23, %v176_v21  ;;  %v197_v39 = vld [vmem:[%s2725_s1 + $0x4f8] sm:$0xff]  ;;  %v198_v53 = vld [vmem:[%s2725_s1 + $0x500] sm:$0xff] }
  0x35   :  { %v1070_v30 = vpack.c.bf16 %v187_v25, %v183_v24  ;;  %v1266_v46 = vpack.c.bf16 %v197_v39, %v193_v38  ;;  %v199_v48 = vld [vmem:[%s2725_s1 + $0x508] sm:$0xff]  ;;  %v201_v50 = vld [vmem:[%s2725_s1 + $0x518] sm:$0xff]  ;;  %v204_v58 = vld [vmem:[%s2725_s1 + $0x530] sm:$0xff] }
  0x36   :  { %1049 = vmatpush1.bf16.msra.mxu0 %v1048_v31  ;;  %v182_v31 = vld [vmem:[%s2725_s1 + $0x480] sm:$0xff]  ;;  %v205_v51 = vld [vmem:[%s2725_s1 + $0x538] sm:$0xff]  ;;  %v207_v60 = vld [vmem:[%s2725_s1 + $0x548] sm:$0xff] }
  0x37   :  { %1241 = vmatpush1.bf16.msra.mxu1 %v1240_v32  ;;  %1051 = vmatprep.subr.bf16.mxu0 %v1050_v33  ;;  %v186_v32 = vld [vmem:[%s2725_s1 + $0x4a0] sm:$0xff]  ;;  %v184_v33 = vld [vmem:[%s2725_s1 + $0x490] sm:$0xff]  ;;  %v1270_v59 = vpack.c.bf16 %v205_v51, %v201_v50  ;;  %v21_v62 = vld [vmem:[%s2726_s0 + $0x38] sm:$0xff] }
  0x38   :  { %1243 = vmatprep.subr.bf16.mxu1 %v1242_v37  ;;  %v195_v37 = vld [vmem:[%s2725_s1 + $0x4e8] sm:$0xff]  ;;  %v1072_v40 = vpack.c.bf16 %v186_v32, %v182_v31  ;;  %v1264_v41 = vpack.c.bf16 %v188_v35, %v184_v33  ;;  %v209_v63 = vld [vmem:[%s2725_s1 + $0x558] sm:$0xff]  ;;  %v20_v1 = vld [vmem:[%s2726_s0 + $0x30] sm:$0xff] }
  0x39   :  { %v1074_v42 = vpack.c.bf16 %v195_v37, %v191_v36  ;;  %v213_v0 = vld [vmem:[%s2725_s1 + $0x578] sm:$0xff]  ;;  %v210_v6 = vld [vmem:[%s2725_s1 + $0x560] sm:$0xff]  ;;  %v208_v7 = vld [vmem:[%s2725_s1 + $0x550] sm:$0xff] }
  0x3a   :  { %1053 = vmatpush1.bf16.msra.mxu0 %v1052_v43  ;;  %v190_v43 = vld [vmem:[%s2725_s1 + $0x4c0] sm:$0xff]  ;;  %v27_v8 = vld [vmem:[%s2726_s0 + $0x68] sm:$0xff]  ;;  %v212_v10 = vld [vmem:[%s2725_s1 + $0x570] sm:$0xff] }
  0x3b   :  { %1245 = vmatpush1.bf16.msra.mxu1 %v1244_v44  ;;  %1055 = vmatprep.subr.bf16.mxu0 %v1054_v45  ;;  %v194_v44 = vld [vmem:[%s2725_s1 + $0x4e0] sm:$0xff]  ;;  %v192_v45 = vld [vmem:[%s2725_s1 + $0x4d0] sm:$0xff]  ;;  %v215_v11 = vld [vmem:[%s2725_s1 + $0x588] sm:$0xff]  ;;  %v1276_v19 = vpack.c.bf16 %v212_v10, %v208_v7 }
  0x3c   :  { %1247 = vmatprep.subr.bf16.mxu1 %v1246_v49  ;;  %v203_v49 = vld [vmem:[%s2725_s1 + $0x528] sm:$0xff]  ;;  %v1076_v52 = vpack.c.bf16 %v194_v44, %v190_v43  ;;  %v1268_v54 = vpack.c.bf16 %v196_v47, %v192_v45  ;;  %v217_v13 = vld [vmem:[%s2725_s1 + $0x598] sm:$0xff]  ;;  %v218_v21 = vld [vmem:[%s2725_s1 + $0x5a0] sm:$0xff] }
  0x3d   :  { %v219_v12 = vld [vmem:[%s2725_s1 + $0x5a8] sm:$0xff]  ;;  %v221_v14 = vld [vmem:[%s2725_s1 + $0x5b8] sm:$0xff]  ;;  %v220_v23 = vld [vmem:[%s2725_s1 + $0x5b0] sm:$0xff] }
  0x3e   :  { %1057 = vmatpush1.bf16.msra.mxu0 %v1056_v55  ;;  %v1078_v55 = vpack.c.bf16 %v203_v49, %v199_v48  ;;  %v1086_v20 = vpack.c.bf16 %v219_v12, %v215_v11  ;;  %v1278_v24 = vpack.c.bf16 %v221_v14, %v217_v13  ;;  %v223_v25 = vld [vmem:[%s2725_s1 + $0x5c8] sm:$0xff]  ;;  %v32_v27 = vld [vmem:[%s2726_s0 + $0x90] sm:$0xff]  ;;  %v17_v31 = vld [vmem:[%s2726_s0 + $0x18] sm:$0xff] }
  0x3f   :  { %1249 = vmatpush1.bf16.msra.mxu1 %v1248_v56  ;;  %1059 = vmatprep.subr.bf16.mxu0 %v1058_v57  ;;  %v202_v56 = vld [vmem:[%s2725_s1 + $0x520] sm:$0xff]  ;;  %v200_v57 = vld [vmem:[%s2725_s1 + $0x510] sm:$0xff]  ;;  %v227_v26 = vld [vmem:[%s2725_s1 + $0x5e8] sm:$0xff] }
  0x40   :  { %1251 = vmatprep.subr.bf16.mxu1 %v1250_v61  ;;  %v211_v61 = vld [vmem:[%s2725_s1 + $0x568] sm:$0xff]  ;;  %v1080_v2 = vpack.c.bf16 %v202_v56, %v198_v53  ;;  %v1090_v33 = vpack.c.bf16 %v227_v26, %v223_v25  ;;  %v226_v35 = vld [vmem:[%s2725_s1 + $0x5e0] sm:$0xff]  ;;  %v224_v36 = vld [vmem:[%s2725_s1 + $0x5d0] sm:$0xff] }
  0x41   :  { %v228_v38 = vld [vmem:[%s2725_s1 + $0x5f0] sm:$0xff]  ;;  %v231_v39 = vld [vmem:[%s2725_s1 + $0x608] sm:$0xff]  ;;  %v234_v47 = vld [vmem:[%s2725_s1 + $0x620] sm:$0xff] }
  0x42   :  { %1061 = vmatpush1.bf16.msra.mxu0 %v1060_v3  ;;  %v206_v3 = vld [vmem:[%s2725_s1 + $0x540] sm:$0xff]  ;;  %v1284_v44 = vpack.c.bf16 %v228_v38, %v224_v36  ;;  %v232_v48 = vld [vmem:[%s2725_s1 + $0x610] sm:$0xff]  ;;  %v239_v51 = vld [vmem:[%s2725_s1 + $0x648] sm:$0xff] }
  0x43   :  { %1253 = vmatpush1.bf16.msra.mxu1 %v1252_v4  ;;  %1063 = vmatprep.subr.bf16.mxu0 %v1062_v5  ;;  %v1272_v4 = vpack.c.bf16 %v204_v58, %v200_v57  ;;  %v1082_v5 = vpack.c.bf16 %v211_v61, %v207_v60  ;;  %v236_v50 = vld [vmem:[%s2725_s1 + $0x630] sm:$0xff]  ;;  %v241_v53 = vld [vmem:[%s2725_s1 + $0x658] sm:$0xff]  ;;  %v238_v58 = vld [vmem:[%s2725_s1 + $0x640] sm:$0xff] }
  0x44   :  { %1255 = vmatprep.subr.bf16.mxu1 %v1254_v9  ;;  %v1274_v9 = vpack.c.bf16 %v213_v0, %v209_v63  ;;  %v1288_v56 = vpack.c.bf16 %v236_v50, %v232_v48  ;;  %v240_v60 = vld [vmem:[%s2725_s1 + $0x650] sm:$0xff]  ;;  %v247_v63 = vld [vmem:[%s2725_s1 + $0x688] sm:$0xff]  ;;  %v250_v7 = vld [vmem:[%s2725_s1 + $0x6a0] sm:$0xff] }
  0x45   :  { %509 = vmatmul.mubr.f32.vlgmr.msra.gmra.mrb[0].mxu0 %v14_v15  ;;  %v251_v0 = vld [vmem:[%s2725_s1 + $0x6a8] sm:$0xff]  ;;  %v252_v10 = vld [vmem:[%s2725_s1 + $0x6b0] sm:$0xff]  ;;  %v257_v13 = vld [vmem:[%s2725_s1 + $0x6d8] sm:$0xff] }
  0x46   :  { %1065 = vmatpush1.bf16.msra.mxu0 %v1064_v16  ;;  %776 = vmatmul.mubr.f32.vlgmr.msra.gmra.mrb[0].mxu1 %v14_v15  ;;  %v26_v15 = vld [vmem:[%s2726_s0 + $0x60] sm:$0xff]  ;;  %v1084_v16 = vpack.c.bf16 %v210_v6, %v206_v3  ;;  %v255_v11 = vld [vmem:[%s2725_s1 + $0x6c8] sm:$0xff]  ;;  %v261_v14 = vld [vmem:[%s2725_s1 + $0x6f8] sm:$0xff] }
  0x47   :  { %1257 = vmatpush1.bf16.msra.mxu1 %v1256_v17  ;;  %1067 = vmatprep.subr.bf16.mxu0 %v1066_v18  ;;  %v214_v17 = vld [vmem:[%s2725_s1 + $0x580] sm:$0xff]  ;;  %v33_v18 = vld [vmem:[%s2726_s0 + $0x98] sm:$0xff]  ;;  %v259_v12 = vld [vmem:[%s2725_s1 + $0x6e8] sm:$0xff] }
  0x48   :  { %1259 = vmatprep.subr.bf16.mxu1 %v1258_v22  ;;  %514 = vmatprep.mubr.f32.mxu0 %v21_v62  ;;  %v216_v22 = vld [vmem:[%s2725_s1 + $0x590] sm:$0xff]  ;;  %v246_v6 = vld [vmem:[%s2725_s1 + $0x680] sm:$0xff]  ;;  %v265_v25 = vld [vmem:[%s2725_s1 + $0x718] sm:$0xff] }
  0x49   :  { %781 = vmatprep.mubr.f32.mxu1 %v21_v62  ;;  %515 = vmatmul.mubr.f32.gmra.mrb[2].mxu0 %v20_v1  ;;  %v1280_v32 = vpack.c.bf16 %v220_v23, %v216_v22  ;;  %v244_v62 = vld [vmem:[%s2725_s1 + $0x670] sm:$0xff]  ;;  %v263_v23 = vld [vmem:[%s2725_s1 + $0x708] sm:$0xff]  ;;  %v269_v26 = vld [vmem:[%s2725_s1 + $0x738] sm:$0xff] }
  0x4a   :  { %1069 = vmatpush1.bf16.msra.mxu0 %v1068_v28  ;;  %782 = vmatmul.mubr.f32.gmra.mrb[2].mxu1 %v20_v1  ;;  %v225_v28 = vld [vmem:[%s2725_s1 + $0x5d8] sm:$0xff]  ;;  %v260_v22 = vld [vmem:[%s2725_s1 + $0x6f0] sm:$0xff]  ;;  %v275_v36 = vld [vmem:[%s2725_s1 + $0x768] sm:$0xff] }
  0x4b   :  { %1261 = vmatpush1.bf16.msra.mxu1 %v1260_v29  ;;  %1071 = vmatprep.subr.bf16.mxu0 %v1070_v30  ;;  %v229_v29 = vld [vmem:[%s2725_s1 + $0x5f8] sm:$0xff]  ;;  %v1088_v30 = vpack.c.bf16 %v218_v21, %v214_v17  ;;  %v1106_v17 = vpack.c.bf16 %v259_v12, %v255_v11  ;;  %v1298_v21 = vpack.c.bf16 %v261_v14, %v257_v13  ;;  %v283_v48 = vld [vmem:[%s2725_s1 + $0x7a8] sm:$0xff]  ;;  %v294_v14 = vld [vmem:[%s2725_s1 + $0x800] sm:$0xff] }
  0x4c   :  { %1263 = vmatprep.subr.bf16.mxu1 %v1262_v34  ;;  %520 = vmatprep.mubr.f32.mxu0 %v27_v8  ;;  %v222_v34 = vld [vmem:[%s2725_s1 + $0x5c0] sm:$0xff]  ;;  %v1282_v37 = vpack.c.bf16 %v229_v29, %v225_v28  ;;  %v249_v1 = vld [vmem:[%s2725_s1 + $0x698] sm:$0xff] }
  0x4d   :  { %787 = vmatprep.mubr.f32.mxu1 %v27_v8  ;;  %521 = vmatmul.mubr.f32.gmra.mrb[4].mxu0 %v26_v15  ;;  %v1092_v43 = vpack.c.bf16 %v226_v35, %v222_v34  ;;  %v248_v8 = vld [vmem:[%s2725_s1 + $0x690] sm:$0xff]  ;;  %v271_v35 = vld [vmem:[%s2725_s1 + $0x748] sm:$0xff]  ;;  %v277_v38 = vld [vmem:[%s2725_s1 + $0x778] sm:$0xff] }
  0x4e   :  { %1073 = vmatpush1.bf16.msra.mxu0 %v1072_v40  ;;  %788 = vmatmul.mubr.f32.gmra.mrb[4].mxu1 %v26_v15  ;;  %v235_v40 = vld [vmem:[%s2725_s1 + $0x628] sm:$0xff]  ;;  %v1104_v15 = vpack.c.bf16 %v250_v7, %v246_v6  ;;  %v268_v34 = vld [vmem:[%s2725_s1 + $0x730] sm:$0xff]  ;;  %v285_v50 = vld [vmem:[%s2725_s1 + $0x7b8] sm:$0xff] }
  0x4f   :  { %1265 = vmatpush1.bf16.msra.mxu1 %v1264_v41  ;;  %1075 = vmatprep.subr.bf16.mxu0 %v1074_v42  ;;  %v233_v41 = vld [vmem:[%s2725_s1 + $0x618] sm:$0xff]  ;;  %v1094_v45 = vpack.c.bf16 %v235_v40, %v231_v39  ;;  %v292_v6 = vld [vmem:[%s2725_s1 + $0x7f0] sm:$0xff]  ;;  %v295_v7 = vld [vmem:[%s2725_s1 + $0x808] sm:$0xff] }
  0x50   :  { %1267 = vmatprep.subr.bf16.mxu1 %v1266_v46  ;;  %526 = vmatprep.mubr.f32.mxu0 %v33_v18  ;;  %v237_v42 = vld [vmem:[%s2725_s1 + $0x638] sm:$0xff]  ;;  %v230_v46 = vld [vmem:[%s2725_s1 + $0x600] sm:$0xff] }
  0x51   :  { %793 = vmatprep.mubr.f32.mxu1 %v33_v18  ;;  %527 = vmatmul.mubr.f32.gmra.mrb[6].mxu0 %v32_v27  ;;  %v1286_v49 = vpack.c.bf16 %v237_v42, %v233_v41  ;;  %v254_v18 = vld [vmem:[%s2725_s1 + $0x6c0] sm:$0xff]  ;;  %v1114_v41 = vpack.c.bf16 %v275_v36, %v271_v35  ;;  %v317_v35 = vld [vmem:[%s2725_s1 + $0x8b8] sm:$0xff]  ;;  %v23_v36 = vld [vmem:[%s2726_s0 + $0x48] sm:$0xff] }
  0x52   :  { %1077 = vmatpush1.bf16.msra.mxu0 %v1076_v52  ;;  %794 = vmatmul.mubr.f32.gmra.mrb[6].mxu1 %v32_v27  ;;  %v243_v52 = vld [vmem:[%s2725_s1 + $0x668] sm:$0xff]  ;;  %v270_v42 = vld [vmem:[%s2725_s1 + $0x740] sm:$0xff] }
  0x53   :  { %1269 = vmatpush1.bf16.msra.mxu1 %v1268_v54  ;;  %1079 = vmatprep.subr.bf16.mxu0 %v1078_v55  ;;  %v245_v54 = vld [vmem:[%s2725_s1 + $0x678] sm:$0xff]  ;;  %v1096_v55 = vpack.c.bf16 %v234_v47, %v230_v46  ;;  %v1098_v57 = vpack.c.bf16 %v243_v52, %v239_v51  ;;  %v276_v46 = vld [vmem:[%s2725_s1 + $0x770] sm:$0xff]  ;;  %v279_v47 = vld [vmem:[%s2725_s1 + $0x788] sm:$0xff] }
  0x54   :  { %1271 = vmatprep.subr.bf16.mxu1 %v1270_v59  ;;  %597 = vmatprep.mubr.f32.mxu0 %v17_v31  ;;  %v242_v59 = vld [vmem:[%s2725_s1 + $0x660] sm:$0xff]  ;;  %v1290_v61 = vpack.c.bf16 %v245_v54, %v241_v53  ;;  %v1118_v53 = vpack.c.bf16 %v283_v48, %v279_v47  ;;  %v323_v47 = vld [vmem:[%s2725_s1 + $0x8e8] sm:$0xff]  ;;  %v321_v48 = vld [vmem:[%s2725_s1 + $0x8d8] sm:$0xff] }
  0x55   :  { %864 = vmatprep.mubr.f32.mxu1 %v17_v31  ;;  %v1100_v3 = vpack.c.bf16 %v242_v59, %v238_v58  ;;  %v266_v31 = vld [vmem:[%s2725_s1 + $0x720] sm:$0xff]  ;;  %v284_v58 = vld [vmem:[%s2725_s1 + $0x7b0] sm:$0xff]  ;;  %v287_v59 = vld [vmem:[%s2725_s1 + $0x7c8] sm:$0xff] }
  0x56   :  { %1081 = vmatpush1.bf16.msra.mxu0 %v1080_v2  ;;  %v253_v2 = vld [vmem:[%s2725_s1 + $0x6b8] sm:$0xff]  ;;  %v278_v54 = vld [vmem:[%s2725_s1 + $0x780] sm:$0xff] }
  0x57   :  { %1273 = vmatpush1.bf16.msra.mxu1 %v1272_v4  ;;  %1083 = vmatprep.subr.bf16.mxu0 %v1082_v5  ;;  %v1292_v4 = vpack.c.bf16 %v244_v62, %v240_v60  ;;  %v1102_v5 = vpack.c.bf16 %v251_v0, %v247_v63  ;;  %v291_v60 = vld [vmem:[%s2725_s1 + $0x7e8] sm:$0xff]  ;;  %v293_v62 = vld [vmem:[%s2725_s1 + $0x7f8] sm:$0xff] }
  0x58   :  { %1275 = vmatprep.subr.bf16.mxu1 %v1274_v9  ;;  %v1294_v9 = vpack.c.bf16 %v253_v2, %v249_v1  ;;  %v1122_v1 = vpack.c.bf16 %v291_v60, %v287_v59  ;;  %v286_v2 = vld [vmem:[%s2725_s1 + $0x7c0] sm:$0xff]  ;;  %v324_v59 = vld [vmem:[%s2725_s1 + $0x8f0] sm:$0xff]  ;;  %v327_v60 = vld [vmem:[%s2725_s1 + $0x908] sm:$0xff] }
  0x5a   :  { %1085 = vmatpush1.bf16.msra.mxu0 %v1084_v16  ;;  %v1296_v16 = vpack.c.bf16 %v252_v10, %v248_v8  ;;  %v299_v8 = vld [vmem:[%s2725_s1 + $0x828] sm:$0xff]  ;;  %v301_v10 = vld [vmem:[%s2725_s1 + $0x838] sm:$0xff] }
  0x5b   :  { %1277 = vmatpush1.bf16.msra.mxu1 %v1276_v19  ;;  %1087 = vmatprep.subr.bf16.mxu0 %v1086_v20  ;;  %v258_v19 = vld [vmem:[%s2725_s1 + $0x6e0] sm:$0xff]  ;;  %v256_v20 = vld [vmem:[%s2725_s1 + $0x6d0] sm:$0xff]  ;;  %v1126_v13 = vpack.c.bf16 %v299_v8, %v295_v7 }
  0x5c   :  { %1279 = vmatprep.subr.bf16.mxu1 %v1278_v24  ;;  %v267_v24 = vld [vmem:[%s2725_s1 + $0x728] sm:$0xff]  ;;  %v1108_v27 = vpack.c.bf16 %v258_v19, %v254_v18  ;;  %v1300_v28 = vpack.c.bf16 %v260_v22, %v256_v20  ;;  %v300_v18 = vld [vmem:[%s2725_s1 + $0x830] sm:$0xff]  ;;  %v309_v22 = vld [vmem:[%s2725_s1 + $0x878] sm:$0xff] }
  0x5d   :  { %v1110_v29 = vpack.c.bf16 %v267_v24, %v263_v23  ;;  %v303_v19 = vld [vmem:[%s2725_s1 + $0x848] sm:$0xff]  ;;  %v16_v23 = vld [vmem:[%s2726_s0 + $0x10] sm:$0xff] }
  0x5e   :  { %1089 = vmatpush1.bf16.msra.mxu0 %v1088_v30  ;;  %v262_v30 = vld [vmem:[%s2725_s1 + $0x700] sm:$0xff]  ;;  %v307_v20 = vld [vmem:[%s2725_s1 + $0x868] sm:$0xff]  ;;  %v328_v7 = vld [vmem:[%s2725_s1 + $0x910] sm:$0xff] }
  0x5f   :  { %1281 = vmatpush1.bf16.msra.mxu1 %v1280_v32  ;;  %1091 = vmatprep.subr.bf16.mxu0 %v1090_v33  ;;  %v264_v32 = vld [vmem:[%s2725_s1 + $0x710] sm:$0xff]  ;;  %v1302_v33 = vpack.c.bf16 %v269_v26, %v265_v25  ;;  %v1112_v39 = vpack.c.bf16 %v266_v31, %v262_v30  ;;  %v1130_v26 = vpack.c.bf16 %v307_v20, %v303_v19  ;;  %v338_v19 = vld [vmem:[%s2725_s1 + $0x960] sm:$0xff] }
  0x60   :  { %1283 = vmatprep.subr.bf16.mxu1 %v1282_v37  ;;  %v273_v37 = vld [vmem:[%s2725_s1 + $0x758] sm:$0xff]  ;;  %v1304_v40 = vpack.c.bf16 %v268_v34, %v264_v32  ;;  %v308_v31 = vld [vmem:[%s2725_s1 + $0x870] sm:$0xff]  ;;  %v311_v32 = vld [vmem:[%s2725_s1 + $0x888] sm:$0xff] }
  0x61   :  { %v313_v34 = vld [vmem:[%s2725_s1 + $0x898] sm:$0xff]  ;;  %v336_v20 = vld [vmem:[%s2725_s1 + $0x950] sm:$0xff] }
  0x62   :  { %1093 = vmatpush1.bf16.msra.mxu0 %v1092_v43  ;;  %v274_v43 = vld [vmem:[%s2725_s1 + $0x760] sm:$0xff] }
  0x63   :  { %1285 = vmatpush1.bf16.msra.mxu1 %v1284_v44  ;;  %1095 = vmatprep.subr.bf16.mxu0 %v1094_v45  ;;  %v272_v44 = vld [vmem:[%s2725_s1 + $0x750] sm:$0xff]  ;;  %v1306_v45 = vpack.c.bf16 %v277_v38, %v273_v37  ;;  %v1116_v51 = vpack.c.bf16 %v274_v43, %v270_v42  ;;  %v22_v38 = vld [vmem:[%s2726_s0 + $0x40] sm:$0xff] }
  0x64   :  { %1287 = vmatprep.subr.bf16.mxu1 %v1286_v49  ;;  %v281_v49 = vld [vmem:[%s2725_s1 + $0x798] sm:$0xff]  ;;  %v1308_v52 = vpack.c.bf16 %v276_v46, %v272_v44  ;;  %v314_v42 = vld [vmem:[%s2725_s1 + $0x8a0] sm:$0xff]  ;;  %v312_v43 = vld [vmem:[%s2725_s1 + $0x890] sm:$0xff]  ;;  %v1326_v44 = vpack.c.bf16 %v317_v35, %v313_v34 }
  0x65   :  { %v319_v46 = vld [vmem:[%s2725_s1 + $0x8c8] sm:$0xff]  ;;  %v348_v34 = vld [vmem:[%s2725_s1 + $0x9b0] sm:$0xff] }
  0x66   :  { %1097 = vmatpush1.bf16.msra.mxu0 %v1096_v55  ;;  %v282_v55 = vld [vmem:[%s2725_s1 + $0x7a0] sm:$0xff]  ;;  %v351_v35 = vld [vmem:[%s2725_s1 + $0x9c8] sm:$0xff] }
  0x67   :  { %1289 = vmatpush1.bf16.msra.mxu1 %v1288_v56  ;;  %1099 = vmatprep.subr.bf16.mxu0 %v1098_v57  ;;  %v280_v56 = vld [vmem:[%s2725_s1 + $0x790] sm:$0xff]  ;;  %v1310_v57 = vpack.c.bf16 %v285_v50, %v281_v49  ;;  %v1120_v63 = vpack.c.bf16 %v282_v55, %v278_v54  ;;  %v325_v49 = vld [vmem:[%s2725_s1 + $0x8f8] sm:$0xff]  ;;  %v1138_v54 = vpack.c.bf16 %v323_v47, %v319_v46  ;;  %v318_v55 = vld [vmem:[%s2725_s1 + $0x8c0] sm:$0xff] }
  0x68   :  { %1291 = vmatprep.subr.bf16.mxu1 %v1290_v61  ;;  %v289_v61 = vld [vmem:[%s2725_s1 + $0x7d8] sm:$0xff]  ;;  %v1312_v0 = vpack.c.bf16 %v284_v58, %v280_v56  ;;  %v322_v56 = vld [vmem:[%s2725_s1 + $0x8e0] sm:$0xff]  ;;  %v1330_v58 = vpack.c.bf16 %v325_v49, %v321_v48  ;;  %v356_v46 = vld [vmem:[%s2725_s1 + $0x9f0] sm:$0xff] }
  0x69   :  { %v29_v50 = vld [vmem:[%s2726_s0 + $0x78] sm:$0xff]  ;;  %v359_v47 = vld [vmem:[%s2725_s1 + $0xa08] sm:$0xff] }
  0x6a   :  { %1101 = vmatpush1.bf16.msra.mxu0 %v1100_v3  ;;  %v290_v3 = vld [vmem:[%s2725_s1 + $0x7e0] sm:$0xff]  ;;  %v363_v48 = vld [vmem:[%s2725_s1 + $0xa28] sm:$0xff]  ;;  %v361_v49 = vld [vmem:[%s2725_s1 + $0xa18] sm:$0xff] }
  0x6b   :  { %1293 = vmatpush1.bf16.msra.mxu1 %v1292_v4  ;;  %1103 = vmatprep.subr.bf16.mxu0 %v1102_v5  ;;  %v288_v4 = vld [vmem:[%s2725_s1 + $0x7d0] sm:$0xff]  ;;  %v1314_v5 = vpack.c.bf16 %v293_v62, %v289_v61  ;;  %v1124_v11 = vpack.c.bf16 %v290_v3, %v286_v2  ;;  %v331_v61 = vld [vmem:[%s2725_s1 + $0x928] sm:$0xff]  ;;  %v329_v62 = vld [vmem:[%s2725_s1 + $0x918] sm:$0xff] }
  0x6c   :  { %1295 = vmatprep.subr.bf16.mxu1 %v1294_v9  ;;  %v297_v9 = vld [vmem:[%s2725_s1 + $0x818] sm:$0xff]  ;;  %v1316_v12 = vpack.c.bf16 %v292_v6, %v288_v4  ;;  %v34_v2 = vld [vmem:[%s2726_s0 + $0xa0] sm:$0xff]  ;;  %v1142_v4 = vpack.c.bf16 %v331_v61, %v327_v60  ;;  %v371_v60 = vld [vmem:[%s2725_s1 + $0xa68] sm:$0xff] }
  0x6d   :  { %v330_v6 = vld [vmem:[%s2725_s1 + $0x920] sm:$0xff]  ;;  %v369_v61 = vld [vmem:[%s2725_s1 + $0xa58] sm:$0xff] }
  0x6e   :  { %1105 = vmatpush1.bf16.msra.mxu0 %v1104_v15  ;;  %v298_v15 = vld [vmem:[%s2725_s1 + $0x820] sm:$0xff] }
  0x6f   :  { %1297 = vmatpush1.bf16.msra.mxu1 %v1296_v16  ;;  %1107 = vmatprep.subr.bf16.mxu0 %v1106_v17  ;;  %v296_v16 = vld [vmem:[%s2725_s1 + $0x810] sm:$0xff]  ;;  %v1318_v17 = vpack.c.bf16 %v301_v10, %v297_v9  ;;  %v1128_v24 = vpack.c.bf16 %v298_v15, %v294_v14  ;;  %v335_v10 = vld [vmem:[%s2725_s1 + $0x948] sm:$0xff] }
  0x70   :  { %1299 = vmatprep.subr.bf16.mxu1 %v1298_v21  ;;  %v305_v21 = vld [vmem:[%s2725_s1 + $0x858] sm:$0xff]  ;;  %v1320_v25 = vpack.c.bf16 %v300_v18, %v296_v16  ;;  %v332_v9 = vld [vmem:[%s2725_s1 + $0x930] sm:$0xff]  ;;  %v19_v14 = vld [vmem:[%s2726_s0 + $0x28] sm:$0xff] }
  0x71   :  { %v1322_v30 = vpack.c.bf16 %v309_v22, %v305_v21  ;;  %v1336_v16 = vpack.c.bf16 %v332_v9, %v328_v7  ;;  %v334_v18 = vld [vmem:[%s2725_s1 + $0x940] sm:$0xff]  ;;  %v340_v22 = vld [vmem:[%s2725_s1 + $0x970] sm:$0xff]  ;;  %v375_v7 = vld [vmem:[%s2725_s1 + $0xa88] sm:$0xff] }
  0x72   :  { %1109 = vmatpush1.bf16.msra.mxu0 %v1108_v27  ;;  %v302_v27 = vld [vmem:[%s2725_s1 + $0x840] sm:$0xff]  ;;  %v377_v9 = vld [vmem:[%s2725_s1 + $0xa98] sm:$0xff] }
  0x73   :  { %1301 = vmatpush1.bf16.msra.mxu1 %v1300_v28  ;;  %1111 = vmatprep.subr.bf16.mxu0 %v1110_v29  ;;  %v306_v28 = vld [vmem:[%s2725_s1 + $0x860] sm:$0xff]  ;;  %v304_v29 = vld [vmem:[%s2725_s1 + $0x850] sm:$0xff] }
  0x74   :  { %1303 = vmatprep.subr.bf16.mxu1 %v1302_v33  ;;  %v315_v33 = vld [vmem:[%s2725_s1 + $0x8a8] sm:$0xff]  ;;  %v1132_v37 = vpack.c.bf16 %v306_v28, %v302_v27  ;;  %v1148_v27 = vpack.c.bf16 %v338_v19, %v334_v18  ;;  %v1340_v28 = vpack.c.bf16 %v340_v22, %v336_v20  ;;  %v380_v18 = vld [vmem:[%s2725_s1 + $0xab0] sm:$0xff]  ;;  %v389_v22 = vld [vmem:[%s2725_s1 + $0xaf8] sm:$0xff] }
  0x75   :  { %v383_v19 = vld [vmem:[%s2725_s1 + $0xac8] sm:$0xff] }
  0x76   :  { %1113 = vmatpush1.bf16.msra.mxu0 %v1112_v39  ;;  %v1324_v39 = vpack.c.bf16 %v308_v31, %v304_v29  ;;  %v346_v31 = vld [vmem:[%s2725_s1 + $0x9a0] sm:$0xff]  ;;  %v387_v20 = vld [vmem:[%s2725_s1 + $0xae8] sm:$0xff] }
  0x77   :  { %1305 = vmatpush1.bf16.msra.mxu1 %v1304_v40  ;;  %1115 = vmatprep.subr.bf16.mxu0 %v1114_v41  ;;  %v1134_v40 = vpack.c.bf16 %v315_v33, %v311_v32  ;;  %v310_v41 = vld [vmem:[%s2725_s1 + $0x880] sm:$0xff]  ;;  %v344_v32 = vld [vmem:[%s2725_s1 + $0x990] sm:$0xff] }
  0x78   :  { %1307 = vmatprep.subr.bf16.mxu1 %v1306_v45  ;;  %v316_v45 = vld [vmem:[%s2725_s1 + $0x8b0] sm:$0xff] }
  0x7a   :  { %1117 = vmatpush1.bf16.msra.mxu0 %v1116_v51  ;;  %v1136_v51 = vpack.c.bf16 %v314_v42, %v310_v41  ;;  %v350_v42 = vld [vmem:[%s2725_s1 + $0x9c0] sm:$0xff] }
  0x7b   :  { %1309 = vmatpush1.bf16.msra.mxu1 %v1308_v52  ;;  %1119 = vmatprep.subr.bf16.mxu0 %v1118_v53  ;;  %v28_v52 = vld [vmem:[%s2726_s0 + $0x70] sm:$0xff]  ;;  %v1328_v53 = vpack.c.bf16 %v316_v45, %v312_v43  ;;  %v354_v43 = vld [vmem:[%s2725_s1 + $0x9e0] sm:$0xff] }
  0x7c   :  { %1311 = vmatprep.subr.bf16.mxu1 %v1310_v57  ;;  %v320_v57 = vld [vmem:[%s2725_s1 + $0x8d0] sm:$0xff] }
  0x7d   :  { %v1332_v3 = vpack.c.bf16 %v324_v59, %v320_v57  ;;  %v367_v59 = vld [vmem:[%s2725_s1 + $0xa48] sm:$0xff] }
  0x7e   :  { %1121 = vmatpush1.bf16.msra.mxu0 %v1120_v63  ;;  %v333_v63 = vld [vmem:[%s2725_s1 + $0x938] sm:$0xff] }
  0x7f   :  { %1313 = vmatpush1.bf16.msra.mxu1 %v1312_v0  ;;  %1123 = vmatprep.subr.bf16.mxu0 %v1122_v1  ;;  %v35_v0 = vld [vmem:[%s2726_s0 + $0xa8] sm:$0xff]  ;;  %v1140_v1 = vpack.c.bf16 %v322_v56, %v318_v55  ;;  %v1334_v8 = vpack.c.bf16 %v333_v63, %v329_v62  ;;  %v362_v55 = vld [vmem:[%s2725_s1 + $0xa20] sm:$0xff]  ;;  %v360_v56 = vld [vmem:[%s2725_s1 + $0xa10] sm:$0xff] }
  0x80   :  { %1315 = vmatprep.subr.bf16.mxu1 %v1314_v5  ;;  %v326_v5 = vld [vmem:[%s2725_s1 + $0x900] sm:$0xff]  ;;  %v373_v62 = vld [vmem:[%s2725_s1 + $0xa78] sm:$0xff] }
  0x81   :  { %v1144_v15 = vpack.c.bf16 %v330_v6, %v326_v5  ;;  %v1354_v5 = vpack.c.bf16 %v373_v62, %v369_v61  ;;  %v372_v6 = vld [vmem:[%s2725_s1 + $0xa70] sm:$0xff]  ;;  %v406_v62 = vld [vmem:[%s2725_s1 + $0xb80] sm:$0xff] }
  0x82   :  { %1125 = vmatpush1.bf16.msra.mxu0 %v1124_v11  ;;  %v339_v11 = vld [vmem:[%s2725_s1 + $0x968] sm:$0xff] }
  0x83   :  { %1317 = vmatpush1.bf16.msra.mxu1 %v1316_v12  ;;  %1127 = vmatprep.subr.bf16.mxu0 %v1126_v13  ;;  %v337_v12 = vld [vmem:[%s2725_s1 + $0x958] sm:$0xff] }
  0x84   :  { %1319 = vmatprep.subr.bf16.mxu1 %v1318_v17  ;;  %v341_v13 = vld [vmem:[%s2725_s1 + $0x978] sm:$0xff]  ;;  %v1146_v17 = vpack.c.bf16 %v339_v11, %v335_v10 }
  0x85   :  { %598 = vmatmul.mubr.f32.vlgmr.msra.gmra.mrb[0].mxu0 %v16_v23  ;;  %v1338_v21 = vpack.c.bf16 %v341_v13, %v337_v12  ;;  %v381_v10 = vld [vmem:[%s2725_s1 + $0xab8] sm:$0xff] }
  0x86   :  { %1129 = vmatpush1.bf16.msra.mxu0 %v1128_v24  ;;  %865 = vmatmul.mubr.f32.vlgmr.msra.gmra.mrb[0].mxu1 %v16_v23  ;;  %v343_v23 = vld [vmem:[%s2725_s1 + $0x988] sm:$0xff] }
  0x87   :  { %1321 = vmatpush1.bf16.msra.mxu1 %v1320_v25  ;;  %1131 = vmatprep.subr.bf16.mxu0 %v1130_v26  ;;  %v347_v24 = vld [vmem:[%s2725_s1 + $0x9a8] sm:$0xff]  ;;  %v345_v25 = vld [vmem:[%s2725_s1 + $0x998] sm:$0xff] }
  0x88   :  { %1323 = vmatprep.subr.bf16.mxu1 %v1322_v30  ;;  %603 = vmatprep.mubr.f32.mxu0 %v23_v36  ;;  %v349_v26 = vld [vmem:[%s2725_s1 + $0x9b8] sm:$0xff]  ;;  %v1150_v29 = vpack.c.bf16 %v347_v24, %v343_v23  ;;  %v342_v30 = vld [vmem:[%s2725_s1 + $0x980] sm:$0xff] }
  0x89   :  { %870 = vmatprep.mubr.f32.mxu1 %v23_v36  ;;  %604 = vmatmul.mubr.f32.gmra.mrb[2].mxu0 %v22_v38  ;;  %v1342_v33 = vpack.c.bf16 %v349_v26, %v345_v25  ;;  %v355_v36 = vld [vmem:[%s2725_s1 + $0x9e8] sm:$0xff]  ;;  %v1170_v25 = vpack.c.bf16 %v387_v20, %v383_v19  ;;  %v382_v26 = vld [vmem:[%s2725_s1 + $0xac0] sm:$0xff]  ;;  %v24_v19 = vld [vmem:[%s2726_s0 + $0x50] sm:$0xff] }
  0x8a   :  { %1133 = vmatpush1.bf16.msra.mxu0 %v1132_v37  ;;  %871 = vmatmul.mubr.f32.gmra.mrb[2].mxu1 %v22_v38  ;;  %v353_v37 = vld [vmem:[%s2725_s1 + $0x9d8] sm:$0xff]  ;;  %v1154_v41 = vpack.c.bf16 %v355_v36, %v351_v35  ;;  %v31_v20 = vld [vmem:[%s2726_s0 + $0x88] sm:$0xff] }
  0x8b   :  { %1325 = vmatpush1.bf16.msra.mxu1 %v1324_v39  ;;  %1135 = vmatprep.subr.bf16.mxu0 %v1134_v40  ;;  %v357_v38 = vld [vmem:[%s2725_s1 + $0x9f8] sm:$0xff]  ;;  %v1152_v39 = vpack.c.bf16 %v346_v31, %v342_v30  ;;  %v1344_v40 = vpack.c.bf16 %v348_v34, %v344_v32  ;;  %v388_v30 = vld [vmem:[%s2725_s1 + $0xaf0] sm:$0xff]  ;;  %v391_v31 = vld [vmem:[%s2725_s1 + $0xb08] sm:$0xff] }
  0x8c   :  { %1327 = vmatprep.subr.bf16.mxu1 %v1326_v44  ;;  %609 = vmatprep.mubr.f32.mxu0 %v29_v50  ;;  %v352_v44 = vld [vmem:[%s2725_s1 + $0x9d0] sm:$0xff]  ;;  %v1346_v45 = vpack.c.bf16 %v357_v38, %v353_v37  ;;  %v395_v32 = vld [vmem:[%s2725_s1 + $0xb28] sm:$0xff]  ;;  %v397_v34 = vld [vmem:[%s2725_s1 + $0xb38] sm:$0xff] }
  0x8d   :  { %876 = vmatprep.mubr.f32.mxu1 %v29_v50  ;;  %610 = vmatmul.mubr.f32.gmra.mrb[4].mxu0 %v28_v52  ;;  %v365_v50 = vld [vmem:[%s2725_s1 + $0xa38] sm:$0xff]  ;;  %v1174_v37 = vpack.c.bf16 %v395_v32, %v391_v31  ;;  %v390_v38 = vld [vmem:[%s2725_s1 + $0xb00] sm:$0xff] }
  0x8e   :  { %1137 = vmatpush1.bf16.msra.mxu0 %v1136_v51  ;;  %877 = vmatmul.mubr.f32.gmra.mrb[4].mxu1 %v28_v52  ;;  %v1156_v51 = vpack.c.bf16 %v354_v43, %v350_v42  ;;  %v1348_v52 = vpack.c.bf16 %v356_v46, %v352_v44  ;;  %v1350_v57 = vpack.c.bf16 %v365_v50, %v361_v49  ;;  %v396_v42 = vld [vmem:[%s2725_s1 + $0xb30] sm:$0xff]  ;;  %v399_v43 = vld [vmem:[%s2725_s1 + $0xb48] sm:$0xff]  ;;  %v405_v46 = vld [vmem:[%s2725_s1 + $0xb78] sm:$0xff] }
  0x8f   :  { %1329 = vmatpush1.bf16.msra.mxu1 %v1328_v53  ;;  %1139 = vmatprep.subr.bf16.mxu0 %v1138_v54  ;;  %v1158_v53 = vpack.c.bf16 %v363_v48, %v359_v47  ;;  %v358_v54 = vld [vmem:[%s2725_s1 + $0xa00] sm:$0xff]  ;;  %v403_v44 = vld [vmem:[%s2725_s1 + $0xb68] sm:$0xff] }
  0x90   :  { %1331 = vmatprep.subr.bf16.mxu1 %v1330_v58  ;;  %615 = vmatprep.mubr.f32.mxu0 %v35_v0  ;;  %v364_v58 = vld [vmem:[%s2725_s1 + $0xa30] sm:$0xff]  ;;  %v1160_v63 = vpack.c.bf16 %v362_v55, %v358_v54  ;;  %v1178_v49 = vpack.c.bf16 %v403_v44, %v399_v43  ;;  %v398_v50 = vld [vmem:[%s2725_s1 + $0xb40] sm:$0xff]  ;;  %v407_v55 = vld [vmem:[%s2725_s1 + $0xb88] sm:$0xff] }
  0x91   :  { %882 = vmatprep.mubr.f32.mxu1 %v35_v0  ;;  %616 = vmatmul.mubr.f32.gmra.mrb[6].mxu0 %v34_v2  ;;  %v1352_v0 = vpack.c.bf16 %v364_v58, %v360_v56  ;;  %v404_v54 = vld [vmem:[%s2725_s1 + $0xb70] sm:$0xff]  ;;  %v411_v56 = vld [vmem:[%s2725_s1 + $0xba8] sm:$0xff]  ;;  %v413_v58 = vld [vmem:[%s2725_s1 + $0xbb8] sm:$0xff] }
  0x92   :  { %1141 = vmatpush1.bf16.msra.mxu0 %v1140_v1  ;;  %883 = vmatmul.mubr.f32.gmra.mrb[6].mxu1 %v34_v2  ;;  %v1162_v1 = vpack.c.bf16 %v371_v60, %v367_v59  ;;  %v366_v2 = vld [vmem:[%s2725_s1 + $0xa40] sm:$0xff]  ;;  %v1182_v61 = vpack.c.bf16 %v411_v56, %v407_v55 }
  0x93   :  { %1333 = vmatpush1.bf16.msra.mxu1 %v1332_v3  ;;  %1143 = vmatprep.subr.bf16.mxu0 %v1142_v4  ;;  %v370_v3 = vld [vmem:[%s2725_s1 + $0xa60] sm:$0xff]  ;;  %v368_v4 = vld [vmem:[%s2725_s1 + $0xa50] sm:$0xff] }
  0x94   :  { %1335 = vmatprep.subr.bf16.mxu1 %v1334_v8  ;;  %686 = vmatprep.mubr.f32.mxu0 %v19_v14  ;;  %v379_v8 = vld [vmem:[%s2725_s1 + $0xaa8] sm:$0xff]  ;;  %v1164_v11 = vpack.c.bf16 %v370_v3, %v366_v2  ;;  %v1356_v12 = vpack.c.bf16 %v372_v6, %v368_v4  ;;  %v412_v2 = vld [vmem:[%s2725_s1 + $0xbb0] sm:$0xff]  ;;  %v421_v6 = vld [vmem:[%s2725_s1 + $0xbf8] sm:$0xff] }
  0x95   :  { %953 = vmatprep.mubr.f32.mxu1 %v19_v14  ;;  %v1166_v13 = vpack.c.bf16 %v379_v8, %v375_v7  ;;  %v374_v14 = vld [vmem:[%s2725_s1 + $0xa80] sm:$0xff]  ;;  %v415_v3 = vld [vmem:[%s2725_s1 + $0xbc8] sm:$0xff] }
  0x96   :  { %1145 = vmatpush1.bf16.msra.mxu0 %v1144_v15  ;;  %v378_v15 = vld [vmem:[%s2725_s1 + $0xaa0] sm:$0xff]  ;;  %v419_v4 = vld [vmem:[%s2725_s1 + $0xbe8] sm:$0xff] }
  0x97   :  { %1337 = vmatpush1.bf16.msra.mxu1 %v1336_v16  ;;  %1147 = vmatprep.subr.bf16.mxu0 %v1146_v17  ;;  %v376_v16 = vld [vmem:[%s2725_s1 + $0xa90] sm:$0xff]  ;;  %v1358_v17 = vpack.c.bf16 %v381_v10, %v377_v9  ;;  %v1168_v23 = vpack.c.bf16 %v378_v15, %v374_v14  ;;  %v1186_v9 = vpack.c.bf16 %v419_v4, %v415_v3  ;;  %v414_v10 = vld [vmem:[%s2725_s1 + $0xbc0] sm:$0xff] }
  0x98   :  { %1339 = vmatprep.subr.bf16.mxu1 %v1338_v21  ;;  %v385_v21 = vld [vmem:[%s2725_s1 + $0xad8] sm:$0xff]  ;;  %v1360_v24 = vpack.c.bf16 %v380_v18, %v376_v16  ;;  %v420_v14 = vld [vmem:[%s2725_s1 + $0xbf0] sm:$0xff] }
  0x99   :  { %v25_v18 = vld [vmem:[%s2726_s0 + $0x58] sm:$0xff] }
  0x9a   :  { %1149 = vmatpush1.bf16.msra.mxu0 %v1148_v27  ;;  %v386_v27 = vld [vmem:[%s2725_s1 + $0xae0] sm:$0xff] }
  0x9b   :  { %1341 = vmatpush1.bf16.msra.mxu1 %v1340_v28  ;;  %1151 = vmatprep.subr.bf16.mxu0 %v1150_v29  ;;  %v384_v28 = vld [vmem:[%s2725_s1 + $0xad0] sm:$0xff]  ;;  %v1362_v29 = vpack.c.bf16 %v389_v22, %v385_v21  ;;  %v1172_v35 = vpack.c.bf16 %v386_v27, %v382_v26  ;;  %v30_v21 = vld [vmem:[%s2726_s0 + $0x80] sm:$0xff]  ;;  %v37_v22 = vld [vmem:[%s2726_s0 + $0xb8] sm:$0xff] }
  0x9c   :  { %1343 = vmatprep.subr.bf16.mxu1 %v1342_v33  ;;  %v393_v33 = vld [vmem:[%s2725_s1 + $0xb18] sm:$0xff]  ;;  %v1364_v36 = vpack.c.bf16 %v388_v30, %v384_v28  ;;  %v422_v27 = vld [vmem:[%s2727_s2] sm:$0xf] }
  0x9e   :  { %1153 = vmatpush1.bf16.msra.mxu0 %v1152_v39  ;;  %v394_v39 = vld [vmem:[%s2725_s1 + $0xb20] sm:$0xff] }
  0x9f   :  { %1345 = vmatpush1.bf16.msra.mxu1 %v1344_v40  ;;  %1155 = vmatprep.subr.bf16.mxu0 %v1154_v41  ;;  %v392_v40 = vld [vmem:[%s2725_s1 + $0xb10] sm:$0xff]  ;;  %v1366_v41 = vpack.c.bf16 %v397_v34, %v393_v33  ;;  %v1176_v47 = vpack.c.bf16 %v394_v39, %v390_v38 }
  0xa0   :  { %1347 = vmatprep.subr.bf16.mxu1 %v1346_v45  ;;  %v401_v45 = vld [vmem:[%s2725_s1 + $0xb58] sm:$0xff]  ;;  %v1368_v48 = vpack.c.bf16 %v396_v42, %v392_v40 }
  0xa2   :  { %1157 = vmatpush1.bf16.msra.mxu0 %v1156_v51  ;;  %v402_v51 = vld [vmem:[%s2725_s1 + $0xb60] sm:$0xff] }
  0xa3   :  { %1349 = vmatpush1.bf16.msra.mxu1 %v1348_v52  ;;  %1159 = vmatprep.subr.bf16.mxu0 %v1158_v53  ;;  %v400_v52 = vld [vmem:[%s2725_s1 + $0xb50] sm:$0xff]  ;;  %v1370_v53 = vpack.c.bf16 %v405_v46, %v401_v45  ;;  %v1180_v59 = vpack.c.bf16 %v402_v51, %v398_v50 }
  0xa4   :  { %1351 = vmatprep.subr.bf16.mxu1 %v1350_v57  ;;  %v409_v57 = vld [vmem:[%s2725_s1 + $0xb98] sm:$0xff]  ;;  %v1372_v60 = vpack.c.bf16 %v404_v54, %v400_v52 }
  0xa6   :  { %1161 = vmatpush1.bf16.msra.mxu0 %v1160_v63  ;;  %v410_v63 = vld [vmem:[%s2725_s1 + $0xba0] sm:$0xff] }
  0xa7   :  { %1353 = vmatpush1.bf16.msra.mxu1 %v1352_v0  ;;  %1163 = vmatprep.subr.bf16.mxu0 %v1162_v1  ;;  %v408_v0 = vld [vmem:[%s2725_s1 + $0xb90] sm:$0xff]  ;;  %v1374_v1 = vpack.c.bf16 %v413_v58, %v409_v57  ;;  %v1184_v7 = vpack.c.bf16 %v410_v63, %v406_v62 }
  0xa8   :  { %1355 = vmatprep.subr.bf16.mxu1 %v1354_v5  ;;  %v417_v5 = vld [vmem:[%s2725_s1 + $0xbd8] sm:$0xff]  ;;  %v1376_v8 = vpack.c.bf16 %v412_v2, %v408_v0 }
  0xaa   :  { %1165 = vmatpush1.bf16.msra.mxu0 %v1164_v11  ;;  %v418_v11 = vld [vmem:[%s2725_s1 + $0xbe0] sm:$0xff] }
  0xab   :  { %1357 = vmatpush1.bf16.msra.mxu1 %v1356_v12  ;;  %1167 = vmatprep.subr.bf16.mxu0 %v1166_v13  ;;  %v1378_v12 = vpack.c.bf16 %v421_v6, %v417_v5  ;;  %v416_v13 = vld [vmem:[%s2725_s1 + $0xbd0] sm:$0xff]  ;;  %v1188_v15 = vpack.c.bf16 %v418_v11, %v414_v10 }
  0xac   :  { %1359 = vmatprep.subr.bf16.mxu1 %v1358_v17  ;;  %v1380_v16 = vpack.c.bf16 %v420_v14, %v416_v13  ;;  %v18_v17 = vld [vmem:[%s2726_s0 + $0x20] sm:$0xff] }
  0xae   :  { %1169 = vmatpush1.bf16.msra.mxu0 %v1168_v23  ;;  %v36_v23 = vld [vmem:[%s2726_s0 + $0xb0] sm:$0xff] }
  0xaf   :  { %1361 = vmatpush1.bf16.msra.mxu1 %v1360_v24  ;;  %1171 = vmatprep.subr.bf16.mxu0 %v1170_v25  ;;  %v424_v24 = vlaneseq }
  0xb0   :  { %1363 = vmatprep.subr.bf16.mxu1 %v1362_v29 }
  0xb1   :  { %v425_v25 = vshrl.u32 %v424_v24, 7 }
  0xb2   :  { %1173 = vmatpush1.bf16.msra.mxu0 %v1172_v35 }
  0xb3   :  { %1365 = vmatpush1.bf16.msra.mxu1 %v1364_v36  ;;  %1175 = vmatprep.subr.bf16.mxu0 %v1174_v37  ;;  %v426_v26 = vsub.s32 0, %v425_v25  ;;  %v434_v28 = vsub.s32 2, %v425_v25  ;;  %v430_v29 = vsub.s32 1, %v425_v25  ;;  %v438_v30 = vsub.s32 3, %v425_v25 }
  0xb4   :  { %1367 = vmatprep.subr.bf16.mxu1 %v1366_v41 }
  0xb5   :  { %v427_v31 = vrot.slane %v422_v27, %v426_v26  ;;  %v435_v32 = vrot.slane %v422_v27, %v434_v28  ;;  %v431_v33 = vrot.slane %v422_v27, %v430_v29  ;;  %v439_v34 = vrot.slane %v422_v27, %v438_v30 }
  0xb6   :  { %1177 = vmatpush1.bf16.msra.mxu0 %v1176_v47 }
  0xb7   :  { %1369 = vmatpush1.bf16.msra.mxu1 %v1368_v48  ;;  %1179 = vmatprep.subr.bf16.mxu0 %v1178_v49 }
  0xb8   :  { %1371 = vmatprep.subr.bf16.mxu1 %v1370_v53 }
  0xba   :  { %1181 = vmatpush1.bf16.msra.mxu0 %v1180_v59 }
  0xbb   :  { %1373 = vmatpush1.bf16.msra.mxu1 %v1372_v60  ;;  %1183 = vmatprep.subr.bf16.mxu0 %v1182_v61 }
  0xbc   :  { %1375 = vmatprep.subr.bf16.mxu1 %v1374_v1 }
  0xbe   :  { %1185 = vmatpush1.bf16.msra.mxu0 %v1184_v7 }
  0xbf   :  { %1377 = vmatpush1.bf16.msra.mxu1 %v1376_v8  ;;  %1187 = vmatprep.subr.bf16.mxu0 %v1186_v9 }
  0xc0   :  { %1379 = vmatprep.subr.bf16.mxu1 %v1378_v12 }
  0xc2   :  { %1189 = vmatpush1.bf16.msra.mxu0 %v1188_v15 }
  0xc3   :  { %1381 = vmatpush1.bf16.msra.mxu1 %v1380_v16 }
  0xc5   :  { %687 = vmatmul.mubr.f32.vlgmr.msra.gmra.mrb[0].mxu0 %v18_v17 }
  0xc6   :  { %954 = vmatmul.mubr.f32.vlgmr.msra.gmra.mrb[0].mxu1 %v18_v17  ;;  %692 = vmatprep.mubr.f32.mxu0 %v25_v18 }
  0xc7   :  { %959 = vmatprep.mubr.f32.mxu1 %v25_v18 }
  0xc9   :  { %693 = vmatmul.mubr.f32.gmra.mrb[2].mxu0 %v24_v19 }
  0xca   :  { %960 = vmatmul.mubr.f32.gmra.mrb[2].mxu1 %v24_v19  ;;  %698 = vmatprep.mubr.f32.mxu0 %v31_v20 }
  0xcb   :  { %965 = vmatprep.mubr.f32.mxu1 %v31_v20 }
  0xcd   :  { %699 = vmatmul.mubr.f32.gmra.mrb[4].mxu0 %v30_v21 }
  0xce   :  { %966 = vmatmul.mubr.f32.gmra.mrb[4].mxu1 %v30_v21  ;;  %704 = vmatprep.mubr.f32.mxu0 %v37_v22 }
  0xcf   :  { %971 = vmatprep.mubr.f32.mxu1 %v37_v22 }
  0xd1   :  { %705 = vmatmul.mubr.f32.gmra.mrb[6].mxu0 %v36_v23 }
  0xd2   :  { %972 = vmatmul.mubr.f32.gmra.mrb[6].mxu1 %v36_v23 }
 0x198   :  { %v688_v35 = vpop.f32.mrb[0].mxu0 }
 0x199   :  { %v1382_v36 = vadd.f32 %v688_v35, %v427_v31  ;;  %v955_v37 = vpop.f32.mrb[0].mxu1  ;;  %v690_v38 = vpop.f32.mrb[1].mxu0 }
 0x19a   :  { %v1390_v39 = vadd.f32 %v955_v37, %v435_v32  ;;  %v1383_v40 = vadd.f32 %v690_v38, %v431_v33  ;;  %v957_v41 = vpop.f32.mrb[1].mxu1 }
 0x19b   :  { %978 = vst [vmem:[%s2728_s3] sm:$0xff] %v1382_v36  ;;  %v1391_v42 = vadd.f32 %v957_v41, %v439_v34 }
 0x19c   :  { %980 = vst [vmem:[%s2728_s3 + $0x10] sm:$0xff] %v1390_v39  ;;  %979 = vst [vmem:[%s2728_s3 + $0x8] sm:$0xff] %v1383_v40  ;;  %v694_v43 = vpop.f32.mrb[2].mxu0 }
 0x19d   :  { %981 = vst [vmem:[%s2728_s3 + $0x18] sm:$0xff] %v1391_v42  ;;  %v1384_v44 = vadd.f32 %v694_v43, %v427_v31  ;;  %v961_v45 = vpop.f32.mrb[2].mxu1  ;;  %v696_v46 = vpop.f32.mrb[3].mxu0 }
 0x19e   :  { %v1392_v47 = vadd.f32 %v961_v45, %v435_v32  ;;  %v1385_v48 = vadd.f32 %v696_v46, %v431_v33  ;;  %v963_v49 = vpop.f32.mrb[3].mxu1 }
 0x19f   :  { %982 = vst [vmem:[%s2728_s3 + $0x20] sm:$0xff] %v1384_v44  ;;  %v1393_v50 = vadd.f32 %v963_v49, %v439_v34 }
 0x1a0   :  { %984 = vst [vmem:[%s2728_s3 + $0x30] sm:$0xff] %v1392_v47  ;;  %983 = vst [vmem:[%s2728_s3 + $0x28] sm:$0xff] %v1385_v48  ;;  %v700_v51 = vpop.f32.mrb[4].mxu0 }
 0x1a1   :  { %985 = vst [vmem:[%s2728_s3 + $0x38] sm:$0xff] %v1393_v50  ;;  %v1386_v52 = vadd.f32 %v700_v51, %v427_v31  ;;  %v967_v53 = vpop.f32.mrb[4].mxu1  ;;  %v702_v54 = vpop.f32.mrb[5].mxu0 }
 0x1a2   :  { %v1394_v55 = vadd.f32 %v967_v53, %v435_v32  ;;  %v1387_v56 = vadd.f32 %v702_v54, %v431_v33  ;;  %v969_v57 = vpop.f32.mrb[5].mxu1 }
 0x1a3   :  { %986 = vst [vmem:[%s2728_s3 + $0x40] sm:$0xff] %v1386_v52  ;;  %v1395_v58 = vadd.f32 %v969_v57, %v439_v34 }
 0x1a4   :  { %988 = vst [vmem:[%s2728_s3 + $0x50] sm:$0xff] %v1394_v55  ;;  %987 = vst [vmem:[%s2728_s3 + $0x48] sm:$0xff] %v1387_v56  ;;  %v706_v59 = vpop.f32.mrb[6].mxu0 }
 0x1a5   :  { %989 = vst [vmem:[%s2728_s3 + $0x58] sm:$0xff] %v1395_v58  ;;  %v1388_v60 = vadd.f32 %v706_v59, %v427_v31  ;;  %v973_v61 = vpop.f32.mrb[6].mxu1  ;;  %v708_v62 = vpop.f32.mrb[7].mxu0 }
 0x1a6   :  { %v1396_v63 = vadd.f32 %v973_v61, %v435_v32  ;;  %v1389_v0 = vadd.f32 %v708_v62, %v431_v33  ;;  %v975_v1 = vpop.f32.mrb[7].mxu1 }
 0x1a7   :  { %990 = vst [vmem:[%s2728_s3 + $0x60] sm:$0xff] %v1388_v60  ;;  %v1397_v2 = vadd.f32 %v975_v1, %v439_v34 }
 0x1a8   :  { %992 = vst [vmem:[%s2728_s3 + $0x70] sm:$0xff] %v1396_v63  ;;  %991 = vst [vmem:[%s2728_s3 + $0x68] sm:$0xff] %v1389_v0 }
 0x1a9   :  { %993 = vst [vmem:[%s2728_s3 + $0x78] sm:$0xff] %v1397_v2 }

// kernel: multitask_forward.9
= control target key start
LH: loop header
LB: loop body
LE: loop exit
PB: predicated region body
PF: predicated region fallthrough
CT: control target
= control target key end

     0   :  { %s1406_s0 = inlined_call_operand.vmem [shape: f32[32,896], index: 0, kind: input, shape index: {}]   ;;  %s1407_s1 = inlined_call_operand.vmem [shape: f32[896,128], index: 1, kind: input, shape index: {}]   ;;  %s1408_s2 = inlined_call_operand.vmem [shape: f32[1,128], index: 2, kind: input, shape index: {}]   ;;  %s1409_s3 = inlined_call_operand.hbm [shape: f32[32,128], index: 3, kind: output, shape index: {}]  }
   0x1   :  { %v87_v0 = vld [vmem:[%s1407_s1 + $0x80] sm:$0xff]  ;;  %v88_v1 = vld [vmem:[%s1407_s1 + $0x88] sm:$0xff]  ;;  %v89_v11 = vld [vmem:[%s1407_s1 + $0x90] sm:$0xff] }
   0x2   :  { %v71_v2 = vld [vmem:[%s1407_s1] sm:$0xff]  ;;  %v777_v3 = vpack.c.bf16 %v88_v1, %v87_v0  ;;  %v72_v4 = vld [vmem:[%s1407_s1 + $0x8] sm:$0xff]  ;;  %v90_v13 = vld [vmem:[%s1407_s1 + $0x98] sm:$0xff] }
   0x3   :  { %v119_v5 = vld [vmem:[%s1407_s1 + $0x180] sm:$0xff]  ;;  %v120_v6 = vld [vmem:[%s1407_s1 + $0x188] sm:$0xff]  ;;  %v779_v7 = vpack.c.bf16 %v72_v4, %v71_v2  ;;  %v73_v14 = vld [vmem:[%s1407_s1 + $0x10] sm:$0xff]  ;;  %v781_v16 = vpack.c.bf16 %v90_v13, %v89_v11 }
   0x4   :  { %v809_v8 = vpack.c.bf16 %v120_v6, %v119_v5  ;;  %v103_v9 = vld [vmem:[%s1407_s1 + $0x100] sm:$0xff]  ;;  %v104_v10 = vld [vmem:[%s1407_s1 + $0x108] sm:$0xff]  ;;  %778 = vmatprep.subr.bf16.mxu0 %v777_v3  ;;  %v74_v15 = vld [vmem:[%s1407_s1 + $0x18] sm:$0xff] }
   0x5   :  { %v811_v12 = vpack.c.bf16 %v104_v10, %v103_v9  ;;  %780 = vmatpush3.bf16.msra.mxu0 %v779_v7  ;;  %v783_v17 = vpack.c.bf16 %v74_v15, %v73_v14  ;;  %v121_v18 = vld [vmem:[%s1407_s1 + $0x190] sm:$0xff]  ;;  %v122_v19 = vld [vmem:[%s1407_s1 + $0x198] sm:$0xff]  ;;  %v91_v23 = vld [vmem:[%s1407_s1 + $0xa0] sm:$0xff] }
   0x6   :  { %810 = vmatprep.subr.bf16.mxu1 %v809_v8  ;;  %v105_v20 = vld [vmem:[%s1407_s1 + $0x110] sm:$0xff]  ;;  %v813_v21 = vpack.c.bf16 %v122_v19, %v121_v18  ;;  %v106_v22 = vld [vmem:[%s1407_s1 + $0x118] sm:$0xff]  ;;  %v92_v24 = vld [vmem:[%s1407_s1 + $0xa8] sm:$0xff]  ;;  %782 = vmatprep.subr.bf16.mxu0 %v781_v16 }
   0x7   :  { %812 = vmatpush3.bf16.msra.mxu1 %v811_v12  ;;  %v815_v25 = vpack.c.bf16 %v106_v22, %v105_v20  ;;  %v785_v26 = vpack.c.bf16 %v92_v24, %v91_v23  ;;  %v75_v27 = vld [vmem:[%s1407_s1 + $0x20] sm:$0xff]  ;;  %v76_v28 = vld [vmem:[%s1407_s1 + $0x28] sm:$0xff]  ;;  %v93_v35 = vld [vmem:[%s1407_s1 + $0xb0] sm:$0xff] }
   0x8   :  { %v123_v29 = vld [vmem:[%s1407_s1 + $0x1a0] sm:$0xff]  ;;  %814 = vmatprep.subr.bf16.mxu1 %v813_v21  ;;  %v124_v30 = vld [vmem:[%s1407_s1 + $0x1a8] sm:$0xff]  ;;  %v787_v33 = vpack.c.bf16 %v76_v28, %v75_v27  ;;  %v94_v36 = vld [vmem:[%s1407_s1 + $0xb8] sm:$0xff] }
   0x9   :  { %v107_v31 = vld [vmem:[%s1407_s1 + $0x120] sm:$0xff]  ;;  %v108_v32 = vld [vmem:[%s1407_s1 + $0x128] sm:$0xff]  ;;  %784 = vmatpush3.bf16.msra.mxu0 %v783_v17  ;;  %v817_v34 = vpack.c.bf16 %v124_v30, %v123_v29  ;;  %v77_v37 = vld [vmem:[%s1407_s1 + $0x30] sm:$0xff]  ;;  %v789_v39 = vpack.c.bf16 %v94_v36, %v93_v35 }
   0xa   :  { %786 = vmatprep.subr.bf16.mxu0 %v785_v26  ;;  %v819_v38 = vpack.c.bf16 %v108_v32, %v107_v31  ;;  %v78_v40 = vld [vmem:[%s1407_s1 + $0x38] sm:$0xff]  ;;  %v125_v41 = vld [vmem:[%s1407_s1 + $0x1b0] sm:$0xff]  ;;  %v95_v46 = vld [vmem:[%s1407_s1 + $0xc0] sm:$0xff] }
   0xb   :  { %816 = vmatpush3.bf16.msra.mxu1 %v815_v25  ;;  %v126_v42 = vld [vmem:[%s1407_s1 + $0x1b8] sm:$0xff]  ;;  %v109_v44 = vld [vmem:[%s1407_s1 + $0x130] sm:$0xff]  ;;  %v96_v47 = vld [vmem:[%s1407_s1 + $0xc8] sm:$0xff]  ;;  %v791_v48 = vpack.c.bf16 %v78_v40, %v77_v37 }
   0xc   :  { %818 = vmatprep.subr.bf16.mxu1 %v817_v34  ;;  %v821_v43 = vpack.c.bf16 %v126_v42, %v125_v41  ;;  %v110_v45 = vld [vmem:[%s1407_s1 + $0x138] sm:$0xff]  ;;  %v127_v49 = vld [vmem:[%s1407_s1 + $0x1c0] sm:$0xff]  ;;  %v128_v50 = vld [vmem:[%s1407_s1 + $0x1c8] sm:$0xff]  ;;  %v793_v52 = vpack.c.bf16 %v96_v47, %v95_v46 }
   0xd   :  { %788 = vmatpush3.bf16.msra.mxu0 %v787_v33  ;;  %v823_v51 = vpack.c.bf16 %v110_v45, %v109_v44  ;;  %v79_v53 = vld [vmem:[%s1407_s1 + $0x40] sm:$0xff]  ;;  %v80_v54 = vld [vmem:[%s1407_s1 + $0x48] sm:$0xff]  ;;  %v825_v56 = vpack.c.bf16 %v128_v50, %v127_v49  ;;  %v97_v58 = vld [vmem:[%s1407_s1 + $0xd0] sm:$0xff] }
   0xe   :  { %790 = vmatprep.subr.bf16.mxu0 %v789_v39  ;;  %v111_v55 = vld [vmem:[%s1407_s1 + $0x140] sm:$0xff]  ;;  %v112_v57 = vld [vmem:[%s1407_s1 + $0x148] sm:$0xff]  ;;  %v98_v59 = vld [vmem:[%s1407_s1 + $0xd8] sm:$0xff]  ;;  %v795_v62 = vpack.c.bf16 %v80_v54, %v79_v53 }
   0xf   :  { %820 = vmatpush3.bf16.msra.mxu1 %v819_v38  ;;  %v129_v60 = vld [vmem:[%s1407_s1 + $0x1d0] sm:$0xff]  ;;  %v130_v61 = vld [vmem:[%s1407_s1 + $0x1d8] sm:$0xff]  ;;  %v827_v63 = vpack.c.bf16 %v112_v57, %v111_v55  ;;  %v797_v0 = vpack.c.bf16 %v98_v59, %v97_v58  ;;  %v99_v6 = vld [vmem:[%s1407_s1 + $0xe0] sm:$0xff] }
  0x10   :  { %822 = vmatprep.subr.bf16.mxu1 %v821_v43  ;;  %v81_v1 = vld [vmem:[%s1407_s1 + $0x50] sm:$0xff]  ;;  %v82_v2 = vld [vmem:[%s1407_s1 + $0x58] sm:$0xff]  ;;  %v829_v4 = vpack.c.bf16 %v130_v61, %v129_v60  ;;  %v100_v7 = vld [vmem:[%s1407_s1 + $0xe8] sm:$0xff] }
  0x11   :  { %792 = vmatpush3.bf16.msra.mxu0 %v791_v48  ;;  %v113_v3 = vld [vmem:[%s1407_s1 + $0x150] sm:$0xff]  ;;  %v114_v5 = vld [vmem:[%s1407_s1 + $0x158] sm:$0xff]  ;;  %v131_v8 = vld [vmem:[%s1407_s1 + $0x1e0] sm:$0xff]  ;;  %v799_v10 = vpack.c.bf16 %v82_v2, %v81_v1  ;;  %v801_v14 = vpack.c.bf16 %v100_v7, %v99_v6 }
  0x12   :  { %794 = vmatprep.subr.bf16.mxu0 %v793_v52  ;;  %v132_v9 = vld [vmem:[%s1407_s1 + $0x1e8] sm:$0xff]  ;;  %v83_v11 = vld [vmem:[%s1407_s1 + $0x60] sm:$0xff]  ;;  %v831_v13 = vpack.c.bf16 %v114_v5, %v113_v3  ;;  %v101_v20 = vld [vmem:[%s1407_s1 + $0xf0] sm:$0xff] }
  0x13   :  { %824 = vmatpush3.bf16.msra.mxu1 %v823_v51  ;;  %v16_v12 = vld [vmem:[%s1406_s0 + $0x8] sm:$0xff]  ;;  %v115_v16 = vld [vmem:[%s1407_s1 + $0x160] sm:$0xff]  ;;  %v833_v19 = vpack.c.bf16 %v132_v9, %v131_v8  ;;  %v102_v21 = vld [vmem:[%s1407_s1 + $0xf8] sm:$0xff] }
  0x14   :  { %826 = vmatprep.subr.bf16.mxu1 %v825_v56  ;;  %v84_v15 = vld [vmem:[%s1407_s1 + $0x68] sm:$0xff]  ;;  %v44_v18 = vmax.f32 %v16_v12, 0.0  ;;  %v18_v22 = vld [vmem:[%s1406_s0 + $0x18] sm:$0xff]  ;;  %v133_v23 = vld [vmem:[%s1407_s1 + $0x1f0] sm:$0xff]  ;;  %v805_v28 = vpack.c.bf16 %v102_v21, %v101_v20 }
  0x15   :  { %796 = vmatpush3.bf16.msra.mxu0 %v795_v62  ;;  %v116_v17 = vld [vmem:[%s1407_s1 + $0x168] sm:$0xff]  ;;  %v134_v24 = vld [vmem:[%s1407_s1 + $0x1f8] sm:$0xff]  ;;  %v46_v25 = vmax.f32 %v18_v22, 0.0  ;;  %v803_v26 = vpack.c.bf16 %v84_v15, %v83_v11  ;;  %v85_v29 = vld [vmem:[%s1407_s1 + $0x70] sm:$0xff] }
  0x16   :  { %798 = vmatprep.subr.bf16.mxu0 %v797_v0  ;;  %254 = vmatprep.mubr.f32.mxu0 %v44_v18  ;;  %v835_v27 = vpack.c.bf16 %v116_v17, %v115_v16  ;;  %v86_v30 = vld [vmem:[%s1407_s1 + $0x78] sm:$0xff]  ;;  %v117_v31 = vld [vmem:[%s1407_s1 + $0x170] sm:$0xff]  ;;  %v837_v32 = vpack.c.bf16 %v134_v24, %v133_v23  ;;  %v151_v34 = vld [vmem:[%s1407_s1 + $0x280] sm:$0xff] }
  0x17   :  { %828 = vmatpush3.bf16.msra.mxu1 %v827_v63  ;;  %v118_v33 = vld [vmem:[%s1407_s1 + $0x178] sm:$0xff]  ;;  %v152_v35 = vld [vmem:[%s1407_s1 + $0x288] sm:$0xff]  ;;  %339 = vmatprep.mubr.f32.mxu1 %v46_v25  ;;  %v167_v36 = vld [vmem:[%s1407_s1 + $0x300] sm:$0xff]  ;;  %v807_v38 = vpack.c.bf16 %v86_v30, %v85_v29 }
  0x18   :  { %830 = vmatprep.subr.bf16.mxu1 %v829_v4  ;;  %v168_v37 = vld [vmem:[%s1407_s1 + $0x308] sm:$0xff]  ;;  %v15_v39 = vld [vmem:[%s1406_s0] sm:$0xff]  ;;  %v839_v40 = vpack.c.bf16 %v118_v33, %v117_v31  ;;  %v841_v41 = vpack.c.bf16 %v152_v35, %v151_v34  ;;  %v17_v44 = vld [vmem:[%s1406_s0 + $0x10] sm:$0xff] }
  0x19   :  { %800 = vmatpush3.bf16.msra.mxu0 %v799_v10  ;;  %v135_v42 = vld [vmem:[%s1407_s1 + $0x200] sm:$0xff]  ;;  %v136_v43 = vld [vmem:[%s1407_s1 + $0x208] sm:$0xff]  ;;  %v153_v45 = vld [vmem:[%s1407_s1 + $0x290] sm:$0xff]  ;;  %v873_v47 = vpack.c.bf16 %v168_v37, %v167_v36  ;;  %v43_v48 = vmax.f32 %v15_v39, 0.0  ;;  %v45_v52 = vmax.f32 %v17_v44, 0.0 }
  0x1a   :  { %802 = vmatprep.subr.bf16.mxu0 %v801_v14  ;;  %v154_v46 = vld [vmem:[%s1407_s1 + $0x298] sm:$0xff]  ;;  %v169_v49 = vld [vmem:[%s1407_s1 + $0x310] sm:$0xff]  ;;  %v843_v51 = vpack.c.bf16 %v136_v43, %v135_v42  ;;  %v23_v53 = vld [vmem:[%s1406_s0 + $0x40] sm:$0xff] }
  0x1b   :  { %832 = vmatpush3.bf16.msra.mxu1 %v831_v13  ;;  %v170_v50 = vld [vmem:[%s1407_s1 + $0x318] sm:$0xff]  ;;  %v25_v55 = vld [vmem:[%s1406_s0 + $0x50] sm:$0xff]  ;;  %v845_v56 = vpack.c.bf16 %v154_v46, %v153_v45  ;;  %v155_v59 = vld [vmem:[%s1407_s1 + $0x2a0] sm:$0xff]  ;;  %v51_v62 = vmax.f32 %v23_v53, 0.0 }
  0x1c   :  { %834 = vmatprep.subr.bf16.mxu1 %v833_v19  ;;  %v22_v54 = vld [vmem:[%s1406_s0 + $0x38] sm:$0xff]  ;;  %v137_v57 = vld [vmem:[%s1407_s1 + $0x210] sm:$0xff]  ;;  %v156_v60 = vld [vmem:[%s1407_s1 + $0x2a8] sm:$0xff]  ;;  %v877_v61 = vpack.c.bf16 %v170_v50, %v169_v49  ;;  %v53_v3 = vmax.f32 %v25_v55, 0.0 }
  0x1d   :  { %804 = vmatpush3.bf16.msra.mxu0 %v803_v26  ;;  %v138_v58 = vld [vmem:[%s1407_s1 + $0x218] sm:$0xff]  ;;  %v24_v63 = vld [vmem:[%s1406_s0 + $0x48] sm:$0xff]  ;;  %v171_v0 = vld [vmem:[%s1407_s1 + $0x320] sm:$0xff]  ;;  %v50_v2 = vmax.f32 %v22_v54, 0.0  ;;  %v849_v9 = vpack.c.bf16 %v156_v60, %v155_v59 }
  0x1e   :  { %806 = vmatprep.subr.bf16.mxu0 %v805_v28  ;;  %v172_v1 = vld [vmem:[%s1407_s1 + $0x328] sm:$0xff]  ;;  %v30_v4 = vld [vmem:[%s1406_s0 + $0x78] sm:$0xff]  ;;  %v847_v5 = vpack.c.bf16 %v138_v58, %v137_v57  ;;  %v52_v6 = vmax.f32 %v24_v63, 0.0  ;;  %v29_v7 = vld [vmem:[%s1406_s0 + $0x70] sm:$0xff] }
  0x1f   :  { %836 = vmatpush3.bf16.msra.mxu1 %v835_v27  ;;  %v32_v8 = vld [vmem:[%s1406_s0 + $0x88] sm:$0xff]  ;;  %v139_v10 = vld [vmem:[%s1407_s1 + $0x220] sm:$0xff]  ;;  %v157_v13 = vld [vmem:[%s1407_s1 + $0x2b0] sm:$0xff]  ;;  %v881_v15 = vpack.c.bf16 %v172_v1, %v171_v0  ;;  %v58_v16 = vmax.f32 %v30_v4, 0.0  ;;  %v57_v19 = vmax.f32 %v29_v7, 0.0 }
  0x20   :  { %838 = vmatprep.subr.bf16.mxu1 %v837_v32  ;;  %v140_v11 = vld [vmem:[%s1407_s1 + $0x228] sm:$0xff]  ;;  %v31_v12 = vld [vmem:[%s1406_s0 + $0x80] sm:$0xff]  ;;  %v158_v14 = vld [vmem:[%s1407_s1 + $0x2b8] sm:$0xff]  ;;  %v60_v20 = vmax.f32 %v32_v8, 0.0 }
  0x21   :  { %808 = vmatpush3.bf16.msra.mxu0 %v807_v38  ;;  %v173_v17 = vld [vmem:[%s1407_s1 + $0x330] sm:$0xff]  ;;  %v174_v18 = vld [vmem:[%s1407_s1 + $0x338] sm:$0xff]  ;;  %v851_v22 = vpack.c.bf16 %v140_v11, %v139_v10  ;;  %v59_v23 = vmax.f32 %v31_v12, 0.0  ;;  %v36_v24 = vld [vmem:[%s1406_s0 + $0xa8] sm:$0xff]  ;;  %v853_v26 = vpack.c.bf16 %v158_v14, %v157_v13 }
  0x22   :  { %842 = vmatprep.subr.bf16.mxu0 %v841_v41  ;;  %v37_v21 = vld [vmem:[%s1406_s0 + $0xb0] sm:$0xff]  ;;  %v39_v25 = vld [vmem:[%s1406_s0 + $0xc0] sm:$0xff]  ;;  %v142_v28 = vld [vmem:[%s1407_s1 + $0x238] sm:$0xff]  ;;  %v885_v32 = vpack.c.bf16 %v174_v18, %v173_v17  ;;  %v64_v36 = vmax.f32 %v36_v24, 0.0 }
  0x23   :  { %840 = vmatpush3.bf16.msra.mxu1 %v839_v40  ;;  %v141_v27 = vld [vmem:[%s1407_s1 + $0x230] sm:$0xff]  ;;  %v38_v29 = vld [vmem:[%s1406_s0 + $0xb8] sm:$0xff]  ;;  %v159_v30 = vld [vmem:[%s1407_s1 + $0x2c0] sm:$0xff]  ;;  %v65_v33 = vmax.f32 %v37_v21, 0.0  ;;  %v67_v37 = vmax.f32 %v39_v25, 0.0 }
  0x24   :  { %874 = vmatprep.subr.bf16.mxu1 %v873_v47  ;;  %255 = vmatmul.mubr.f32.vlgmr.msra.gmra.mrb[0].mxu0 %v43_v48  ;;  %v160_v31 = vld [vmem:[%s1407_s1 + $0x2c8] sm:$0xff]  ;;  %v175_v34 = vld [vmem:[%s1407_s1 + $0x340] sm:$0xff]  ;;  %v855_v39 = vpack.c.bf16 %v142_v28, %v141_v27  ;;  %v66_v40 = vmax.f32 %v38_v29, 0.0  ;;  %v21_v41 = vld [vmem:[%s1406_s0 + $0x30] sm:$0xff] }
  0x25   :  { %844 = vmatpush3.bf16.msra.mxu0 %v843_v51  ;;  %259 = vmatprep.mubr.f32.mxu0 %v51_v62  ;;  %v176_v35 = vld [vmem:[%s1407_s1 + $0x348] sm:$0xff]  ;;  %v857_v42 = vpack.c.bf16 %v160_v31, %v159_v30  ;;  %v143_v43 = vld [vmem:[%s1407_s1 + $0x240] sm:$0xff]  ;;  %v161_v45 = vld [vmem:[%s1407_s1 + $0x2d0] sm:$0xff]  ;;  %v49_v51 = vmax.f32 %v21_v41, 0.0 }
  0x26   :  { %340 = vmatmul.mubr.f32.vlgmr.msra.gmra.mrb[0].mxu1 %v45_v52  ;;  %846 = vmatprep.subr.bf16.mxu0 %v845_v56  ;;  %v20_v38 = vld [vmem:[%s1406_s0 + $0x28] sm:$0xff]  ;;  %v162_v46 = vld [vmem:[%s1407_s1 + $0x2d8] sm:$0xff]  ;;  %v177_v49 = vld [vmem:[%s1407_s1 + $0x350] sm:$0xff] }
  0x27   :  { %876 = vmatpush3.bf16.msra.mxu1 %v873_v47  ;;  %344 = vmatprep.mubr.f32.mxu1 %v53_v3  ;;  %v144_v44 = vld [vmem:[%s1407_s1 + $0x248] sm:$0xff]  ;;  %v889_v47 = vpack.c.bf16 %v176_v35, %v175_v34  ;;  %v48_v48 = vmax.f32 %v20_v38, 0.0  ;;  %v178_v50 = vld [vmem:[%s1407_s1 + $0x358] sm:$0xff] }
  0x28   :  { %878 = vmatprep.subr.bf16.mxu1 %v877_v61  ;;  %260 = vmatmul.mubr.f32.gmra.mrb[2].mxu0 %v50_v2 }
  0x29   :  { %848 = vmatpush3.bf16.msra.mxu0 %v847_v5  ;;  %264 = vmatprep.mubr.f32.mxu0 %v58_v16 }
  0x2a   :  { %345 = vmatmul.mubr.f32.gmra.mrb[2].mxu1 %v52_v6  ;;  %850 = vmatprep.subr.bf16.mxu0 %v849_v9 }
  0x2b   :  { %880 = vmatpush3.bf16.msra.mxu1 %v877_v61  ;;  %349 = vmatprep.mubr.f32.mxu1 %v60_v20 }
  0x2c   :  { %882 = vmatprep.subr.bf16.mxu1 %v881_v15  ;;  %265 = vmatmul.mubr.f32.gmra.mrb[4].mxu0 %v57_v19 }
  0x2d   :  { %852 = vmatpush3.bf16.msra.mxu0 %v851_v22  ;;  %269 = vmatprep.mubr.f32.mxu0 %v65_v33 }
  0x2e   :  { %350 = vmatmul.mubr.f32.gmra.mrb[4].mxu1 %v59_v23  ;;  %854 = vmatprep.subr.bf16.mxu0 %v853_v26 }
  0x2f   :  { %884 = vmatpush3.bf16.msra.mxu1 %v881_v15  ;;  %354 = vmatprep.mubr.f32.mxu1 %v67_v37 }
  0x30   :  { %886 = vmatprep.subr.bf16.mxu1 %v885_v32  ;;  %270 = vmatmul.mubr.f32.gmra.mrb[6].mxu0 %v64_v36 }
  0x31   :  { %8 = vsyncpa [#allocation3], 0  ;;  %856 = vmatpush3.bf16.msra.mxu0 %v855_v39  ;;  %v859_v52 = vpack.c.bf16 %v144_v44, %v143_v43  ;;  %v861_v53 = vpack.c.bf16 %v162_v46, %v161_v45  ;;  %v145_v54 = vld [vmem:[%s1407_s1 + $0x250] sm:$0xff]  ;;  %v146_v55 = vld [vmem:[%s1407_s1 + $0x258] sm:$0xff]  ;;  %v893_v58 = vpack.c.bf16 %v178_v50, %v177_v49  ;;  %424 = vmatprep.mubr.f32.mxu0 %v48_v48 }
  0x32   :  { %355 = vmatmul.mubr.f32.gmra.mrb[6].mxu1 %v66_v40  ;;  %858 = vmatprep.subr.bf16.mxu0 %v857_v42  ;;  %v163_v56 = vld [vmem:[%s1407_s1 + $0x2e0] sm:$0xff]  ;;  %v164_v57 = vld [vmem:[%s1407_s1 + $0x2e8] sm:$0xff]  ;;  %v863_v61 = vpack.c.bf16 %v146_v55, %v145_v54  ;;  %v165_v1 = vld [vmem:[%s1407_s1 + $0x2f0] sm:$0xff] }
  0x33   :  { %888 = vmatpush3.bf16.msra.mxu1 %v885_v32  ;;  %v179_v59 = vld [vmem:[%s1407_s1 + $0x360] sm:$0xff]  ;;  %v180_v60 = vld [vmem:[%s1407_s1 + $0x368] sm:$0xff]  ;;  %771 = vmatprep.mubr.f32.mxu1 %v49_v51  ;;  %v865_v62 = vpack.c.bf16 %v164_v57, %v163_v56  ;;  %v166_v2 = vld [vmem:[%s1407_s1 + $0x2f8] sm:$0xff] }
  0x34   :  { %890 = vmatprep.subr.bf16.mxu1 %v889_v47  ;;  %v147_v63 = vld [vmem:[%s1407_s1 + $0x260] sm:$0xff]  ;;  %v148_v0 = vld [vmem:[%s1407_s1 + $0x268] sm:$0xff]  ;;  %v897_v3 = vpack.c.bf16 %v180_v60, %v179_v59  ;;  %v181_v4 = vld [vmem:[%s1407_s1 + $0x370] sm:$0xff]  ;;  %v869_v7 = vpack.c.bf16 %v166_v2, %v165_v1 }
  0x35   :  { %860 = vmatpush3.bf16.msra.mxu0 %v859_v52  ;;  %v182_v5 = vld [vmem:[%s1407_s1 + $0x378] sm:$0xff]  ;;  %v867_v6 = vpack.c.bf16 %v148_v0, %v147_v63  ;;  %v149_v8 = vld [vmem:[%s1407_s1 + $0x270] sm:$0xff]  ;;  %v19_v12 = vld [vmem:[%s1406_s0 + $0x20] sm:$0xff] }
  0x36   :  { %862 = vmatprep.subr.bf16.mxu0 %v861_v53  ;;  %v150_v9 = vld [vmem:[%s1407_s1 + $0x278] sm:$0xff]  ;;  %v901_v10 = vpack.c.bf16 %v182_v5, %v181_v4  ;;  %v27_v13 = vld [vmem:[%s1406_s0 + $0x60] sm:$0xff]  ;;  %v28_v14 = vld [vmem:[%s1406_s0 + $0x68] sm:$0xff]  ;;  %v47_v16 = vmax.f32 %v19_v12, 0.0 }
  0x37   :  { %892 = vmatpush3.bf16.msra.mxu1 %v889_v47  ;;  %v871_v11 = vpack.c.bf16 %v150_v9, %v149_v8  ;;  %v35_v15 = vld [vmem:[%s1406_s0 + $0xa0] sm:$0xff]  ;;  %v55_v17 = vmax.f32 %v27_v13, 0.0  ;;  %v26_v18 = vld [vmem:[%s1406_s0 + $0x58] sm:$0xff]  ;;  %v56_v19 = vmax.f32 %v28_v14, 0.0  ;;  %v33_v25 = vld [vmem:[%s1406_s0 + $0x90] sm:$0xff] }
  0x38   :  { %894 = vmatprep.subr.bf16.mxu1 %v893_v58  ;;  %v34_v20 = vld [vmem:[%s1406_s0 + $0x98] sm:$0xff]  ;;  %v63_v21 = vmax.f32 %v35_v15, 0.0  ;;  %v54_v23 = vmax.f32 %v26_v18, 0.0  ;;  %v41_v27 = vld [vmem:[%s1406_s0 + $0xd0] sm:$0xff]  ;;  %v61_v28 = vmax.f32 %v33_v25, 0.0  ;;  %v40_v30 = vld [vmem:[%s1406_s0 + $0xc8] sm:$0xff] }
  0x39   :  { %864 = vmatpush3.bf16.msra.mxu0 %v863_v61  ;;  %v42_v22 = vld [vmem:[%s1406_s0 + $0xd8] sm:$0xff]  ;;  %v62_v24 = vmax.f32 %v34_v20, 0.0  ;;  %v69_v29 = vmax.f32 %v41_v27, 0.0  ;;  %v68_v31 = vmax.f32 %v40_v30, 0.0  ;;  %v586_v33 = vld [vmem:[%s1408_s2] ss:$0 sm:$0xff] }
  0x3a   :  { %866 = vmatprep.subr.bf16.mxu0 %v865_v62  ;;  %v70_v26 = vmax.f32 %v42_v22, 0.0  ;;  %s948_s0 = smov [#allocation2]  }
  0x3b   :  { %896 = vmatpush3.bf16.msra.mxu1 %v893_v58  ;;  %s575_s2 = sshll.u32 %s948_s0, 4  ;;  %s576_s2 = int_to_ptr.vmem [resolvable:$true] %s575_s2 }
  0x3c   :  { %898 = vmatprep.subr.bf16.mxu1 %v897_v3  ;;  %s924_s23 = scalar_lea.vmem %s576_s2, 512  ;;  %p929_p1 = scmp.lt.s32.totalorder %s576_s2, %s576_s2 }
  0x3d   :  { %868 = vmatpush3.bf16.msra.mxu0 %v867_v6  ;;  %p925_p0 = scmp.ne.s32.totalorder %s576_s2, %s924_s23  ;;  %p930_p2 = scmp.lt.s32.totalorder %s924_s23, %s924_s23 }
  0x3e   :  { %870 = vmatprep.subr.bf16.mxu0 %v869_v7 }
  0x3f   :  { %900 = vmatpush3.bf16.msra.mxu1 %v897_v3  ;;  %p931_p3 = por %p930_p2, %p929_p1 }
  0x40   :  { %902 = vmatprep.subr.bf16.mxu1 %v901_v10 }
  0x41   :  { %872 = vmatpush3.bf16.msra.mxu0 %v871_v11  ;;  %p932_p4 = pnand %p931_p3, %p925_p0 }
  0x43   :  { %904 = vmatpush3.bf16.msra.mxu1 %v901_v10 }
  0x44   :  { %425 = vmatmul.mubr.f32.vlgmr.msra.gmra.mrb[8].mxu0 %v47_v16 }
  0x45   :  { %429 = vmatprep.mubr.f32.mxu0 %v55_v17 }
  0x46   :  { %772 = vmatmul.mubr.f32.vlgmr.msra.gmra.mrb[8].mxu1 %v56_v19 }
  0x47   :  { %774 = vmatprep.mubr.f32.mxu1 %v63_v21 }
  0x48   :  { %430 = vmatmul.mubr.f32.gmra.mrb[10].mxu0 %v54_v23 }
  0x49   :  { %434 = vmatprep.mubr.f32.mxu0 %v62_v24 }
  0x4a   :  { %775 = vmatmul.mubr.f32.gmra.mrb[10].mxu1 %v70_v26 }
  0x4c   :  { %435 = vmatmul.mubr.f32.gmra.mrb[12].mxu0 %v61_v28 }
  0x4d   :  { %439 = vmatprep.mubr.f32.mxu0 %v69_v29 }
  0x50   :  { %440 = vmatmul.mubr.f32.gmra.mrb[14].mxu0 %v68_v31 }
  0xf7   :  { %v619_v32 = vpop.f32.mrb[0].mxu0 }
  0xf8   :  { %v620_v34 = vpop.f32.mrb[1].mxu0 }
  0xf9   :  { %v663_v35 = vpop.f32.mrb[0].mxu1  ;;  %v621_v36 = vadd.f32 %v620_v34, %v619_v32 }
  0xfa   :  { %v664_v37 = vpop.f32.mrb[1].mxu1 }
  0xfb   :  { %v665_v38 = vadd.f32 %v664_v37, %v663_v35  ;;  %v257_v39 = vadd.f32 %v621_v36, %v586_v33  ;;  %v622_v40 = vpop.f32.mrb[2].mxu0 }
  0xfc   :  { %v623_v41 = vpop.f32.mrb[3].mxu0 }
  0xfd   :  { %v666_v42 = vpop.f32.mrb[2].mxu1  ;;  %v342_v43 = vadd.f32 %v665_v38, %v257_v39  ;;  %v624_v44 = vadd.f32 %v623_v41, %v622_v40 }
  0xfe   :  { %v667_v45 = vpop.f32.mrb[3].mxu1 }
  0xff   :  { %v668_v46 = vadd.f32 %v667_v45, %v666_v42  ;;  %v262_v47 = vadd.f32 %v624_v44, %v586_v33  ;;  %v625_v48 = vpop.f32.mrb[4].mxu0 }
 0x100   :  { %v626_v49 = vpop.f32.mrb[5].mxu0 }
 0x101   :  { %v669_v50 = vpop.f32.mrb[4].mxu1  ;;  %v347_v51 = vadd.f32 %v668_v46, %v262_v47  ;;  %v627_v52 = vadd.f32 %v626_v49, %v625_v48 }
 0x102   :  { %v670_v53 = vpop.f32.mrb[5].mxu1 }
 0x103   :  { %v671_v54 = vadd.f32 %v670_v53, %v669_v50  ;;  %v267_v55 = vadd.f32 %v627_v52, %v586_v33  ;;  %v628_v56 = vpop.f32.mrb[6].mxu0 }
 0x104   :  { %v629_v57 = vpop.f32.mrb[7].mxu0 }
 0x105   :  { %v672_v58 = vpop.f32.mrb[6].mxu1  ;;  %v352_v59 = vadd.f32 %v671_v54, %v267_v55  ;;  %v630_v60 = vadd.f32 %v629_v57, %v628_v56 }
 0x106   :  { %v673_v61 = vpop.f32.mrb[7].mxu1 }
 0x107   :  { %v674_v62 = vadd.f32 %v673_v61, %v672_v58  ;;  %v272_v63 = vadd.f32 %v630_v60, %v586_v33 }
 0x109   :  { %v357_v0 = vadd.f32 %v674_v62, %v272_v63 }
 0x117   :  { %v707_v1 = vpop.f32.mrb[8].mxu0 }
 0x118   :  { %v708_v2 = vpop.f32.mrb[9].mxu0 }
 0x119   :  { %v773_v3 = vpop.f32.mrb[8].mxu1  ;;  %v709_v4 = vadd.f32 %v708_v2, %v707_v1 }
 0x11a   :  { %v511_v5 = vpop.f32.mrb[9].mxu1 }
 0x11b   :  { %v710_v6 = vpop.f32.mrb[10].mxu0  ;;  %v427_v7 = vadd.f32 %v709_v4, %v342_v43 }
 0x11c   :  { %v711_v8 = vpop.f32.mrb[11].mxu0 }
 0x11d   :  { %v776_v9 = vpop.f32.mrb[10].mxu1  ;;  %v712_v10 = vadd.f32 %v711_v8, %v710_v6  ;;  %v512_v11 = vadd.f32 %v511_v5, %v427_v7 }
 0x11e   :  { %v521_v12 = vpop.f32.mrb[11].mxu1 }
 0x11f   :  { %v432_v13 = vadd.f32 %v712_v10, %v347_v51  ;;  %v713_v14 = vpop.f32.mrb[12].mxu0  ;;  %530 = vmax.xlane.f32.xlu0 %v512_v11 }
 0x120   :  { %v714_v15 = vpop.f32.mrb[13].mxu0 }
 0x121   :  { %v715_v16 = vadd.f32 %v714_v15, %v713_v14  ;;  %v517_v17 = vadd.f32 %v773_v3, %v432_v13 }
 0x123   :  { %v716_v18 = vpop.f32.mrb[14].mxu0  ;;  %v437_v19 = vadd.f32 %v715_v16, %v352_v59  ;;  %532 = vmax.xlane.f32.xlu0 %v517_v17 }
 0x124   :  { %v717_v20 = vpop.f32.mrb[15].mxu0 }
 0x125   :  { %v522_v21 = vadd.f32 %v521_v12, %v437_v19  ;;  %v718_v22 = vadd.f32 %v717_v20, %v716_v18 }
 0x127   :  { %v442_v23 = vadd.f32 %v718_v22, %v357_v0  ;;  %534 = vmax.xlane.f32.xlu1 %v522_v21 }
 0x129   :  { %v527_v24 = vadd.f32 %v776_v9, %v442_v23 }
 0x12b   :  { %536 = vmax.xlane.f32.xlu1 %v527_v24 }
 0x1ac   :  { %v531_v25 = vpop.xlane.xlu0 %530 }
 0x1ad   :  { %v538_v26 = vsub.f32 %v512_v11, %v531_v25 }
 0x1af   :  { %v542_v27 = vmul.f32 1.442695, %v538_v26 }
 0x1b0   :  { %v533_v28 = vpop.xlane.xlu0 %532 }
 0x1b1   :  { %908 = vpow2.f32 %v542_v27  ;;  %v539_v29 = vsub.f32 %v517_v17, %v533_v28 }
 0x1b3   :  { %v544_v30 = vmul.f32 1.442695, %v539_v29 }
 0x1b4   :  { %v535_v31 = vpop.xlane.xlu1 %534 }
 0x1b5   :  { %910 = vpow2.f32 %v544_v30  ;;  %v540_v32 = vsub.f32 %v522_v21, %v535_v31 }
 0x1b7   :  { %v546_v33 = vmul.f32 1.442695, %v540_v32 }
 0x1b8   :  { %v537_v34 = vpop.xlane.xlu1 %536 }
 0x1b9   :  { %912 = vpow2.f32 %v546_v33  ;;  %v541_v35 = vsub.f32 %v527_v24, %v537_v34 }
 0x1bb   :  { %v909_v36 = vpop.eup %908  ;;  %v548_v37 = vmul.f32 1.442695, %v541_v35 }
 0x1bc   :  { %550 = vadd.xlane.f32.xlu0 %v909_v36 }
 0x1bd   :  { %914 = vpow2.f32 %v548_v37 }
 0x1bf   :  { %v911_v38 = vpop.eup %910 }
 0x1c0   :  { %552 = vadd.xlane.f32.xlu1 %v911_v38 }
 0x1c3   :  { %v913_v39 = vpop.eup %912 }
 0x1c4   :  { %554 = vadd.xlane.f32.xlu0 %v913_v39 }
 0x1c7   :  { %v915_v40 = vpop.eup %914 }
 0x1c8   :  { %556 = vadd.xlane.f32.xlu1 %v915_v40 }
 0x249   :  { %v551_v41 = vpop.xlane.xlu0 %550 }
 0x24a   :  { %916 = vrcp.f32 %v551_v41 }
 0x24d   :  { %v553_v42 = vpop.xlane.xlu1 %552 }
 0x24e   :  { %918 = vrcp.f32 %v553_v42 }
 0x251   :  { %v555_v43 = vpop.xlane.xlu0 %554 }
 0x252   :  { %920 = vrcp.f32 %v555_v43 }
 0x254   :  { %v917_v44 = vpop.eup %916 }
 0x255   :  { %v559_v45 = vmul.f32 %v917_v44, %v909_v36  ;;  %v557_v46 = vpop.xlane.xlu1 %556 }
 0x256   :  { %922 = vrcp.f32 %v557_v46 }
 0x257   :  { %566 = vst [vmem:[#allocation2] sm:$0xff] %v559_v45 }
 0x258   :  { %v919_v47 = vpop.eup %918 }
 0x259   :  { %v561_v48 = vmul.f32 %v919_v47, %v911_v38 }
 0x25b   :  { %567 = vst [vmem:[#allocation2 + $0x8] sm:$0xff] %v561_v48 }
 0x25c   :  { %v921_v49 = vpop.eup %920 }
 0x25d   :  { %v563_v50 = vmul.f32 %v921_v49, %v913_v39 }
 0x25f   :  { %568 = vst [vmem:[#allocation2 + $0x10] sm:$0xff] %v563_v50 }
 0x260   :  { %v923_v51 = vpop.eup %922 }
 0x261   :  { %v565_v52 = vmul.f32 %v923_v51, %v915_v40 }
 0x263   :  { %569 = vst [vmem:[#allocation2 + $0x18] sm:$0xff] %v565_v52 }
 0x264   :  { %935 = shalt.err (!%p932_p4)
}
 0x265   :  { %s936_s26 = scalar_lea.hbm %s1409_s3, 512 }
 0x266   :  { %p937_p5 = scmp.ne.s32.totalorder %s1409_s3, %s936_s26  ;;  %p940_p6 = scmp.lt.u32.totalorder %s936_s26, %s1409_s3 }
 0x268   :  { %p942_p7 = pnand %p940_p6, %p937_p5 }
 0x26a   :  { %945 = shalt.err (!%p942_p7)
}
 0x26b   :  { %s949_s4 = smov 128   ;;  %s950_s5 = smov 8  }
 0x26c   :  { %581 = dma.vmem_to_hbm [thread:$0]  %s576_s2, 512, %s1409_s3, [#allocation3], %s949_s4, %s949_s4, %s950_s5  }
 0x26d   :  { %946 = dma.done.wait [#allocation3], 512  }
 0x26e   :  { %947 = vsyncadd [#allocation3], 4294966784 }
 0x26f   :  { %585 = vsyncpa [#allocation3], 1 }

// kernel: multitask_forward.6
= control target key start
LH: loop header
LB: loop body
LE: loop exit
PB: predicated region body
PF: predicated region fallthrough
CT: control target
= control target key end

     0   :  { %vm234_vm0 = vcmask 517120   ;;  %v360_v3 = vlaneseq  ;;  %v6189_v8 = vmov 0.0   ;;  %v6190_v14 = vmov 1983009808   ;;  %s6191_s6 = smov 64   ;;  %s7724_s0 = inlined_call_operand.vmem [shape: s32[2,1], index: 0, kind: input, shape index: {}]   ;;  %s7725_s1 = inlined_call_operand.vmem [shape: f32[16,2,512], index: 1, kind: input, shape index: {}, may-alias: {1,2}]   ;;  %s7726_s2 = inlined_call_operand.vmem [shape: f32[16,2,512], index: 2, kind: input, shape index: {}, may-alias: {1,2}]   ;;  %s7727_s3 = inlined_call_operand.vmem [shape: f32[64,256], index: 3, kind: input, shape index: {}]   ;;  %s7728_s4 = inlined_call_operand.vmem [shape: f32[64,256], index: 4, kind: input, shape index: {}]   ;;  %s7729_s5 = inlined_call_operand.vmem [shape: f32[16,2,128], index: 5, kind: output, shape index: {}]  }
   0x1   :  { %v257_v0 = vld [vmem:[%s7728_s4 + $0x8] sm:$0xff]  ;;  %v259_v1 = vld [vmem:[%s7728_s4 + $0x18] sm:$0xff]  ;;  %v256_v2 = vld [vmem:[%s7728_s4] sm:$0xff]  ;;  %499 = vmatprep.mubr.f32.mxu1 %v6189_v8  ;;  %237 = vst.msk [vmem:[#allocation4] sm:$0x3] %vm234_vm0, %v6189_v8  ;;  %347 = vmatprep.mubr.f32.mxu0 %v6189_v8  ;;  %v358_v15 = vunpack.c.l.s4 %v6190_v14  ;;  %vm279_vm1 = vcmask 523264  }
   0x2   :  { %v6232_v4 = vpack.c.bf16 %v259_v1, %v257_v0  ;;  %v258_v5 = vld [vmem:[%s7728_s4 + $0x10] sm:$0xff]  ;;  %v241_v6 = vld [vmem:[%s7727_s3 + $0x8] sm:$0xff]  ;;  %v243_v7 = vld [vmem:[%s7727_s3 + $0x18] sm:$0xff]  ;;  %235 = vst.msk [vmem:[#allocation2] sm:$0x3] %vm234_vm0, %v6189_v8  ;;  %v361_v26 = vshrl.u32 %v360_v3, 7 }
   0x3   :  { %236 = vst.msk [vmem:[#allocation3] sm:$0x3] %vm234_vm0, %v6189_v8  ;;  %238 = vst.msk [vmem:[#allocation5] sm:$0x3] %vm234_vm0, %v6189_v8  ;;  %v6253_v9 = vpack.c.bf16 %v258_v5, %v256_v2  ;;  %v6255_v10 = vpack.c.bf16 %v243_v7, %v241_v6  ;;  %v261_v11 = vld [vmem:[%s7728_s4 + $0x28] sm:$0xff]  ;;  %v263_v12 = vld [vmem:[%s7728_s4 + $0x38] sm:$0xff]  ;;  %v359_v25 = vunpack.c.0.s8 %v358_v15 }
   0x4   :  { %v240_v13 = vld [vmem:[%s7727_s3] sm:$0xff]  ;;  %5431 = vmatprep.subr.bf16.mxu1 %v6232_v4  ;;  %v6267_v16 = vpack.c.bf16 %v263_v12, %v261_v11  ;;  %v242_v17 = vld [vmem:[%s7727_s3 + $0x10] sm:$0xff]  ;;  %v245_v22 = vld [vmem:[%s7727_s3 + $0x28] sm:$0xff]  ;;  %v6192_v15 = vmov 0  }
   0x5   :  { %v260_v18 = vld [vmem:[%s7728_s4 + $0x20] sm:$0xff]  ;;  %v262_v19 = vld [vmem:[%s7728_s4 + $0x30] sm:$0xff]  ;;  %5433 = vmatpush1.bf16.msra.mxu1 %v6253_v9  ;;  %5415 = vmatprep.subr.bf16.mxu0 %v6255_v10  ;;  %v6280_v20 = vpack.c.bf16 %v242_v17, %v240_v13  ;;  %v247_v23 = vld [vmem:[%s7727_s3 + $0x38] sm:$0xff]  ;;  %v6343_v44 = vsub.s32 %v359_v25, %v361_v26 }
   0x6   :  { %v6282_v21 = vpack.c.bf16 %v262_v19, %v260_v18  ;;  %v265_v24 = vld [vmem:[%s7728_s4 + $0x48] sm:$0xff]  ;;  %5435 = vmatprep.subr.bf16.mxu1 %v6267_v16  ;;  %v6294_v27 = vpack.c.bf16 %v247_v23, %v245_v22  ;;  %v267_v28 = vld [vmem:[%s7728_s4 + $0x58] sm:$0xff]  ;;  %v244_v29 = vld [vmem:[%s7727_s3 + $0x20] sm:$0xff]  ;;  %5930 = vset.pattern.permute.xlu0 %v6192_v15 }
   0x7   :  { %v246_v30 = vld [vmem:[%s7727_s3 + $0x30] sm:$0xff]  ;;  %5417 = vmatpush1.bf16.msra.mxu0 %v6280_v20  ;;  %v6306_v31 = vpack.c.bf16 %v267_v28, %v265_v24  ;;  %v264_v33 = vld [vmem:[%s7728_s4 + $0x40] sm:$0xff]  ;;  %v249_v35 = vld [vmem:[%s7727_s3 + $0x48] sm:$0xff]  ;;  %5931 = vset.pattern.permute.xlu1 %v6192_v15 }
   0x8   :  { %v6308_v32 = vpack.c.bf16 %v246_v30, %v244_v29  ;;  %v266_v34 = vld [vmem:[%s7728_s4 + $0x50] sm:$0xff]  ;;  %5419 = vmatprep.subr.bf16.mxu0 %v6294_v27  ;;  %v251_v36 = vld [vmem:[%s7727_s3 + $0x58] sm:$0xff]  ;;  %v269_v37 = vld [vmem:[%s7728_s4 + $0x68] sm:$0xff] }
   0x9   :  { %v271_v38 = vld [vmem:[%s7728_s4 + $0x78] sm:$0xff]  ;;  %5437 = vmatpush1.bf16.msra.mxu1 %v6282_v21  ;;  %v6330_v39 = vpack.c.bf16 %v266_v34, %v264_v33  ;;  %v6332_v40 = vpack.c.bf16 %v251_v36, %v249_v35  ;;  %v248_v41 = vld [vmem:[%s7727_s3 + $0x40] sm:$0xff]  ;;  %v250_v42 = vld [vmem:[%s7727_s3 + $0x50] sm:$0xff] }
   0xa   :  { %v268_v43 = vld [vmem:[%s7728_s4 + $0x60] sm:$0xff]  ;;  %5439 = vmatprep.subr.bf16.mxu1 %v6306_v31  ;;  %v6346_v45 = vpack.c.bf16 %v271_v38, %v269_v37  ;;  %v270_v46 = vld [vmem:[%s7728_s4 + $0x70] sm:$0xff]  ;;  %v253_v47 = vld [vmem:[%s7727_s3 + $0x68] sm:$0xff]  ;;  %v6358_v49 = vpack.c.bf16 %v250_v42, %v248_v41 }
   0xb   :  { %v255_v48 = vld [vmem:[%s7727_s3 + $0x78] sm:$0xff]  ;;  %5421 = vmatpush1.bf16.msra.mxu0 %v6308_v32  ;;  %v252_v51 = vld [vmem:[%s7727_s3 + $0x60] sm:$0xff]  ;;  %v254_v52 = vld [vmem:[%s7727_s3 + $0x70] sm:$0xff]  ;;  %v6372_v54 = vpack.c.bf16 %v270_v46, %v268_v43 }
   0xc   :  { %5423 = vmatprep.subr.bf16.mxu0 %v6332_v40  ;;  %v6361_v50 = vpack.c.bf16 %v255_v48, %v253_v47  ;;  %v6369_v53 = vld [vmem:[#allocation5] sm:$0x3]  ;;  %v6378_v56 = vpack.c.bf16 %v254_v52, %v252_v51  ;;  %v6383_v57 = vld [vmem:[#allocation4] sm:$0x3]  ;;  %v6387_v58 = vld [vmem:[#allocation2] sm:$0x3] }
   0xd   :  { %5441 = vmatpush1.bf16.msra.mxu1 %v6330_v39  ;;  %v537_v55 = vrot.slane %v6369_v53, %v6343_v44  ;;  %v5287_v59 = vld [vmem:[%s7726_s2 + $0x7c] sm:$0xf]  ;;  %v29_v60 = vld [vmem:[%s7725_s1] sm:$0xf] }
   0xe   :  { %5443 = vmatprep.subr.bf16.mxu1 %v6346_v45  ;;  %167 = vst [vmem:[#allocation7 + $0x3c] sm:$0xf] %v5287_v59  ;;  %30 = vst [vmem:[#allocation6] sm:$0xf] %v29_v60  ;;  %v6421_v13 = vld [vmem:[#allocation3] sm:$0x3] }
   0xf   :  { %5425 = vmatpush1.bf16.msra.mxu0 %v6358_v49  ;;  %538 = vrot.lane.b32.xlu1 %v537_v55, %s6191_s6  ;;  %v385_v14 = vrot.slane %v6421_v13, %v6343_v44  ;;  %v6432_v25 = vld [vmem:[%s7724_s0] sm:$0x3] }
  0x10   :  { %5427 = vmatprep.subr.bf16.mxu0 %v6361_v50  ;;  %vm5293_vm2 = vcmp.gt.s32.totalorder %v6432_v25, 15  ;;  %vm5290_vm3 = vcmp.gt.s32.totalorder %v6432_v25, 0  ;;  %vm5301_vm6 = vcmp.gt.s32.totalorder %v6432_v25, 14  ;;  %vm5297_vm7 = vcmp.gt.s32.totalorder %v6432_v25, 1 }
  0x11   :  { %5445 = vmatpush1.bf16.msra.mxu1 %v6372_v54  ;;  %v6436_v29 = vsel %vm5293_vm2, 1, %v6192_v15  ;;  %v6444_v60 = vsel %vm5290_vm3, 1, %v6192_v15  ;;  %vm5309_vm10 = vcmp.gt.s32.totalorder %v6432_v25, 13  ;;  %vm5305_vm11 = vcmp.gt.s32.totalorder %v6432_v25, 2 }
  0x12   :  { %5463 = vmatprep.subr.bf16.mxu1 %v6232_v4  ;;  %vm5317_vm14 = vcmp.gt.s32.totalorder %v6432_v25, 12  ;;  %vm5313_vm15 = vcmp.gt.s32.totalorder %v6432_v25, 3 }
  0x13   :  { %5429 = vmatpush1.bf16.msra.mxu0 %v6378_v56 }
  0x14   :  { %5291 = vmatmul.mubr.msk.f32.vlgmr.msra.gmra.mrb[0].mxu1 %vm279_vm1, %v6383_v57  ;;  %5447 = vmatprep.subr.bf16.mxu0 %v6255_v10 }
  0x15   :  { %5465 = vmatpush1.bf16.msra.mxu1 %v6253_v9  ;;  %807 = vmatprep.mubr.f32.mxu1 %v6189_v8  ;;  %v431_v2 = vld [vmem:[#allocation7 + $0x3c] sm:$0xf]  ;;  %v278_v6 = vld [vmem:[#allocation6] sm:$0xf] }
  0x16   :  { %5288 = vmatmul.mubr.msk.f32.vlgmr.msra.gmra.mrb[0].mxu0 %vm279_vm1, %v6387_v58  ;;  %5467 = vmatprep.subr.bf16.mxu1 %v6267_v16 }
  0x17   :  { %5449 = vmatpush1.bf16.msra.mxu0 %v6280_v20  ;;  %655 = vmatprep.mubr.f32.mxu0 %v6189_v8 }
  0x18   :  { %5451 = vmatprep.subr.bf16.mxu0 %v6294_v27 }
  0x19   :  { %5469 = vmatpush1.bf16.msra.mxu1 %v6282_v21 }
  0x1a   :  { %5471 = vmatprep.subr.bf16.mxu1 %v6306_v31 }
  0x1b   :  { %5453 = vmatpush1.bf16.msra.mxu0 %v6308_v32 }
  0x1c   :  { %5455 = vmatprep.subr.bf16.mxu0 %v6332_v40 }
  0x1d   :  { %5473 = vmatpush1.bf16.msra.mxu1 %v6330_v39 }
  0x1e   :  { %5475 = vmatprep.subr.bf16.mxu1 %v6346_v45 }
  0x1f   :  { %5457 = vmatpush1.bf16.msra.mxu0 %v6358_v49 }
  0x20   :  { %5459 = vmatprep.subr.bf16.mxu0 %v6361_v50 }
  0x21   :  { %5477 = vmatpush1.bf16.msra.mxu1 %v6372_v54 }
  0x22   :  { %5495 = vmatprep.subr.bf16.mxu1 %v6232_v4 }
  0x23   :  { %5461 = vmatpush1.bf16.msra.mxu0 %v6378_v56 }
  0x24   :  { %5479 = vmatprep.subr.bf16.mxu0 %v6255_v10 }
  0x81   :  { %v539_v42 = vpop.permute.xlu1 %538 }
  0xe7   :  { %v501_v61 = vpop.f32.mrb[0].mxu1 }
  0xe8   :  { %v503_v62 = vpop.f32.mrb[1].mxu1 }
  0xe9   :  { %v508_v63 = vcombine.low %v501_v61, %v503_v62  ;;  %v349_v0 = vpop.f32.mrb[0].mxu0 }
  0xea   :  { %v351_v1 = vpop.f32.mrb[1].mxu0 }
  0xeb   :  { %v515_v3 = vrot.slane %v508_v63, %v6343_v44  ;;  %v356_v5 = vcombine.low %v349_v0, %v351_v1 }
  0xed   :  { %v363_v7 = vrot.slane %v356_v5, %v6343_v44  ;;  %v517_v11 = vadd.f32 %v515_v3, %v431_v2 }
  0xef   :  { %525 = vrot.lane.b32.xlu0 %v517_v11, %s6191_s6  ;;  %v365_v12 = vadd.f32 %v363_v7, %v278_v6  ;;  %v5292_v17 = vmul.f32 -1.442695, %v517_v11 }
  0xf1   :  { %v5289_v18 = vmul.f32 -1.442695, %v365_v12  ;;  %5932 = vpow2.f32 %v5292_v17 }
  0xf3   :  { %373 = vrot.lane.b32.xlu0 %v365_v12, %s6191_s6  ;;  %5934 = vpow2.f32 %v5289_v18  ;;  %v31_v18 = vld [vmem:[%s7725_s1 + $0x8] sm:$0xf] }
  0xf4   :  { %32 = vst [vmem:[#allocation6 + $0x4] sm:$0xf] %v31_v18 }
  0xf7   :  { %386 = vrot.lane.b32.xlu0 %v385_v14, %s6191_s6 }
  0xfb   :  { %v5933_v19 = vpop.eup %5932  ;;  %561 = vperm.xlu0 %5930, %v6436_v29  }
  0xfc   :  { %v521_v23 = vadd.f32 1.0, %v5933_v19 }
  0xfd   :  { %v5935_v22 = vpop.eup %5934 }
  0xfe   :  { %v369_v26 = vadd.f32 1.0, %v5935_v22  ;;  %5936 = vrcp.f32 %v521_v23 }
 0x108   :  { %v5937_v34 = vpop.eup %5936 }
 0x109   :  { %v541_v43 = vmul.f32 %v5937_v34, %v539_v42  ;;  %v550_v1 = vrot.slane %v5937_v34, 2 }
 0x161   :  { %v526_v24 = vpop.permute.xlu0 %525 }
 0x162   :  { %v527_v28 = vrot.slane %v526_v24, 2 }
 0x164   :  { %5938 = vtanh.f32 %v527_v28 }
 0x165   :  { %v374_v30 = vpop.permute.xlu0 %373  ;;  %5940 = vrcp.f32 %v369_v26 }
 0x166   :  { %v375_v33 = vrot.slane %v374_v30, 2 }
 0x168   :  { %5942 = vtanh.f32 %v375_v33 }
 0x169   :  { %v387_v46 = vpop.permute.xlu0 %386 }
 0x16e   :  { %v5939_v35 = vpop.eup %5938 }
 0x16f   :  { %v542_v36 = vmul.f32 %v5939_v35, %v5937_v34  ;;  %v5941_v37 = vpop.eup %5940  ;;  %v587_v35 = vld [vmem:[#allocation6 + $0x4] sm:$0xf] }
 0x170   :  { %v389_v51 = vmul.f32 %v5941_v37, %v387_v46  ;;  %v398_v7 = vrot.slane %v5941_v37, 2 }
 0x171   :  { %544 = vrot.lane.b32.xlu1 %v542_v36, %s6191_s6 }
 0x172   :  { %v5943_v38 = vpop.eup %5942 }
 0x173   :  { %v390_v41 = vmul.f32 %v5943_v38, %v5941_v37 }
 0x175   :  { %392 = vrot.lane.b32.xlu1 %v390_v41, %s6191_s6 }
 0x17a   :  { %v562_v0 = vpop.permute.xlu0 %561 }
 0x17b   :  { %vm563_vm4 = vcmp.eq.s32.totalorder %v562_v0, 1 }
 0x1e3   :  { %v545_v47 = vpop.permute.xlu1 %544 }
 0x1e4   :  { %v547_v48 = vadd.f32 %v545_v47, %v541_v43 }
 0x1e6   :  { %5944 = vtanh.f32 %v547_v48  ;;  %v572_v62 = vrot.slane %v547_v48, %v6343_v44  ;;  %v6521_v48 = vsel %vm5297_vm7, 1, %v6192_v15 }
 0x1e7   :  { %v393_v52 = vpop.permute.xlu1 %392 }
 0x1e8   :  { %v395_v55 = vadd.f32 %v393_v52, %v389_v51 }
 0x1ea   :  { %5946 = vtanh.f32 %v395_v55  ;;  %v420_v63 = vrot.slane %v395_v55, %v6343_v44 }
 0x1f0   :  { %v5945_v59 = vpop.eup %5944 }
 0x1f1   :  { %553 = vrot.lane.b32.xlu1 %v5945_v59, %s6191_s6 }
 0x1f4   :  { %v5947_v61 = vpop.eup %5946 }
 0x1f5   :  { %409 = vperm.xlu1 %5931, %v6444_v60   ;;  %401 = vrot.lane.b32.xlu0 %v5947_v61, %s6191_s6 }
 0x1f9   :  { %573 = vrot.lane.b32.xlu0 %v572_v62, %s6191_s6 }
 0x1fd   :  { %421 = vrot.lane.b32.xlu0 %v420_v63, %s6191_s6 }
 0x263   :  { %v554_v2 = vpop.permute.xlu1 %553 }
 0x264   :  { %v556_v3 = vmul.f32 %v554_v2, %v550_v1 }
 0x266   :  { %v6454_v5 = vsel %vm563_vm4, %v556_v3, %v6383_v57  ;;  %v6457_v6 = vsel %vm563_vm4, %v556_v3, 0.0 }
 0x267   :  { %5299 = vmatmul.mubr.msk.f32.vlgmr.msra.gmra.mrb[2].mxu1 %vm279_vm1, %v6454_v5  ;;  %v402_v57 = vpop.permute.xlu0 %401 }
 0x268   :  { %5497 = vmatpush1.bf16.msra.mxu1 %v6253_v9  ;;  %1115 = vmatprep.mubr.f32.mxu1 %v6189_v8  ;;  %v404_v11 = vmul.f32 %v402_v57, %v398_v7 }
 0x269   :  { %5499 = vmatprep.subr.bf16.mxu1 %v6267_v16 }
 0x26b   :  { %v574_v36 = vpop.permute.xlu0 %573 }
 0x26c   :  { %5501 = vmatpush1.bf16.msra.mxu1 %v6282_v21  ;;  %v6501_v41 = vsel %vm563_vm4, %v574_v36, %v6369_v53  ;;  %v6516_v53 = vsel %vm5301_vm6, 1, %v6192_v15  ;;  %vm5325_vm4 = vcmp.gt.s32.totalorder %v6432_v25, 11 }
 0x26d   :  { %5503 = vmatprep.subr.bf16.mxu1 %v6306_v31  ;;  %v845_v42 = vrot.slane %v6501_v41, %v6343_v44 }
 0x26f   :  { %v422_v43 = vpop.permute.xlu0 %421 }
 0x270   :  { %5505 = vmatpush1.bf16.msra.mxu1 %v6330_v39 }
 0x271   :  { %5507 = vmatprep.subr.bf16.mxu1 %v6346_v45 }
 0x274   :  { %v410_v12 = vpop.permute.xlu1 %409  ;;  %5509 = vmatpush1.bf16.msra.mxu1 %v6372_v54 }
 0x275   :  { %vm411_vm5 = vcmp.eq.s32.totalorder %v410_v12, 1  ;;  %5527 = vmatprep.subr.bf16.mxu1 %v6232_v4 }
 0x276   :  { %v6472_v14 = vsel %vm411_vm5, %v404_v11, %v6387_v58  ;;  %v425_v17 = vsel %vm411_vm5, %v404_v11, 0.0  ;;  %v5286_v58 = vld [vmem:[%s7726_s2 + $0x74] sm:$0xf]  ;;  %v6508_v46 = vsel %vm411_vm5, %v422_v43, %v6421_v13  ;;  %vm5321_vm5 = vcmp.gt.s32.totalorder %v6432_v25, 4 }
 0x277   :  { %429 = vst.msk [vmem:[%s7729_s5] sm:$0x3] %vm234_vm0, %v425_v17  ;;  %5295 = vmatmul.mubr.msk.f32.vlgmr.msra.gmra.mrb[2].mxu0 %vm279_vm1, %v6472_v14  ;;  %165 = vst [vmem:[#allocation7 + $0x38] sm:$0xf] %v5286_v58  ;;  %v693_v47 = vrot.slane %v6508_v46, %v6343_v44 }
 0x278   :  { %5481 = vmatpush1.bf16.msra.mxu0 %v6280_v20  ;;  %963 = vmatprep.mubr.f32.mxu0 %v6189_v8 }
 0x279   :  { %5483 = vmatprep.subr.bf16.mxu0 %v6294_v27 }
 0x27c   :  { %5485 = vmatpush1.bf16.msra.mxu0 %v6308_v32 }
 0x27d   :  { %5487 = vmatprep.subr.bf16.mxu0 %v6332_v40 }
 0x27e   :  { %v739_v24 = vld [vmem:[#allocation7 + $0x38] sm:$0xf] }
 0x280   :  { %5489 = vmatpush1.bf16.msra.mxu0 %v6358_v49 }
 0x281   :  { %5491 = vmatprep.subr.bf16.mxu0 %v6361_v50 }
 0x284   :  { %5493 = vmatpush1.bf16.msra.mxu0 %v6378_v56 }
 0x285   :  { %5511 = vmatprep.subr.bf16.mxu0 %v6255_v10 }
 0x33a   :  { %v809_v19 = vpop.f32.mrb[2].mxu1 }
 0x33b   :  { %v811_v22 = vpop.f32.mrb[3].mxu1 }
 0x33c   :  { %v816_v23 = vcombine.low %v809_v19, %v811_v22 }
 0x33e   :  { %v823_v26 = vrot.slane %v816_v23, %v6343_v44 }
 0x340   :  { %v825_v28 = vadd.f32 %v823_v26, %v739_v24 }
 0x342   :  { %833 = vrot.lane.b32.xlu1 %v825_v28, %s6191_s6  ;;  %v5300_v13 = vmul.f32 -1.442695, %v825_v28 }
 0x344   :  { %5948 = vpow2.f32 %v5300_v13 }
 0x34a   :  { %v657_v30 = vpop.f32.mrb[2].mxu0 }
 0x34b   :  { %v659_v33 = vpop.f32.mrb[3].mxu0 }
 0x34c   :  { %v664_v34 = vcombine.low %v657_v30, %v659_v33 }
 0x34e   :  { %v671_v37 = vrot.slane %v664_v34, %v6343_v44  ;;  %v5949_v51 = vpop.eup %5948 }
 0x34f   :  { %v829_v55 = vadd.f32 1.0, %v5949_v51 }
 0x350   :  { %v673_v38 = vadd.f32 %v671_v37, %v587_v35 }
 0x352   :  { %681 = vrot.lane.b32.xlu1 %v673_v38, %s6191_s6  ;;  %v5296_v52 = vmul.f32 -1.442695, %v673_v38 }
 0x354   :  { %5950 = vpow2.f32 %v5296_v52 }
 0x355   :  { %5952 = vrcp.f32 %v829_v55 }
 0x356   :  { %846 = vrot.lane.b32.xlu1 %v845_v42, %s6191_s6 }
 0x35a   :  { %694 = vrot.lane.b32.xlu1 %v693_v47, %s6191_s6 }
 0x35e   :  { %870 = vperm.xlu1 %5931, %v6516_v53   ;;  %v5951_v62 = vpop.eup %5950 }
 0x35f   :  { %v5953_v63 = vpop.eup %5952  ;;  %v677_v1 = vadd.f32 1.0, %v5951_v62 }
 0x360   :  { %v858_v36 = vrot.slane %v5953_v63, 2 }
 0x362   :  { %718 = vperm.xlu1 %5931, %v6521_v48  }
 0x3b4   :  { %v834_v59 = vpop.permute.xlu1 %833 }
 0x3b5   :  { %v835_v61 = vrot.slane %v834_v59, 2  ;;  %v33_v59 = vld [vmem:[%s7725_s1 + $0x10] sm:$0xf] }
 0x3b6   :  { %34 = vst [vmem:[#allocation6 + $0x8] sm:$0xf] %v33_v59 }
 0x3b7   :  { %5954 = vtanh.f32 %v835_v61 }
 0x3b8   :  { %5956 = vrcp.f32 %v677_v1 }
 0x3c1   :  { %v5955_v0 = vpop.eup %5954 }
 0x3c2   :  { %v850_v2 = vmul.f32 %v5955_v0, %v5953_v63  ;;  %v5957_v7 = vpop.eup %5956 }
 0x3c3   :  { %v706_v47 = vrot.slane %v5957_v7, 2 }
 0x3c4   :  { %852 = vrot.lane.b32.xlu0 %v850_v2, %s6191_s6  ;;  %v682_v3 = vpop.permute.xlu1 %681 }
 0x3c5   :  { %v683_v57 = vrot.slane %v682_v3, 2 }
 0x3c7   :  { %5958 = vtanh.f32 %v683_v57 }
 0x3c8   :  { %v847_v17 = vpop.permute.xlu1 %846 }
 0x3c9   :  { %v849_v58 = vmul.f32 %v5953_v63, %v847_v17 }
 0x3cc   :  { %v695_v22 = vpop.permute.xlu1 %694 }
 0x3cd   :  { %v697_v24 = vmul.f32 %v5957_v7, %v695_v22 }
 0x3d1   :  { %v5959_v11 = vpop.eup %5958 }
 0x3d2   :  { %v698_v12 = vmul.f32 %v5959_v11, %v5957_v7 }
 0x3d4   :  { %700 = vrot.lane.b32.xlu0 %v698_v12, %s6191_s6  ;;  %v895_v12 = vld [vmem:[#allocation6 + $0x8] sm:$0xf] }
 0x3dd   :  { %v871_v35 = vpop.permute.xlu1 %870 }
 0x3de   :  { %vm872_vm8 = vcmp.eq.s32.totalorder %v871_v35, 1 }
 0x436   :  { %v853_v18 = vpop.permute.xlu0 %852 }
 0x437   :  { %v855_v19 = vadd.f32 %v853_v18, %v849_v58 }
 0x439   :  { %5960 = vtanh.f32 %v855_v19  ;;  %v881_v33 = vrot.slane %v855_v19, %v6343_v44 }
 0x443   :  { %v5961_v23 = vpop.eup %5960 }
 0x444   :  { %861 = vrot.lane.b32.xlu0 %v5961_v23, %s6191_s6 }
 0x446   :  { %v701_v26 = vpop.permute.xlu0 %700 }
 0x447   :  { %v703_v28 = vadd.f32 %v701_v26, %v697_v24  ;;  %v6601_v26 = vsel %vm5305_vm11, 1, %v6192_v15 }
 0x449   :  { %5962 = vtanh.f32 %v703_v28  ;;  %v729_v34 = vrot.slane %v703_v28, %v6343_v44 }
 0x453   :  { %v5963_v30 = vpop.eup %5962 }
 0x454   :  { %709 = vrot.lane.b32.xlu0 %v5963_v30, %s6191_s6 }
 0x458   :  { %882 = vrot.lane.b32.xlu0 %v881_v33, %s6191_s6 }
 0x45c   :  { %730 = vrot.lane.b32.xlu0 %v729_v34, %s6191_s6 }
 0x4b6   :  { %v862_v37 = vpop.permute.xlu0 %861 }
 0x4b7   :  { %v864_v38 = vmul.f32 %v862_v37, %v858_v36 }
 0x4b9   :  { %v6534_v42 = vsel %vm872_vm8, %v864_v38, %v6454_v5  ;;  %v6537_v43 = vsel %vm872_vm8, %v864_v38, 0.0  ;;  %v719_v5 = vpop.permute.xlu1 %718 }
 0x4ba   :  { %5307 = vmatmul.mubr.msk.f32.vlgmr.msra.gmra.mrb[4].mxu1 %vm279_vm1, %v6534_v42  ;;  %vm720_vm9 = vcmp.eq.s32.totalorder %v719_v5, 1 }
 0x4bb   :  { %5529 = vmatpush1.bf16.msra.mxu1 %v6253_v9  ;;  %1423 = vmatprep.mubr.f32.mxu1 %v6189_v8 }
 0x4bc   :  { %5531 = vmatprep.subr.bf16.mxu1 %v6267_v16 }
 0x4bf   :  { %5533 = vmatpush1.bf16.msra.mxu1 %v6282_v21 }
 0x4c0   :  { %5535 = vmatprep.subr.bf16.mxu1 %v6306_v31 }
 0x4c3   :  { %5537 = vmatpush1.bf16.msra.mxu1 %v6330_v39 }
 0x4c4   :  { %5539 = vmatprep.subr.bf16.mxu1 %v6346_v45 }
 0x4c6   :  { %v710_v13 = vpop.permute.xlu0 %709 }
 0x4c7   :  { %v712_v51 = vmul.f32 %v710_v13, %v706_v47  ;;  %5541 = vmatpush1.bf16.msra.mxu1 %v6372_v54 }
 0x4c8   :  { %5559 = vmatprep.subr.bf16.mxu1 %v6232_v4 }
 0x4c9   :  { %v734_v52 = vsel %vm720_vm9, %v712_v51, 0.0  ;;  %v6553_v55 = vsel %vm720_vm9, %v712_v51, %v6472_v14  ;;  %v5285_v14 = vld [vmem:[%s7726_s2 + $0x6c] sm:$0xf] }
 0x4ca   :  { %5298 = vst.msk [vmem:[%s7729_s5 + $0x2] sm:$0x3] %vm234_vm0, %v734_v52  ;;  %5303 = vmatmul.mubr.msk.f32.vlgmr.msra.gmra.mrb[4].mxu0 %vm279_vm1, %v6553_v55  ;;  %163 = vst [vmem:[#allocation7 + $0x34] sm:$0xf] %v5285_v14  ;;  %v883_v7 = vpop.permute.xlu0 %882 }
 0x4cb   :  { %5513 = vmatpush1.bf16.msra.mxu0 %v6280_v20  ;;  %1271 = vmatprep.mubr.f32.mxu0 %v6189_v8  ;;  %v6581_v18 = vsel %vm872_vm8, %v883_v7, %v6501_v41  ;;  %v6596_v41 = vsel %vm5309_vm10, 1, %v6192_v15 }
 0x4cc   :  { %5515 = vmatprep.subr.bf16.mxu0 %v6294_v27  ;;  %v1153_v22 = vrot.slane %v6581_v18, %v6343_v44 }
 0x4ce   :  { %v731_v19 = vpop.permute.xlu0 %730 }
 0x4cf   :  { %5517 = vmatpush1.bf16.msra.mxu0 %v6308_v32  ;;  %v6588_v23 = vsel %vm720_vm9, %v731_v19, %v6508_v46 }
 0x4d0   :  { %5519 = vmatprep.subr.bf16.mxu0 %v6332_v40  ;;  %v1001_v24 = vrot.slane %v6588_v23, %v6343_v44 }
 0x4d1   :  { %v1047_v0 = vld [vmem:[#allocation7 + $0x34] sm:$0xf] }
 0x4d3   :  { %5521 = vmatpush1.bf16.msra.mxu0 %v6358_v49 }
 0x4d4   :  { %5523 = vmatprep.subr.bf16.mxu0 %v6361_v50 }
 0x4d7   :  { %5525 = vmatpush1.bf16.msra.mxu0 %v6378_v56 }
 0x4d8   :  { %5543 = vmatprep.subr.bf16.mxu0 %v6255_v10 }
 0x58d   :  { %v1117_v61 = vpop.f32.mrb[4].mxu1 }
 0x58e   :  { %v1119_v62 = vpop.f32.mrb[5].mxu1 }
 0x58f   :  { %v1124_v63 = vcombine.low %v1117_v61, %v1119_v62 }
 0x591   :  { %v1131_v1 = vrot.slane %v1124_v63, %v6343_v44 }
 0x593   :  { %v1133_v2 = vadd.f32 %v1131_v1, %v1047_v0 }
 0x595   :  { %1141 = vrot.lane.b32.xlu1 %v1133_v2, %s6191_s6  ;;  %v5308_v46 = vmul.f32 -1.442695, %v1133_v2 }
 0x597   :  { %5964 = vpow2.f32 %v5308_v46 }
 0x59d   :  { %v965_v3 = vpop.f32.mrb[4].mxu0 }
 0x59e   :  { %v967_v57 = vpop.f32.mrb[5].mxu0 }
 0x59f   :  { %v972_v11 = vcombine.low %v965_v3, %v967_v57 }
 0x5a1   :  { %v979_v17 = vrot.slane %v972_v11, %v6343_v44  ;;  %v5965_v28 = vpop.eup %5964 }
 0x5a2   :  { %v1137_v33 = vadd.f32 1.0, %v5965_v28 }
 0x5a3   :  { %v981_v58 = vadd.f32 %v979_v17, %v895_v12 }
 0x5a5   :  { %989 = vrot.lane.b32.xlu1 %v981_v58, %s6191_s6  ;;  %v5304_v30 = vmul.f32 -1.442695, %v981_v58 }
 0x5a7   :  { %5966 = vpow2.f32 %v5304_v30 }
 0x5a8   :  { %5968 = vrcp.f32 %v1137_v33 }
 0x5a9   :  { %1154 = vrot.lane.b32.xlu1 %v1153_v22, %s6191_s6 }
 0x5ad   :  { %1002 = vrot.lane.b32.xlu1 %v1001_v24, %s6191_s6 }
 0x5b1   :  { %1178 = vperm.xlu1 %5931, %v6596_v41   ;;  %v5967_v36 = vpop.eup %5966 }
 0x5b2   :  { %v5969_v37 = vpop.eup %5968  ;;  %v985_v5 = vadd.f32 1.0, %v5967_v36 }
 0x5b3   :  { %v1166_v19 = vrot.slane %v5969_v37, 2 }
 0x5b5   :  { %1026 = vperm.xlu1 %5931, %v6601_v26  }
 0x607   :  { %v1142_v34 = vpop.permute.xlu1 %1141 }
 0x608   :  { %v1143_v35 = vrot.slane %v1142_v34, 2 }
 0x60a   :  { %5970 = vtanh.f32 %v1143_v35 }
 0x60b   :  { %5972 = vrcp.f32 %v985_v5 }
 0x614   :  { %v5971_v38 = vpop.eup %5970 }
 0x615   :  { %v1158_v47 = vmul.f32 %v5971_v38, %v5969_v37  ;;  %v5973_v52 = vpop.eup %5972 }
 0x616   :  { %v1014_v30 = vrot.slane %v5973_v52, 2 }
 0x617   :  { %1160 = vrot.lane.b32.xlu0 %v1158_v47, %s6191_s6  ;;  %v990_v13 = vpop.permute.xlu1 %989 }
 0x618   :  { %v991_v51 = vrot.slane %v990_v13, 2 }
 0x61a   :  { %5974 = vtanh.f32 %v991_v51 }
 0x61b   :  { %v1155_v61 = vpop.permute.xlu1 %1154 }
 0x61c   :  { %v1157_v62 = vmul.f32 %v5969_v37, %v1155_v61  ;;  %v35_v37 = vld [vmem:[%s7725_s1 + $0x18] sm:$0xf] }
 0x61d   :  { %36 = vst [vmem:[#allocation6 + $0xc] sm:$0xf] %v35_v37 }
 0x61f   :  { %v1003_v1 = vpop.permute.xlu1 %1002 }
 0x620   :  { %v1005_v3 = vmul.f32 %v5973_v52, %v1003_v1 }
 0x624   :  { %v5975_v14 = vpop.eup %5974 }
 0x625   :  { %v1006_v59 = vmul.f32 %v5975_v14, %v5973_v52 }
 0x627   :  { %1008 = vrot.lane.b32.xlu0 %v1006_v59, %s6191_s6 }
 0x630   :  { %v1179_v58 = vpop.permute.xlu1 %1178 }
 0x631   :  { %vm1180_vm12 = vcmp.eq.s32.totalorder %v1179_v58, 1 }
 0x689   :  { %v1161_v63 = vpop.permute.xlu0 %1160 }
 0x68a   :  { %v1163_v0 = vadd.f32 %v1161_v63, %v1157_v62  ;;  %v1203_v63 = vld [vmem:[#allocation6 + $0xc] sm:$0xf] }
 0x68c   :  { %5976 = vtanh.f32 %v1163_v0  ;;  %v1189_v12 = vrot.slane %v1163_v0, %v6343_v44 }
 0x696   :  { %v5977_v2 = vpop.eup %5976 }
 0x697   :  { %1169 = vrot.lane.b32.xlu0 %v5977_v2, %s6191_s6 }
 0x699   :  { %v1009_v57 = vpop.permute.xlu0 %1008 }
 0x69a   :  { %v1011_v7 = vadd.f32 %v1009_v57, %v1005_v3 }
 0x69c   :  { %5978 = vtanh.f32 %v1011_v7  ;;  %v1037_v17 = vrot.slane %v1011_v7, %v6343_v44 }
 0x6a6   :  { %v5979_v11 = vpop.eup %5978 }
 0x6a7   :  { %1017 = vrot.lane.b32.xlu0 %v5979_v11, %s6191_s6 }
 0x6ab   :  { %1190 = vrot.lane.b32.xlu0 %v1189_v12, %s6191_s6  ;;  %v6681_v12 = vsel %vm5313_vm15, 1, %v6192_v15 }
 0x6af   :  { %1038 = vrot.lane.b32.xlu0 %v1037_v17, %s6191_s6 }
 0x709   :  { %v1170_v22 = vpop.permute.xlu0 %1169 }
 0x70a   :  { %v1172_v24 = vmul.f32 %v1170_v22, %v1166_v19 }
 0x70c   :  { %v6614_v46 = vsel %vm1180_vm12, %v1172_v24, %v6534_v42  ;;  %v6617_v28 = vsel %vm1180_vm12, %v1172_v24, 0.0  ;;  %v1027_v42 = vpop.permute.xlu1 %1026 }
 0x70d   :  { %5315 = vmatmul.mubr.msk.f32.vlgmr.msra.gmra.mrb[6].mxu1 %vm279_vm1, %v6614_v46  ;;  %vm1028_vm13 = vcmp.eq.s32.totalorder %v1027_v42, 1 }
 0x70e   :  { %5561 = vmatpush1.bf16.msra.mxu1 %v6253_v9  ;;  %1731 = vmatprep.mubr.f32.mxu1 %v6189_v8 }
 0x70f   :  { %5563 = vmatprep.subr.bf16.mxu1 %v6267_v16 }
 0x712   :  { %5565 = vmatpush1.bf16.msra.mxu1 %v6282_v21 }
 0x713   :  { %5567 = vmatprep.subr.bf16.mxu1 %v6306_v31 }
 0x716   :  { %5569 = vmatpush1.bf16.msra.mxu1 %v6330_v39 }
 0x717   :  { %5571 = vmatprep.subr.bf16.mxu1 %v6346_v45 }
 0x719   :  { %v1018_v33 = vpop.permute.xlu0 %1017 }
 0x71a   :  { %v1020_v34 = vmul.f32 %v1018_v33, %v1014_v30  ;;  %5573 = vmatpush1.bf16.msra.mxu1 %v6372_v54 }
 0x71b   :  { %5591 = vmatprep.subr.bf16.mxu1 %v6232_v4 }
 0x71c   :  { %v1042_v35 = vsel %vm1028_vm13, %v1020_v34, 0.0  ;;  %v6633_v36 = vsel %vm1028_vm13, %v1020_v34, %v6553_v55  ;;  %v5284_v55 = vld [vmem:[%s7726_s2 + $0x64] sm:$0xf] }
 0x71d   :  { %5306 = vst.msk [vmem:[%s7729_s5 + $0x4] sm:$0x3] %vm234_vm0, %v1042_v35  ;;  %5311 = vmatmul.mubr.msk.f32.vlgmr.msra.gmra.mrb[6].mxu0 %vm279_vm1, %v6633_v36  ;;  %161 = vst [vmem:[#allocation7 + $0x30] sm:$0xf] %v5284_v55  ;;  %v1191_v61 = vpop.permute.xlu0 %1190 }
 0x71e   :  { %5545 = vmatpush1.bf16.msra.mxu0 %v6280_v20  ;;  %1579 = vmatprep.mubr.f32.mxu0 %v6189_v8  ;;  %v6661_v2 = vsel %vm1180_vm12, %v1191_v61, %v6581_v18  ;;  %v6676_v18 = vsel %vm5317_vm14, 1, %v6192_v15 }
 0x71f   :  { %5547 = vmatprep.subr.bf16.mxu0 %v6294_v27  ;;  %v1461_v57 = vrot.slane %v6661_v2, %v6343_v44 }
 0x721   :  { %v1039_v3 = vpop.permute.xlu0 %1038 }
 0x722   :  { %5549 = vmatpush1.bf16.msra.mxu0 %v6308_v32  ;;  %v6668_v7 = vsel %vm1028_vm13, %v1039_v3, %v6588_v23 }
 0x723   :  { %5551 = vmatprep.subr.bf16.mxu0 %v6332_v40  ;;  %v1309_v11 = vrot.slane %v6668_v7, %v6343_v44 }
 0x724   :  { %v1355_v13 = vld [vmem:[#allocation7 + $0x30] sm:$0xf] }
 0x726   :  { %5553 = vmatpush1.bf16.msra.mxu0 %v6358_v49 }
 0x727   :  { %5555 = vmatprep.subr.bf16.mxu0 %v6361_v50 }
 0x72a   :  { %5557 = vmatpush1.bf16.msra.mxu0 %v6378_v56 }
 0x72b   :  { %5575 = vmatprep.subr.bf16.mxu0 %v6255_v10 }
 0x7e0   :  { %v1425_v38 = vpop.f32.mrb[6].mxu1 }
 0x7e1   :  { %v1427_v5 = vpop.f32.mrb[7].mxu1 }
 0x7e2   :  { %v1432_v47 = vcombine.low %v1425_v38, %v1427_v5 }
 0x7e4   :  { %v1439_v51 = vrot.slane %v1432_v47, %v6343_v44 }
 0x7e6   :  { %v1441_v52 = vadd.f32 %v1439_v51, %v1355_v13 }
 0x7e8   :  { %1449 = vrot.lane.b32.xlu1 %v1441_v52, %s6191_s6  ;;  %v5316_v23 = vmul.f32 -1.442695, %v1441_v52 }
 0x7ea   :  { %5980 = vpow2.f32 %v5316_v23 }
 0x7f0   :  { %v1273_v14 = vpop.f32.mrb[6].mxu0 }
 0x7f1   :  { %v1275_v59 = vpop.f32.mrb[7].mxu0 }
 0x7f2   :  { %v1280_v62 = vcombine.low %v1273_v14, %v1275_v59 }
 0x7f4   :  { %v1287_v0 = vrot.slane %v1280_v62, %v6343_v44  ;;  %v5981_v17 = vpop.eup %5980 }
 0x7f5   :  { %v1445_v19 = vadd.f32 1.0, %v5981_v17 }
 0x7f6   :  { %v1289_v1 = vadd.f32 %v1287_v0, %v1203_v63 }
 0x7f8   :  { %1297 = vrot.lane.b32.xlu1 %v1289_v1, %s6191_s6  ;;  %v5312_v58 = vmul.f32 -1.442695, %v1289_v1 }
 0x7fa   :  { %5982 = vpow2.f32 %v5312_v58 }
 0x7fb   :  { %5984 = vrcp.f32 %v1445_v19 }
 0x7fc   :  { %1462 = vrot.lane.b32.xlu1 %v1461_v57, %s6191_s6 }
 0x800   :  { %1310 = vrot.lane.b32.xlu1 %v1309_v11, %s6191_s6 }
 0x804   :  { %1486 = vperm.xlu1 %5931, %v6676_v18   ;;  %v5983_v42 = vpop.eup %5982 }
 0x805   :  { %v5985_v30 = vpop.eup %5984  ;;  %v1293_v34 = vadd.f32 1.0, %v5983_v42 }
 0x806   :  { %v1474_v23 = vrot.slane %v5985_v30, 2 }
 0x808   :  { %1334 = vperm.xlu1 %5931, %v6681_v12  }
 0x85a   :  { %v1450_v22 = vpop.permute.xlu1 %1449 }
 0x85b   :  { %v1451_v24 = vrot.slane %v1450_v22, 2 }
 0x85d   :  { %5986 = vtanh.f32 %v1451_v24 }
 0x85e   :  { %5988 = vrcp.f32 %v1293_v34 }
 0x867   :  { %v5987_v33 = vpop.eup %5986 }
 0x868   :  { %v1466_v35 = vmul.f32 %v5987_v33, %v5985_v30  ;;  %v5989_v38 = vpop.eup %5988 }
 0x869   :  { %v1322_v24 = vrot.slane %v5989_v38, 2 }
 0x86a   :  { %1468 = vrot.lane.b32.xlu0 %v1466_v35, %s6191_s6  ;;  %v1298_v55 = vpop.permute.xlu1 %1297  ;;  %v37_v35 = vld [vmem:[%s7725_s1 + $0x20] sm:$0xf] }
 0x86b   :  { %v1299_v37 = vrot.slane %v1298_v55, 2  ;;  %38 = vst [vmem:[#allocation6 + $0x10] sm:$0xf] %v37_v35 }
 0x86d   :  { %5990 = vtanh.f32 %v1299_v37 }
 0x86e   :  { %v1463_v13 = vpop.permute.xlu1 %1462 }
 0x86f   :  { %v1465_v51 = vmul.f32 %v5985_v30, %v1463_v13 }
 0x872   :  { %v1311_v59 = vpop.permute.xlu1 %1310 }
 0x873   :  { %v1313_v62 = vmul.f32 %v5989_v38, %v1311_v59 }
 0x877   :  { %v5991_v5 = vpop.eup %5990 }
 0x878   :  { %v1314_v47 = vmul.f32 %v5991_v5, %v5989_v38 }
 0x87a   :  { %1316 = vrot.lane.b32.xlu0 %v1314_v47, %s6191_s6 }
 0x883   :  { %v1487_v11 = vpop.permute.xlu1 %1486 }
 0x884   :  { %vm1488_vm2 = vcmp.eq.s32.totalorder %v1487_v11, 1  ;;  %v6761_v11 = vsel %vm5321_vm5, 1, %v6192_v15 }
 0x8dc   :  { %v1469_v52 = vpop.permute.xlu0 %1468 }
 0x8dd   :  { %v1471_v14 = vadd.f32 %v1469_v52, %v1465_v51 }
 0x8df   :  { %5992 = vtanh.f32 %v1471_v14  ;;  %v1497_v3 = vrot.slane %v1471_v14, %v6343_v44 }
 0x8e9   :  { %v5993_v61 = vpop.eup %5992 }
 0x8ea   :  { %1477 = vrot.lane.b32.xlu0 %v5993_v61, %s6191_s6  ;;  %v1511_v61 = vld [vmem:[#allocation6 + $0x10] sm:$0xf] }
 0x8ec   :  { %v1317_v63 = vpop.permute.xlu0 %1316 }
 0x8ed   :  { %v1319_v0 = vadd.f32 %v1317_v63, %v1313_v62 }
 0x8ef   :  { %5994 = vtanh.f32 %v1319_v0  ;;  %v1345_v57 = vrot.slane %v1319_v0, %v6343_v44 }
 0x8f9   :  { %v5995_v1 = vpop.eup %5994 }
 0x8fa   :  { %1325 = vrot.lane.b32.xlu0 %v5995_v1, %s6191_s6 }
 0x8fe   :  { %1498 = vrot.lane.b32.xlu0 %v1497_v3, %s6191_s6 }
 0x902   :  { %1346 = vrot.lane.b32.xlu0 %v1345_v57, %s6191_s6 }
 0x95c   :  { %v1478_v17 = vpop.permute.xlu0 %1477 }
 0x95d   :  { %v1480_v58 = vmul.f32 %v1478_v17, %v1474_v23 }
 0x95f   :  { %v6694_v19 = vsel %vm1488_vm2, %v1480_v58, %v6614_v46  ;;  %v6697_v22 = vsel %vm1488_vm2, %v1480_v58, 0.0  ;;  %v1335_v46 = vpop.permute.xlu1 %1334 }
 0x960   :  { %5323 = vmatmul.mubr.msk.f32.vlgmr.msra.gmra.mrb[8].mxu1 %vm279_vm1, %v6694_v19  ;;  %vm1336_vm3 = vcmp.eq.s32.totalorder %v1335_v46, 1 }
 0x961   :  { %5593 = vmatpush1.bf16.msra.mxu1 %v6253_v9  ;;  %2039 = vmatprep.mubr.f32.mxu1 %v6189_v8 }
 0x962   :  { %5595 = vmatprep.subr.bf16.mxu1 %v6267_v16 }
 0x965   :  { %5597 = vmatpush1.bf16.msra.mxu1 %v6282_v21 }
 0x966   :  { %5599 = vmatprep.subr.bf16.mxu1 %v6306_v31 }
 0x969   :  { %5601 = vmatpush1.bf16.msra.mxu1 %v6330_v39 }
 0x96a   :  { %5603 = vmatprep.subr.bf16.mxu1 %v6346_v45 }
 0x96c   :  { %v1326_v42 = vpop.permute.xlu0 %1325 }
 0x96d   :  { %v1328_v30 = vmul.f32 %v1326_v42, %v1322_v24  ;;  %5605 = vmatpush1.bf16.msra.mxu1 %v6372_v54 }
 0x96e   :  { %5623 = vmatprep.subr.bf16.mxu1 %v6232_v4 }
 0x96f   :  { %v1350_v33 = vsel %vm1336_vm3, %v1328_v30, 0.0  ;;  %v6713_v34 = vsel %vm1336_vm3, %v1328_v30, %v6633_v36  ;;  %v5283_v36 = vld [vmem:[%s7726_s2 + $0x5c] sm:$0xf] }
 0x970   :  { %5314 = vst.msk [vmem:[%s7729_s5 + $0x6] sm:$0x3] %vm234_vm0, %v1350_v33  ;;  %5319 = vmatmul.mubr.msk.f32.vlgmr.msra.gmra.mrb[8].mxu0 %vm279_vm1, %v6713_v34  ;;  %159 = vst [vmem:[#allocation7 + $0x2c] sm:$0xf] %v5283_v36  ;;  %v1499_v14 = vpop.permute.xlu0 %1498 }
 0x971   :  { %5577 = vmatpush1.bf16.msra.mxu0 %v6280_v20  ;;  %1887 = vmatprep.mubr.f32.mxu0 %v6189_v8  ;;  %v6741_v0 = vsel %vm1488_vm2, %v1499_v14, %v6661_v2  ;;  %v6756_v2 = vsel %vm5325_vm4, 1, %v6192_v15 }
 0x972   :  { %5579 = vmatprep.subr.bf16.mxu0 %v6294_v27  ;;  %v1769_v3 = vrot.slane %v6741_v0, %v6343_v44 }
 0x974   :  { %v1347_v1 = vpop.permute.xlu0 %1346 }
 0x975   :  { %5581 = vmatpush1.bf16.msra.mxu0 %v6308_v32  ;;  %v6748_v57 = vsel %vm1336_vm3, %v1347_v1, %v6668_v7 }
 0x976   :  { %5583 = vmatprep.subr.bf16.mxu0 %v6332_v40  ;;  %v1617_v23 = vrot.slane %v6748_v57, %v6343_v44 }
 0x977   :  { %v1663_v5 = vld [vmem:[#allocation7 + $0x2c] sm:$0xf] }
 0x979   :  { %5585 = vmatpush1.bf16.msra.mxu0 %v6358_v49 }
 0x97a   :  { %5587 = vmatprep.subr.bf16.mxu0 %v6361_v50 }
 0x97d   :  { %5589 = vmatpush1.bf16.msra.mxu0 %v6378_v56 }
 0x97e   :  { %5607 = vmatprep.subr.bf16.mxu0 %v6255_v10 }
 0xa33   :  { %v1733_v55 = vpop.f32.mrb[8].mxu1 }
 0xa34   :  { %v1735_v37 = vpop.f32.mrb[9].mxu1 }
 0xa35   :  { %v1740_v38 = vcombine.low %v1733_v55, %v1735_v37 }
 0xa37   :  { %v1747_v47 = vrot.slane %v1740_v38, %v6343_v44 }
 0xa39   :  { %v1749_v13 = vadd.f32 %v1747_v47, %v1663_v5 }
 0xa3b   :  { %1757 = vrot.lane.b32.xlu1 %v1749_v13, %s6191_s6  ;;  %v5324_v7 = vmul.f32 -1.442695, %v1749_v13 }
 0xa3d   :  { %5996 = vpow2.f32 %v5324_v7 }
 0xa43   :  { %v1581_v51 = vpop.f32.mrb[8].mxu0 }
 0xa44   :  { %v1583_v52 = vpop.f32.mrb[9].mxu0 }
 0xa45   :  { %v1588_v59 = vcombine.low %v1581_v51, %v1583_v52 }
 0xa47   :  { %v1595_v62 = vrot.slane %v1588_v59, %v6343_v44  ;;  %v5997_v17 = vpop.eup %5996 }
 0xa48   :  { %v1753_v46 = vadd.f32 1.0, %v5997_v17 }
 0xa49   :  { %v1597_v63 = vadd.f32 %v1595_v62, %v1511_v61 }
 0xa4b   :  { %1605 = vrot.lane.b32.xlu1 %v1597_v63, %s6191_s6  ;;  %v5320_v58 = vmul.f32 -1.442695, %v1597_v63 }
 0xa4d   :  { %5998 = vpow2.f32 %v5320_v58 }
 0xa4e   :  { %6000 = vrcp.f32 %v1753_v46 }
 0xa4f   :  { %1770 = vrot.lane.b32.xlu1 %v1769_v3, %s6191_s6 }
 0xa53   :  { %1618 = vrot.lane.b32.xlu1 %v1617_v23, %s6191_s6 }
 0xa57   :  { %1794 = vperm.xlu1 %5931, %v6756_v2   ;;  %v5999_v30 = vpop.eup %5998 }
 0xa58   :  { %v6001_v33 = vpop.eup %6000  ;;  %v1601_v36 = vadd.f32 1.0, %v5999_v30 }
 0xa59   :  { %v1782_v58 = vrot.slane %v6001_v33, 2 }
 0xa5b   :  { %1642 = vperm.xlu1 %5931, %v6761_v11  }
 0xaad   :  { %v1758_v24 = vpop.permute.xlu1 %1757 }
 0xaae   :  { %v1759_v42 = vrot.slane %v1758_v24, 2 }
 0xab0   :  { %6002 = vtanh.f32 %v1759_v42 }
 0xab1   :  { %6004 = vrcp.f32 %v1601_v36 }
 0xaba   :  { %v6003_v25 = vpop.eup %6002 }
 0xabb   :  { %v1774_v35 = vmul.f32 %v6003_v25, %v6001_v33  ;;  %v6005_v38 = vpop.eup %6004 }
 0xabd   :  { %1776 = vrot.lane.b32.xlu0 %v1774_v35, %s6191_s6  ;;  %v1606_v55 = vpop.permute.xlu1 %1605 }
 0xabe   :  { %v1607_v37 = vrot.slane %v1606_v55, 2 }
 0xac0   :  { %6006 = vtanh.f32 %v1607_v37  ;;  %v39_v37 = vld [vmem:[%s7725_s1 + $0x28] sm:$0xf] }
 0xac1   :  { %v1771_v13 = vpop.permute.xlu1 %1770  ;;  %40 = vst [vmem:[#allocation6 + $0x14] sm:$0xf] %v39_v37 }
 0xac2   :  { %v1773_v51 = vmul.f32 %v6001_v33, %v1771_v13  ;;  %v1630_v33 = vrot.slane %v6005_v38, 2 }
 0xac5   :  { %v1619_v59 = vpop.permute.xlu1 %1618 }
 0xac6   :  { %v1621_v62 = vmul.f32 %v6005_v38, %v1619_v59 }
 0xaca   :  { %v6007_v5 = vpop.eup %6006 }
 0xacb   :  { %v1622_v47 = vmul.f32 %v6007_v5, %v6005_v38 }
 0xacd   :  { %1624 = vrot.lane.b32.xlu0 %v1622_v47, %s6191_s6 }
 0xad6   :  { %v1795_v17 = vpop.permute.xlu1 %1794 }
 0xad7   :  { %vm1796_vm6 = vcmp.eq.s32.totalorder %v1795_v17, 1 }
 0xb2f   :  { %v1777_v52 = vpop.permute.xlu0 %1776 }
 0xb30   :  { %v1779_v14 = vadd.f32 %v1777_v52, %v1773_v51 }
 0xb32   :  { %6008 = vtanh.f32 %v1779_v14  ;;  %v1805_v23 = vrot.slane %v1779_v14, %v6343_v44 }
 0xb3c   :  { %v6009_v61 = vpop.eup %6008 }
 0xb3d   :  { %1785 = vrot.lane.b32.xlu0 %v6009_v61, %s6191_s6 }
 0xb3f   :  { %v1625_v63 = vpop.permute.xlu0 %1624 }
 0xb40   :  { %v1627_v1 = vadd.f32 %v1625_v63, %v1621_v62  ;;  %v1819_v63 = vld [vmem:[#allocation6 + $0x14] sm:$0xf] }
 0xb42   :  { %6010 = vtanh.f32 %v1627_v1  ;;  %v1653_v7 = vrot.slane %v1627_v1, %v6343_v44 }
 0xb4c   :  { %v6011_v3 = vpop.eup %6010 }
 0xb4d   :  { %1633 = vrot.lane.b32.xlu0 %v6011_v3, %s6191_s6 }
 0xb51   :  { %1806 = vrot.lane.b32.xlu0 %v1805_v23, %s6191_s6 }
 0xb55   :  { %1654 = vrot.lane.b32.xlu0 %v1653_v7, %s6191_s6 }
 0xbaf   :  { %v1786_v46 = vpop.permute.xlu0 %1785 }
 0xbb0   :  { %v1788_v24 = vmul.f32 %v1786_v46, %v1782_v58 }
 0xbb2   :  { %v6774_v42 = vsel %vm1796_vm6, %v1788_v24, %v6694_v19  ;;  %v6777_v30 = vsel %vm1796_vm6, %v1788_v24, 0.0  ;;  %v1643_v19 = vpop.permute.xlu1 %1642 }
 0xbb3   :  { %5331 = vmatmul.mubr.msk.f32.vlgmr.msra.gmra.mrb[10].mxu1 %vm279_vm1, %v6774_v42  ;;  %vm1644_vm7 = vcmp.eq.s32.totalorder %v1643_v19, 1 }
 0xbb4   :  { %5625 = vmatpush1.bf16.msra.mxu1 %v6253_v9  ;;  %2347 = vmatprep.mubr.f32.mxu1 %v6189_v8 }
 0xbb5   :  { %5627 = vmatprep.subr.bf16.mxu1 %v6267_v16 }
 0xbb8   :  { %5629 = vmatpush1.bf16.msra.mxu1 %v6282_v21 }
 0xbb9   :  { %5631 = vmatprep.subr.bf16.mxu1 %v6306_v31 }
 0xbbc   :  { %5633 = vmatpush1.bf16.msra.mxu1 %v6330_v39 }
 0xbbd   :  { %5635 = vmatprep.subr.bf16.mxu1 %v6346_v45 }
 0xbbf   :  { %v1634_v25 = vpop.permute.xlu0 %1633 }
 0xbc0   :  { %v1636_v36 = vmul.f32 %v1634_v25, %v1630_v33  ;;  %5637 = vmatpush1.bf16.msra.mxu1 %v6372_v54 }
 0xbc1   :  { %5655 = vmatprep.subr.bf16.mxu1 %v6232_v4 }
 0xbc2   :  { %v1658_v35 = vsel %vm1644_vm7, %v1636_v36, 0.0  ;;  %v6793_v55 = vsel %vm1644_vm7, %v1636_v36, %v6713_v34  ;;  %v5282_v34 = vld [vmem:[%s7726_s2 + $0x54] sm:$0xf] }
 0xbc3   :  { %5322 = vst.msk [vmem:[%s7729_s5 + $0x8] sm:$0x3] %vm234_vm0, %v1658_v35  ;;  %5327 = vmatmul.mubr.msk.f32.vlgmr.msra.gmra.mrb[10].mxu0 %vm279_vm1, %v6793_v55  ;;  %157 = vst [vmem:[#allocation7 + $0x28] sm:$0xf] %v5282_v34  ;;  %v1807_v61 = vpop.permute.xlu0 %1806 }
 0xbc4   :  { %5609 = vmatpush1.bf16.msra.mxu0 %v6280_v20  ;;  %2195 = vmatprep.mubr.f32.mxu0 %v6189_v8  ;;  %v6821_v23 = vsel %vm1796_vm6, %v1807_v61, %v6741_v0  ;;  %v6836_v0 = vld [vmem:[%s7724_s0] sm:$0x3] }
 0xbc5   :  { %5611 = vmatprep.subr.bf16.mxu0 %v6294_v27  ;;  %v2077_v58 = vrot.slane %v6821_v23, %v6343_v44  ;;  %vm5333_vm8 = vcmp.gt.s32.totalorder %v6836_v0, 10  ;;  %vm5329_vm9 = vcmp.gt.s32.totalorder %v6836_v0, 5  ;;  %vm5341_vm12 = vcmp.gt.s32.totalorder %v6836_v0, 9 }
 0xbc6   :  { %v6841_v17 = vsel %vm5333_vm8, 1, %v6192_v15  ;;  %vm5337_vm13 = vcmp.gt.s32.totalorder %v6836_v0, 6  ;;  %vm5349_vm2 = vcmp.gt.s32.totalorder %v6836_v0, 8  ;;  %vm5345_vm3 = vcmp.gt.s32.totalorder %v6836_v0, 7 }
 0xbc7   :  { %v1655_v7 = vpop.permute.xlu0 %1654 }
 0xbc8   :  { %5613 = vmatpush1.bf16.msra.mxu0 %v6308_v32  ;;  %v6828_v46 = vsel %vm1644_vm7, %v1655_v7, %v6748_v57  ;;  %v6846_v57 = vsel %vm5329_vm9, 1, %v6192_v15 }
 0xbc9   :  { %5615 = vmatprep.subr.bf16.mxu0 %v6332_v40  ;;  %v1925_v24 = vrot.slane %v6828_v46, %v6343_v44 }
 0xbca   :  { %v1971_v13 = vld [vmem:[#allocation7 + $0x28] sm:$0xf] }
 0xbcc   :  { %5617 = vmatpush1.bf16.msra.mxu0 %v6358_v49 }
 0xbcd   :  { %5619 = vmatprep.subr.bf16.mxu0 %v6361_v50 }
 0xbd0   :  { %5621 = vmatpush1.bf16.msra.mxu0 %v6378_v56 }
 0xbd1   :  { %5639 = vmatprep.subr.bf16.mxu0 %v6255_v10 }
 0xc86   :  { %v2041_v38 = vpop.f32.mrb[10].mxu1 }
 0xc87   :  { %v2043_v5 = vpop.f32.mrb[11].mxu1 }
 0xc88   :  { %v2048_v47 = vcombine.low %v2041_v38, %v2043_v5 }
 0xc8a   :  { %v2055_v51 = vrot.slane %v2048_v47, %v6343_v44 }
 0xc8c   :  { %v2057_v52 = vadd.f32 %v2055_v51, %v1971_v13 }
 0xc8e   :  { %2065 = vrot.lane.b32.xlu1 %v2057_v52, %s6191_s6  ;;  %v5332_v19 = vmul.f32 -1.442695, %v2057_v52 }
 0xc90   :  { %6012 = vpow2.f32 %v5332_v19 }
 0xc96   :  { %v1889_v14 = vpop.f32.mrb[10].mxu0 }
 0xc97   :  { %v1891_v59 = vpop.f32.mrb[11].mxu0 }
 0xc98   :  { %v1896_v62 = vcombine.low %v1889_v14, %v1891_v59 }
 0xc9a   :  { %v1903_v1 = vrot.slane %v1896_v62, %v6343_v44  ;;  %v6013_v33 = vpop.eup %6012 }
 0xc9b   :  { %v2061_v36 = vadd.f32 1.0, %v6013_v33 }
 0xc9c   :  { %v1905_v3 = vadd.f32 %v1903_v1, %v1819_v63 }
 0xc9e   :  { %1913 = vrot.lane.b32.xlu1 %v1905_v3, %s6191_s6  ;;  %v5328_v25 = vmul.f32 -1.442695, %v1905_v3 }
 0xca0   :  { %6014 = vpow2.f32 %v5328_v25 }
 0xca1   :  { %6016 = vrcp.f32 %v2061_v36 }
 0xca2   :  { %2078 = vrot.lane.b32.xlu1 %v2077_v58, %s6191_s6 }
 0xca6   :  { %1926 = vrot.lane.b32.xlu1 %v1925_v24, %s6191_s6 }
 0xcaa   :  { %2102 = vperm.xlu1 %5931, %v6841_v17   ;;  %v6015_v37 = vpop.eup %6014 }
 0xcab   :  { %v6017_v38 = vpop.eup %6016  ;;  %v1909_v47 = vadd.f32 1.0, %v6015_v37 }
 0xcac   :  { %v2090_v37 = vrot.slane %v6017_v38, 2 }
 0xcae   :  { %1950 = vperm.xlu1 %5931, %v6846_v57  }
 0xd00   :  { %v2066_v35 = vpop.permute.xlu1 %2065 }
 0xd01   :  { %v2067_v34 = vrot.slane %v2066_v35, 2 }
 0xd03   :  { %6018 = vtanh.f32 %v2067_v34 }
 0xd04   :  { %6020 = vrcp.f32 %v1909_v47 }
 0xd0d   :  { %v6019_v5 = vpop.eup %6018 }
 0xd0e   :  { %v2082_v13 = vmul.f32 %v6019_v5, %v6017_v38  ;;  %v6021_v52 = vpop.eup %6020 }
 0xd10   :  { %2084 = vrot.lane.b32.xlu0 %v2082_v13, %s6191_s6  ;;  %v1914_v51 = vpop.permute.xlu1 %1913 }
 0xd11   :  { %v1915_v14 = vrot.slane %v1914_v51, 2 }
 0xd13   :  { %6022 = vtanh.f32 %v1915_v14 }
 0xd14   :  { %v2079_v62 = vpop.permute.xlu1 %2078 }
 0xd15   :  { %v2081_v63 = vmul.f32 %v6017_v38, %v2079_v62  ;;  %v1938_v38 = vrot.slane %v6021_v52, 2 }
 0xd18   :  { %v1927_v7 = vpop.permute.xlu1 %1926 }
 0xd19   :  { %v1929_v24 = vmul.f32 %v6021_v52, %v1927_v7 }
 0xd1d   :  { %v6023_v59 = vpop.eup %6022 }
 0xd1e   :  { %v1930_v61 = vmul.f32 %v6023_v59, %v6021_v52  ;;  %v41_v52 = vld [vmem:[%s7725_s1 + $0x30] sm:$0xf] }
 0xd1f   :  { %42 = vst [vmem:[#allocation6 + $0x18] sm:$0xf] %v41_v52 }
 0xd20   :  { %1932 = vrot.lane.b32.xlu0 %v1930_v61, %s6191_s6 }
 0xd29   :  { %v2103_v34 = vpop.permute.xlu1 %2102 }
 0xd2a   :  { %vm2104_vm10 = vcmp.eq.s32.totalorder %v2103_v34, 1  ;;  %v6926_v34 = vsel %vm5337_vm13, 1, %v6192_v15 }
 0xd82   :  { %v2085_v1 = vpop.permute.xlu0 %2084 }
 0xd83   :  { %v2087_v3 = vadd.f32 %v2085_v1, %v2081_v63 }
 0xd85   :  { %6024 = vtanh.f32 %v2087_v3  ;;  %v2113_v36 = vrot.slane %v2087_v3, %v6343_v44 }
 0xd8f   :  { %v6025_v58 = vpop.eup %6024 }
 0xd90   :  { %2093 = vrot.lane.b32.xlu0 %v6025_v58, %s6191_s6 }
 0xd92   :  { %v1933_v19 = vpop.permute.xlu0 %1932 }
 0xd93   :  { %v1935_v33 = vadd.f32 %v1933_v19, %v1929_v24 }
 0xd95   :  { %6026 = vtanh.f32 %v1935_v33  ;;  %v1961_v35 = vrot.slane %v1935_v33, %v6343_v44 }
 0xd9f   :  { %v6027_v25 = vpop.eup %6026 }
 0xda0   :  { %1941 = vrot.lane.b32.xlu0 %v6027_v25, %s6191_s6 }
 0xda4   :  { %2114 = vrot.lane.b32.xlu0 %v2113_v36, %s6191_s6 }
 0xda8   :  { %1962 = vrot.lane.b32.xlu0 %v1961_v35, %s6191_s6  ;;  %v2127_v35 = vld [vmem:[#allocation6 + $0x18] sm:$0xf] }
 0xe02   :  { %v2094_v5 = vpop.permute.xlu0 %2093 }
 0xe03   :  { %v2096_v47 = vmul.f32 %v2094_v5, %v2090_v37 }
 0xe05   :  { %v6859_v13 = vsel %vm2104_vm10, %v2096_v47, %v6774_v42  ;;  %v6862_v51 = vsel %vm2104_vm10, %v2096_v47, 0.0  ;;  %v1951_v42 = vpop.permute.xlu1 %1950 }
 0xe06   :  { %5339 = vmatmul.mubr.msk.f32.vlgmr.msra.gmra.mrb[12].mxu1 %vm279_vm1, %v6859_v13  ;;  %vm1952_vm11 = vcmp.eq.s32.totalorder %v1951_v42, 1 }
 0xe07   :  { %5657 = vmatpush1.bf16.msra.mxu1 %v6253_v9  ;;  %2655 = vmatprep.mubr.f32.mxu1 %v6189_v8 }
 0xe08   :  { %5659 = vmatprep.subr.bf16.mxu1 %v6267_v16 }
 0xe0b   :  { %5661 = vmatpush1.bf16.msra.mxu1 %v6282_v21 }
 0xe0c   :  { %5663 = vmatprep.subr.bf16.mxu1 %v6306_v31 }
 0xe0f   :  { %5665 = vmatpush1.bf16.msra.mxu1 %v6330_v39 }
 0xe10   :  { %5667 = vmatprep.subr.bf16.mxu1 %v6346_v45 }
 0xe12   :  { %v1942_v14 = vpop.permute.xlu0 %1941 }
 0xe13   :  { %v1944_v59 = vmul.f32 %v1942_v14, %v1938_v38  ;;  %5669 = vmatpush1.bf16.msra.mxu1 %v6372_v54 }
 0xe14   :  { %5687 = vmatprep.subr.bf16.mxu1 %v6232_v4 }
 0xe15   :  { %v1966_v61 = vsel %vm1952_vm11, %v1944_v59, 0.0  ;;  %v6878_v62 = vsel %vm1952_vm11, %v1944_v59, %v6793_v55  ;;  %v5281_v55 = vld [vmem:[%s7726_s2 + $0x4c] sm:$0xf] }
 0xe16   :  { %5330 = vst.msk [vmem:[%s7729_s5 + $0xa] sm:$0x3] %vm234_vm0, %v1966_v61  ;;  %5335 = vmatmul.mubr.msk.f32.vlgmr.msra.gmra.mrb[12].mxu0 %vm279_vm1, %v6878_v62  ;;  %155 = vst [vmem:[#allocation7 + $0x24] sm:$0xf] %v5281_v55  ;;  %v2115_v25 = vpop.permute.xlu0 %2114 }
 0xe17   :  { %5641 = vmatpush1.bf16.msra.mxu0 %v6280_v20  ;;  %2503 = vmatprep.mubr.f32.mxu0 %v6189_v8  ;;  %v6906_v47 = vsel %vm2104_vm10, %v2115_v25, %v6821_v23  ;;  %v6921_v23 = vsel %vm5341_vm12, 1, %v6192_v15 }
 0xe18   :  { %5643 = vmatprep.subr.bf16.mxu0 %v6294_v27  ;;  %v2385_v14 = vrot.slane %v6906_v47, %v6343_v44 }
 0xe1a   :  { %v1963_v38 = vpop.permute.xlu0 %1962 }
 0xe1b   :  { %5645 = vmatpush1.bf16.msra.mxu0 %v6308_v32  ;;  %v6913_v59 = vsel %vm1952_vm11, %v1963_v38, %v6828_v46 }
 0xe1c   :  { %5647 = vmatprep.subr.bf16.mxu0 %v6332_v40  ;;  %v2233_v61 = vrot.slane %v6913_v59, %v6343_v44 }
 0xe1d   :  { %v2279_v7 = vld [vmem:[#allocation7 + $0x24] sm:$0xf] }
 0xe1f   :  { %5649 = vmatpush1.bf16.msra.mxu0 %v6358_v49 }
 0xe20   :  { %5651 = vmatprep.subr.bf16.mxu0 %v6361_v50 }
 0xe23   :  { %5653 = vmatpush1.bf16.msra.mxu0 %v6378_v56 }
 0xe24   :  { %5671 = vmatprep.subr.bf16.mxu0 %v6255_v10 }
 0xed9   :  { %v2349_v63 = vpop.f32.mrb[12].mxu1 }
 0xeda   :  { %v2351_v1 = vpop.f32.mrb[13].mxu1 }
 0xedb   :  { %v2356_v3 = vcombine.low %v2349_v63, %v2351_v1 }
 0xedd   :  { %v2363_v58 = vrot.slane %v2356_v3, %v6343_v44 }
 0xedf   :  { %v2365_v24 = vadd.f32 %v2363_v58, %v2279_v7 }
 0xee1   :  { %2373 = vrot.lane.b32.xlu1 %v2365_v24, %s6191_s6  ;;  %v5340_v46 = vmul.f32 -1.442695, %v2365_v24 }
 0xee3   :  { %6028 = vpow2.f32 %v5340_v46 }
 0xee9   :  { %v2197_v19 = vpop.f32.mrb[12].mxu0 }
 0xeea   :  { %v2199_v33 = vpop.f32.mrb[13].mxu0 }
 0xeeb   :  { %v2204_v36 = vcombine.low %v2197_v19, %v2199_v33 }
 0xeed   :  { %v2211_v37 = vrot.slane %v2204_v36, %v6343_v44  ;;  %v6029_v42 = vpop.eup %6028 }
 0xeee   :  { %v2369_v52 = vadd.f32 1.0, %v6029_v42 }
 0xeef   :  { %v2213_v5 = vadd.f32 %v2211_v37, %v2127_v35 }
 0xef1   :  { %2221 = vrot.lane.b32.xlu1 %v2213_v5, %s6191_s6  ;;  %v5336_v55 = vmul.f32 -1.442695, %v2213_v5 }
 0xef3   :  { %6030 = vpow2.f32 %v5336_v55 }
 0xef4   :  { %6032 = vrcp.f32 %v2369_v52 }
 0xef5   :  { %2386 = vrot.lane.b32.xlu1 %v2385_v14, %s6191_s6 }
 0xef9   :  { %2234 = vrot.lane.b32.xlu1 %v2233_v61, %s6191_s6 }
 0xefd   :  { %2410 = vperm.xlu1 %5931, %v6921_v23   ;;  %v6031_v3 = vpop.eup %6030 }
 0xefe   :  { %v6033_v7 = vpop.eup %6032  ;;  %v2217_v19 = vadd.f32 1.0, %v6031_v3 }
 0xf01   :  { %2258 = vperm.xlu1 %5931, %v6926_v34  }
 0xf53   :  { %v2374_v63 = vpop.permute.xlu1 %2373 }
 0xf54   :  { %v2375_v1 = vrot.slane %v2374_v63, 2 }
 0xf56   :  { %6034 = vtanh.f32 %v2375_v1 }
 0xf57   :  { %6036 = vrcp.f32 %v2217_v19 }
 0xf60   :  { %v6035_v58 = vpop.eup %6034 }
 0xf61   :  { %v2390_v33 = vmul.f32 %v6035_v58, %v6033_v7  ;;  %v6037_v24 = vpop.eup %6036 }
 0xf63   :  { %2392 = vrot.lane.b32.xlu0 %v2390_v33, %s6191_s6  ;;  %v2222_v25 = vpop.permute.xlu1 %2221  ;;  %v2398_v33 = vrot.slane %v6033_v7, 2 }
 0xf64   :  { %v2223_v36 = vrot.slane %v2222_v25, 2 }
 0xf66   :  { %6038 = vtanh.f32 %v2223_v36 }
 0xf67   :  { %v2387_v5 = vpop.permute.xlu1 %2386 }
 0xf68   :  { %v2389_v38 = vmul.f32 %v6033_v7, %v2387_v5  ;;  %v2246_v7 = vrot.slane %v6037_v24, 2 }
 0xf6b   :  { %v2235_v46 = vpop.permute.xlu1 %2234 }
 0xf6c   :  { %v2237_v55 = vmul.f32 %v6037_v24, %v2235_v46 }
 0xf70   :  { %v6039_v35 = vpop.eup %6038 }
 0xf71   :  { %v2238_v37 = vmul.f32 %v6039_v35, %v6037_v24  ;;  %v43_v24 = vld [vmem:[%s7725_s1 + $0x38] sm:$0xf] }
 0xf72   :  { %44 = vst [vmem:[#allocation6 + $0x1c] sm:$0xf] %v43_v24 }
 0xf73   :  { %2240 = vrot.lane.b32.xlu0 %v2238_v37, %s6191_s6 }
 0xf7c   :  { %v2411_v19 = vpop.permute.xlu1 %2410 }
 0xf7d   :  { %vm2412_vm14 = vcmp.eq.s32.totalorder %v2411_v19, 1  ;;  %v7006_v19 = vsel %vm5345_vm3, 1, %v6192_v15 }
 0xfd5   :  { %v2393_v14 = vpop.permute.xlu0 %2392 }
 0xfd6   :  { %v2395_v61 = vadd.f32 %v2393_v14, %v2389_v38 }
 0xfd8   :  { %6040 = vtanh.f32 %v2395_v61  ;;  %v2421_v3 = vrot.slane %v2395_v61, %v6343_v44 }
 0xfe2   :  { %v6041_v42 = vpop.eup %6040 }
 0xfe3   :  { %2401 = vrot.lane.b32.xlu0 %v6041_v42, %s6191_s6 }
 0xfe5   :  { %v2241_v52 = vpop.permute.xlu0 %2240 }
 0xfe6   :  { %v2243_v63 = vadd.f32 %v2241_v52, %v2237_v55 }
 0xfe8   :  { %6042 = vtanh.f32 %v2243_v63  ;;  %v2269_v58 = vrot.slane %v2243_v63, %v6343_v44 }
 0xff2   :  { %v6043_v1 = vpop.eup %6042 }
 0xff3   :  { %2249 = vrot.lane.b32.xlu0 %v6043_v1, %s6191_s6 }
 0xff7   :  { %2422 = vrot.lane.b32.xlu0 %v2421_v3, %s6191_s6 }
 0xffb   :  { %2270 = vrot.lane.b32.xlu0 %v2269_v58, %s6191_s6 }
0x1055   :  { %v2402_v25 = vpop.permute.xlu0 %2401 }
0x1056   :  { %v2404_v36 = vmul.f32 %v2402_v25, %v2398_v33 }
0x1058   :  { %v6939_v35 = vsel %vm2412_vm14, %v2404_v36, %v6859_v13  ;;  %v6942_v37 = vsel %vm2412_vm14, %v2404_v36, 0.0  ;;  %v2259_v13 = vpop.permute.xlu1 %2258  ;;  %v2435_v36 = vld [vmem:[#allocation6 + $0x1c] sm:$0xf] }
0x1059   :  { %5347 = vmatmul.mubr.msk.f32.vlgmr.msra.gmra.mrb[14].mxu1 %vm279_vm1, %v6939_v35  ;;  %vm2260_vm15 = vcmp.eq.s32.totalorder %v2259_v13, 1 }
0x105a   :  { %5689 = vmatpush1.bf16.msra.mxu1 %v6253_v9  ;;  %2963 = vmatprep.mubr.f32.mxu1 %v6189_v8 }
0x105b   :  { %5691 = vmatprep.subr.bf16.mxu1 %v6267_v16 }
0x105e   :  { %5693 = vmatpush1.bf16.msra.mxu1 %v6282_v21 }
0x105f   :  { %5695 = vmatprep.subr.bf16.mxu1 %v6306_v31 }
0x1062   :  { %5697 = vmatpush1.bf16.msra.mxu1 %v6330_v39 }
0x1063   :  { %5699 = vmatprep.subr.bf16.mxu1 %v6346_v45 }
0x1065   :  { %v2250_v5 = vpop.permute.xlu0 %2249 }
0x1066   :  { %v2252_v38 = vmul.f32 %v2250_v5, %v2246_v7  ;;  %5701 = vmatpush1.bf16.msra.mxu1 %v6372_v54 }
0x1067   :  { %5719 = vmatprep.subr.bf16.mxu1 %v6232_v4 }
0x1068   :  { %v2274_v14 = vsel %vm2260_vm15, %v2252_v38, 0.0  ;;  %v6958_v61 = vsel %vm2260_vm15, %v2252_v38, %v6878_v62  ;;  %v5280_v62 = vld [vmem:[%s7726_s2 + $0x44] sm:$0xf] }
0x1069   :  { %5338 = vst.msk [vmem:[%s7729_s5 + $0xc] sm:$0x3] %vm234_vm0, %v2274_v14  ;;  %5343 = vmatmul.mubr.msk.f32.vlgmr.msra.gmra.mrb[14].mxu0 %vm279_vm1, %v6958_v61  ;;  %153 = vst [vmem:[#allocation7 + $0x20] sm:$0xf] %v5280_v62  ;;  %v2423_v33 = vpop.permute.xlu0 %2422 }
0x106a   :  { %5673 = vmatpush1.bf16.msra.mxu0 %v6280_v20  ;;  %2811 = vmatprep.mubr.f32.mxu0 %v6189_v8  ;;  %v6986_v38 = vsel %vm2412_vm14, %v2423_v33, %v6906_v47  ;;  %v7001_v47 = vsel %vm5349_vm2, 1, %v6192_v15 }
0x106b   :  { %5675 = vmatprep.subr.bf16.mxu0 %v6294_v27  ;;  %v2693_v62 = vrot.slane %v6986_v38, %v6343_v44 }
0x106d   :  { %v2271_v14 = vpop.permute.xlu0 %2270 }
0x106e   :  { %5677 = vmatpush1.bf16.msra.mxu0 %v6308_v32  ;;  %v6993_v24 = vsel %vm2260_vm15, %v2271_v14, %v6913_v59 }
0x106f   :  { %5679 = vmatprep.subr.bf16.mxu0 %v6332_v40 }
0x1070   :  { %v2587_v52 = vld [vmem:[#allocation7 + $0x20] sm:$0xf] }
0x1072   :  { %5681 = vmatpush1.bf16.msra.mxu0 %v6358_v49 }
0x1073   :  { %5683 = vmatprep.subr.bf16.mxu0 %v6361_v50 }
0x1076   :  { %5685 = vmatpush1.bf16.msra.mxu0 %v6378_v56 }
0x1077   :  { %5703 = vmatprep.subr.bf16.mxu0 %v6255_v10 }
0x112c   :  { %v2657_v46 = vpop.f32.mrb[14].mxu1 }
0x112d   :  { %v2659_v42 = vpop.f32.mrb[15].mxu1 }
0x112e   :  { %v2664_v55 = vcombine.low %v2657_v46, %v2659_v42  ;;  %v2541_v46 = vrot.slane %v6993_v24, %v6343_v44 }
0x1130   :  { %v2671_v63 = vrot.slane %v2664_v55, %v6343_v44 }
0x1132   :  { %v2673_v1 = vadd.f32 %v2671_v63, %v2587_v52 }
0x1134   :  { %2681 = vrot.lane.b32.xlu1 %v2673_v1, %s6191_s6  ;;  %v5348_v59 = vmul.f32 -1.442695, %v2673_v1 }
0x1136   :  { %6044 = vpow2.f32 %v5348_v59 }
0x113c   :  { %v2505_v3 = vpop.f32.mrb[14].mxu0 }
0x113d   :  { %v2507_v58 = vpop.f32.mrb[15].mxu0 }
0x113e   :  { %v2512_v25 = vcombine.low %v2505_v3, %v2507_v58 }
0x1140   :  { %v2519_v7 = vrot.slane %v2512_v25, %v6343_v44  ;;  %v6045_v13 = vpop.eup %6044 }
0x1141   :  { %v2677_v55 = vadd.f32 1.0, %v6045_v13 }
0x1142   :  { %v2521_v5 = vadd.f32 %v2519_v7, %v2435_v36 }
0x1144   :  { %2529 = vrot.lane.b32.xlu1 %v2521_v5, %s6191_s6  ;;  %v5344_v42 = vmul.f32 -1.442695, %v2521_v5 }
0x1146   :  { %6046 = vpow2.f32 %v5344_v42 }
0x1147   :  { %6048 = vrcp.f32 %v2677_v55 }
0x1148   :  { %2694 = vrot.lane.b32.xlu1 %v2693_v62, %s6191_s6 }
0x114c   :  { %2542 = vrot.lane.b32.xlu1 %v2541_v46, %s6191_s6 }
0x1150   :  { %2718 = vperm.xlu1 %5931, %v7001_v47   ;;  %v6047_v3 = vpop.eup %6046 }
0x1151   :  { %v6049_v58 = vpop.eup %6048  ;;  %v2525_v33 = vadd.f32 1.0, %v6047_v3 }
0x1154   :  { %2566 = vperm.xlu1 %5931, %v7006_v19  }
0x11a6   :  { %v2682_v52 = vpop.permute.xlu1 %2681 }
0x11a7   :  { %v2683_v63 = vrot.slane %v2682_v52, 2 }
0x11a9   :  { %6050 = vtanh.f32 %v2683_v63 }
0x11aa   :  { %6052 = vrcp.f32 %v2525_v33 }
0x11b3   :  { %v6051_v0 = vpop.eup %6050 }
0x11b4   :  { %v2698_v25 = vmul.f32 %v6051_v0, %v6049_v58  ;;  %v6053_v1 = vpop.eup %6052 }
0x11b6   :  { %2700 = vrot.lane.b32.xlu0 %v2698_v25, %s6191_s6  ;;  %v2530_v15 = vpop.permute.xlu1 %2529 }
0x11b7   :  { %v2531_v36 = vrot.slane %v2530_v15, 2  ;;  %v2706_v15 = vrot.slane %v6049_v58, 2 }
0x11b9   :  { %6054 = vtanh.f32 %v2531_v36 }
0x11ba   :  { %v2695_v14 = vpop.permute.xlu1 %2694 }
0x11bb   :  { %v2697_v62 = vmul.f32 %v6049_v58, %v2695_v14  ;;  %v2554_v58 = vrot.slane %v6053_v1, 2 }
0x11be   :  { %v2543_v13 = vpop.permute.xlu1 %2542 }
0x11bf   :  { %v2545_v55 = vmul.f32 %v6053_v1, %v2543_v13 }
0x11c3   :  { %v6055_v7 = vpop.eup %6054 }
0x11c4   :  { %v2546_v5 = vmul.f32 %v6055_v7, %v6053_v1  ;;  %v45_v1 = vld [vmem:[%s7725_s1 + $0x40] sm:$0xf] }
0x11c5   :  { %46 = vst [vmem:[#allocation6 + $0x20] sm:$0xf] %v45_v1 }
0x11c6   :  { %2548 = vrot.lane.b32.xlu0 %v2546_v5, %s6191_s6 }
0x11cf   :  { %v2719_v25 = vpop.permute.xlu1 %2718 }
0x11d0   :  { %vm2720_vm4 = vcmp.eq.s32.totalorder %v2719_v25, 1 }
0x1228   :  { %v2701_v46 = vpop.permute.xlu0 %2700 }
0x1229   :  { %v2703_v59 = vadd.f32 %v2701_v46, %v2697_v62 }
0x122b   :  { %6056 = vtanh.f32 %v2703_v59  ;;  %v2729_v0 = vrot.slane %v2703_v59, %v6343_v44 }
0x1235   :  { %v6057_v42 = vpop.eup %6056 }
0x1236   :  { %2709 = vrot.lane.b32.xlu0 %v6057_v42, %s6191_s6 }
0x1238   :  { %v2549_v52 = vpop.permute.xlu0 %2548 }
0x1239   :  { %v2551_v63 = vadd.f32 %v2549_v52, %v2545_v55 }
0x123b   :  { %6058 = vtanh.f32 %v2551_v63  ;;  %v2577_v33 = vrot.slane %v2551_v63, %v6343_v44 }
0x1245   :  { %v6059_v3 = vpop.eup %6058 }
0x1246   :  { %2557 = vrot.lane.b32.xlu0 %v6059_v3, %s6191_s6 }
0x124a   :  { %2730 = vrot.lane.b32.xlu0 %v2729_v0, %s6191_s6 }
0x124e   :  { %2578 = vrot.lane.b32.xlu0 %v2577_v33, %s6191_s6 }
0x12a8   :  { %v2710_v36 = vpop.permute.xlu0 %2709 }
0x12a9   :  { %v2712_v7 = vmul.f32 %v2710_v36, %v2706_v15 }
0x12ab   :  { %v7019_v5 = vsel %vm2720_vm4, %v2712_v7, %v6939_v35  ;;  %v7022_v14 = vsel %vm2720_vm4, %v2712_v7, 0.0  ;;  %v2567_v35 = vpop.permute.xlu1 %2566 }
0x12ac   :  { %5355 = vmatmul.mubr.msk.f32.vlgmr.msra.gmra.mrb[16].mxu1 %vm279_vm1, %v7019_v5  ;;  %vm2568_vm5 = vcmp.eq.s32.totalorder %v2567_v35, 1 }
0x12ad   :  { %5721 = vmatpush1.bf16.msra.mxu1 %v6253_v9  ;;  %3271 = vmatprep.mubr.f32.mxu1 %v6189_v8 }
0x12ae   :  { %5723 = vmatprep.subr.bf16.mxu1 %v6267_v16 }
0x12b1   :  { %5725 = vmatpush1.bf16.msra.mxu1 %v6282_v21 }
0x12b2   :  { %5727 = vmatprep.subr.bf16.mxu1 %v6306_v31 }
0x12b5   :  { %5729 = vmatpush1.bf16.msra.mxu1 %v6330_v39 }
0x12b6   :  { %5731 = vmatprep.subr.bf16.mxu1 %v6346_v45 }
0x12b8   :  { %v2558_v62 = vpop.permute.xlu0 %2557 }
0x12b9   :  { %v2560_v46 = vmul.f32 %v2558_v62, %v2554_v58  ;;  %5733 = vmatpush1.bf16.msra.mxu1 %v6372_v54  ;;  %v2743_v58 = vld [vmem:[#allocation6 + $0x20] sm:$0xf] }
0x12ba   :  { %5751 = vmatprep.subr.bf16.mxu1 %v6232_v4 }
0x12bb   :  { %v2582_v59 = vsel %vm2568_vm5, %v2560_v46, 0.0  ;;  %v7038_v13 = vsel %vm2568_vm5, %v2560_v46, %v6958_v61  ;;  %v5279_v61 = vld [vmem:[%s7726_s2 + $0x3c] sm:$0xf] }
0x12bc   :  { %5346 = vst.msk [vmem:[%s7729_s5 + $0xe] sm:$0x3] %vm234_vm0, %v2582_v59  ;;  %5351 = vmatmul.mubr.msk.f32.vlgmr.msra.gmra.mrb[16].mxu0 %vm279_vm1, %v7038_v13  ;;  %151 = vst [vmem:[#allocation7 + $0x1c] sm:$0xf] %v5279_v61  ;;  %v2731_v36 = vpop.permute.xlu0 %2730 }
0x12bd   :  { %5705 = vmatpush1.bf16.msra.mxu0 %v6280_v20  ;;  %3119 = vmatprep.mubr.f32.mxu0 %v6189_v8  ;;  %v7066_v59 = vsel %vm2720_vm4, %v2731_v36, %v6986_v38 }
0x12be   :  { %5707 = vmatprep.subr.bf16.mxu0 %v6294_v27  ;;  %v3001_v1 = vrot.slane %v7066_v59, %v6343_v44 }
0x12c0   :  { %v2579_v61 = vpop.permute.xlu0 %2578 }
0x12c1   :  { %5709 = vmatpush1.bf16.msra.mxu0 %v6308_v32 }
0x12c2   :  { %5711 = vmatprep.subr.bf16.mxu0 %v6332_v40 }
0x12c3   :  { %v2895_v63 = vld [vmem:[#allocation7 + $0x1c] sm:$0xf] }
0x12c5   :  { %5713 = vmatpush1.bf16.msra.mxu0 %v6358_v49 }
0x12c6   :  { %5715 = vmatprep.subr.bf16.mxu0 %v6361_v50 }
0x12c9   :  { %5717 = vmatpush1.bf16.msra.mxu0 %v6378_v56 }
0x12ca   :  { %5735 = vmatprep.subr.bf16.mxu0 %v6255_v10 }
0x137f   :  { %v2965_v42 = vpop.f32.mrb[16].mxu1 }
0x1380   :  { %v2967_v55 = vpop.f32.mrb[17].mxu1 }
0x1381   :  { %v2972_v52 = vcombine.low %v2965_v42, %v2967_v55  ;;  %v7073_v42 = vsel %vm2568_vm5, %v2579_v61, %v6993_v24 }
0x1382   :  { %v2849_v55 = vrot.slane %v7073_v42, %v6343_v44 }
0x1383   :  { %v2979_v3 = vrot.slane %v2972_v52, %v6343_v44 }
0x1385   :  { %v2981_v0 = vadd.f32 %v2979_v3, %v2895_v63 }
0x1387   :  { %2989 = vrot.lane.b32.xlu1 %v2981_v0, %s6191_s6  ;;  %v5356_v38 = vmul.f32 -1.442695, %v2981_v0 }
0x1389   :  { %6060 = vpow2.f32 %v5356_v38 }
0x138f   :  { %v2813_v33 = vpop.f32.mrb[16].mxu0 }
0x1390   :  { %v2815_v15 = vpop.f32.mrb[17].mxu0 }
0x1391   :  { %v2820_v7 = vcombine.low %v2813_v33, %v2815_v15 }
0x1393   :  { %v2827_v62 = vrot.slane %v2820_v7, %v6343_v44  ;;  %v6061_v25 = vpop.eup %6060 }
0x1394   :  { %v2985_v63 = vadd.f32 1.0, %v6061_v25 }
0x1395   :  { %v2829_v46 = vadd.f32 %v2827_v62, %v2743_v58 }
0x1397   :  { %2837 = vrot.lane.b32.xlu1 %v2829_v46, %s6191_s6  ;;  %v5352_v52 = vmul.f32 -1.442695, %v2829_v46 }
0x1399   :  { %6062 = vpow2.f32 %v5352_v52 }
0x139a   :  { %6064 = vrcp.f32 %v2985_v63 }
0x139b   :  { %3002 = vrot.lane.b32.xlu1 %v3001_v1, %s6191_s6 }
0x139f   :  { %2850 = vrot.lane.b32.xlu1 %v2849_v55, %s6191_s6 }
0x13a3   :  { %3026 = vperm.xlu1 %5931, %v7006_v19   ;;  %v6063_v35 = vpop.eup %6062 }
0x13a4   :  { %v6065_v33 = vpop.eup %6064  ;;  %v2833_v36 = vadd.f32 1.0, %v6063_v35 }
0x13a7   :  { %2874 = vperm.xlu1 %5931, %v7001_v47  }
0x13f9   :  { %v2990_v3 = vpop.permute.xlu1 %2989 }
0x13fa   :  { %v2991_v24 = vrot.slane %v2990_v3, 2 }
0x13fc   :  { %6066 = vtanh.f32 %v2991_v24 }
0x13fd   :  { %6068 = vrcp.f32 %v2833_v36 }
0x1406   :  { %v6067_v15 = vpop.eup %6066 }
0x1407   :  { %v3006_v7 = vmul.f32 %v6067_v15, %v6065_v33  ;;  %v6069_v47 = vpop.eup %6068 }
0x1409   :  { %3008 = vrot.lane.b32.xlu0 %v3006_v7, %s6191_s6  ;;  %v2838_v19 = vpop.permute.xlu1 %2837  ;;  %v3014_v7 = vrot.slane %v6065_v33, 2 }
0x140a   :  { %v2839_v58 = vrot.slane %v2838_v19, 2 }
0x140c   :  { %6070 = vtanh.f32 %v2839_v58 }
0x140d   :  { %v3003_v46 = vpop.permute.xlu1 %3002 }
0x140e   :  { %v3005_v61 = vmul.f32 %v6065_v33, %v3003_v46  ;;  %v2862_v33 = vrot.slane %v6069_v47, 2 }
0x1411   :  { %v2851_v38 = vpop.permute.xlu1 %2850 }
0x1412   :  { %v2853_v52 = vmul.f32 %v6069_v47, %v2851_v38 }
0x1416   :  { %v6071_v0 = vpop.eup %6070 }
0x1417   :  { %v2854_v62 = vmul.f32 %v6071_v0, %v6069_v47  ;;  %v47_v47 = vld [vmem:[%s7725_s1 + $0x48] sm:$0xf] }
0x1418   :  { %48 = vst [vmem:[#allocation6 + $0x24] sm:$0xf] %v47_v47 }
0x1419   :  { %2856 = vrot.lane.b32.xlu0 %v2854_v62, %s6191_s6 }
0x1422   :  { %v3027_v36 = vpop.permute.xlu1 %3026 }
0x1423   :  { %vm3028_vm6 = vcmp.eq.s32.totalorder %v3027_v36, 1 }
0x147b   :  { %v3009_v1 = vpop.permute.xlu0 %3008 }
0x147c   :  { %v3011_v55 = vadd.f32 %v3009_v1, %v3005_v61 }
0x147e   :  { %6072 = vtanh.f32 %v3011_v55  ;;  %v3037_v35 = vrot.slane %v3011_v55, %v6343_v44 }
0x1488   :  { %v6073_v25 = vpop.eup %6072 }
0x1489   :  { %3017 = vrot.lane.b32.xlu0 %v6073_v25, %s6191_s6 }
0x148b   :  { %v2857_v63 = vpop.permute.xlu0 %2856 }
0x148c   :  { %v2859_v3 = vadd.f32 %v2857_v63, %v2853_v52 }
0x148e   :  { %6074 = vtanh.f32 %v2859_v3  ;;  %v2885_v15 = vrot.slane %v2859_v3, %v6343_v44 }
0x1498   :  { %v6075_v24 = vpop.eup %6074 }
0x1499   :  { %2865 = vrot.lane.b32.xlu0 %v6075_v24, %s6191_s6 }
0x149d   :  { %3038 = vrot.lane.b32.xlu0 %v3037_v35, %s6191_s6 }
0x14a1   :  { %2886 = vrot.lane.b32.xlu0 %v2885_v15, %s6191_s6 }
0x14fb   :  { %v3018_v19 = vpop.permute.xlu0 %3017 }
0x14fc   :  { %v3020_v58 = vmul.f32 %v3018_v19, %v3014_v7 }
0x14fe   :  { %v7091_v0 = vsel %vm3028_vm6, %v3020_v58, %v7019_v5  ;;  %v7094_v62 = vsel %vm3028_vm6, %v3020_v58, 0.0  ;;  %v2875_v5 = vpop.permute.xlu1 %2874  ;;  %v3051_v58 = vld [vmem:[#allocation6 + $0x24] sm:$0xf] }
0x14ff   :  { %5363 = vmatmul.mubr.msk.f32.vlgmr.msra.gmra.mrb[18].mxu1 %vm279_vm1, %v7091_v0  ;;  %vm2876_vm7 = vcmp.eq.s32.totalorder %v2875_v5, 1 }
0x1500   :  { %5753 = vmatpush1.bf16.msra.mxu1 %v6253_v9  ;;  %3579 = vmatprep.mubr.f32.mxu1 %v6189_v8 }
0x1501   :  { %5755 = vmatprep.subr.bf16.mxu1 %v6267_v16 }
0x1504   :  { %5757 = vmatpush1.bf16.msra.mxu1 %v6282_v21 }
0x1505   :  { %5759 = vmatprep.subr.bf16.mxu1 %v6306_v31 }
0x1508   :  { %5761 = vmatpush1.bf16.msra.mxu1 %v6330_v39 }
0x1509   :  { %5763 = vmatprep.subr.bf16.mxu1 %v6346_v45 }
0x150b   :  { %v2866_v46 = vpop.permute.xlu0 %2865 }
0x150c   :  { %v2868_v61 = vmul.f32 %v2866_v46, %v2862_v33  ;;  %5765 = vmatpush1.bf16.msra.mxu1 %v6372_v54 }
0x150d   :  { %5783 = vmatprep.subr.bf16.mxu1 %v6232_v4 }
0x150e   :  { %v7108_v1 = vsel %vm2876_vm7, %v2868_v61, 0.0  ;;  %v7112_v55 = vsel %vm2876_vm7, %v2868_v61, %v7038_v13  ;;  %v5278_v13 = vld [vmem:[%s7726_s2 + $0x34] sm:$0xf] }
0x150f   :  { %5359 = vmatmul.mubr.msk.f32.vlgmr.msra.gmra.mrb[18].mxu0 %vm279_vm1, %v7112_v55  ;;  %149 = vst [vmem:[#allocation7 + $0x18] sm:$0xf] %v5278_v13  ;;  %v3039_v7 = vpop.permute.xlu0 %3038 }
0x1510   :  { %5737 = vmatpush1.bf16.msra.mxu0 %v6280_v20  ;;  %3427 = vmatprep.mubr.f32.mxu0 %v6189_v8  ;;  %v7136_v61 = vsel %vm3028_vm6, %v3039_v7, %v7066_v59 }
0x1511   :  { %5739 = vmatprep.subr.bf16.mxu0 %v6294_v27  ;;  %v3309_v47 = vrot.slane %v7136_v61, %v6343_v44 }
0x1513   :  { %v2887_v13 = vpop.permute.xlu0 %2886 }
0x1514   :  { %5741 = vmatpush1.bf16.msra.mxu0 %v6308_v32 }
0x1515   :  { %5743 = vmatprep.subr.bf16.mxu0 %v6332_v40 }
0x1516   :  { %v3203_v63 = vld [vmem:[#allocation7 + $0x18] sm:$0xf] }
0x1518   :  { %5745 = vmatpush1.bf16.msra.mxu0 %v6358_v49 }
0x1519   :  { %5747 = vmatprep.subr.bf16.mxu0 %v6361_v50 }
0x151c   :  { %5749 = vmatpush1.bf16.msra.mxu0 %v6378_v56 }
0x151d   :  { %5767 = vmatprep.subr.bf16.mxu0 %v6255_v10 }
0x15d2   :  { %v3273_v38 = vpop.f32.mrb[18].mxu1 }
0x15d3   :  { %v3275_v25 = vpop.f32.mrb[19].mxu1 }
0x15d4   :  { %v3280_v52 = vcombine.low %v3273_v38, %v3275_v25  ;;  %v7143_v38 = vsel %vm2876_vm7, %v2887_v13, %v7073_v42 }
0x15d5   :  { %v3157_v25 = vrot.slane %v7143_v38, %v6343_v44 }
0x15d6   :  { %v3287_v3 = vrot.slane %v3280_v52, %v6343_v44 }
0x15d8   :  { %v3289_v24 = vadd.f32 %v3287_v3, %v3203_v63 }
0x15da   :  { %3297 = vrot.lane.b32.xlu1 %v3289_v24, %s6191_s6  ;;  %v5364_v59 = vmul.f32 -1.442695, %v3289_v24 }
0x15dc   :  { %6076 = vpow2.f32 %v5364_v59 }
0x15e2   :  { %v3121_v35 = vpop.f32.mrb[18].mxu0 }
0x15e3   :  { %v3123_v15 = vpop.f32.mrb[19].mxu0 }
0x15e4   :  { %v3128_v19 = vcombine.low %v3121_v35, %v3123_v15 }
0x15e6   :  { %v3135_v33 = vrot.slane %v3128_v19, %v6343_v44  ;;  %v6077_v36 = vpop.eup %6076 }
0x15e7   :  { %v3293_v63 = vadd.f32 1.0, %v6077_v36 }
0x15e8   :  { %v3137_v46 = vadd.f32 %v3135_v33, %v3051_v58 }
0x15ea   :  { %3145 = vrot.lane.b32.xlu1 %v3137_v46, %s6191_s6  ;;  %v5360_v52 = vmul.f32 -1.442695, %v3137_v46 }
0x15ec   :  { %6078 = vpow2.f32 %v5360_v52 }
0x15ed   :  { %6080 = vrcp.f32 %v3293_v63 }
0x15ee   :  { %3310 = vrot.lane.b32.xlu1 %v3309_v47, %s6191_s6 }
0x15f2   :  { %3158 = vrot.lane.b32.xlu1 %v3157_v25, %s6191_s6 }
0x15f6   :  { %3334 = vperm.xlu1 %5931, %v6926_v34   ;;  %v6079_v5 = vpop.eup %6078 }
0x15f7   :  { %v6081_v35 = vpop.eup %6080  ;;  %v3141_v7 = vadd.f32 1.0, %v6079_v5 }
0x15fa   :  { %3182 = vperm.xlu1 %5931, %v6921_v23  }
0x164c   :  { %v3298_v3 = vpop.permute.xlu1 %3297 }
0x164d   :  { %v3299_v42 = vrot.slane %v3298_v3, 2 }
0x164f   :  { %6082 = vtanh.f32 %v3299_v42 }
0x1650   :  { %6084 = vrcp.f32 %v3141_v7 }
0x1659   :  { %v6083_v15 = vpop.eup %6082 }
0x165a   :  { %v3314_v19 = vmul.f32 %v6083_v15, %v6081_v35  ;;  %v6085_v23 = vpop.eup %6084 }
0x165c   :  { %3316 = vrot.lane.b32.xlu0 %v3314_v19, %s6191_s6  ;;  %v3146_v34 = vpop.permute.xlu1 %3145  ;;  %v3322_v19 = vrot.slane %v6081_v35, 2 }
0x165d   :  { %v3147_v58 = vrot.slane %v3146_v34, 2 }
0x165f   :  { %6086 = vtanh.f32 %v3147_v58 }
0x1660   :  { %v3311_v46 = vpop.permute.xlu1 %3310 }
0x1661   :  { %v3313_v13 = vmul.f32 %v6081_v35, %v3311_v46  ;;  %v3170_v35 = vrot.slane %v6085_v23, 2 }
0x1664   :  { %v3159_v59 = vpop.permute.xlu1 %3158 }
0x1665   :  { %v3161_v52 = vmul.f32 %v6085_v23, %v3159_v59 }
0x1669   :  { %v6087_v24 = vpop.eup %6086 }
0x166a   :  { %v3162_v33 = vmul.f32 %v6087_v24, %v6085_v23  ;;  %v49_v23 = vld [vmem:[%s7725_s1 + $0x50] sm:$0xf] }
0x166b   :  { %50 = vst [vmem:[#allocation6 + $0x28] sm:$0xf] %v49_v23 }
0x166c   :  { %3164 = vrot.lane.b32.xlu0 %v3162_v33, %s6191_s6 }
0x1675   :  { %v3335_v7 = vpop.permute.xlu1 %3334 }
0x1676   :  { %vm3336_vm8 = vcmp.eq.s32.totalorder %v3335_v7, 1 }
0x16ce   :  { %v3317_v47 = vpop.permute.xlu0 %3316 }
0x16cf   :  { %v3319_v25 = vadd.f32 %v3317_v47, %v3313_v13 }
0x16d1   :  { %6088 = vtanh.f32 %v3319_v25  ;;  %v3345_v5 = vrot.slane %v3319_v25, %v6343_v44 }
0x16db   :  { %v6089_v36 = vpop.eup %6088 }
0x16dc   :  { %3325 = vrot.lane.b32.xlu0 %v6089_v36, %s6191_s6 }
0x16de   :  { %v3165_v63 = vpop.permute.xlu0 %3164 }
0x16df   :  { %v3167_v3 = vadd.f32 %v3165_v63, %v3161_v52 }
0x16e1   :  { %6090 = vtanh.f32 %v3167_v3  ;;  %v3193_v15 = vrot.slane %v3167_v3, %v6343_v44 }
0x16eb   :  { %v6091_v42 = vpop.eup %6090 }
0x16ec   :  { %3173 = vrot.lane.b32.xlu0 %v6091_v42, %s6191_s6 }
0x16f0   :  { %3346 = vrot.lane.b32.xlu0 %v3345_v5, %s6191_s6 }
0x16f4   :  { %3194 = vrot.lane.b32.xlu0 %v3193_v15, %s6191_s6 }
0x174e   :  { %v3326_v34 = vpop.permute.xlu0 %3325 }
0x174f   :  { %v3328_v58 = vmul.f32 %v3326_v34, %v3322_v19 }
0x1751   :  { %v7161_v24 = vsel %vm3336_vm8, %v3328_v58, %v7091_v0  ;;  %v7164_v33 = vsel %vm3336_vm8, %v3328_v58, 0.0  ;;  %v3183_v0 = vpop.permute.xlu1 %3182  ;;  %v3359_v58 = vld [vmem:[#allocation6 + $0x28] sm:$0xf] }
0x1752   :  { %5371 = vmatmul.mubr.msk.f32.vlgmr.msra.gmra.mrb[20].mxu1 %vm279_vm1, %v7161_v24  ;;  %vm3184_vm9 = vcmp.eq.s32.totalorder %v3183_v0, 1 }
0x1753   :  { %5785 = vmatpush1.bf16.msra.mxu1 %v6253_v9  ;;  %3887 = vmatprep.mubr.f32.mxu1 %v6189_v8 }
0x1754   :  { %5787 = vmatprep.subr.bf16.mxu1 %v6267_v16 }
0x1757   :  { %5789 = vmatpush1.bf16.msra.mxu1 %v6282_v21 }
0x1758   :  { %5791 = vmatprep.subr.bf16.mxu1 %v6306_v31 }
0x175b   :  { %5793 = vmatpush1.bf16.msra.mxu1 %v6330_v39 }
0x175c   :  { %5795 = vmatprep.subr.bf16.mxu1 %v6346_v45 }
0x175e   :  { %v3174_v46 = vpop.permute.xlu0 %3173 }
0x175f   :  { %v3176_v13 = vmul.f32 %v3174_v46, %v3170_v35  ;;  %5797 = vmatpush1.bf16.msra.mxu1 %v6372_v54 }
0x1760   :  { %5815 = vmatprep.subr.bf16.mxu1 %v6232_v4 }
0x1761   :  { %v7179_v47 = vsel %vm3184_vm9, %v3176_v13, %v7112_v55  ;;  %v7182_v25 = vsel %vm3184_vm9, %v3176_v13, 0.0  ;;  %v5277_v55 = vld [vmem:[%s7726_s2 + $0x2c] sm:$0xf] }
0x1762   :  { %5367 = vmatmul.mubr.msk.f32.vlgmr.msra.gmra.mrb[20].mxu0 %vm279_vm1, %v7179_v47  ;;  %147 = vst [vmem:[#allocation7 + $0x14] sm:$0xf] %v5277_v55  ;;  %v3347_v19 = vpop.permute.xlu0 %3346 }
0x1763   :  { %5769 = vmatpush1.bf16.msra.mxu0 %v6280_v20  ;;  %3735 = vmatprep.mubr.f32.mxu0 %v6189_v8  ;;  %v7206_v13 = vsel %vm3336_vm8, %v3347_v19, %v7136_v61 }
0x1764   :  { %5771 = vmatprep.subr.bf16.mxu0 %v6294_v27  ;;  %v3617_v23 = vrot.slane %v7206_v13, %v6343_v44 }
0x1766   :  { %v3195_v55 = vpop.permute.xlu0 %3194 }
0x1767   :  { %5773 = vmatpush1.bf16.msra.mxu0 %v6308_v32 }
0x1768   :  { %5775 = vmatprep.subr.bf16.mxu0 %v6332_v40 }
0x1769   :  { %v3511_v63 = vld [vmem:[#allocation7 + $0x14] sm:$0xf] }
0x176b   :  { %5777 = vmatpush1.bf16.msra.mxu0 %v6358_v49 }
0x176c   :  { %5779 = vmatprep.subr.bf16.mxu0 %v6361_v50 }
0x176f   :  { %5781 = vmatpush1.bf16.msra.mxu0 %v6378_v56 }
0x1770   :  { %5799 = vmatprep.subr.bf16.mxu0 %v6255_v10 }
0x1825   :  { %v3581_v59 = vpop.f32.mrb[20].mxu1 }
0x1826   :  { %v3583_v36 = vpop.f32.mrb[21].mxu1 }
0x1827   :  { %v3588_v52 = vcombine.low %v3581_v59, %v3583_v36  ;;  %v7213_v59 = vsel %vm3184_vm9, %v3195_v55, %v7143_v38 }
0x1828   :  { %v3465_v36 = vrot.slane %v7213_v59, %v6343_v44 }
0x1829   :  { %v3595_v3 = vrot.slane %v3588_v52, %v6343_v44 }
0x182b   :  { %v3597_v42 = vadd.f32 %v3595_v3, %v3511_v63 }
0x182d   :  { %3605 = vrot.lane.b32.xlu1 %v3597_v42, %s6191_s6  ;;  %v5372_v61 = vmul.f32 -1.442695, %v3597_v42 }
0x182f   :  { %6092 = vpow2.f32 %v5372_v61 }
0x1835   :  { %v3429_v5 = vpop.f32.mrb[20].mxu0 }
0x1836   :  { %v3431_v15 = vpop.f32.mrb[21].mxu0 }
0x1837   :  { %v3436_v34 = vcombine.low %v3429_v5, %v3431_v15 }
0x1839   :  { %v3443_v35 = vrot.slane %v3436_v34, %v6343_v44  ;;  %v6093_v7 = vpop.eup %6092 }
0x183a   :  { %v3601_v63 = vadd.f32 1.0, %v6093_v7 }
0x183b   :  { %v3445_v46 = vadd.f32 %v3443_v35, %v3359_v58 }
0x183d   :  { %3453 = vrot.lane.b32.xlu1 %v3445_v46, %s6191_s6  ;;  %v5368_v52 = vmul.f32 -1.442695, %v3445_v46 }
0x183f   :  { %6094 = vpow2.f32 %v5368_v52 }
0x1840   :  { %6096 = vrcp.f32 %v3601_v63 }
0x1841   :  { %3618 = vrot.lane.b32.xlu1 %v3617_v23, %s6191_s6 }
0x1845   :  { %3466 = vrot.lane.b32.xlu1 %v3465_v36, %s6191_s6 }
0x1849   :  { %3642 = vperm.xlu1 %5931, %v6846_v57   ;;  %v6095_v0 = vpop.eup %6094 }
0x184a   :  { %v6097_v5 = vpop.eup %6096  ;;  %v3449_v19 = vadd.f32 1.0, %v6095_v0 }
0x184d   :  { %3490 = vperm.xlu1 %5931, %v6841_v17  }
0x189f   :  { %v3606_v3 = vpop.permute.xlu1 %3605 }
0x18a0   :  { %v3607_v38 = vrot.slane %v3606_v3, 2 }
0x18a2   :  { %6098 = vtanh.f32 %v3607_v38 }
0x18a3   :  { %6100 = vrcp.f32 %v3449_v19 }
0x18ac   :  { %v6099_v15 = vpop.eup %6098 }
0x18ad   :  { %v3622_v34 = vmul.f32 %v6099_v15, %v6097_v5  ;;  %v6101_v17 = vpop.eup %6100 }
0x18af   :  { %3624 = vrot.lane.b32.xlu0 %v3622_v34, %s6191_s6  ;;  %v3454_v57 = vpop.permute.xlu1 %3453  ;;  %v3630_v34 = vrot.slane %v6097_v5, 2 }
0x18b0   :  { %v3455_v58 = vrot.slane %v3454_v57, 2 }
0x18b2   :  { %6102 = vtanh.f32 %v3455_v58 }
0x18b3   :  { %v3619_v46 = vpop.permute.xlu1 %3618 }
0x18b4   :  { %v3621_v55 = vmul.f32 %v6097_v5, %v3619_v46  ;;  %v3478_v5 = vrot.slane %v6101_v17, 2 }
0x18b7   :  { %v3467_v61 = vpop.permute.xlu1 %3466 }
0x18b8   :  { %v3469_v52 = vmul.f32 %v6101_v17, %v3467_v61 }
0x18bc   :  { %v6103_v42 = vpop.eup %6102 }
0x18bd   :  { %v3470_v35 = vmul.f32 %v6103_v42, %v6101_v17  ;;  %v51_v17 = vld [vmem:[%s7725_s1 + $0x58] sm:$0xf] }
0x18be   :  { %52 = vst [vmem:[#allocation6 + $0x2c] sm:$0xf] %v51_v17 }
0x18bf   :  { %3472 = vrot.lane.b32.xlu0 %v3470_v35, %s6191_s6 }
0x18c8   :  { %v3643_v19 = vpop.permute.xlu1 %3642 }
0x18c9   :  { %vm3644_vm10 = vcmp.eq.s32.totalorder %v3643_v19, 1 }
0x1921   :  { %v3625_v23 = vpop.permute.xlu0 %3624 }
0x1922   :  { %v3627_v36 = vadd.f32 %v3625_v23, %v3621_v55 }
0x1924   :  { %6104 = vtanh.f32 %v3627_v36  ;;  %v3653_v0 = vrot.slane %v3627_v36, %v6343_v44 }
0x192e   :  { %v6105_v7 = vpop.eup %6104 }
0x192f   :  { %3633 = vrot.lane.b32.xlu0 %v6105_v7, %s6191_s6 }
0x1931   :  { %v3473_v63 = vpop.permute.xlu0 %3472 }
0x1932   :  { %v3475_v3 = vadd.f32 %v3473_v63, %v3469_v52 }
0x1934   :  { %6106 = vtanh.f32 %v3475_v3  ;;  %v3501_v15 = vrot.slane %v3475_v3, %v6343_v44 }
0x193e   :  { %v6107_v38 = vpop.eup %6106 }
0x193f   :  { %3481 = vrot.lane.b32.xlu0 %v6107_v38, %s6191_s6 }
0x1943   :  { %3654 = vrot.lane.b32.xlu0 %v3653_v0, %s6191_s6 }
0x1947   :  { %3502 = vrot.lane.b32.xlu0 %v3501_v15, %s6191_s6 }
0x19a1   :  { %v3634_v57 = vpop.permute.xlu0 %3633 }
0x19a2   :  { %v3636_v58 = vmul.f32 %v3634_v57, %v3630_v34 }
0x19a4   :  { %v7231_v42 = vsel %vm3644_vm10, %v3636_v58, %v7161_v24  ;;  %v7234_v35 = vsel %vm3644_vm10, %v3636_v58, 0.0  ;;  %v3491_v24 = vpop.permute.xlu1 %3490  ;;  %v3667_v58 = vld [vmem:[#allocation6 + $0x2c] sm:$0xf] }
0x19a5   :  { %5379 = vmatmul.mubr.msk.f32.vlgmr.msra.gmra.mrb[22].mxu1 %vm279_vm1, %v7231_v42  ;;  %vm3492_vm11 = vcmp.eq.s32.totalorder %v3491_v24, 1 }
0x19a6   :  { %5817 = vmatpush1.bf16.msra.mxu1 %v6253_v9  ;;  %4195 = vmatprep.mubr.f32.mxu1 %v6189_v8 }
0x19a7   :  { %5819 = vmatprep.subr.bf16.mxu1 %v6267_v16 }
0x19aa   :  { %5821 = vmatpush1.bf16.msra.mxu1 %v6282_v21 }
0x19ab   :  { %5823 = vmatprep.subr.bf16.mxu1 %v6306_v31 }
0x19ae   :  { %5825 = vmatpush1.bf16.msra.mxu1 %v6330_v39 }
0x19af   :  { %5827 = vmatprep.subr.bf16.mxu1 %v6346_v45 }
0x19b1   :  { %v3482_v46 = vpop.permute.xlu0 %3481 }
0x19b2   :  { %v3484_v55 = vmul.f32 %v3482_v46, %v3478_v5  ;;  %5829 = vmatpush1.bf16.msra.mxu1 %v6372_v54 }
0x19b3   :  { %5847 = vmatprep.subr.bf16.mxu1 %v6232_v4 }
0x19b4   :  { %v7249_v23 = vsel %vm3492_vm11, %v3484_v55, %v7179_v47  ;;  %v7252_v36 = vsel %vm3492_vm11, %v3484_v55, 0.0  ;;  %v5276_v47 = vld [vmem:[%s7726_s2 + $0x24] sm:$0xf] }
0x19b5   :  { %5375 = vmatmul.mubr.msk.f32.vlgmr.msra.gmra.mrb[22].mxu0 %vm279_vm1, %v7249_v23  ;;  %145 = vst [vmem:[#allocation7 + $0x10] sm:$0xf] %v5276_v47  ;;  %v3655_v34 = vpop.permute.xlu0 %3654 }
0x19b6   :  { %5801 = vmatpush1.bf16.msra.mxu0 %v6280_v20  ;;  %4043 = vmatprep.mubr.f32.mxu0 %v6189_v8  ;;  %v7276_v55 = vsel %vm3644_vm10, %v3655_v34, %v7206_v13 }
0x19b7   :  { %5803 = vmatprep.subr.bf16.mxu0 %v6294_v27  ;;  %v3925_v17 = vrot.slane %v7276_v55, %v6343_v44 }
0x19b9   :  { %v3503_v47 = vpop.permute.xlu0 %3502 }
0x19ba   :  { %5805 = vmatpush1.bf16.msra.mxu0 %v6308_v32 }
0x19bb   :  { %5807 = vmatprep.subr.bf16.mxu0 %v6332_v40 }
0x19bc   :  { %v3819_v63 = vld [vmem:[#allocation7 + $0x10] sm:$0xf] }
0x19be   :  { %5809 = vmatpush1.bf16.msra.mxu0 %v6358_v49 }
0x19bf   :  { %5811 = vmatprep.subr.bf16.mxu0 %v6361_v50 }
0x19c2   :  { %5813 = vmatpush1.bf16.msra.mxu0 %v6378_v56 }
0x19c3   :  { %5831 = vmatprep.subr.bf16.mxu0 %v6255_v10 }
0x1a78   :  { %v3889_v61 = vpop.f32.mrb[22].mxu1 }
0x1a79   :  { %v3891_v7 = vpop.f32.mrb[23].mxu1 }
0x1a7a   :  { %v3896_v52 = vcombine.low %v3889_v61, %v3891_v7  ;;  %v7283_v61 = vsel %vm3492_vm11, %v3503_v47, %v7213_v59 }
0x1a7b   :  { %v3773_v7 = vrot.slane %v7283_v61, %v6343_v44 }
0x1a7c   :  { %v3903_v3 = vrot.slane %v3896_v52, %v6343_v44 }
0x1a7e   :  { %v3905_v38 = vadd.f32 %v3903_v3, %v3819_v63 }
0x1a80   :  { %3913 = vrot.lane.b32.xlu1 %v3905_v38, %s6191_s6  ;;  %v5380_v13 = vmul.f32 -1.442695, %v3905_v38 }
0x1a82   :  { %6108 = vpow2.f32 %v5380_v13 }
0x1a88   :  { %v3737_v0 = vpop.f32.mrb[22].mxu0 }
0x1a89   :  { %v3739_v15 = vpop.f32.mrb[23].mxu0 }
0x1a8a   :  { %v3744_v57 = vcombine.low %v3737_v0, %v3739_v15 }
0x1a8c   :  { %v3751_v5 = vrot.slane %v3744_v57, %v6343_v44  ;;  %v6109_v19 = vpop.eup %6108 }
0x1a8d   :  { %v3909_v63 = vadd.f32 1.0, %v6109_v19 }
0x1a8e   :  { %v3753_v46 = vadd.f32 %v3751_v5, %v3667_v58 }
0x1a90   :  { %3761 = vrot.lane.b32.xlu1 %v3753_v46, %s6191_s6  ;;  %v5376_v52 = vmul.f32 -1.442695, %v3753_v46 }
0x1a92   :  { %6110 = vpow2.f32 %v5376_v52 }
0x1a93   :  { %6112 = vrcp.f32 %v3909_v63 }
0x1a94   :  { %3926 = vrot.lane.b32.xlu1 %v3925_v17, %s6191_s6 }
0x1a98   :  { %3774 = vrot.lane.b32.xlu1 %v3773_v7, %s6191_s6 }
0x1a9c   :  { %3950 = vperm.xlu1 %5931, %v6761_v11   ;;  %v6111_v24 = vpop.eup %6110 }
0x1a9d   :  { %v6113_v0 = vpop.eup %6112  ;;  %v3757_v34 = vadd.f32 1.0, %v6111_v24 }
0x1aa0   :  { %3798 = vperm.xlu1 %5931, %v6756_v2  }
0x1af2   :  { %v3914_v3 = vpop.permute.xlu1 %3913 }
0x1af3   :  { %v3915_v59 = vrot.slane %v3914_v3, 2 }
0x1af5   :  { %6114 = vtanh.f32 %v3915_v59 }
0x1af6   :  { %6116 = vrcp.f32 %v3757_v34 }
0x1aff   :  { %v6115_v15 = vpop.eup %6114 }
0x1b00   :  { %v3930_v57 = vmul.f32 %v6115_v15, %v6113_v0  ;;  %v6117_v2 = vpop.eup %6116 }
0x1b02   :  { %3932 = vrot.lane.b32.xlu0 %v3930_v57, %s6191_s6  ;;  %v3762_v11 = vpop.permute.xlu1 %3761  ;;  %v3938_v57 = vrot.slane %v6113_v0, 2 }
0x1b03   :  { %v3763_v58 = vrot.slane %v3762_v11, 2 }
0x1b05   :  { %6118 = vtanh.f32 %v3763_v58 }
0x1b06   :  { %v3927_v46 = vpop.permute.xlu1 %3926 }
0x1b07   :  { %v3929_v47 = vmul.f32 %v6113_v0, %v3927_v46  ;;  %v3786_v0 = vrot.slane %v6117_v2, 2 }
0x1b0a   :  { %v3775_v13 = vpop.permute.xlu1 %3774 }
0x1b0b   :  { %v3777_v52 = vmul.f32 %v6117_v2, %v3775_v13 }
0x1b0f   :  { %v6119_v38 = vpop.eup %6118 }
0x1b10   :  { %v3778_v5 = vmul.f32 %v6119_v38, %v6117_v2  ;;  %v53_v2 = vld [vmem:[%s7725_s1 + $0x60] sm:$0xf] }
0x1b11   :  { %54 = vst [vmem:[#allocation6 + $0x30] sm:$0xf] %v53_v2 }
0x1b12   :  { %3780 = vrot.lane.b32.xlu0 %v3778_v5, %s6191_s6 }
0x1b1b   :  { %v3951_v34 = vpop.permute.xlu1 %3950 }
0x1b1c   :  { %vm3952_vm12 = vcmp.eq.s32.totalorder %v3951_v34, 1 }
0x1b74   :  { %v3933_v17 = vpop.permute.xlu0 %3932 }
0x1b75   :  { %v3935_v7 = vadd.f32 %v3933_v17, %v3929_v47 }
0x1b77   :  { %6120 = vtanh.f32 %v3935_v7  ;;  %v3961_v24 = vrot.slane %v3935_v7, %v6343_v44 }
0x1b81   :  { %v6121_v19 = vpop.eup %6120 }
0x1b82   :  { %3941 = vrot.lane.b32.xlu0 %v6121_v19, %s6191_s6 }
0x1b84   :  { %v3781_v63 = vpop.permute.xlu0 %3780 }
0x1b85   :  { %v3783_v3 = vadd.f32 %v3781_v63, %v3777_v52 }
0x1b87   :  { %6122 = vtanh.f32 %v3783_v3  ;;  %v3809_v15 = vrot.slane %v3783_v3, %v6343_v44 }
0x1b91   :  { %v6123_v59 = vpop.eup %6122 }
0x1b92   :  { %3789 = vrot.lane.b32.xlu0 %v6123_v59, %s6191_s6 }
0x1b96   :  { %3962 = vrot.lane.b32.xlu0 %v3961_v24, %s6191_s6 }
0x1b9a   :  { %3810 = vrot.lane.b32.xlu0 %v3809_v15, %s6191_s6 }
0x1bf4   :  { %v3942_v11 = vpop.permute.xlu0 %3941 }
0x1bf5   :  { %v3944_v58 = vmul.f32 %v3942_v11, %v3938_v57 }
0x1bf7   :  { %v7301_v38 = vsel %vm3952_vm12, %v3944_v58, %v7231_v42  ;;  %v7304_v5 = vsel %vm3952_vm12, %v3944_v58, 0.0  ;;  %v3799_v42 = vpop.permute.xlu1 %3798  ;;  %v3975_v58 = vld [vmem:[#allocation6 + $0x30] sm:$0xf] }
0x1bf8   :  { %5387 = vmatmul.mubr.msk.f32.vlgmr.msra.gmra.mrb[24].mxu1 %vm279_vm1, %v7301_v38  ;;  %vm3800_vm13 = vcmp.eq.s32.totalorder %v3799_v42, 1 }
0x1bf9   :  { %5849 = vmatpush1.bf16.msra.mxu1 %v6253_v9  ;;  %4503 = vmatprep.mubr.f32.mxu1 %v6189_v8 }
0x1bfa   :  { %5851 = vmatprep.subr.bf16.mxu1 %v6267_v16 }
0x1bfd   :  { %5853 = vmatpush1.bf16.msra.mxu1 %v6282_v21 }
0x1bfe   :  { %5855 = vmatprep.subr.bf16.mxu1 %v6306_v31 }
0x1c01   :  { %5857 = vmatpush1.bf16.msra.mxu1 %v6330_v39 }
0x1c02   :  { %5859 = vmatprep.subr.bf16.mxu1 %v6346_v45 }
0x1c04   :  { %v3790_v46 = vpop.permute.xlu0 %3789 }
0x1c05   :  { %v3792_v47 = vmul.f32 %v3790_v46, %v3786_v0  ;;  %5861 = vmatpush1.bf16.msra.mxu1 %v6372_v54 }
0x1c06   :  { %5879 = vmatprep.subr.bf16.mxu1 %v6232_v4 }
0x1c07   :  { %v7319_v17 = vsel %vm3800_vm13, %v3792_v47, %v7249_v23  ;;  %v7322_v7 = vsel %vm3800_vm13, %v3792_v47, 0.0  ;;  %v5275_v23 = vld [vmem:[%s7726_s2 + $0x1c] sm:$0xf] }
0x1c08   :  { %5383 = vmatmul.mubr.msk.f32.vlgmr.msra.gmra.mrb[24].mxu0 %vm279_vm1, %v7319_v17  ;;  %143 = vst [vmem:[#allocation7 + $0xc] sm:$0xf] %v5275_v23  ;;  %v3963_v57 = vpop.permute.xlu0 %3962 }
0x1c09   :  { %5833 = vmatpush1.bf16.msra.mxu0 %v6280_v20  ;;  %4351 = vmatprep.mubr.f32.mxu0 %v6189_v8  ;;  %v7346_v47 = vsel %vm3952_vm12, %v3963_v57, %v7276_v55 }
0x1c0a   :  { %5835 = vmatprep.subr.bf16.mxu0 %v6294_v27  ;;  %v4233_v2 = vrot.slane %v7346_v47, %v6343_v44 }
0x1c0c   :  { %v3811_v23 = vpop.permute.xlu0 %3810 }
0x1c0d   :  { %5837 = vmatpush1.bf16.msra.mxu0 %v6308_v32 }
0x1c0e   :  { %5839 = vmatprep.subr.bf16.mxu0 %v6332_v40 }
0x1c0f   :  { %v4127_v63 = vld [vmem:[#allocation7 + $0xc] sm:$0xf] }
0x1c11   :  { %5841 = vmatpush1.bf16.msra.mxu0 %v6358_v49 }
0x1c12   :  { %5843 = vmatprep.subr.bf16.mxu0 %v6361_v50 }
0x1c15   :  { %5845 = vmatpush1.bf16.msra.mxu0 %v6378_v56 }
0x1c16   :  { %5863 = vmatprep.subr.bf16.mxu0 %v6255_v10 }
0x1ccb   :  { %v4197_v13 = vpop.f32.mrb[24].mxu1 }
0x1ccc   :  { %v4199_v19 = vpop.f32.mrb[25].mxu1 }
0x1ccd   :  { %v4204_v52 = vcombine.low %v4197_v13, %v4199_v19  ;;  %v7353_v13 = vsel %vm3800_vm13, %v3811_v23, %v7283_v61 }
0x1cce   :  { %v4081_v19 = vrot.slane %v7353_v13, %v6343_v44 }
0x1ccf   :  { %v4211_v3 = vrot.slane %v4204_v52, %v6343_v44 }
0x1cd1   :  { %v4213_v59 = vadd.f32 %v4211_v3, %v4127_v63 }
0x1cd3   :  { %4221 = vrot.lane.b32.xlu1 %v4213_v59, %s6191_s6  ;;  %v5388_v55 = vmul.f32 -1.442695, %v4213_v59 }
0x1cd5   :  { %6124 = vpow2.f32 %v5388_v55 }
0x1cdb   :  { %v4045_v24 = vpop.f32.mrb[24].mxu0 }
0x1cdc   :  { %v4047_v15 = vpop.f32.mrb[25].mxu0 }
0x1cdd   :  { %v4052_v11 = vcombine.low %v4045_v24, %v4047_v15 }
0x1cdf   :  { %v4059_v0 = vrot.slane %v4052_v11, %v6343_v44  ;;  %v6125_v34 = vpop.eup %6124 }
0x1ce0   :  { %v4217_v63 = vadd.f32 1.0, %v6125_v34 }
0x1ce1   :  { %v4061_v46 = vadd.f32 %v4059_v0, %v3975_v58 }
0x1ce3   :  { %4069 = vrot.lane.b32.xlu1 %v4061_v46, %s6191_s6  ;;  %v5384_v52 = vmul.f32 -1.442695, %v4061_v46 }
0x1ce5   :  { %6126 = vpow2.f32 %v5384_v52 }
0x1ce6   :  { %6128 = vrcp.f32 %v4217_v63 }
0x1ce7   :  { %4234 = vrot.lane.b32.xlu1 %v4233_v2, %s6191_s6 }
0x1ceb   :  { %4082 = vrot.lane.b32.xlu1 %v4081_v19, %s6191_s6 }
0x1cef   :  { %4258 = vperm.xlu1 %5931, %v6681_v12   ;;  %v6127_v42 = vpop.eup %6126 }
0x1cf0   :  { %v6129_v24 = vpop.eup %6128  ;;  %v4065_v57 = vadd.f32 1.0, %v6127_v42 }
0x1cf3   :  { %4106 = vperm.xlu1 %5931, %v6676_v18  }
0x1d45   :  { %v4222_v3 = vpop.permute.xlu1 %4221 }
0x1d46   :  { %v4223_v61 = vrot.slane %v4222_v3, 2 }
0x1d48   :  { %6130 = vtanh.f32 %v4223_v61 }
0x1d49   :  { %6132 = vrcp.f32 %v4065_v57 }
0x1d52   :  { %v6131_v15 = vpop.eup %6130 }
0x1d53   :  { %v4238_v11 = vmul.f32 %v6131_v15, %v6129_v24  ;;  %v6133_v18 = vpop.eup %6132 }
0x1d55   :  { %4240 = vrot.lane.b32.xlu0 %v4238_v11, %s6191_s6  ;;  %v4070_v12 = vpop.permute.xlu1 %4069  ;;  %v4246_v11 = vrot.slane %v6129_v24, 2 }
0x1d56   :  { %v4071_v58 = vrot.slane %v4070_v12, 2 }
0x1d58   :  { %6134 = vtanh.f32 %v4071_v58 }
0x1d59   :  { %v4235_v46 = vpop.permute.xlu1 %4234 }
0x1d5a   :  { %v4237_v23 = vmul.f32 %v6129_v24, %v4235_v46  ;;  %v4094_v24 = vrot.slane %v6133_v18, 2 }
0x1d5d   :  { %v4083_v55 = vpop.permute.xlu1 %4082 }
0x1d5e   :  { %v4085_v52 = vmul.f32 %v6133_v18, %v4083_v55 }
0x1d62   :  { %v6135_v59 = vpop.eup %6134 }
0x1d63   :  { %v4086_v0 = vmul.f32 %v6135_v59, %v6133_v18 }
0x1d65   :  { %4088 = vrot.lane.b32.xlu0 %v4086_v0, %s6191_s6 }
0x1d6e   :  { %v4259_v57 = vpop.permute.xlu1 %4258 }
0x1d6f   :  { %vm4260_vm14 = vcmp.eq.s32.totalorder %v4259_v57, 1 }
0x1dc7   :  { %v4241_v2 = vpop.permute.xlu0 %4240 }
0x1dc8   :  { %v4243_v19 = vadd.f32 %v4241_v2, %v4237_v23 }
0x1dca   :  { %6136 = vtanh.f32 %v4243_v19  ;;  %v4269_v42 = vrot.slane %v4243_v19, %v6343_v44 }
0x1dd4   :  { %v6137_v34 = vpop.eup %6136 }
0x1dd5   :  { %4249 = vrot.lane.b32.xlu0 %v6137_v34, %s6191_s6 }
0x1dd7   :  { %v4089_v63 = vpop.permute.xlu0 %4088 }
0x1dd8   :  { %v4091_v3 = vadd.f32 %v4089_v63, %v4085_v52 }
0x1dda   :  { %6138 = vtanh.f32 %v4091_v3  ;;  %v4117_v15 = vrot.slane %v4091_v3, %v6343_v44 }
0x1de4   :  { %v6139_v61 = vpop.eup %6138 }
0x1de5   :  { %4097 = vrot.lane.b32.xlu0 %v6139_v61, %s6191_s6 }
0x1de9   :  { %4270 = vrot.lane.b32.xlu0 %v4269_v42, %s6191_s6 }
0x1ded   :  { %4118 = vrot.lane.b32.xlu0 %v4117_v15, %s6191_s6 }
0x1e47   :  { %v4250_v12 = vpop.permute.xlu0 %4249 }
0x1e48   :  { %v4252_v58 = vmul.f32 %v4250_v12, %v4246_v11 }
0x1e4a   :  { %v7371_v59 = vsel %vm4260_vm14, %v4252_v58, %v7301_v38  ;;  %v7374_v0 = vsel %vm4260_vm14, %v4252_v58, 0.0  ;;  %v4107_v38 = vpop.permute.xlu1 %4106 }
0x1e4b   :  { %5395 = vmatmul.mubr.msk.f32.vlgmr.msra.gmra.mrb[26].mxu1 %vm279_vm1, %v7371_v59  ;;  %vm4108_vm15 = vcmp.eq.s32.totalorder %v4107_v38, 1 }
0x1e4c   :  { %5881 = vmatpush1.bf16.msra.mxu1 %v6253_v9  ;;  %4811 = vmatprep.mubr.f32.mxu1 %v6189_v8 }
0x1e4d   :  { %5883 = vmatprep.subr.bf16.mxu1 %v6267_v16 }
0x1e50   :  { %5885 = vmatpush1.bf16.msra.mxu1 %v6282_v21 }
0x1e51   :  { %5887 = vmatprep.subr.bf16.mxu1 %v6306_v31 }
0x1e54   :  { %5889 = vmatpush1.bf16.msra.mxu1 %v6330_v39 }
0x1e55   :  { %5891 = vmatprep.subr.bf16.mxu1 %v6346_v45 }
0x1e57   :  { %v4098_v46 = vpop.permute.xlu0 %4097 }
0x1e58   :  { %v4100_v23 = vmul.f32 %v4098_v46, %v4094_v24  ;;  %5893 = vmatpush1.bf16.msra.mxu1 %v6372_v54 }
0x1e59   :  { %5911 = vmatprep.subr.bf16.mxu1 %v6232_v4  ;;  %v5274_v4 = vld [vmem:[%s7726_s2 + $0x14] sm:$0xf] }
0x1e5a   :  { %v7389_v2 = vsel %vm4108_vm15, %v4100_v23, %v7319_v17  ;;  %v7392_v19 = vsel %vm4108_vm15, %v4100_v23, 0.0  ;;  %141 = vst [vmem:[#allocation7 + $0x8] sm:$0xf] %v5274_v4  ;;  %v55_v17 = vld [vmem:[%s7725_s1 + $0x68] sm:$0xf] }
0x1e5b   :  { %5391 = vmatmul.mubr.msk.f32.vlgmr.msra.gmra.mrb[26].mxu0 %vm279_vm1, %v7389_v2  ;;  %56 = vst [vmem:[#allocation6 + $0x34] sm:$0xf] %v55_v17  ;;  %v4271_v42 = vpop.permute.xlu0 %4270 }
0x1e5c   :  { %5865 = vmatpush1.bf16.msra.mxu0 %v6280_v20  ;;  %4659 = vmatprep.mubr.f32.mxu0 %v6189_v8  ;;  %v7416_v24 = vsel %vm4260_vm14, %v4271_v42, %v7346_v47 }
0x1e5d   :  { %5867 = vmatprep.subr.bf16.mxu0 %v6294_v27  ;;  %v4541_v23 = vrot.slane %v7416_v24, %v6343_v44 }
0x1e5f   :  { %v4119_v46 = vpop.permute.xlu0 %4118 }
0x1e60   :  { %5869 = vmatpush1.bf16.msra.mxu0 %v6308_v32  ;;  %v7423_v4 = vsel %vm4108_vm15, %v4119_v46, %v7353_v13 }
0x1e61   :  { %5871 = vmatprep.subr.bf16.mxu0 %v6332_v40  ;;  %v4435_v52 = vld [vmem:[#allocation7 + $0x8] sm:$0xf]  ;;  %v4389_v17 = vrot.slane %v7423_v4, %v6343_v44 }
0x1e62   :  { %v4283_v11 = vld [vmem:[#allocation6 + $0x34] sm:$0xf] }
0x1e64   :  { %5873 = vmatpush1.bf16.msra.mxu0 %v6358_v49 }
0x1e65   :  { %5875 = vmatprep.subr.bf16.mxu0 %v6361_v50 }
0x1e68   :  { %5877 = vmatpush1.bf16.msra.mxu0 %v6378_v56 }
0x1e69   :  { %5895 = vmatprep.subr.bf16.mxu0 %v6255_v10 }
0x1f1e   :  { %v4505_v18 = vpop.f32.mrb[26].mxu1 }
0x1f1f   :  { %v4507_v55 = vpop.f32.mrb[27].mxu1 }
0x1f20   :  { %v4512_v34 = vcombine.low %v4505_v18, %v4507_v55 }
0x1f22   :  { %v4519_v63 = vrot.slane %v4512_v34, %v6343_v44 }
0x1f24   :  { %v4521_v3 = vadd.f32 %v4519_v63, %v4435_v52 }
0x1f26   :  { %4529 = vrot.lane.b32.xlu1 %v4521_v3, %s6191_s6  ;;  %v5396_v47 = vmul.f32 -1.442695, %v4521_v3 }
0x1f28   :  { %6140 = vpow2.f32 %v5396_v47 }
0x1f2e   :  { %v4353_v10 = vpop.f32.mrb[26].mxu0 }
0x1f2f   :  { %v4355_v61 = vpop.f32.mrb[27].mxu0 }
0x1f30   :  { %v4360_v15 = vcombine.low %v4353_v10, %v4355_v61 }
0x1f32   :  { %v4367_v12 = vrot.slane %v4360_v15, %v6343_v44  ;;  %v6141_v57 = vpop.eup %6140 }
0x1f33   :  { %v4525_v55 = vadd.f32 1.0, %v6141_v57 }
0x1f34   :  { %v4369_v58 = vadd.f32 %v4367_v12, %v4283_v11 }
0x1f36   :  { %4377 = vrot.lane.b32.xlu1 %v4369_v58, %s6191_s6  ;;  %v5392_v18 = vmul.f32 -1.442695, %v4369_v58 }
0x1f38   :  { %6142 = vpow2.f32 %v5392_v18 }
0x1f39   :  { %6144 = vrcp.f32 %v4525_v55 }
0x1f3a   :  { %4542 = vrot.lane.b32.xlu1 %v4541_v23, %s6191_s6 }
0x1f3e   :  { %4390 = vrot.lane.b32.xlu1 %v4389_v17, %s6191_s6 }
0x1f42   :  { %4566 = vperm.xlu1 %5931, %v6601_v26   ;;  %v6143_v38 = vpop.eup %6142 }
0x1f43   :  { %v6145_v52 = vpop.eup %6144  ;;  %v4373_v10 = vadd.f32 1.0, %v6143_v38 }
0x1f46   :  { %4414 = vperm.xlu1 %5931, %v6596_v41  }
0x1f98   :  { %v4530_v34 = vpop.permute.xlu1 %4529 }
0x1f99   :  { %v4531_v13 = vrot.slane %v4530_v34, 2 }
0x1f9b   :  { %6146 = vtanh.f32 %v4531_v13 }
0x1f9c   :  { %6148 = vrcp.f32 %v4373_v10 }
0x1fa5   :  { %v6147_v63 = vpop.eup %6146 }
0x1fa6   :  { %v4546_v61 = vmul.f32 %v6147_v63, %v6145_v52  ;;  %v6149_v41 = vpop.eup %6148  ;;  %v4554_v63 = vrot.slane %v6145_v52, 2 }
0x1fa8   :  { %4548 = vrot.lane.b32.xlu0 %v4546_v61, %s6191_s6  ;;  %v4378_v26 = vpop.permute.xlu1 %4377 }
0x1fa9   :  { %v4379_v42 = vrot.slane %v4378_v26, 2 }
0x1fab   :  { %6150 = vtanh.f32 %v4379_v42 }
0x1fac   :  { %v4543_v11 = vpop.permute.xlu1 %4542 }
0x1fad   :  { %v4545_v12 = vmul.f32 %v6145_v52, %v4543_v11  ;;  %v4402_v52 = vrot.slane %v6149_v41, 2 }
0x1fb0   :  { %v4391_v23 = vpop.permute.xlu1 %4390 }
0x1fb1   :  { %v4393_v47 = vmul.f32 %v6149_v41, %v4391_v23 }
0x1fb5   :  { %v6151_v3 = vpop.eup %6150 }
0x1fb6   :  { %v4394_v15 = vmul.f32 %v6151_v3, %v6149_v41 }
0x1fb8   :  { %4396 = vrot.lane.b32.xlu0 %v4394_v15, %s6191_s6 }
0x1fc1   :  { %v4567_v38 = vpop.permute.xlu1 %4566 }
0x1fc2   :  { %vm4568_vm2 = vcmp.eq.s32.totalorder %v4567_v38, 1 }
0x201a   :  { %v4549_v58 = vpop.permute.xlu0 %4548 }
0x201b   :  { %v4551_v46 = vadd.f32 %v4549_v58, %v4545_v12 }
0x201d   :  { %6152 = vtanh.f32 %v4551_v46  ;;  %v4577_v34 = vrot.slane %v4551_v46, %v6343_v44 }
0x2027   :  { %v6153_v17 = vpop.eup %6152 }
0x2028   :  { %4557 = vrot.lane.b32.xlu0 %v6153_v17, %s6191_s6 }
0x202a   :  { %v4397_v57 = vpop.permute.xlu0 %4396 }
0x202b   :  { %v4399_v18 = vadd.f32 %v4397_v57, %v4393_v47 }
0x202d   :  { %6154 = vtanh.f32 %v4399_v18  ;;  %v4425_v13 = vrot.slane %v4399_v18, %v6343_v44 }
0x2037   :  { %v6155_v55 = vpop.eup %6154 }
0x2038   :  { %4405 = vrot.lane.b32.xlu0 %v6155_v55, %s6191_s6 }
0x203c   :  { %4578 = vrot.lane.b32.xlu0 %v4577_v34, %s6191_s6 }
0x2040   :  { %4426 = vrot.lane.b32.xlu0 %v4425_v13, %s6191_s6 }
0x209a   :  { %v4558_v10 = vpop.permute.xlu0 %4557 }
0x209b   :  { %v4560_v61 = vmul.f32 %v4558_v10, %v4554_v63 }
0x209d   :  { %v7441_v26 = vsel %vm4568_vm2, %v4560_v61, %v7371_v59  ;;  %v7444_v42 = vsel %vm4568_vm2, %v4560_v61, 0.0  ;;  %v4415_v59 = vpop.permute.xlu1 %4414 }
0x209e   :  { %5403 = vmatmul.mubr.msk.f32.vlgmr.msra.gmra.mrb[28].mxu1 %vm279_vm1, %v7441_v26  ;;  %vm4416_vm3 = vcmp.eq.s32.totalorder %v4415_v59, 1 }
0x209f   :  { %5913 = vmatpush1.bf16.msra.mxu1 %v6253_v9  ;;  %5118 = vmatprep.mubr.f32.mxu1 %v6189_v8 }
0x20a0   :  { %5915 = vmatprep.subr.bf16.mxu1 %v6267_v16 }
0x20a3   :  { %5917 = vmatpush1.bf16.msra.mxu1 %v6282_v21  ;;  %v5273_v21 = vld [vmem:[%s7726_s2 + $0xc] sm:$0xf] }
0x20a4   :  { %5919 = vmatprep.subr.bf16.mxu1 %v6306_v31  ;;  %139 = vst [vmem:[#allocation7 + $0x4] sm:$0xf] %v5273_v21 }
0x20a7   :  { %5921 = vmatpush1.bf16.msra.mxu1 %v6330_v39 }
0x20a8   :  { %5923 = vmatprep.subr.bf16.mxu1 %v6346_v45 }
0x20aa   :  { %v4406_v3 = vpop.permute.xlu0 %4405 }
0x20ab   :  { %v4408_v15 = vmul.f32 %v4406_v3, %v4402_v52  ;;  %5925 = vmatpush1.bf16.msra.mxu1 %v6372_v54 }
0x20ad   :  { %v7458_v9 = vsel %vm4416_vm3, %v4408_v15, %v7389_v2  ;;  %v7461_v16 = vsel %vm4416_vm3, %v4408_v15, 0.0 }
0x20ae   :  { %5399 = vmatmul.mubr.msk.f32.vlgmr.msra.gmra.mrb[28].mxu0 %vm279_vm1, %v7458_v9 }
0x20af   :  { %5897 = vmatpush1.bf16.msra.mxu0 %v6280_v20  ;;  %4967 = vmatprep.mubr.f32.mxu0 %v6189_v8  ;;  %v57_v8 = vld [vmem:[%s7725_s1 + $0x70] sm:$0xf] }
0x20b0   :  { %5899 = vmatprep.subr.bf16.mxu0 %v6294_v27  ;;  %58 = vst [vmem:[#allocation6 + $0x38] sm:$0xf] %v57_v8 }
0x20b3   :  { %5901 = vmatpush1.bf16.msra.mxu0 %v6308_v32  ;;  %v4743_v32 = vld [vmem:[#allocation7 + $0x4] sm:$0xf] }
0x20b4   :  { %5903 = vmatprep.subr.bf16.mxu0 %v6332_v40 }
0x20b7   :  { %5905 = vmatpush1.bf16.msra.mxu0 %v6358_v49 }
0x20b8   :  { %5907 = vmatprep.subr.bf16.mxu0 %v6361_v50  ;;  %v4579_v50 = vpop.permute.xlu0 %4578 }
0x20b9   :  { %v7484_v11 = vsel %vm4568_vm2, %v4579_v50, %v7416_v24 }
0x20ba   :  { %v4849_v58 = vrot.slane %v7484_v11, %v6343_v44 }
0x20bb   :  { %5909 = vmatpush1.bf16.msra.mxu0 %v6378_v56  ;;  %v4591_v56 = vld [vmem:[#allocation6 + $0x38] sm:$0xf] }
0x20bc   :  { %v4427_v12 = vpop.permute.xlu0 %4426 }
0x20bd   :  { %v7491_v46 = vsel %vm4416_vm3, %v4427_v12, %v7423_v4 }
0x20be   :  { %v4697_v23 = vrot.slane %v7491_v46, %v6343_v44 }
0x2171   :  { %v4813_v20 = vpop.f32.mrb[28].mxu1 }
0x2172   :  { %v4815_v27 = vpop.f32.mrb[29].mxu1 }
0x2173   :  { %v4820_v31 = vcombine.low %v4813_v20, %v4815_v27 }
0x2175   :  { %v4827_v39 = vrot.slane %v4820_v31, %v6343_v44 }
0x2177   :  { %v4829_v40 = vadd.f32 %v4827_v39, %v4743_v32 }
0x2179   :  { %4837 = vrot.lane.b32.xlu1 %v4829_v40, %s6191_s6  ;;  %v5404_v24 = vmul.f32 -1.442695, %v4829_v40 }
0x217b   :  { %6156 = vpow2.f32 %v5404_v24 }
0x2181   :  { %v4661_v45 = vpop.f32.mrb[28].mxu0 }
0x2182   :  { %v4663_v49 = vpop.f32.mrb[29].mxu0 }
0x2183   :  { %v4668_v54 = vcombine.low %v4661_v45, %v4663_v49 }
0x2185   :  { %v4675_v2 = vrot.slane %v4668_v54, %v6343_v44  ;;  %v6157_v17 = vpop.eup %6156 }
0x2186   :  { %v4833_v57 = vadd.f32 1.0, %v6157_v17 }
0x2187   :  { %v4677_v41 = vadd.f32 %v4675_v2, %v4591_v56 }
0x2189   :  { %4685 = vrot.lane.b32.xlu1 %v4677_v41, %s6191_s6  ;;  %v5400_v47 = vmul.f32 -1.442695, %v4677_v41 }
0x218b   :  { %6158 = vpow2.f32 %v5400_v47 }
0x218c   :  { %6160 = vrcp.f32 %v4833_v57  ;;  %v59_v57 = vld [vmem:[%s7725_s1 + $0x78] sm:$0xf] }
0x218d   :  { %4850 = vrot.lane.b32.xlu1 %v4849_v58, %s6191_s6  ;;  %60 = vst [vmem:[#allocation6 + $0x3c] sm:$0xf] %v59_v57 }
0x2191   :  { %4698 = vrot.lane.b32.xlu1 %v4697_v23, %s6191_s6 }
0x2195   :  { %4874 = vperm.xlu1 %5931, %v6521_v48   ;;  %v6159_v55 = vpop.eup %6158 }
0x2196   :  { %v6161_v34 = vpop.eup %6160  ;;  %v4681_v38 = vadd.f32 1.0, %v6159_v55 }
0x2197   :  { %v4862_v50 = vrot.slane %v6161_v34, 2 }
0x2199   :  { %4722 = vperm.xlu1 %5931, %v6516_v53  }
0x21eb   :  { %v4838_v18 = vpop.permute.xlu1 %4837 }
0x21ec   :  { %v4839_v4 = vrot.slane %v4838_v18, 2 }
0x21ee   :  { %6162 = vtanh.f32 %v4839_v4 }
0x21ef   :  { %6164 = vrcp.f32 %v4681_v38 }
0x21f8   :  { %v6163_v13 = vpop.eup %6162 }
0x21f9   :  { %v4854_v63 = vmul.f32 %v6163_v13, %v6161_v34  ;;  %v6165_v53 = vpop.eup %6164 }
0x21fa   :  { %v4710_v58 = vrot.slane %v6165_v53, 2 }
0x21fb   :  { %4856 = vrot.lane.b32.xlu0 %v4854_v63, %s6191_s6  ;;  %v4686_v48 = vpop.permute.xlu1 %4685 }
0x21fc   :  { %v4687_v10 = vrot.slane %v4686_v48, 2 }
0x21fe   :  { %6166 = vtanh.f32 %v4687_v10 }
0x21ff   :  { %v4851_v52 = vpop.permute.xlu1 %4850 }
0x2200   :  { %v4853_v3 = vmul.f32 %v6161_v34, %v4851_v52 }
0x2203   :  { %v4699_v8 = vpop.permute.xlu1 %4698 }
0x2204   :  { %v4701_v27 = vmul.f32 %v6165_v53, %v4699_v8 }
0x2208   :  { %v6167_v61 = vpop.eup %6166 }
0x2209   :  { %v4702_v59 = vmul.f32 %v6167_v61, %v6165_v53  ;;  %v4899_v53 = vld [vmem:[#allocation6 + $0x3c] sm:$0xf] }
0x220b   :  { %4704 = vrot.lane.b32.xlu0 %v4702_v59, %s6191_s6 }
0x2214   :  { %v4875_v49 = vpop.permute.xlu1 %4874 }
0x2215   :  { %vm4876_vm4 = vcmp.eq.s32.totalorder %v4875_v49, 1 }
0x2218   :  { %v4723_v12 = vpop.permute.xlu1 %4722 }
0x2219   :  { %vm4724_vm5 = vcmp.eq.s32.totalorder %v4723_v12, 1 }
0x226d   :  { %v4857_v15 = vpop.permute.xlu0 %4856 }
0x226e   :  { %v4859_v21 = vadd.f32 %v4857_v15, %v4853_v3 }
0x2270   :  { %6168 = vtanh.f32 %v4859_v21  ;;  %v4885_v40 = vrot.slane %v4859_v21, %v6343_v44 }
0x227a   :  { %v6169_v20 = vpop.eup %6168 }
0x227b   :  { %4865 = vrot.lane.b32.xlu0 %v6169_v20, %s6191_s6 }
0x227d   :  { %v4705_v31 = vpop.permute.xlu0 %4704 }
0x227e   :  { %v4707_v32 = vadd.f32 %v4705_v31, %v4701_v27 }
0x2280   :  { %6170 = vtanh.f32 %v4707_v32  ;;  %v4733_v45 = vrot.slane %v4707_v32, %v6343_v44 }
0x228a   :  { %v6171_v39 = vpop.eup %6170 }
0x228b   :  { %4713 = vrot.lane.b32.xlu0 %v6171_v39, %s6191_s6 }
0x228f   :  { %4886 = vrot.lane.b32.xlu0 %v4885_v40, %s6191_s6 }
0x2293   :  { %4734 = vrot.lane.b32.xlu0 %v4733_v45, %s6191_s6 }
0x22ed   :  { %v4866_v54 = vpop.permute.xlu0 %4865 }
0x22ee   :  { %v4868_v56 = vmul.f32 %v4866_v54, %v4862_v50 }
0x22f0   :  { %v7509_v2 = vsel %vm4876_vm4, %v4868_v56, %v7441_v26  ;;  %v7512_v41 = vsel %vm4876_vm4, %v4868_v56, 0.0  ;;  %v5272_v26 = vld [vmem:[%s7726_s2 + $0x4] sm:$0xf] }
0x22f1   :  { %5411 = vmatmul.mubr.msk.f32.vlgmr.msra.gmra.mrb[30].mxu1 %vm279_vm1, %v7509_v2  ;;  %137 = vst [vmem:[#allocation7] sm:$0xf] %v5272_v26 }
0x22f8   :  { %v5050_v55 = vld [vmem:[#allocation7] sm:$0xf] }
0x22fd   :  { %v4714_v23 = vpop.permute.xlu0 %4713 }
0x22fe   :  { %v4716_v24 = vmul.f32 %v4714_v23, %v4710_v58 }
0x2300   :  { %v7518_v17 = vsel %vm4724_vm5, %v4716_v24, %v7458_v9  ;;  %v7521_v47 = vsel %vm4724_vm5, %v4716_v24, 0.0 }
0x2301   :  { %5407 = vmatmul.mubr.msk.f32.vlgmr.msra.gmra.mrb[30].mxu0 %vm279_vm1, %v7518_v17  ;;  %v4887_v48 = vpop.permute.xlu0 %4886  ;;  %vm584_vm1 = vcmask 1041920  }
0x2302   :  { %v7536_v52 = vsel %vm4876_vm4, %v4887_v48, %v7484_v11 }
0x2303   :  { %v5156_v15 = vrot.slane %v7536_v52, %v6343_v44 }
0x2305   :  { %v4735_v3 = vpop.permute.xlu0 %4734 }
0x2306   :  { %v7543_v21 = vsel %vm4724_vm5, %v4735_v3, %v7491_v46 }
0x2307   :  { %v5005_v8 = vrot.slane %v7543_v21, %v6343_v44 }
0x23c4   :  { %v5120_v18 = vpop.f32.mrb[30].mxu1 }
0x23c5   :  { %v5122_v4 = vpop.f32.mrb[31].mxu1 }
0x23c6   :  { %v5127_v9 = vcombine.low %v5120_v18, %v5122_v4 }
0x23c8   :  { %v5134_v34 = vrot.slane %v5127_v9, %v6343_v44 }
0x23ca   :  { %v5136_v13 = vadd.f32 %v5134_v34, %v5050_v55 }
0x23cc   :  { %5144 = vrot.lane.b32.xlu1 %v5136_v13, %s6191_s6  ;;  %v5412_v11 = vmul.f32 -1.442695, %v5136_v13 }
0x23ce   :  { %6172 = vpow2.f32 %v5412_v11 }
0x23d4   :  { %v4969_v38 = vpop.f32.mrb[30].mxu0 }
0x23d5   :  { %v4971_v63 = vpop.f32.mrb[31].mxu0 }
0x23d6   :  { %v4976_v10 = vcombine.low %v4969_v38, %v4971_v63 }
0x23d8   :  { %v4983_v61 = vrot.slane %v4976_v10, %v6343_v44  ;;  %v6173_v46 = vpop.eup %6172 }
0x23d9   :  { %v5140_v27 = vadd.f32 1.0, %v6173_v46 }
0x23da   :  { %v4985_v59 = vadd.f32 %v4983_v61, %v4899_v53 }
0x23dc   :  { %4993 = vrot.lane.b32.xlu1 %v4985_v59, %s6191_s6  ;;  %v5408_v20 = vmul.f32 -1.442695, %v4985_v59 }
0x23de   :  { %6174 = vpow2.f32 %v5408_v20 }
0x23df   :  { %6176 = vrcp.f32 %v5140_v27 }
0x23e0   :  { %5157 = vrot.lane.b32.xlu1 %v5156_v15, %s6191_s6 }
0x23e4   :  { %5006 = vrot.lane.b32.xlu1 %v5005_v8, %s6191_s6 }
0x23e8   :  { %5181 = vperm.xlu1 %5931, %v6444_v60  }
0x23ec   :  { %5030 = vperm.xlu1 %5931, %v6436_v29  }
0x23f0   :  { %579 = vrot.lane.b32.xlu1 %v6457_v6, %s6191_s6  ;;  %v6175_v6 = vpop.eup %6174 }
0x23f1   :  { %v6177_v31 = vpop.eup %6176 }
0x23f4   :  { %1196 = vrot.lane.b32.xlu1 %v6617_v28, %s6191_s6  ;;  %v4989_v28 = vadd.f32 1.0, %v6175_v6 }
0x23f8   :  { %1812 = vrot.lane.b32.xlu1 %v6777_v30, %s6191_s6 }
0x23fc   :  { %2428 = vrot.lane.b32.xlu1 %v6942_v37, %s6191_s6 }
0x243e   :  { %v5145_v60 = vpop.permute.xlu1 %5144 }
0x243f   :  { %v5146_v29 = vrot.slane %v5145_v60, 2 }
0x2441   :  { %6178 = vtanh.f32 %v5146_v29 }
0x2442   :  { %6180 = vrcp.f32 %v4989_v28 }
0x244b   :  { %v6179_v32 = vpop.eup %6178 }
0x244c   :  { %v5161_v39 = vmul.f32 %v6179_v32, %v6177_v31  ;;  %v7560_v37 = vpop.eup %6180 }
0x244d   :  { %v5018_v10 = vrot.slane %v7560_v37, 2 }
0x244e   :  { %5163 = vrot.lane.b32.xlu0 %v5161_v39, %s6191_s6  ;;  %v4994_v30 = vpop.permute.xlu1 %4993 }
0x244f   :  { %v4995_v40 = vrot.slane %v4994_v30, 2 }
0x2451   :  { %6182 = vtanh.f32 %v4995_v40 }
0x2452   :  { %v5158_v50 = vpop.permute.xlu1 %5157 }
0x2456   :  { %v5007_v54 = vpop.permute.xlu1 %5006 }
0x245b   :  { %v6183_v45 = vpop.eup %6182 }
0x245c   :  { %v5010_v49 = vmul.f32 %v6183_v45, %v7560_v37 }
0x245e   :  { %5012 = vrot.lane.b32.xlu0 %v5010_v49, %s6191_s6 }
0x2467   :  { %v7564_v56 = vpop.permute.xlu1 %5181 }
0x2468   :  { %vm5183_vm6 = vcmp.eq.s32.totalorder %v7564_v56, 1 }
0x246b   :  { %v7566_v12 = vpop.permute.xlu1 %5030 }
0x246c   :  { %vm5032_vm7 = vcmp.eq.s32.totalorder %v7566_v12, 1 }
0x246f   :  { %v580_v58 = vpop.permute.xlu1 %579 }
0x2470   :  { %5294 = vst.msk [vmem:[%s7729_s5 + $0x1e] sm:$0x3] %vm584_vm1, %v580_v58 }
0x2473   :  { %v1197_v23 = vpop.permute.xlu1 %1196 }
0x2474   :  { %5310 = vst.msk [vmem:[%s7729_s5 + $0x1a] sm:$0x3] %vm584_vm1, %v1197_v23 }
0x2475   :  { %5394 = vst.msk [vmem:[%s7729_s5 + $0x1a] sm:$0x3] %vm234_vm0, %v7461_v16  ;;  %v5160_v16 = vmul.f32 %v6177_v31, %v5158_v50 }
0x2477   :  { %v1813_v24 = vpop.permute.xlu1 %1812 }
0x2478   :  { %5326 = vst.msk [vmem:[%s7729_s5 + $0x16] sm:$0x3] %vm584_vm1, %v1813_v24 }
0x2479   :  { %5378 = vst.msk [vmem:[%s7729_s5 + $0x16] sm:$0x3] %vm234_vm0, %v7322_v7  ;;  %v5009_v7 = vmul.f32 %v7560_v37, %v5007_v54 }
0x247b   :  { %v2429_v26 = vpop.permute.xlu1 %2428 }
0x247c   :  { %5342 = vst.msk [vmem:[%s7729_s5 + $0x12] sm:$0x3] %vm584_vm1, %v2429_v26 }
0x247d   :  { %5362 = vst.msk [vmem:[%s7729_s5 + $0x12] sm:$0x3] %vm234_vm0, %v7182_v25 }
0x24c0   :  { %v5164_v57 = vpop.permute.xlu0 %5163 }
0x24c1   :  { %v5166_v18 = vadd.f32 %v5164_v57, %v5160_v16 }
0x24c3   :  { %6184 = vtanh.f32 %v5166_v18 }
0x24cd   :  { %v6185_v4 = vpop.eup %6184 }
0x24ce   :  { %5172 = vrot.lane.b32.xlu0 %v6185_v4, %s6191_s6 }
0x24d0   :  { %v5013_v9 = vpop.permute.xlu0 %5012 }
0x24d1   :  { %v5015_v55 = vadd.f32 %v5013_v9, %v5009_v7 }
0x24d2   :  { %888 = vrot.lane.b32.xlu0 %v6537_v43, %s6191_s6  ;;  %v5192_v43 = vrot.slane %v5166_v18, %v6343_v44 }
0x24d3   :  { %v5041_v34 = vrot.slane %v5015_v55, %v6343_v44  ;;  %6186 = vtanh.f32 %v5015_v55  ;;  %v5169_v44 = vrot.slane %v6177_v31, 2 }
0x24d5   :  { %5042 = vrot.lane.b32.xlu1 %v5041_v34, %s6191_s6 }
0x24d6   :  { %1504 = vrot.lane.b32.xlu0 %v6697_v22, %s6191_s6 }
0x24d9   :  { %3044 = vrot.lane.b32.xlu1 %v7094_v62, %s6191_s6 }
0x24da   :  { %2120 = vrot.lane.b32.xlu0 %v6862_v51, %s6191_s6 }
0x24dd   :  { %3660 = vrot.lane.b32.xlu1 %v7234_v35, %s6191_s6  ;;  %v6187_v22 = vpop.eup %6186 }
0x24de   :  { %2736 = vrot.lane.b32.xlu0 %v7022_v14, %s6191_s6 }
0x24e1   :  { %4276 = vrot.lane.b32.xlu1 %v7374_v0, %s6191_s6 }
0x24e2   :  { %5193 = vrot.lane.b32.xlu0 %v5192_v43, %s6191_s6 }
0x24e5   :  { %4892 = vrot.lane.b32.xlu1 %v7512_v41, %s6191_s6 }
0x24e6   :  { %3352 = vrot.lane.b32.xlu0 %v7164_v33, %s6191_s6 }
0x24ea   :  { %3968 = vrot.lane.b32.xlu0 %v7304_v5, %s6191_s6 }
0x24ee   :  { %4584 = vrot.lane.b32.xlu0 %v7444_v42, %s6191_s6 }
0x24f2   :  { %5021 = vrot.lane.b32.xlu0 %v6187_v22, %s6191_s6 }
0x2540   :  { %v5173_v51 = vpop.permute.xlu0 %5172 }
0x2541   :  { %v5175_v14 = vmul.f32 %v5173_v51, %v5169_v44 }
0x2543   :  { %v5184_v62 = vsel %vm5183_vm6, %v5175_v14, %v7509_v2  ;;  %v5197_v33 = vsel %vm5183_vm6, %v5175_v14, 0.0 }
0x2544   :  { %5207 = vst.msk [vmem:[#allocation4] sm:$0x3] %vm234_vm0, %v5184_v62  ;;  %5199 = vrot.lane.b32.xlu0 %v5197_v33, %s6191_s6  ;;  %v889_v25 = vpop.permute.xlu0 %888 }
0x2545   :  { %5302 = vst.msk [vmem:[%s7729_s5 + $0x1c] sm:$0x3] %vm584_vm1, %v889_v25 }
0x2546   :  { %5402 = vst.msk [vmem:[%s7729_s5 + $0x1c] sm:$0x3] %vm234_vm0, %v7521_v47 }
0x2547   :  { %v5043_v35 = vpop.permute.xlu1 %5042 }
0x2548   :  { %v5045_v5 = vsel %vm5032_vm7, %v5043_v35, %v7543_v21  ;;  %v1505_v0 = vpop.permute.xlu0 %1504 }
0x2549   :  { %5206 = vst.msk [vmem:[#allocation3] sm:$0x3] %vm234_vm0, %v5045_v5 }
0x254a   :  { %5318 = vst.msk [vmem:[%s7729_s5 + $0x18] sm:$0x3] %vm584_vm1, %v1505_v0 }
0x254b   :  { %5386 = vst.msk [vmem:[%s7729_s5 + $0x18] sm:$0x3] %vm234_vm0, %v7392_v19  ;;  %v3045_v42 = vpop.permute.xlu1 %3044 }
0x254c   :  { %5358 = vst.msk [vmem:[%s7729_s5 + $0xe] sm:$0x3] %vm584_vm1, %v3045_v42  ;;  %v2121_v2 = vpop.permute.xlu0 %2120 }
0x254d   :  { %5334 = vst.msk [vmem:[%s7729_s5 + $0x14] sm:$0x3] %vm584_vm1, %v2121_v2 }
0x254e   :  { %5370 = vst.msk [vmem:[%s7729_s5 + $0x14] sm:$0x3] %vm234_vm0, %v7252_v36 }
0x254f   :  { %v3661_v41 = vpop.permute.xlu1 %3660 }
0x2550   :  { %5374 = vst.msk [vmem:[%s7729_s5 + $0xa] sm:$0x3] %vm584_vm1, %v3661_v41  ;;  %v2737_v19 = vpop.permute.xlu0 %2736 }
0x2551   :  { %5350 = vst.msk [vmem:[%s7729_s5 + $0x10] sm:$0x3] %vm584_vm1, %v2737_v19 }
0x2552   :  { %5354 = vst.msk [vmem:[%s7729_s5 + $0x10] sm:$0x3] %vm234_vm0, %v7108_v1 }
0x2553   :  { %v4277_v47 = vpop.permute.xlu1 %4276 }
0x2554   :  { %5390 = vst.msk [vmem:[%s7729_s5 + $0x6] sm:$0x3] %vm584_vm1, %v4277_v47  ;;  %v5194_v36 = vpop.permute.xlu0 %5193 }
0x2555   :  { %v5196_v13 = vsel %vm5183_vm6, %v5194_v36, %v7536_v52 }
0x2556   :  { %5208 = vst.msk [vmem:[#allocation5] sm:$0x3] %vm234_vm0, %v5196_v13 }
0x2557   :  { %v4893_v38 = vpop.permute.xlu1 %4892 }
0x2558   :  { %5406 = vst.msk [vmem:[%s7729_s5 + $0x2] sm:$0x3] %vm584_vm1, %v4893_v38  ;;  %v3353_v1 = vpop.permute.xlu0 %3352 }
0x2559   :  { %5366 = vst.msk [vmem:[%s7729_s5 + $0xc] sm:$0x3] %vm584_vm1, %v3353_v1 }
0x255c   :  { %v3969_v63 = vpop.permute.xlu0 %3968 }
0x255d   :  { %5382 = vst.msk [vmem:[%s7729_s5 + $0x8] sm:$0x3] %vm584_vm1, %v3969_v63 }
0x2560   :  { %v4585_v48 = vpop.permute.xlu0 %4584 }
0x2561   :  { %5398 = vst.msk [vmem:[%s7729_s5 + $0x4] sm:$0x3] %vm584_vm1, %v4585_v48 }
0x2564   :  { %v5022_v53 = vpop.permute.xlu0 %5021 }
0x2565   :  { %v5024_v61 = vmul.f32 %v5022_v53, %v5018_v10 }
0x2567   :  { %v5033_v59 = vsel %vm5032_vm7, %v5024_v61, %v7518_v17  ;;  %v5046_v52 = vsel %vm5032_vm7, %v5024_v61, 0.0 }
0x2568   :  { %5410 = vst.msk [vmem:[%s7729_s5 + $0x1e] sm:$0x3] %vm234_vm0, %v5046_v52  ;;  %5205 = vst.msk [vmem:[#allocation2] sm:$0x3] %vm234_vm0, %v5033_v59 }
0x25b6   :  { %v5200_v3 = vpop.permute.xlu0 %5199 }
0x25b7   :  { %5204 = vst.msk [vmem:[%s7729_s5] sm:$0x3] %vm584_vm1, %v5200_v3 }

</bundles_post_ra>
